<compile_context>
chip_gen: v7x
topology: tpu7x:2x2x1
jax: 0.10.0
libtpu: 0.0.40
codegen_flags: <defaults>
</compile_context>

<pallas_src>
import functools

import jax
import jax.numpy as jnp
from jax.experimental import pallas as pl
from jax.experimental.pallas import tpu as pltpu

HIDDEN = 32
NUM_CLASSES = 8
_LANES = 128
_STRIP = 32  # int8 native sublane tile; keeps live vregs well under the 64-vreg file


def _seg_kernel(x_ref, s_ref, t_ref, w2_ref, b2_ref, o_ref):
    # x_ref: (TM, 128) raw grayscale values in [0, 255]; pixels on BOTH sublanes and lanes.
    # s/t/w2/b2: scalar parameters in SMEM (collapsed layer-1 scale/offset, layer-2 weights).
    n_strips = x_ref.shape[0] // _STRIP

    def strip_body(i, carry):
        r0 = pl.multiple_of(i * _STRIP, _STRIP)
        x = x_ref[pl.ds(r0, _STRIP), :].astype(jnp.float32)      # (STRIP, 128)

        # logits_c = b2_c + sum_k relu(x*s_k + t_k) * w2[k, c]   -- all elementwise on the VPU,
        # hidden planes produced one at a time so only 8 accumulators stay live.
        acc = [b2_ref[c] + jnp.zeros_like(x) for c in range(NUM_CLASSES)]
        for k in range(HIDDEN):
            h = jnp.maximum(x * s_ref[k] + t_ref[k], 0.0)        # collapsed layer 1 (FMA + ReLU)
            for c in range(NUM_CLASSES):
                acc[c] = acc[c] + h * w2_ref[k * NUM_CLASSES + c]

        # reverse_one_hot_uint8: running (max, argmax) over the 8 class planes,
        # first-occurrence tie-break (strict '>' keeps the earlier class on ties).
        best_val = acc[0]
        best_idx = jnp.zeros_like(x, dtype=jnp.int32)
        for c in range(1, NUM_CLASSES):
            better = acc[c] > best_val
            best_val = jnp.where(better, acc[c], best_val)
            best_idx = jnp.where(better, jnp.int32(c), best_idx)

        o_ref[pl.ds(r0, _STRIP), :] = best_idx.astype(o_ref.dtype)
        return carry

    jax.lax.fori_loop(0, n_strips, strip_body, 0)


def _round_up(n, m):
    return ((n + m - 1) // m) * m


@functools.partial(jax.jit, static_argnames=("tile_rows",))
def script_inference_forward(inp, params, *, tile_rows=512):
    """inp: (H, W) grayscale in [0, 255] (float32 or uint8). Returns (H, W) uint8 class map."""
    mean, std, w1, b1, w2, b2 = params
    H, W = inp.shape
    P = H * W

    # Collapse steps 1-3 + layer 1 into one affine map of the grayscale value:
    #   feats_c(x) = x / (255*std_c) - mean_c/std_c ;  h = relu(feats @ w1 + b1) = relu(x*s + t)
    mean1 = mean.reshape(3).astype(jnp.float32)
    std1 = std.reshape(3).astype(jnp.float32)
    s = ((1.0 / (255.0 * std1))[:, None] * w1).sum(axis=0)                # (HIDDEN,)
    t = b1.reshape(HIDDEN) - ((mean1 / std1)[:, None] * w1).sum(axis=0)   # (HIDDEN,)
    w2_flat = w2.reshape(HIDDEN * NUM_CLASSES)
    b2_flat = b2.reshape(NUM_CLASSES)

    # Lane-dense pixel layout: (rows, 128) with rows padded up to a multiple of the tile.
    rows_needed = -(-P // _LANES)
    tm = _round_up(min(tile_rows, _round_up(rows_needed, _STRIP)), _STRIP)
    n_rows = _round_up(rows_needed, tm)
    p_pad = n_rows * _LANES

    x = inp.reshape(P)
    if p_pad != P:
        x = jnp.pad(x, (0, p_pad - P))
    x2 = x.reshape(n_rows, _LANES)

    out = pl.pallas_call(
        _seg_kernel,
        out_shape=jax.ShapeDtypeStruct((n_rows, _LANES), jnp.int8),
        grid=(n_rows // tm,),
        in_specs=[
            pl.BlockSpec((tm, _LANES), lambda i: (i, 0)),           # pixels, lane-dense
            pl.BlockSpec(memory_space=pltpu.MemorySpace.SMEM),      # s   (HIDDEN,)
            pl.BlockSpec(memory_space=pltpu.MemorySpace.SMEM),      # t   (HIDDEN,)
            pl.BlockSpec(memory_space=pltpu.MemorySpace.SMEM),      # w2  (HIDDEN*NUM_CLASSES,)
            pl.BlockSpec(memory_space=pltpu.MemorySpace.SMEM),      # b2  (NUM_CLASSES,)
        ],
        out_specs=pl.BlockSpec((tm, _LANES), lambda i: (i, 0)),
        compiler_params=pltpu.CompilerParams(dimension_semantics=("parallel",)),
    )(x2, s, t, w2_flat, b2_flat)

    # reverse_one_hot_uint8 returns uint8: int8 -> uint8 is a free bitcast (classes are 0..7).
    out_u8 = jax.lax.bitcast_convert_type(out.reshape(p_pad)[:P], jnp.uint8)
    return out_u8.reshape(H, W)


def _reference(inp, params):
    """Pure-JAX reference mirroring the PyTorch forward pass."""
    mean, std, w1, b1, w2, b2 = params
    x = inp.astype(jnp.float32) / 255.0
    x3 = jnp.stack([x, x, x], axis=0)                                    # (3, H, W)
    x3 = (x3 - mean.reshape(3, 1, 1)) / std.reshape(3, 1, 1)
    feats = x3.reshape(3, -1).T                                          # (P, 3)
    h = jnp.maximum(feats @ w1 + b1, 0.0)
    logits = h @ w2 + b2
    return jnp.argmax(logits, axis=-1).reshape(inp.shape).astype(jnp.uint8)


if __name__ == "__main__":
    key = jax.random.PRNGKey(0)
    kx, k1, k2, k3, k4 = jax.random.split(key, 5)

    # Small spatial size; H*W deliberately NOT a multiple of 128 to exercise the padding path.
    H, W = 64, 50
    inp = jax.random.uniform(kx, (H, W), jnp.float32, 0.0, 255.0)   # 2-D grayscale branch

    # Registered buffers from __init__ (deterministic).
    mean = jnp.array([0.485, 0.456, 0.406], jnp.float32)
    std = jnp.array([0.229, 0.224, 0.225], jnp.float32)
    # TODO(synk): the real wrapped nn.Module is an arbitrary checkpointed segmentation network;
    # modeled here as a deterministic two-layer 1x1-conv head (3 -> 32 -> 8, ReLU).
    w1 = jax.random.normal(k1, (3, HIDDEN), jnp.float32) * 0.5
    b1 = jax.random.normal(k2, (1, HIDDEN), jnp.float32) * 0.1
    w2 = jax.random.normal(k3, (HIDDEN, NUM_CLASSES), jnp.float32) * 0.5
    b2 = jax.random.normal(k4, (1, NUM_CLASSES), jnp.float32) * 0.1
    params = (mean, std, w1, b1, w2, b2)

    out = script_inference_forward(inp, params)
    jax.block_until_ready(out)

    ref = _reference(inp, params)
    assert out.shape == (H, W), out.shape
    assert out.dtype == jnp.uint8, out.dtype
    # Layer 1 is algebraically refactored (precomputed scale/offset), so tolerate the
    # vanishingly-rare pixel whose top-2 logits tie to within float rounding.
    mismatch = float(jnp.mean((out != ref).astype(jnp.float32)))
    assert mismatch <= 1e-3, f"class-map mismatch fraction {mismatch}"
    print("KERNEL_OK")
</pallas_src>

<mosaic_0001>
module attributes {stable_mosaic.version = 11 : i64} {
  func.func @_seg_kernel(%arg0: i32, %arg1: memref<32x128xf32, #tpu.memory_space<vmem>>, %arg2: memref<32xf32, #tpu.memory_space<smem>>, %arg3: memref<32xf32, #tpu.memory_space<smem>>, %arg4: memref<256xf32, #tpu.memory_space<smem>>, %arg5: memref<8xf32, #tpu.memory_space<smem>>, %arg6: memref<32x128xi8, #tpu.memory_space<vmem>>) attributes {dimension_semantics = [#tpu.dimension_semantics<parallel>], iteration_bounds = array<i64: 1>, scalar_prefetch = 0 : i64, scratch_operands = 0 : i64, tpu.core_type = #tpu.core_type<tc>, window_params = [{transform_indices = @transform_0, window_bounds = array<i64: 32, 128>}, {transform_indices = @transform_1, window_bounds = array<i64: 32>}, {transform_indices = @transform_2, window_bounds = array<i64: 32>}, {transform_indices = @transform_3, window_bounds = array<i64: 256>}, {transform_indices = @transform_4, window_bounds = array<i64: 8>}, {transform_indices = @transform_5, window_bounds = array<i64: 32, 128>}]} {
    %c0_i32 = arith.constant 0 : i32
    %c32_i32 = arith.constant 32 : i32
    %0 = arith.muli %c0_i32, %c32_i32 : i32
    %1 = tpu.assume_multiple %0, 32 : i32
    %2 = arith.index_cast %1 : i32 to index
    %c0 = arith.constant 0 : index
    %3 = vector.load %arg1[%2, %c0] : memref<32x128xf32, #tpu.memory_space<vmem>>, vector<32x128xf32>
    %c0_0 = arith.constant 0 : index
    %4 = memref.load %arg5[%c0_0] : memref<8xf32, #tpu.memory_space<smem>>
    %cst = arith.constant 0.000000e+00 : f32
    %5 = vector.broadcast %cst : f32 to vector<32x128xf32>
    %6 = vector.broadcast %4 : f32 to vector<32x128xf32>
    %7 = arith.addf %6, %5 : vector<32x128xf32>
    %c1 = arith.constant 1 : index
    %8 = memref.load %arg5[%c1] : memref<8xf32, #tpu.memory_space<smem>>
    %cst_1 = arith.constant 0.000000e+00 : f32
    %9 = vector.broadcast %cst_1 : f32 to vector<32x128xf32>
    %10 = vector.broadcast %8 : f32 to vector<32x128xf32>
    %11 = arith.addf %10, %9 : vector<32x128xf32>
    %c2 = arith.constant 2 : index
    %12 = memref.load %arg5[%c2] : memref<8xf32, #tpu.memory_space<smem>>
    %cst_2 = arith.constant 0.000000e+00 : f32
    %13 = vector.broadcast %cst_2 : f32 to vector<32x128xf32>
    %14 = vector.broadcast %12 : f32 to vector<32x128xf32>
    %15 = arith.addf %14, %13 : vector<32x128xf32>
    %c3 = arith.constant 3 : index
    %16 = memref.load %arg5[%c3] : memref<8xf32, #tpu.memory_space<smem>>
    %cst_3 = arith.constant 0.000000e+00 : f32
    %17 = vector.broadcast %cst_3 : f32 to vector<32x128xf32>
    %18 = vector.broadcast %16 : f32 to vector<32x128xf32>
    %19 = arith.addf %18, %17 : vector<32x128xf32>
    %c4 = arith.constant 4 : index
    %20 = memref.load %arg5[%c4] : memref<8xf32, #tpu.memory_space<smem>>
    %cst_4 = arith.constant 0.000000e+00 : f32
    %21 = vector.broadcast %cst_4 : f32 to vector<32x128xf32>
    %22 = vector.broadcast %20 : f32 to vector<32x128xf32>
    %23 = arith.addf %22, %21 : vector<32x128xf32>
    %c5 = arith.constant 5 : index
    %24 = memref.load %arg5[%c5] : memref<8xf32, #tpu.memory_space<smem>>
    %cst_5 = arith.constant 0.000000e+00 : f32
    %25 = vector.broadcast %cst_5 : f32 to vector<32x128xf32>
    %26 = vector.broadcast %24 : f32 to vector<32x128xf32>
    %27 = arith.addf %26, %25 : vector<32x128xf32>
    %c6 = arith.constant 6 : index
    %28 = memref.load %arg5[%c6] : memref<8xf32, #tpu.memory_space<smem>>
    %cst_6 = arith.constant 0.000000e+00 : f32
    %29 = vector.broadcast %cst_6 : f32 to vector<32x128xf32>
    %30 = vector.broadcast %28 : f32 to vector<32x128xf32>
    %31 = arith.addf %30, %29 : vector<32x128xf32>
    %c7 = arith.constant 7 : index
    %32 = memref.load %arg5[%c7] : memref<8xf32, #tpu.memory_space<smem>>
    %cst_7 = arith.constant 0.000000e+00 : f32
    %33 = vector.broadcast %cst_7 : f32 to vector<32x128xf32>
    %34 = vector.broadcast %32 : f32 to vector<32x128xf32>
    %35 = arith.addf %34, %33 : vector<32x128xf32>
    %c0_8 = arith.constant 0 : index
    %36 = memref.load %arg2[%c0_8] : memref<32xf32, #tpu.memory_space<smem>>
    %37 = vector.broadcast %36 : f32 to vector<32x128xf32>
    %38 = arith.mulf %3, %37 : vector<32x128xf32>
    %c0_9 = arith.constant 0 : index
    %39 = memref.load %arg3[%c0_9] : memref<32xf32, #tpu.memory_space<smem>>
    %40 = vector.broadcast %39 : f32 to vector<32x128xf32>
    %41 = arith.addf %38, %40 : vector<32x128xf32>
    %cst_10 = arith.constant 0.000000e+00 : f32
    %42 = vector.broadcast %cst_10 : f32 to vector<32x128xf32>
    %43 = arith.maximumf %41, %42 : vector<32x128xf32>
    %c0_11 = arith.constant 0 : index
    %44 = memref.load %arg4[%c0_11] : memref<256xf32, #tpu.memory_space<smem>>
    %45 = vector.broadcast %44 : f32 to vector<32x128xf32>
    %46 = arith.mulf %43, %45 : vector<32x128xf32>
    %47 = arith.addf %7, %46 : vector<32x128xf32>
    %c1_12 = arith.constant 1 : index
    %48 = memref.load %arg4[%c1_12] : memref<256xf32, #tpu.memory_space<smem>>
    %49 = vector.broadcast %48 : f32 to vector<32x128xf32>
    %50 = arith.mulf %43, %49 : vector<32x128xf32>
    %51 = arith.addf %11, %50 : vector<32x128xf32>
    %c2_13 = arith.constant 2 : index
    %52 = memref.load %arg4[%c2_13] : memref<256xf32, #tpu.memory_space<smem>>
    %53 = vector.broadcast %52 : f32 to vector<32x128xf32>
    %54 = arith.mulf %43, %53 : vector<32x128xf32>
    %55 = arith.addf %15, %54 : vector<32x128xf32>
    %c3_14 = arith.constant 3 : index
    %56 = memref.load %arg4[%c3_14] : memref<256xf32, #tpu.memory_space<smem>>
    %57 = vector.broadcast %56 : f32 to vector<32x128xf32>
    %58 = arith.mulf %43, %57 : vector<32x128xf32>
    %59 = arith.addf %19, %58 : vector<32x128xf32>
    %c4_15 = arith.constant 4 : index
    %60 = memref.load %arg4[%c4_15] : memref<256xf32, #tpu.memory_space<smem>>
    %61 = vector.broadcast %60 : f32 to vector<32x128xf32>
    %62 = arith.mulf %43, %61 : vector<32x128xf32>
    %63 = arith.addf %23, %62 : vector<32x128xf32>
    %c5_16 = arith.constant 5 : index
    %64 = memref.load %arg4[%c5_16] : memref<256xf32, #tpu.memory_space<smem>>
    %65 = vector.broadcast %64 : f32 to vector<32x128xf32>
    %66 = arith.mulf %43, %65 : vector<32x128xf32>
    %67 = arith.addf %27, %66 : vector<32x128xf32>
    %c6_17 = arith.constant 6 : index
    %68 = memref.load %arg4[%c6_17] : memref<256xf32, #tpu.memory_space<smem>>
    %69 = vector.broadcast %68 : f32 to vector<32x128xf32>
    %70 = arith.mulf %43, %69 : vector<32x128xf32>
    %71 = arith.addf %31, %70 : vector<32x128xf32>
    %c7_18 = arith.constant 7 : index
    %72 = memref.load %arg4[%c7_18] : memref<256xf32, #tpu.memory_space<smem>>
    %73 = vector.broadcast %72 : f32 to vector<32x128xf32>
    %74 = arith.mulf %43, %73 : vector<32x128xf32>
    %75 = arith.addf %35, %74 : vector<32x128xf32>
    %c1_19 = arith.constant 1 : index
    %76 = memref.load %arg2[%c1_19] : memref<32xf32, #tpu.memory_space<smem>>
    %77 = vector.broadcast %76 : f32 to vector<32x128xf32>
    %78 = arith.mulf %3, %77 : vector<32x128xf32>
    %c1_20 = arith.constant 1 : index
    %79 = memref.load %arg3[%c1_20] : memref<32xf32, #tpu.memory_space<smem>>
    %80 = vector.broadcast %79 : f32 to vector<32x128xf32>
    %81 = arith.addf %78, %80 : vector<32x128xf32>
    %cst_21 = arith.constant 0.000000e+00 : f32
    %82 = vector.broadcast %cst_21 : f32 to vector<32x128xf32>
    %83 = arith.maximumf %81, %82 : vector<32x128xf32>
    %c8 = arith.constant 8 : index
    %84 = memref.load %arg4[%c8] : memref<256xf32, #tpu.memory_space<smem>>
    %85 = vector.broadcast %84 : f32 to vector<32x128xf32>
    %86 = arith.mulf %83, %85 : vector<32x128xf32>
    %87 = arith.addf %47, %86 : vector<32x128xf32>
    %c9 = arith.constant 9 : index
    %88 = memref.load %arg4[%c9] : memref<256xf32, #tpu.memory_space<smem>>
    %89 = vector.broadcast %88 : f32 to vector<32x128xf32>
    %90 = arith.mulf %83, %89 : vector<32x128xf32>
    %91 = arith.addf %51, %90 : vector<32x128xf32>
    %c10 = arith.constant 10 : index
    %92 = memref.load %arg4[%c10] : memref<256xf32, #tpu.memory_space<smem>>
    %93 = vector.broadcast %92 : f32 to vector<32x128xf32>
    %94 = arith.mulf %83, %93 : vector<32x128xf32>
    %95 = arith.addf %55, %94 : vector<32x128xf32>
    %c11 = arith.constant 11 : index
    %96 = memref.load %arg4[%c11] : memref<256xf32, #tpu.memory_space<smem>>
    %97 = vector.broadcast %96 : f32 to vector<32x128xf32>
    %98 = arith.mulf %83, %97 : vector<32x128xf32>
    %99 = arith.addf %59, %98 : vector<32x128xf32>
    %c12 = arith.constant 12 : index
    %100 = memref.load %arg4[%c12] : memref<256xf32, #tpu.memory_space<smem>>
    %101 = vector.broadcast %100 : f32 to vector<32x128xf32>
    %102 = arith.mulf %83, %101 : vector<32x128xf32>
    %103 = arith.addf %63, %102 : vector<32x128xf32>
    %c13 = arith.constant 13 : index
    %104 = memref.load %arg4[%c13] : memref<256xf32, #tpu.memory_space<smem>>
    %105 = vector.broadcast %104 : f32 to vector<32x128xf32>
    %106 = arith.mulf %83, %105 : vector<32x128xf32>
    %107 = arith.addf %67, %106 : vector<32x128xf32>
    %c14 = arith.constant 14 : index
    %108 = memref.load %arg4[%c14] : memref<256xf32, #tpu.memory_space<smem>>
    %109 = vector.broadcast %108 : f32 to vector<32x128xf32>
    %110 = arith.mulf %83, %109 : vector<32x128xf32>
    %111 = arith.addf %71, %110 : vector<32x128xf32>
    %c15 = arith.constant 15 : index
    %112 = memref.load %arg4[%c15] : memref<256xf32, #tpu.memory_space<smem>>
    %113 = vector.broadcast %112 : f32 to vector<32x128xf32>
    %114 = arith.mulf %83, %113 : vector<32x128xf32>
    %115 = arith.addf %75, %114 : vector<32x128xf32>
    %c2_22 = arith.constant 2 : index
    %116 = memref.load %arg2[%c2_22] : memref<32xf32, #tpu.memory_space<smem>>
    %117 = vector.broadcast %116 : f32 to vector<32x128xf32>
    %118 = arith.mulf %3, %117 : vector<32x128xf32>
    %c2_23 = arith.constant 2 : index
    %119 = memref.load %arg3[%c2_23] : memref<32xf32, #tpu.memory_space<smem>>
    %120 = vector.broadcast %119 : f32 to vector<32x128xf32>
    %121 = arith.addf %118, %120 : vector<32x128xf32>
    %cst_24 = arith.constant 0.000000e+00 : f32
    %122 = vector.broadcast %cst_24 : f32 to vector<32x128xf32>
    %123 = arith.maximumf %121, %122 : vector<32x128xf32>
    %c16 = arith.constant 16 : index
    %124 = memref.load %arg4[%c16] : memref<256xf32, #tpu.memory_space<smem>>
    %125 = vector.broadcast %124 : f32 to vector<32x128xf32>
    %126 = arith.mulf %123, %125 : vector<32x128xf32>
    %127 = arith.addf %87, %126 : vector<32x128xf32>
    %c17 = arith.constant 17 : index
    %128 = memref.load %arg4[%c17] : memref<256xf32, #tpu.memory_space<smem>>
    %129 = vector.broadcast %128 : f32 to vector<32x128xf32>
    %130 = arith.mulf %123, %129 : vector<32x128xf32>
    %131 = arith.addf %91, %130 : vector<32x128xf32>
    %c18 = arith.constant 18 : index
    %132 = memref.load %arg4[%c18] : memref<256xf32, #tpu.memory_space<smem>>
    %133 = vector.broadcast %132 : f32 to vector<32x128xf32>
    %134 = arith.mulf %123, %133 : vector<32x128xf32>
    %135 = arith.addf %95, %134 : vector<32x128xf32>
    %c19 = arith.constant 19 : index
    %136 = memref.load %arg4[%c19] : memref<256xf32, #tpu.memory_space<smem>>
    %137 = vector.broadcast %136 : f32 to vector<32x128xf32>
    %138 = arith.mulf %123, %137 : vector<32x128xf32>
    %139 = arith.addf %99, %138 : vector<32x128xf32>
    %c20 = arith.constant 20 : index
    %140 = memref.load %arg4[%c20] : memref<256xf32, #tpu.memory_space<smem>>
    %141 = vector.broadcast %140 : f32 to vector<32x128xf32>
    %142 = arith.mulf %123, %141 : vector<32x128xf32>
    %143 = arith.addf %103, %142 : vector<32x128xf32>
    %c21 = arith.constant 21 : index
    %144 = memref.load %arg4[%c21] : memref<256xf32, #tpu.memory_space<smem>>
    %145 = vector.broadcast %144 : f32 to vector<32x128xf32>
    %146 = arith.mulf %123, %145 : vector<32x128xf32>
    %147 = arith.addf %107, %146 : vector<32x128xf32>
    %c22 = arith.constant 22 : index
    %148 = memref.load %arg4[%c22] : memref<256xf32, #tpu.memory_space<smem>>
    %149 = vector.broadcast %148 : f32 to vector<32x128xf32>
    %150 = arith.mulf %123, %149 : vector<32x128xf32>
    %151 = arith.addf %111, %150 : vector<32x128xf32>
    %c23 = arith.constant 23 : index
    %152 = memref.load %arg4[%c23] : memref<256xf32, #tpu.memory_space<smem>>
    %153 = vector.broadcast %152 : f32 to vector<32x128xf32>
    %154 = arith.mulf %123, %153 : vector<32x128xf32>
    %155 = arith.addf %115, %154 : vector<32x128xf32>
    %c3_25 = arith.constant 3 : index
    %156 = memref.load %arg2[%c3_25] : memref<32xf32, #tpu.memory_space<smem>>
    %157 = vector.broadcast %156 : f32 to vector<32x128xf32>
    %158 = arith.mulf %3, %157 : vector<32x128xf32>
    %c3_26 = arith.constant 3 : index
    %159 = memref.load %arg3[%c3_26] : memref<32xf32, #tpu.memory_space<smem>>
    %160 = vector.broadcast %159 : f32 to vector<32x128xf32>
    %161 = arith.addf %158, %160 : vector<32x128xf32>
    %cst_27 = arith.constant 0.000000e+00 : f32
    %162 = vector.broadcast %cst_27 : f32 to vector<32x128xf32>
    %163 = arith.maximumf %161, %162 : vector<32x128xf32>
    %c24 = arith.constant 24 : index
    %164 = memref.load %arg4[%c24] : memref<256xf32, #tpu.memory_space<smem>>
    %165 = vector.broadcast %164 : f32 to vector<32x128xf32>
    %166 = arith.mulf %163, %165 : vector<32x128xf32>
    %167 = arith.addf %127, %166 : vector<32x128xf32>
    %c25 = arith.constant 25 : index
    %168 = memref.load %arg4[%c25] : memref<256xf32, #tpu.memory_space<smem>>
    %169 = vector.broadcast %168 : f32 to vector<32x128xf32>
    %170 = arith.mulf %163, %169 : vector<32x128xf32>
    %171 = arith.addf %131, %170 : vector<32x128xf32>
    %c26 = arith.constant 26 : index
    %172 = memref.load %arg4[%c26] : memref<256xf32, #tpu.memory_space<smem>>
    %173 = vector.broadcast %172 : f32 to vector<32x128xf32>
    %174 = arith.mulf %163, %173 : vector<32x128xf32>
    %175 = arith.addf %135, %174 : vector<32x128xf32>
    %c27 = arith.constant 27 : index
    %176 = memref.load %arg4[%c27] : memref<256xf32, #tpu.memory_space<smem>>
    %177 = vector.broadcast %176 : f32 to vector<32x128xf32>
    %178 = arith.mulf %163, %177 : vector<32x128xf32>
    %179 = arith.addf %139, %178 : vector<32x128xf32>
    %c28 = arith.constant 28 : index
    %180 = memref.load %arg4[%c28] : memref<256xf32, #tpu.memory_space<smem>>
    %181 = vector.broadcast %180 : f32 to vector<32x128xf32>
    %182 = arith.mulf %163, %181 : vector<32x128xf32>
    %183 = arith.addf %143, %182 : vector<32x128xf32>
    %c29 = arith.constant 29 : index
    %184 = memref.load %arg4[%c29] : memref<256xf32, #tpu.memory_space<smem>>
    %185 = vector.broadcast %184 : f32 to vector<32x128xf32>
    %186 = arith.mulf %163, %185 : vector<32x128xf32>
    %187 = arith.addf %147, %186 : vector<32x128xf32>
    %c30 = arith.constant 30 : index
    %188 = memref.load %arg4[%c30] : memref<256xf32, #tpu.memory_space<smem>>
    %189 = vector.broadcast %188 : f32 to vector<32x128xf32>
    %190 = arith.mulf %163, %189 : vector<32x128xf32>
    %191 = arith.addf %151, %190 : vector<32x128xf32>
    %c31 = arith.constant 31 : index
    %192 = memref.load %arg4[%c31] : memref<256xf32, #tpu.memory_space<smem>>
    %193 = vector.broadcast %192 : f32 to vector<32x128xf32>
    %194 = arith.mulf %163, %193 : vector<32x128xf32>
    %195 = arith.addf %155, %194 : vector<32x128xf32>
    %c4_28 = arith.constant 4 : index
    %196 = memref.load %arg2[%c4_28] : memref<32xf32, #tpu.memory_space<smem>>
    %197 = vector.broadcast %196 : f32 to vector<32x128xf32>
    %198 = arith.mulf %3, %197 : vector<32x128xf32>
    %c4_29 = arith.constant 4 : index
    %199 = memref.load %arg3[%c4_29] : memref<32xf32, #tpu.memory_space<smem>>
    %200 = vector.broadcast %199 : f32 to vector<32x128xf32>
    %201 = arith.addf %198, %200 : vector<32x128xf32>
    %cst_30 = arith.constant 0.000000e+00 : f32
    %202 = vector.broadcast %cst_30 : f32 to vector<32x128xf32>
    %203 = arith.maximumf %201, %202 : vector<32x128xf32>
    %c32 = arith.constant 32 : index
    %204 = memref.load %arg4[%c32] : memref<256xf32, #tpu.memory_space<smem>>
    %205 = vector.broadcast %204 : f32 to vector<32x128xf32>
    %206 = arith.mulf %203, %205 : vector<32x128xf32>
    %207 = arith.addf %167, %206 : vector<32x128xf32>
    %c33 = arith.constant 33 : index
    %208 = memref.load %arg4[%c33] : memref<256xf32, #tpu.memory_space<smem>>
    %209 = vector.broadcast %208 : f32 to vector<32x128xf32>
    %210 = arith.mulf %203, %209 : vector<32x128xf32>
    %211 = arith.addf %171, %210 : vector<32x128xf32>
    %c34 = arith.constant 34 : index
    %212 = memref.load %arg4[%c34] : memref<256xf32, #tpu.memory_space<smem>>
    %213 = vector.broadcast %212 : f32 to vector<32x128xf32>
    %214 = arith.mulf %203, %213 : vector<32x128xf32>
    %215 = arith.addf %175, %214 : vector<32x128xf32>
    %c35 = arith.constant 35 : index
    %216 = memref.load %arg4[%c35] : memref<256xf32, #tpu.memory_space<smem>>
    %217 = vector.broadcast %216 : f32 to vector<32x128xf32>
    %218 = arith.mulf %203, %217 : vector<32x128xf32>
    %219 = arith.addf %179, %218 : vector<32x128xf32>
    %c36 = arith.constant 36 : index
    %220 = memref.load %arg4[%c36] : memref<256xf32, #tpu.memory_space<smem>>
    %221 = vector.broadcast %220 : f32 to vector<32x128xf32>
    %222 = arith.mulf %203, %221 : vector<32x128xf32>
    %223 = arith.addf %183, %222 : vector<32x128xf32>
    %c37 = arith.constant 37 : index
    %224 = memref.load %arg4[%c37] : memref<256xf32, #tpu.memory_space<smem>>
    %225 = vector.broadcast %224 : f32 to vector<32x128xf32>
    %226 = arith.mulf %203, %225 : vector<32x128xf32>
    %227 = arith.addf %187, %226 : vector<32x128xf32>
    %c38 = arith.constant 38 : index
    %228 = memref.load %arg4[%c38] : memref<256xf32, #tpu.memory_space<smem>>
    %229 = vector.broadcast %228 : f32 to vector<32x128xf32>
    %230 = arith.mulf %203, %229 : vector<32x128xf32>
    %231 = arith.addf %191, %230 : vector<32x128xf32>
    %c39 = arith.constant 39 : index
    %232 = memref.load %arg4[%c39] : memref<256xf32, #tpu.memory_space<smem>>
    %233 = vector.broadcast %232 : f32 to vector<32x128xf32>
    %234 = arith.mulf %203, %233 : vector<32x128xf32>
    %235 = arith.addf %195, %234 : vector<32x128xf32>
    %c5_31 = arith.constant 5 : index
    %236 = memref.load %arg2[%c5_31] : memref<32xf32, #tpu.memory_space<smem>>
    %237 = vector.broadcast %236 : f32 to vector<32x128xf32>
    %238 = arith.mulf %3, %237 : vector<32x128xf32>
    %c5_32 = arith.constant 5 : index
    %239 = memref.load %arg3[%c5_32] : memref<32xf32, #tpu.memory_space<smem>>
    %240 = vector.broadcast %239 : f32 to vector<32x128xf32>
    %241 = arith.addf %238, %240 : vector<32x128xf32>
    %cst_33 = arith.constant 0.000000e+00 : f32
    %242 = vector.broadcast %cst_33 : f32 to vector<32x128xf32>
    %243 = arith.maximumf %241, %242 : vector<32x128xf32>
    %c40 = arith.constant 40 : index
    %244 = memref.load %arg4[%c40] : memref<256xf32, #tpu.memory_space<smem>>
    %245 = vector.broadcast %244 : f32 to vector<32x128xf32>
    %246 = arith.mulf %243, %245 : vector<32x128xf32>
    %247 = arith.addf %207, %246 : vector<32x128xf32>
    %c41 = arith.constant 41 : index
    %248 = memref.load %arg4[%c41] : memref<256xf32, #tpu.memory_space<smem>>
    %249 = vector.broadcast %248 : f32 to vector<32x128xf32>
    %250 = arith.mulf %243, %249 : vector<32x128xf32>
    %251 = arith.addf %211, %250 : vector<32x128xf32>
    %c42 = arith.constant 42 : index
    %252 = memref.load %arg4[%c42] : memref<256xf32, #tpu.memory_space<smem>>
    %253 = vector.broadcast %252 : f32 to vector<32x128xf32>
    %254 = arith.mulf %243, %253 : vector<32x128xf32>
    %255 = arith.addf %215, %254 : vector<32x128xf32>
    %c43 = arith.constant 43 : index
    %256 = memref.load %arg4[%c43] : memref<256xf32, #tpu.memory_space<smem>>
    %257 = vector.broadcast %256 : f32 to vector<32x128xf32>
    %258 = arith.mulf %243, %257 : vector<32x128xf32>
    %259 = arith.addf %219, %258 : vector<32x128xf32>
    %c44 = arith.constant 44 : index
    %260 = memref.load %arg4[%c44] : memref<256xf32, #tpu.memory_space<smem>>
    %261 = vector.broadcast %260 : f32 to vector<32x128xf32>
    %262 = arith.mulf %243, %261 : vector<32x128xf32>
    %263 = arith.addf %223, %262 : vector<32x128xf32>
    %c45 = arith.constant 45 : index
    %264 = memref.load %arg4[%c45] : memref<256xf32, #tpu.memory_space<smem>>
    %265 = vector.broadcast %264 : f32 to vector<32x128xf32>
    %266 = arith.mulf %243, %265 : vector<32x128xf32>
    %267 = arith.addf %227, %266 : vector<32x128xf32>
    %c46 = arith.constant 46 : index
    %268 = memref.load %arg4[%c46] : memref<256xf32, #tpu.memory_space<smem>>
    %269 = vector.broadcast %268 : f32 to vector<32x128xf32>
    %270 = arith.mulf %243, %269 : vector<32x128xf32>
    %271 = arith.addf %231, %270 : vector<32x128xf32>
    %c47 = arith.constant 47 : index
    %272 = memref.load %arg4[%c47] : memref<256xf32, #tpu.memory_space<smem>>
    %273 = vector.broadcast %272 : f32 to vector<32x128xf32>
    %274 = arith.mulf %243, %273 : vector<32x128xf32>
    %275 = arith.addf %235, %274 : vector<32x128xf32>
    %c6_34 = arith.constant 6 : index
    %276 = memref.load %arg2[%c6_34] : memref<32xf32, #tpu.memory_space<smem>>
    %277 = vector.broadcast %276 : f32 to vector<32x128xf32>
    %278 = arith.mulf %3, %277 : vector<32x128xf32>
    %c6_35 = arith.constant 6 : index
    %279 = memref.load %arg3[%c6_35] : memref<32xf32, #tpu.memory_space<smem>>
    %280 = vector.broadcast %279 : f32 to vector<32x128xf32>
    %281 = arith.addf %278, %280 : vector<32x128xf32>
    %cst_36 = arith.constant 0.000000e+00 : f32
    %282 = vector.broadcast %cst_36 : f32 to vector<32x128xf32>
    %283 = arith.maximumf %281, %282 : vector<32x128xf32>
    %c48 = arith.constant 48 : index
    %284 = memref.load %arg4[%c48] : memref<256xf32, #tpu.memory_space<smem>>
    %285 = vector.broadcast %284 : f32 to vector<32x128xf32>
    %286 = arith.mulf %283, %285 : vector<32x128xf32>
    %287 = arith.addf %247, %286 : vector<32x128xf32>
    %c49 = arith.constant 49 : index
    %288 = memref.load %arg4[%c49] : memref<256xf32, #tpu.memory_space<smem>>
    %289 = vector.broadcast %288 : f32 to vector<32x128xf32>
    %290 = arith.mulf %283, %289 : vector<32x128xf32>
    %291 = arith.addf %251, %290 : vector<32x128xf32>
    %c50 = arith.constant 50 : index
    %292 = memref.load %arg4[%c50] : memref<256xf32, #tpu.memory_space<smem>>
    %293 = vector.broadcast %292 : f32 to vector<32x128xf32>
    %294 = arith.mulf %283, %293 : vector<32x128xf32>
    %295 = arith.addf %255, %294 : vector<32x128xf32>
    %c51 = arith.constant 51 : index
    %296 = memref.load %arg4[%c51] : memref<256xf32, #tpu.memory_space<smem>>
    %297 = vector.broadcast %296 : f32 to vector<32x128xf32>
    %298 = arith.mulf %283, %297 : vector<32x128xf32>
    %299 = arith.addf %259, %298 : vector<32x128xf32>
    %c52 = arith.constant 52 : index
    %300 = memref.load %arg4[%c52] : memref<256xf32, #tpu.memory_space<smem>>
    %301 = vector.broadcast %300 : f32 to vector<32x128xf32>
    %302 = arith.mulf %283, %301 : vector<32x128xf32>
    %303 = arith.addf %263, %302 : vector<32x128xf32>
    %c53 = arith.constant 53 : index
    %304 = memref.load %arg4[%c53] : memref<256xf32, #tpu.memory_space<smem>>
    %305 = vector.broadcast %304 : f32 to vector<32x128xf32>
    %306 = arith.mulf %283, %305 : vector<32x128xf32>
    %307 = arith.addf %267, %306 : vector<32x128xf32>
    %c54 = arith.constant 54 : index
    %308 = memref.load %arg4[%c54] : memref<256xf32, #tpu.memory_space<smem>>
    %309 = vector.broadcast %308 : f32 to vector<32x128xf32>
    %310 = arith.mulf %283, %309 : vector<32x128xf32>
    %311 = arith.addf %271, %310 : vector<32x128xf32>
    %c55 = arith.constant 55 : index
    %312 = memref.load %arg4[%c55] : memref<256xf32, #tpu.memory_space<smem>>
    %313 = vector.broadcast %312 : f32 to vector<32x128xf32>
    %314 = arith.mulf %283, %313 : vector<32x128xf32>
    %315 = arith.addf %275, %314 : vector<32x128xf32>
    %c7_37 = arith.constant 7 : index
    %316 = memref.load %arg2[%c7_37] : memref<32xf32, #tpu.memory_space<smem>>
    %317 = vector.broadcast %316 : f32 to vector<32x128xf32>
    %318 = arith.mulf %3, %317 : vector<32x128xf32>
    %c7_38 = arith.constant 7 : index
    %319 = memref.load %arg3[%c7_38] : memref<32xf32, #tpu.memory_space<smem>>
    %320 = vector.broadcast %319 : f32 to vector<32x128xf32>
    %321 = arith.addf %318, %320 : vector<32x128xf32>
    %cst_39 = arith.constant 0.000000e+00 : f32
    %322 = vector.broadcast %cst_39 : f32 to vector<32x128xf32>
    %323 = arith.maximumf %321, %322 : vector<32x128xf32>
    %c56 = arith.constant 56 : index
    %324 = memref.load %arg4[%c56] : memref<256xf32, #tpu.memory_space<smem>>
    %325 = vector.broadcast %324 : f32 to vector<32x128xf32>
    %326 = arith.mulf %323, %325 : vector<32x128xf32>
    %327 = arith.addf %287, %326 : vector<32x128xf32>
    %c57 = arith.constant 57 : index
    %328 = memref.load %arg4[%c57] : memref<256xf32, #tpu.memory_space<smem>>
    %329 = vector.broadcast %328 : f32 to vector<32x128xf32>
    %330 = arith.mulf %323, %329 : vector<32x128xf32>
    %331 = arith.addf %291, %330 : vector<32x128xf32>
    %c58 = arith.constant 58 : index
    %332 = memref.load %arg4[%c58] : memref<256xf32, #tpu.memory_space<smem>>
    %333 = vector.broadcast %332 : f32 to vector<32x128xf32>
    %334 = arith.mulf %323, %333 : vector<32x128xf32>
    %335 = arith.addf %295, %334 : vector<32x128xf32>
    %c59 = arith.constant 59 : index
    %336 = memref.load %arg4[%c59] : memref<256xf32, #tpu.memory_space<smem>>
    %337 = vector.broadcast %336 : f32 to vector<32x128xf32>
    %338 = arith.mulf %323, %337 : vector<32x128xf32>
    %339 = arith.addf %299, %338 : vector<32x128xf32>
    %c60 = arith.constant 60 : index
    %340 = memref.load %arg4[%c60] : memref<256xf32, #tpu.memory_space<smem>>
    %341 = vector.broadcast %340 : f32 to vector<32x128xf32>
    %342 = arith.mulf %323, %341 : vector<32x128xf32>
    %343 = arith.addf %303, %342 : vector<32x128xf32>
    %c61 = arith.constant 61 : index
    %344 = memref.load %arg4[%c61] : memref<256xf32, #tpu.memory_space<smem>>
    %345 = vector.broadcast %344 : f32 to vector<32x128xf32>
    %346 = arith.mulf %323, %345 : vector<32x128xf32>
    %347 = arith.addf %307, %346 : vector<32x128xf32>
    %c62 = arith.constant 62 : index
    %348 = memref.load %arg4[%c62] : memref<256xf32, #tpu.memory_space<smem>>
    %349 = vector.broadcast %348 : f32 to vector<32x128xf32>
    %350 = arith.mulf %323, %349 : vector<32x128xf32>
    %351 = arith.addf %311, %350 : vector<32x128xf32>
    %c63 = arith.constant 63 : index
    %352 = memref.load %arg4[%c63] : memref<256xf32, #tpu.memory_space<smem>>
    %353 = vector.broadcast %352 : f32 to vector<32x128xf32>
    %354 = arith.mulf %323, %353 : vector<32x128xf32>
    %355 = arith.addf %315, %354 : vector<32x128xf32>
    %c8_40 = arith.constant 8 : index
    %356 = memref.load %arg2[%c8_40] : memref<32xf32, #tpu.memory_space<smem>>
    %357 = vector.broadcast %356 : f32 to vector<32x128xf32>
    %358 = arith.mulf %3, %357 : vector<32x128xf32>
    %c8_41 = arith.constant 8 : index
    %359 = memref.load %arg3[%c8_41] : memref<32xf32, #tpu.memory_space<smem>>
    %360 = vector.broadcast %359 : f32 to vector<32x128xf32>
    %361 = arith.addf %358, %360 : vector<32x128xf32>
    %cst_42 = arith.constant 0.000000e+00 : f32
    %362 = vector.broadcast %cst_42 : f32 to vector<32x128xf32>
    %363 = arith.maximumf %361, %362 : vector<32x128xf32>
    %c64 = arith.constant 64 : index
    %364 = memref.load %arg4[%c64] : memref<256xf32, #tpu.memory_space<smem>>
    %365 = vector.broadcast %364 : f32 to vector<32x128xf32>
    %366 = arith.mulf %363, %365 : vector<32x128xf32>
    %367 = arith.addf %327, %366 : vector<32x128xf32>
    %c65 = arith.constant 65 : index
    %368 = memref.load %arg4[%c65] : memref<256xf32, #tpu.memory_space<smem>>
    %369 = vector.broadcast %368 : f32 to vector<32x128xf32>
    %370 = arith.mulf %363, %369 : vector<32x128xf32>
    %371 = arith.addf %331, %370 : vector<32x128xf32>
    %c66 = arith.constant 66 : index
    %372 = memref.load %arg4[%c66] : memref<256xf32, #tpu.memory_space<smem>>
    %373 = vector.broadcast %372 : f32 to vector<32x128xf32>
    %374 = arith.mulf %363, %373 : vector<32x128xf32>
    %375 = arith.addf %335, %374 : vector<32x128xf32>
    %c67 = arith.constant 67 : index
    %376 = memref.load %arg4[%c67] : memref<256xf32, #tpu.memory_space<smem>>
    %377 = vector.broadcast %376 : f32 to vector<32x128xf32>
    %378 = arith.mulf %363, %377 : vector<32x128xf32>
    %379 = arith.addf %339, %378 : vector<32x128xf32>
    %c68 = arith.constant 68 : index
    %380 = memref.load %arg4[%c68] : memref<256xf32, #tpu.memory_space<smem>>
    %381 = vector.broadcast %380 : f32 to vector<32x128xf32>
    %382 = arith.mulf %363, %381 : vector<32x128xf32>
    %383 = arith.addf %343, %382 : vector<32x128xf32>
    %c69 = arith.constant 69 : index
    %384 = memref.load %arg4[%c69] : memref<256xf32, #tpu.memory_space<smem>>
    %385 = vector.broadcast %384 : f32 to vector<32x128xf32>
    %386 = arith.mulf %363, %385 : vector<32x128xf32>
    %387 = arith.addf %347, %386 : vector<32x128xf32>
    %c70 = arith.constant 70 : index
    %388 = memref.load %arg4[%c70] : memref<256xf32, #tpu.memory_space<smem>>
    %389 = vector.broadcast %388 : f32 to vector<32x128xf32>
    %390 = arith.mulf %363, %389 : vector<32x128xf32>
    %391 = arith.addf %351, %390 : vector<32x128xf32>
    %c71 = arith.constant 71 : index
    %392 = memref.load %arg4[%c71] : memref<256xf32, #tpu.memory_space<smem>>
    %393 = vector.broadcast %392 : f32 to vector<32x128xf32>
    %394 = arith.mulf %363, %393 : vector<32x128xf32>
    %395 = arith.addf %355, %394 : vector<32x128xf32>
    %c9_43 = arith.constant 9 : index
    %396 = memref.load %arg2[%c9_43] : memref<32xf32, #tpu.memory_space<smem>>
    %397 = vector.broadcast %396 : f32 to vector<32x128xf32>
    %398 = arith.mulf %3, %397 : vector<32x128xf32>
    %c9_44 = arith.constant 9 : index
    %399 = memref.load %arg3[%c9_44] : memref<32xf32, #tpu.memory_space<smem>>
    %400 = vector.broadcast %399 : f32 to vector<32x128xf32>
    %401 = arith.addf %398, %400 : vector<32x128xf32>
    %cst_45 = arith.constant 0.000000e+00 : f32
    %402 = vector.broadcast %cst_45 : f32 to vector<32x128xf32>
    %403 = arith.maximumf %401, %402 : vector<32x128xf32>
    %c72 = arith.constant 72 : index
    %404 = memref.load %arg4[%c72] : memref<256xf32, #tpu.memory_space<smem>>
    %405 = vector.broadcast %404 : f32 to vector<32x128xf32>
    %406 = arith.mulf %403, %405 : vector<32x128xf32>
    %407 = arith.addf %367, %406 : vector<32x128xf32>
    %c73 = arith.constant 73 : index
    %408 = memref.load %arg4[%c73] : memref<256xf32, #tpu.memory_space<smem>>
    %409 = vector.broadcast %408 : f32 to vector<32x128xf32>
    %410 = arith.mulf %403, %409 : vector<32x128xf32>
    %411 = arith.addf %371, %410 : vector<32x128xf32>
    %c74 = arith.constant 74 : index
    %412 = memref.load %arg4[%c74] : memref<256xf32, #tpu.memory_space<smem>>
    %413 = vector.broadcast %412 : f32 to vector<32x128xf32>
    %414 = arith.mulf %403, %413 : vector<32x128xf32>
    %415 = arith.addf %375, %414 : vector<32x128xf32>
    %c75 = arith.constant 75 : index
    %416 = memref.load %arg4[%c75] : memref<256xf32, #tpu.memory_space<smem>>
    %417 = vector.broadcast %416 : f32 to vector<32x128xf32>
    %418 = arith.mulf %403, %417 : vector<32x128xf32>
    %419 = arith.addf %379, %418 : vector<32x128xf32>
    %c76 = arith.constant 76 : index
    %420 = memref.load %arg4[%c76] : memref<256xf32, #tpu.memory_space<smem>>
    %421 = vector.broadcast %420 : f32 to vector<32x128xf32>
    %422 = arith.mulf %403, %421 : vector<32x128xf32>
    %423 = arith.addf %383, %422 : vector<32x128xf32>
    %c77 = arith.constant 77 : index
    %424 = memref.load %arg4[%c77] : memref<256xf32, #tpu.memory_space<smem>>
    %425 = vector.broadcast %424 : f32 to vector<32x128xf32>
    %426 = arith.mulf %403, %425 : vector<32x128xf32>
    %427 = arith.addf %387, %426 : vector<32x128xf32>
    %c78 = arith.constant 78 : index
    %428 = memref.load %arg4[%c78] : memref<256xf32, #tpu.memory_space<smem>>
    %429 = vector.broadcast %428 : f32 to vector<32x128xf32>
    %430 = arith.mulf %403, %429 : vector<32x128xf32>
    %431 = arith.addf %391, %430 : vector<32x128xf32>
    %c79 = arith.constant 79 : index
    %432 = memref.load %arg4[%c79] : memref<256xf32, #tpu.memory_space<smem>>
    %433 = vector.broadcast %432 : f32 to vector<32x128xf32>
    %434 = arith.mulf %403, %433 : vector<32x128xf32>
    %435 = arith.addf %395, %434 : vector<32x128xf32>
    %c10_46 = arith.constant 10 : index
    %436 = memref.load %arg2[%c10_46] : memref<32xf32, #tpu.memory_space<smem>>
    %437 = vector.broadcast %436 : f32 to vector<32x128xf32>
    %438 = arith.mulf %3, %437 : vector<32x128xf32>
    %c10_47 = arith.constant 10 : index
    %439 = memref.load %arg3[%c10_47] : memref<32xf32, #tpu.memory_space<smem>>
    %440 = vector.broadcast %439 : f32 to vector<32x128xf32>
    %441 = arith.addf %438, %440 : vector<32x128xf32>
    %cst_48 = arith.constant 0.000000e+00 : f32
    %442 = vector.broadcast %cst_48 : f32 to vector<32x128xf32>
    %443 = arith.maximumf %441, %442 : vector<32x128xf32>
    %c80 = arith.constant 80 : index
    %444 = memref.load %arg4[%c80] : memref<256xf32, #tpu.memory_space<smem>>
    %445 = vector.broadcast %444 : f32 to vector<32x128xf32>
    %446 = arith.mulf %443, %445 : vector<32x128xf32>
    %447 = arith.addf %407, %446 : vector<32x128xf32>
    %c81 = arith.constant 81 : index
    %448 = memref.load %arg4[%c81] : memref<256xf32, #tpu.memory_space<smem>>
    %449 = vector.broadcast %448 : f32 to vector<32x128xf32>
    %450 = arith.mulf %443, %449 : vector<32x128xf32>
    %451 = arith.addf %411, %450 : vector<32x128xf32>
    %c82 = arith.constant 82 : index
    %452 = memref.load %arg4[%c82] : memref<256xf32, #tpu.memory_space<smem>>
    %453 = vector.broadcast %452 : f32 to vector<32x128xf32>
    %454 = arith.mulf %443, %453 : vector<32x128xf32>
    %455 = arith.addf %415, %454 : vector<32x128xf32>
    %c83 = arith.constant 83 : index
    %456 = memref.load %arg4[%c83] : memref<256xf32, #tpu.memory_space<smem>>
    %457 = vector.broadcast %456 : f32 to vector<32x128xf32>
    %458 = arith.mulf %443, %457 : vector<32x128xf32>
    %459 = arith.addf %419, %458 : vector<32x128xf32>
    %c84 = arith.constant 84 : index
    %460 = memref.load %arg4[%c84] : memref<256xf32, #tpu.memory_space<smem>>
    %461 = vector.broadcast %460 : f32 to vector<32x128xf32>
    %462 = arith.mulf %443, %461 : vector<32x128xf32>
    %463 = arith.addf %423, %462 : vector<32x128xf32>
    %c85 = arith.constant 85 : index
    %464 = memref.load %arg4[%c85] : memref<256xf32, #tpu.memory_space<smem>>
    %465 = vector.broadcast %464 : f32 to vector<32x128xf32>
    %466 = arith.mulf %443, %465 : vector<32x128xf32>
    %467 = arith.addf %427, %466 : vector<32x128xf32>
    %c86 = arith.constant 86 : index
    %468 = memref.load %arg4[%c86] : memref<256xf32, #tpu.memory_space<smem>>
    %469 = vector.broadcast %468 : f32 to vector<32x128xf32>
    %470 = arith.mulf %443, %469 : vector<32x128xf32>
    %471 = arith.addf %431, %470 : vector<32x128xf32>
    %c87 = arith.constant 87 : index
    %472 = memref.load %arg4[%c87] : memref<256xf32, #tpu.memory_space<smem>>
    %473 = vector.broadcast %472 : f32 to vector<32x128xf32>
    %474 = arith.mulf %443, %473 : vector<32x128xf32>
    %475 = arith.addf %435, %474 : vector<32x128xf32>
    %c11_49 = arith.constant 11 : index
    %476 = memref.load %arg2[%c11_49] : memref<32xf32, #tpu.memory_space<smem>>
    %477 = vector.broadcast %476 : f32 to vector<32x128xf32>
    %478 = arith.mulf %3, %477 : vector<32x128xf32>
    %c11_50 = arith.constant 11 : index
    %479 = memref.load %arg3[%c11_50] : memref<32xf32, #tpu.memory_space<smem>>
    %480 = vector.broadcast %479 : f32 to vector<32x128xf32>
    %481 = arith.addf %478, %480 : vector<32x128xf32>
    %cst_51 = arith.constant 0.000000e+00 : f32
    %482 = vector.broadcast %cst_51 : f32 to vector<32x128xf32>
    %483 = arith.maximumf %481, %482 : vector<32x128xf32>
    %c88 = arith.constant 88 : index
    %484 = memref.load %arg4[%c88] : memref<256xf32, #tpu.memory_space<smem>>
    %485 = vector.broadcast %484 : f32 to vector<32x128xf32>
    %486 = arith.mulf %483, %485 : vector<32x128xf32>
    %487 = arith.addf %447, %486 : vector<32x128xf32>
    %c89 = arith.constant 89 : index
    %488 = memref.load %arg4[%c89] : memref<256xf32, #tpu.memory_space<smem>>
    %489 = vector.broadcast %488 : f32 to vector<32x128xf32>
    %490 = arith.mulf %483, %489 : vector<32x128xf32>
    %491 = arith.addf %451, %490 : vector<32x128xf32>
    %c90 = arith.constant 90 : index
    %492 = memref.load %arg4[%c90] : memref<256xf32, #tpu.memory_space<smem>>
    %493 = vector.broadcast %492 : f32 to vector<32x128xf32>
    %494 = arith.mulf %483, %493 : vector<32x128xf32>
    %495 = arith.addf %455, %494 : vector<32x128xf32>
    %c91 = arith.constant 91 : index
    %496 = memref.load %arg4[%c91] : memref<256xf32, #tpu.memory_space<smem>>
    %497 = vector.broadcast %496 : f32 to vector<32x128xf32>
    %498 = arith.mulf %483, %497 : vector<32x128xf32>
    %499 = arith.addf %459, %498 : vector<32x128xf32>
    %c92 = arith.constant 92 : index
    %500 = memref.load %arg4[%c92] : memref<256xf32, #tpu.memory_space<smem>>
    %501 = vector.broadcast %500 : f32 to vector<32x128xf32>
    %502 = arith.mulf %483, %501 : vector<32x128xf32>
    %503 = arith.addf %463, %502 : vector<32x128xf32>
    %c93 = arith.constant 93 : index
    %504 = memref.load %arg4[%c93] : memref<256xf32, #tpu.memory_space<smem>>
    %505 = vector.broadcast %504 : f32 to vector<32x128xf32>
    %506 = arith.mulf %483, %505 : vector<32x128xf32>
    %507 = arith.addf %467, %506 : vector<32x128xf32>
    %c94 = arith.constant 94 : index
    %508 = memref.load %arg4[%c94] : memref<256xf32, #tpu.memory_space<smem>>
    %509 = vector.broadcast %508 : f32 to vector<32x128xf32>
    %510 = arith.mulf %483, %509 : vector<32x128xf32>
    %511 = arith.addf %471, %510 : vector<32x128xf32>
    %c95 = arith.constant 95 : index
    %512 = memref.load %arg4[%c95] : memref<256xf32, #tpu.memory_space<smem>>
    %513 = vector.broadcast %512 : f32 to vector<32x128xf32>
    %514 = arith.mulf %483, %513 : vector<32x128xf32>
    %515 = arith.addf %475, %514 : vector<32x128xf32>
    %c12_52 = arith.constant 12 : index
    %516 = memref.load %arg2[%c12_52] : memref<32xf32, #tpu.memory_space<smem>>
    %517 = vector.broadcast %516 : f32 to vector<32x128xf32>
    %518 = arith.mulf %3, %517 : vector<32x128xf32>
    %c12_53 = arith.constant 12 : index
    %519 = memref.load %arg3[%c12_53] : memref<32xf32, #tpu.memory_space<smem>>
    %520 = vector.broadcast %519 : f32 to vector<32x128xf32>
    %521 = arith.addf %518, %520 : vector<32x128xf32>
    %cst_54 = arith.constant 0.000000e+00 : f32
    %522 = vector.broadcast %cst_54 : f32 to vector<32x128xf32>
    %523 = arith.maximumf %521, %522 : vector<32x128xf32>
    %c96 = arith.constant 96 : index
    %524 = memref.load %arg4[%c96] : memref<256xf32, #tpu.memory_space<smem>>
    %525 = vector.broadcast %524 : f32 to vector<32x128xf32>
    %526 = arith.mulf %523, %525 : vector<32x128xf32>
    %527 = arith.addf %487, %526 : vector<32x128xf32>
    %c97 = arith.constant 97 : index
    %528 = memref.load %arg4[%c97] : memref<256xf32, #tpu.memory_space<smem>>
    %529 = vector.broadcast %528 : f32 to vector<32x128xf32>
    %530 = arith.mulf %523, %529 : vector<32x128xf32>
    %531 = arith.addf %491, %530 : vector<32x128xf32>
    %c98 = arith.constant 98 : index
    %532 = memref.load %arg4[%c98] : memref<256xf32, #tpu.memory_space<smem>>
    %533 = vector.broadcast %532 : f32 to vector<32x128xf32>
    %534 = arith.mulf %523, %533 : vector<32x128xf32>
    %535 = arith.addf %495, %534 : vector<32x128xf32>
    %c99 = arith.constant 99 : index
    %536 = memref.load %arg4[%c99] : memref<256xf32, #tpu.memory_space<smem>>
    %537 = vector.broadcast %536 : f32 to vector<32x128xf32>
    %538 = arith.mulf %523, %537 : vector<32x128xf32>
    %539 = arith.addf %499, %538 : vector<32x128xf32>
    %c100 = arith.constant 100 : index
    %540 = memref.load %arg4[%c100] : memref<256xf32, #tpu.memory_space<smem>>
    %541 = vector.broadcast %540 : f32 to vector<32x128xf32>
    %542 = arith.mulf %523, %541 : vector<32x128xf32>
    %543 = arith.addf %503, %542 : vector<32x128xf32>
    %c101 = arith.constant 101 : index
    %544 = memref.load %arg4[%c101] : memref<256xf32, #tpu.memory_space<smem>>
    %545 = vector.broadcast %544 : f32 to vector<32x128xf32>
    %546 = arith.mulf %523, %545 : vector<32x128xf32>
    %547 = arith.addf %507, %546 : vector<32x128xf32>
    %c102 = arith.constant 102 : index
    %548 = memref.load %arg4[%c102] : memref<256xf32, #tpu.memory_space<smem>>
    %549 = vector.broadcast %548 : f32 to vector<32x128xf32>
    %550 = arith.mulf %523, %549 : vector<32x128xf32>
    %551 = arith.addf %511, %550 : vector<32x128xf32>
    %c103 = arith.constant 103 : index
    %552 = memref.load %arg4[%c103] : memref<256xf32, #tpu.memory_space<smem>>
    %553 = vector.broadcast %552 : f32 to vector<32x128xf32>
    %554 = arith.mulf %523, %553 : vector<32x128xf32>
    %555 = arith.addf %515, %554 : vector<32x128xf32>
    %c13_55 = arith.constant 13 : index
    %556 = memref.load %arg2[%c13_55] : memref<32xf32, #tpu.memory_space<smem>>
    %557 = vector.broadcast %556 : f32 to vector<32x128xf32>
    %558 = arith.mulf %3, %557 : vector<32x128xf32>
    %c13_56 = arith.constant 13 : index
    %559 = memref.load %arg3[%c13_56] : memref<32xf32, #tpu.memory_space<smem>>
    %560 = vector.broadcast %559 : f32 to vector<32x128xf32>
    %561 = arith.addf %558, %560 : vector<32x128xf32>
    %cst_57 = arith.constant 0.000000e+00 : f32
    %562 = vector.broadcast %cst_57 : f32 to vector<32x128xf32>
    %563 = arith.maximumf %561, %562 : vector<32x128xf32>
    %c104 = arith.constant 104 : index
    %564 = memref.load %arg4[%c104] : memref<256xf32, #tpu.memory_space<smem>>
    %565 = vector.broadcast %564 : f32 to vector<32x128xf32>
    %566 = arith.mulf %563, %565 : vector<32x128xf32>
    %567 = arith.addf %527, %566 : vector<32x128xf32>
    %c105 = arith.constant 105 : index
    %568 = memref.load %arg4[%c105] : memref<256xf32, #tpu.memory_space<smem>>
    %569 = vector.broadcast %568 : f32 to vector<32x128xf32>
    %570 = arith.mulf %563, %569 : vector<32x128xf32>
    %571 = arith.addf %531, %570 : vector<32x128xf32>
    %c106 = arith.constant 106 : index
    %572 = memref.load %arg4[%c106] : memref<256xf32, #tpu.memory_space<smem>>
    %573 = vector.broadcast %572 : f32 to vector<32x128xf32>
    %574 = arith.mulf %563, %573 : vector<32x128xf32>
    %575 = arith.addf %535, %574 : vector<32x128xf32>
    %c107 = arith.constant 107 : index
    %576 = memref.load %arg4[%c107] : memref<256xf32, #tpu.memory_space<smem>>
    %577 = vector.broadcast %576 : f32 to vector<32x128xf32>
    %578 = arith.mulf %563, %577 : vector<32x128xf32>
    %579 = arith.addf %539, %578 : vector<32x128xf32>
    %c108 = arith.constant 108 : index
    %580 = memref.load %arg4[%c108] : memref<256xf32, #tpu.memory_space<smem>>
    %581 = vector.broadcast %580 : f32 to vector<32x128xf32>
    %582 = arith.mulf %563, %581 : vector<32x128xf32>
    %583 = arith.addf %543, %582 : vector<32x128xf32>
    %c109 = arith.constant 109 : index
    %584 = memref.load %arg4[%c109] : memref<256xf32, #tpu.memory_space<smem>>
    %585 = vector.broadcast %584 : f32 to vector<32x128xf32>
    %586 = arith.mulf %563, %585 : vector<32x128xf32>
    %587 = arith.addf %547, %586 : vector<32x128xf32>
    %c110 = arith.constant 110 : index
    %588 = memref.load %arg4[%c110] : memref<256xf32, #tpu.memory_space<smem>>
    %589 = vector.broadcast %588 : f32 to vector<32x128xf32>
    %590 = arith.mulf %563, %589 : vector<32x128xf32>
    %591 = arith.addf %551, %590 : vector<32x128xf32>
    %c111 = arith.constant 111 : index
    %592 = memref.load %arg4[%c111] : memref<256xf32, #tpu.memory_space<smem>>
    %593 = vector.broadcast %592 : f32 to vector<32x128xf32>
    %594 = arith.mulf %563, %593 : vector<32x128xf32>
    %595 = arith.addf %555, %594 : vector<32x128xf32>
    %c14_58 = arith.constant 14 : index
    %596 = memref.load %arg2[%c14_58] : memref<32xf32, #tpu.memory_space<smem>>
    %597 = vector.broadcast %596 : f32 to vector<32x128xf32>
    %598 = arith.mulf %3, %597 : vector<32x128xf32>
    %c14_59 = arith.constant 14 : index
    %599 = memref.load %arg3[%c14_59] : memref<32xf32, #tpu.memory_space<smem>>
    %600 = vector.broadcast %599 : f32 to vector<32x128xf32>
    %601 = arith.addf %598, %600 : vector<32x128xf32>
    %cst_60 = arith.constant 0.000000e+00 : f32
    %602 = vector.broadcast %cst_60 : f32 to vector<32x128xf32>
    %603 = arith.maximumf %601, %602 : vector<32x128xf32>
    %c112 = arith.constant 112 : index
    %604 = memref.load %arg4[%c112] : memref<256xf32, #tpu.memory_space<smem>>
    %605 = vector.broadcast %604 : f32 to vector<32x128xf32>
    %606 = arith.mulf %603, %605 : vector<32x128xf32>
    %607 = arith.addf %567, %606 : vector<32x128xf32>
    %c113 = arith.constant 113 : index
    %608 = memref.load %arg4[%c113] : memref<256xf32, #tpu.memory_space<smem>>
    %609 = vector.broadcast %608 : f32 to vector<32x128xf32>
    %610 = arith.mulf %603, %609 : vector<32x128xf32>
    %611 = arith.addf %571, %610 : vector<32x128xf32>
    %c114 = arith.constant 114 : index
    %612 = memref.load %arg4[%c114] : memref<256xf32, #tpu.memory_space<smem>>
    %613 = vector.broadcast %612 : f32 to vector<32x128xf32>
    %614 = arith.mulf %603, %613 : vector<32x128xf32>
    %615 = arith.addf %575, %614 : vector<32x128xf32>
    %c115 = arith.constant 115 : index
    %616 = memref.load %arg4[%c115] : memref<256xf32, #tpu.memory_space<smem>>
    %617 = vector.broadcast %616 : f32 to vector<32x128xf32>
    %618 = arith.mulf %603, %617 : vector<32x128xf32>
    %619 = arith.addf %579, %618 : vector<32x128xf32>
    %c116 = arith.constant 116 : index
    %620 = memref.load %arg4[%c116] : memref<256xf32, #tpu.memory_space<smem>>
    %621 = vector.broadcast %620 : f32 to vector<32x128xf32>
    %622 = arith.mulf %603, %621 : vector<32x128xf32>
    %623 = arith.addf %583, %622 : vector<32x128xf32>
    %c117 = arith.constant 117 : index
    %624 = memref.load %arg4[%c117] : memref<256xf32, #tpu.memory_space<smem>>
    %625 = vector.broadcast %624 : f32 to vector<32x128xf32>
    %626 = arith.mulf %603, %625 : vector<32x128xf32>
    %627 = arith.addf %587, %626 : vector<32x128xf32>
    %c118 = arith.constant 118 : index
    %628 = memref.load %arg4[%c118] : memref<256xf32, #tpu.memory_space<smem>>
    %629 = vector.broadcast %628 : f32 to vector<32x128xf32>
    %630 = arith.mulf %603, %629 : vector<32x128xf32>
    %631 = arith.addf %591, %630 : vector<32x128xf32>
    %c119 = arith.constant 119 : index
    %632 = memref.load %arg4[%c119] : memref<256xf32, #tpu.memory_space<smem>>
    %633 = vector.broadcast %632 : f32 to vector<32x128xf32>
    %634 = arith.mulf %603, %633 : vector<32x128xf32>
    %635 = arith.addf %595, %634 : vector<32x128xf32>
    %c15_61 = arith.constant 15 : index
    %636 = memref.load %arg2[%c15_61] : memref<32xf32, #tpu.memory_space<smem>>
    %637 = vector.broadcast %636 : f32 to vector<32x128xf32>
    %638 = arith.mulf %3, %637 : vector<32x128xf32>
    %c15_62 = arith.constant 15 : index
    %639 = memref.load %arg3[%c15_62] : memref<32xf32, #tpu.memory_space<smem>>
    %640 = vector.broadcast %639 : f32 to vector<32x128xf32>
    %641 = arith.addf %638, %640 : vector<32x128xf32>
    %cst_63 = arith.constant 0.000000e+00 : f32
    %642 = vector.broadcast %cst_63 : f32 to vector<32x128xf32>
    %643 = arith.maximumf %641, %642 : vector<32x128xf32>
    %c120 = arith.constant 120 : index
    %644 = memref.load %arg4[%c120] : memref<256xf32, #tpu.memory_space<smem>>
    %645 = vector.broadcast %644 : f32 to vector<32x128xf32>
    %646 = arith.mulf %643, %645 : vector<32x128xf32>
    %647 = arith.addf %607, %646 : vector<32x128xf32>
    %c121 = arith.constant 121 : index
    %648 = memref.load %arg4[%c121] : memref<256xf32, #tpu.memory_space<smem>>
    %649 = vector.broadcast %648 : f32 to vector<32x128xf32>
    %650 = arith.mulf %643, %649 : vector<32x128xf32>
    %651 = arith.addf %611, %650 : vector<32x128xf32>
    %c122 = arith.constant 122 : index
    %652 = memref.load %arg4[%c122] : memref<256xf32, #tpu.memory_space<smem>>
    %653 = vector.broadcast %652 : f32 to vector<32x128xf32>
    %654 = arith.mulf %643, %653 : vector<32x128xf32>
    %655 = arith.addf %615, %654 : vector<32x128xf32>
    %c123 = arith.constant 123 : index
    %656 = memref.load %arg4[%c123] : memref<256xf32, #tpu.memory_space<smem>>
    %657 = vector.broadcast %656 : f32 to vector<32x128xf32>
    %658 = arith.mulf %643, %657 : vector<32x128xf32>
    %659 = arith.addf %619, %658 : vector<32x128xf32>
    %c124 = arith.constant 124 : index
    %660 = memref.load %arg4[%c124] : memref<256xf32, #tpu.memory_space<smem>>
    %661 = vector.broadcast %660 : f32 to vector<32x128xf32>
    %662 = arith.mulf %643, %661 : vector<32x128xf32>
    %663 = arith.addf %623, %662 : vector<32x128xf32>
    %c125 = arith.constant 125 : index
    %664 = memref.load %arg4[%c125] : memref<256xf32, #tpu.memory_space<smem>>
    %665 = vector.broadcast %664 : f32 to vector<32x128xf32>
    %666 = arith.mulf %643, %665 : vector<32x128xf32>
    %667 = arith.addf %627, %666 : vector<32x128xf32>
    %c126 = arith.constant 126 : index
    %668 = memref.load %arg4[%c126] : memref<256xf32, #tpu.memory_space<smem>>
    %669 = vector.broadcast %668 : f32 to vector<32x128xf32>
    %670 = arith.mulf %643, %669 : vector<32x128xf32>
    %671 = arith.addf %631, %670 : vector<32x128xf32>
    %c127 = arith.constant 127 : index
    %672 = memref.load %arg4[%c127] : memref<256xf32, #tpu.memory_space<smem>>
    %673 = vector.broadcast %672 : f32 to vector<32x128xf32>
    %674 = arith.mulf %643, %673 : vector<32x128xf32>
    %675 = arith.addf %635, %674 : vector<32x128xf32>
    %c16_64 = arith.constant 16 : index
    %676 = memref.load %arg2[%c16_64] : memref<32xf32, #tpu.memory_space<smem>>
    %677 = vector.broadcast %676 : f32 to vector<32x128xf32>
    %678 = arith.mulf %3, %677 : vector<32x128xf32>
    %c16_65 = arith.constant 16 : index
    %679 = memref.load %arg3[%c16_65] : memref<32xf32, #tpu.memory_space<smem>>
    %680 = vector.broadcast %679 : f32 to vector<32x128xf32>
    %681 = arith.addf %678, %680 : vector<32x128xf32>
    %cst_66 = arith.constant 0.000000e+00 : f32
    %682 = vector.broadcast %cst_66 : f32 to vector<32x128xf32>
    %683 = arith.maximumf %681, %682 : vector<32x128xf32>
    %c128 = arith.constant 128 : index
    %684 = memref.load %arg4[%c128] : memref<256xf32, #tpu.memory_space<smem>>
    %685 = vector.broadcast %684 : f32 to vector<32x128xf32>
    %686 = arith.mulf %683, %685 : vector<32x128xf32>
    %687 = arith.addf %647, %686 : vector<32x128xf32>
    %c129 = arith.constant 129 : index
    %688 = memref.load %arg4[%c129] : memref<256xf32, #tpu.memory_space<smem>>
    %689 = vector.broadcast %688 : f32 to vector<32x128xf32>
    %690 = arith.mulf %683, %689 : vector<32x128xf32>
    %691 = arith.addf %651, %690 : vector<32x128xf32>
    %c130 = arith.constant 130 : index
    %692 = memref.load %arg4[%c130] : memref<256xf32, #tpu.memory_space<smem>>
    %693 = vector.broadcast %692 : f32 to vector<32x128xf32>
    %694 = arith.mulf %683, %693 : vector<32x128xf32>
    %695 = arith.addf %655, %694 : vector<32x128xf32>
    %c131 = arith.constant 131 : index
    %696 = memref.load %arg4[%c131] : memref<256xf32, #tpu.memory_space<smem>>
    %697 = vector.broadcast %696 : f32 to vector<32x128xf32>
    %698 = arith.mulf %683, %697 : vector<32x128xf32>
    %699 = arith.addf %659, %698 : vector<32x128xf32>
    %c132 = arith.constant 132 : index
    %700 = memref.load %arg4[%c132] : memref<256xf32, #tpu.memory_space<smem>>
    %701 = vector.broadcast %700 : f32 to vector<32x128xf32>
    %702 = arith.mulf %683, %701 : vector<32x128xf32>
    %703 = arith.addf %663, %702 : vector<32x128xf32>
    %c133 = arith.constant 133 : index
    %704 = memref.load %arg4[%c133] : memref<256xf32, #tpu.memory_space<smem>>
    %705 = vector.broadcast %704 : f32 to vector<32x128xf32>
    %706 = arith.mulf %683, %705 : vector<32x128xf32>
    %707 = arith.addf %667, %706 : vector<32x128xf32>
    %c134 = arith.constant 134 : index
    %708 = memref.load %arg4[%c134] : memref<256xf32, #tpu.memory_space<smem>>
    %709 = vector.broadcast %708 : f32 to vector<32x128xf32>
    %710 = arith.mulf %683, %709 : vector<32x128xf32>
    %711 = arith.addf %671, %710 : vector<32x128xf32>
    %c135 = arith.constant 135 : index
    %712 = memref.load %arg4[%c135] : memref<256xf32, #tpu.memory_space<smem>>
    %713 = vector.broadcast %712 : f32 to vector<32x128xf32>
    %714 = arith.mulf %683, %713 : vector<32x128xf32>
    %715 = arith.addf %675, %714 : vector<32x128xf32>
    %c17_67 = arith.constant 17 : index
    %716 = memref.load %arg2[%c17_67] : memref<32xf32, #tpu.memory_space<smem>>
    %717 = vector.broadcast %716 : f32 to vector<32x128xf32>
    %718 = arith.mulf %3, %717 : vector<32x128xf32>
    %c17_68 = arith.constant 17 : index
    %719 = memref.load %arg3[%c17_68] : memref<32xf32, #tpu.memory_space<smem>>
    %720 = vector.broadcast %719 : f32 to vector<32x128xf32>
    %721 = arith.addf %718, %720 : vector<32x128xf32>
    %cst_69 = arith.constant 0.000000e+00 : f32
    %722 = vector.broadcast %cst_69 : f32 to vector<32x128xf32>
    %723 = arith.maximumf %721, %722 : vector<32x128xf32>
    %c136 = arith.constant 136 : index
    %724 = memref.load %arg4[%c136] : memref<256xf32, #tpu.memory_space<smem>>
    %725 = vector.broadcast %724 : f32 to vector<32x128xf32>
    %726 = arith.mulf %723, %725 : vector<32x128xf32>
    %727 = arith.addf %687, %726 : vector<32x128xf32>
    %c137 = arith.constant 137 : index
    %728 = memref.load %arg4[%c137] : memref<256xf32, #tpu.memory_space<smem>>
    %729 = vector.broadcast %728 : f32 to vector<32x128xf32>
    %730 = arith.mulf %723, %729 : vector<32x128xf32>
    %731 = arith.addf %691, %730 : vector<32x128xf32>
    %c138 = arith.constant 138 : index
    %732 = memref.load %arg4[%c138] : memref<256xf32, #tpu.memory_space<smem>>
    %733 = vector.broadcast %732 : f32 to vector<32x128xf32>
    %734 = arith.mulf %723, %733 : vector<32x128xf32>
    %735 = arith.addf %695, %734 : vector<32x128xf32>
    %c139 = arith.constant 139 : index
    %736 = memref.load %arg4[%c139] : memref<256xf32, #tpu.memory_space<smem>>
    %737 = vector.broadcast %736 : f32 to vector<32x128xf32>
    %738 = arith.mulf %723, %737 : vector<32x128xf32>
    %739 = arith.addf %699, %738 : vector<32x128xf32>
    %c140 = arith.constant 140 : index
    %740 = memref.load %arg4[%c140] : memref<256xf32, #tpu.memory_space<smem>>
    %741 = vector.broadcast %740 : f32 to vector<32x128xf32>
    %742 = arith.mulf %723, %741 : vector<32x128xf32>
    %743 = arith.addf %703, %742 : vector<32x128xf32>
    %c141 = arith.constant 141 : index
    %744 = memref.load %arg4[%c141] : memref<256xf32, #tpu.memory_space<smem>>
    %745 = vector.broadcast %744 : f32 to vector<32x128xf32>
    %746 = arith.mulf %723, %745 : vector<32x128xf32>
    %747 = arith.addf %707, %746 : vector<32x128xf32>
    %c142 = arith.constant 142 : index
    %748 = memref.load %arg4[%c142] : memref<256xf32, #tpu.memory_space<smem>>
    %749 = vector.broadcast %748 : f32 to vector<32x128xf32>
    %750 = arith.mulf %723, %749 : vector<32x128xf32>
    %751 = arith.addf %711, %750 : vector<32x128xf32>
    %c143 = arith.constant 143 : index
    %752 = memref.load %arg4[%c143] : memref<256xf32, #tpu.memory_space<smem>>
    %753 = vector.broadcast %752 : f32 to vector<32x128xf32>
    %754 = arith.mulf %723, %753 : vector<32x128xf32>
    %755 = arith.addf %715, %754 : vector<32x128xf32>
    %c18_70 = arith.constant 18 : index
    %756 = memref.load %arg2[%c18_70] : memref<32xf32, #tpu.memory_space<smem>>
    %757 = vector.broadcast %756 : f32 to vector<32x128xf32>
    %758 = arith.mulf %3, %757 : vector<32x128xf32>
    %c18_71 = arith.constant 18 : index
    %759 = memref.load %arg3[%c18_71] : memref<32xf32, #tpu.memory_space<smem>>
    %760 = vector.broadcast %759 : f32 to vector<32x128xf32>
    %761 = arith.addf %758, %760 : vector<32x128xf32>
    %cst_72 = arith.constant 0.000000e+00 : f32
    %762 = vector.broadcast %cst_72 : f32 to vector<32x128xf32>
    %763 = arith.maximumf %761, %762 : vector<32x128xf32>
    %c144 = arith.constant 144 : index
    %764 = memref.load %arg4[%c144] : memref<256xf32, #tpu.memory_space<smem>>
    %765 = vector.broadcast %764 : f32 to vector<32x128xf32>
    %766 = arith.mulf %763, %765 : vector<32x128xf32>
    %767 = arith.addf %727, %766 : vector<32x128xf32>
    %c145 = arith.constant 145 : index
    %768 = memref.load %arg4[%c145] : memref<256xf32, #tpu.memory_space<smem>>
    %769 = vector.broadcast %768 : f32 to vector<32x128xf32>
    %770 = arith.mulf %763, %769 : vector<32x128xf32>
    %771 = arith.addf %731, %770 : vector<32x128xf32>
    %c146 = arith.constant 146 : index
    %772 = memref.load %arg4[%c146] : memref<256xf32, #tpu.memory_space<smem>>
    %773 = vector.broadcast %772 : f32 to vector<32x128xf32>
    %774 = arith.mulf %763, %773 : vector<32x128xf32>
    %775 = arith.addf %735, %774 : vector<32x128xf32>
    %c147 = arith.constant 147 : index
    %776 = memref.load %arg4[%c147] : memref<256xf32, #tpu.memory_space<smem>>
    %777 = vector.broadcast %776 : f32 to vector<32x128xf32>
    %778 = arith.mulf %763, %777 : vector<32x128xf32>
    %779 = arith.addf %739, %778 : vector<32x128xf32>
    %c148 = arith.constant 148 : index
    %780 = memref.load %arg4[%c148] : memref<256xf32, #tpu.memory_space<smem>>
    %781 = vector.broadcast %780 : f32 to vector<32x128xf32>
    %782 = arith.mulf %763, %781 : vector<32x128xf32>
    %783 = arith.addf %743, %782 : vector<32x128xf32>
    %c149 = arith.constant 149 : index
    %784 = memref.load %arg4[%c149] : memref<256xf32, #tpu.memory_space<smem>>
    %785 = vector.broadcast %784 : f32 to vector<32x128xf32>
    %786 = arith.mulf %763, %785 : vector<32x128xf32>
    %787 = arith.addf %747, %786 : vector<32x128xf32>
    %c150 = arith.constant 150 : index
    %788 = memref.load %arg4[%c150] : memref<256xf32, #tpu.memory_space<smem>>
    %789 = vector.broadcast %788 : f32 to vector<32x128xf32>
    %790 = arith.mulf %763, %789 : vector<32x128xf32>
    %791 = arith.addf %751, %790 : vector<32x128xf32>
    %c151 = arith.constant 151 : index
    %792 = memref.load %arg4[%c151] : memref<256xf32, #tpu.memory_space<smem>>
    %793 = vector.broadcast %792 : f32 to vector<32x128xf32>
    %794 = arith.mulf %763, %793 : vector<32x128xf32>
    %795 = arith.addf %755, %794 : vector<32x128xf32>
    %c19_73 = arith.constant 19 : index
    %796 = memref.load %arg2[%c19_73] : memref<32xf32, #tpu.memory_space<smem>>
    %797 = vector.broadcast %796 : f32 to vector<32x128xf32>
    %798 = arith.mulf %3, %797 : vector<32x128xf32>
    %c19_74 = arith.constant 19 : index
    %799 = memref.load %arg3[%c19_74] : memref<32xf32, #tpu.memory_space<smem>>
    %800 = vector.broadcast %799 : f32 to vector<32x128xf32>
    %801 = arith.addf %798, %800 : vector<32x128xf32>
    %cst_75 = arith.constant 0.000000e+00 : f32
    %802 = vector.broadcast %cst_75 : f32 to vector<32x128xf32>
    %803 = arith.maximumf %801, %802 : vector<32x128xf32>
    %c152 = arith.constant 152 : index
    %804 = memref.load %arg4[%c152] : memref<256xf32, #tpu.memory_space<smem>>
    %805 = vector.broadcast %804 : f32 to vector<32x128xf32>
    %806 = arith.mulf %803, %805 : vector<32x128xf32>
    %807 = arith.addf %767, %806 : vector<32x128xf32>
    %c153 = arith.constant 153 : index
    %808 = memref.load %arg4[%c153] : memref<256xf32, #tpu.memory_space<smem>>
    %809 = vector.broadcast %808 : f32 to vector<32x128xf32>
    %810 = arith.mulf %803, %809 : vector<32x128xf32>
    %811 = arith.addf %771, %810 : vector<32x128xf32>
    %c154 = arith.constant 154 : index
    %812 = memref.load %arg4[%c154] : memref<256xf32, #tpu.memory_space<smem>>
    %813 = vector.broadcast %812 : f32 to vector<32x128xf32>
    %814 = arith.mulf %803, %813 : vector<32x128xf32>
    %815 = arith.addf %775, %814 : vector<32x128xf32>
    %c155 = arith.constant 155 : index
    %816 = memref.load %arg4[%c155] : memref<256xf32, #tpu.memory_space<smem>>
    %817 = vector.broadcast %816 : f32 to vector<32x128xf32>
    %818 = arith.mulf %803, %817 : vector<32x128xf32>
    %819 = arith.addf %779, %818 : vector<32x128xf32>
    %c156 = arith.constant 156 : index
    %820 = memref.load %arg4[%c156] : memref<256xf32, #tpu.memory_space<smem>>
    %821 = vector.broadcast %820 : f32 to vector<32x128xf32>
    %822 = arith.mulf %803, %821 : vector<32x128xf32>
    %823 = arith.addf %783, %822 : vector<32x128xf32>
    %c157 = arith.constant 157 : index
    %824 = memref.load %arg4[%c157] : memref<256xf32, #tpu.memory_space<smem>>
    %825 = vector.broadcast %824 : f32 to vector<32x128xf32>
    %826 = arith.mulf %803, %825 : vector<32x128xf32>
    %827 = arith.addf %787, %826 : vector<32x128xf32>
    %c158 = arith.constant 158 : index
    %828 = memref.load %arg4[%c158] : memref<256xf32, #tpu.memory_space<smem>>
    %829 = vector.broadcast %828 : f32 to vector<32x128xf32>
    %830 = arith.mulf %803, %829 : vector<32x128xf32>
    %831 = arith.addf %791, %830 : vector<32x128xf32>
    %c159 = arith.constant 159 : index
    %832 = memref.load %arg4[%c159] : memref<256xf32, #tpu.memory_space<smem>>
    %833 = vector.broadcast %832 : f32 to vector<32x128xf32>
    %834 = arith.mulf %803, %833 : vector<32x128xf32>
    %835 = arith.addf %795, %834 : vector<32x128xf32>
    %c20_76 = arith.constant 20 : index
    %836 = memref.load %arg2[%c20_76] : memref<32xf32, #tpu.memory_space<smem>>
    %837 = vector.broadcast %836 : f32 to vector<32x128xf32>
    %838 = arith.mulf %3, %837 : vector<32x128xf32>
    %c20_77 = arith.constant 20 : index
    %839 = memref.load %arg3[%c20_77] : memref<32xf32, #tpu.memory_space<smem>>
    %840 = vector.broadcast %839 : f32 to vector<32x128xf32>
    %841 = arith.addf %838, %840 : vector<32x128xf32>
    %cst_78 = arith.constant 0.000000e+00 : f32
    %842 = vector.broadcast %cst_78 : f32 to vector<32x128xf32>
    %843 = arith.maximumf %841, %842 : vector<32x128xf32>
    %c160 = arith.constant 160 : index
    %844 = memref.load %arg4[%c160] : memref<256xf32, #tpu.memory_space<smem>>
    %845 = vector.broadcast %844 : f32 to vector<32x128xf32>
    %846 = arith.mulf %843, %845 : vector<32x128xf32>
    %847 = arith.addf %807, %846 : vector<32x128xf32>
    %c161 = arith.constant 161 : index
    %848 = memref.load %arg4[%c161] : memref<256xf32, #tpu.memory_space<smem>>
    %849 = vector.broadcast %848 : f32 to vector<32x128xf32>
    %850 = arith.mulf %843, %849 : vector<32x128xf32>
    %851 = arith.addf %811, %850 : vector<32x128xf32>
    %c162 = arith.constant 162 : index
    %852 = memref.load %arg4[%c162] : memref<256xf32, #tpu.memory_space<smem>>
    %853 = vector.broadcast %852 : f32 to vector<32x128xf32>
    %854 = arith.mulf %843, %853 : vector<32x128xf32>
    %855 = arith.addf %815, %854 : vector<32x128xf32>
    %c163 = arith.constant 163 : index
    %856 = memref.load %arg4[%c163] : memref<256xf32, #tpu.memory_space<smem>>
    %857 = vector.broadcast %856 : f32 to vector<32x128xf32>
    %858 = arith.mulf %843, %857 : vector<32x128xf32>
    %859 = arith.addf %819, %858 : vector<32x128xf32>
    %c164 = arith.constant 164 : index
    %860 = memref.load %arg4[%c164] : memref<256xf32, #tpu.memory_space<smem>>
    %861 = vector.broadcast %860 : f32 to vector<32x128xf32>
    %862 = arith.mulf %843, %861 : vector<32x128xf32>
    %863 = arith.addf %823, %862 : vector<32x128xf32>
    %c165 = arith.constant 165 : index
    %864 = memref.load %arg4[%c165] : memref<256xf32, #tpu.memory_space<smem>>
    %865 = vector.broadcast %864 : f32 to vector<32x128xf32>
    %866 = arith.mulf %843, %865 : vector<32x128xf32>
    %867 = arith.addf %827, %866 : vector<32x128xf32>
    %c166 = arith.constant 166 : index
    %868 = memref.load %arg4[%c166] : memref<256xf32, #tpu.memory_space<smem>>
    %869 = vector.broadcast %868 : f32 to vector<32x128xf32>
    %870 = arith.mulf %843, %869 : vector<32x128xf32>
    %871 = arith.addf %831, %870 : vector<32x128xf32>
    %c167 = arith.constant 167 : index
    %872 = memref.load %arg4[%c167] : memref<256xf32, #tpu.memory_space<smem>>
    %873 = vector.broadcast %872 : f32 to vector<32x128xf32>
    %874 = arith.mulf %843, %873 : vector<32x128xf32>
    %875 = arith.addf %835, %874 : vector<32x128xf32>
    %c21_79 = arith.constant 21 : index
    %876 = memref.load %arg2[%c21_79] : memref<32xf32, #tpu.memory_space<smem>>
    %877 = vector.broadcast %876 : f32 to vector<32x128xf32>
    %878 = arith.mulf %3, %877 : vector<32x128xf32>
    %c21_80 = arith.constant 21 : index
    %879 = memref.load %arg3[%c21_80] : memref<32xf32, #tpu.memory_space<smem>>
    %880 = vector.broadcast %879 : f32 to vector<32x128xf32>
    %881 = arith.addf %878, %880 : vector<32x128xf32>
    %cst_81 = arith.constant 0.000000e+00 : f32
    %882 = vector.broadcast %cst_81 : f32 to vector<32x128xf32>
    %883 = arith.maximumf %881, %882 : vector<32x128xf32>
    %c168 = arith.constant 168 : index
    %884 = memref.load %arg4[%c168] : memref<256xf32, #tpu.memory_space<smem>>
    %885 = vector.broadcast %884 : f32 to vector<32x128xf32>
    %886 = arith.mulf %883, %885 : vector<32x128xf32>
    %887 = arith.addf %847, %886 : vector<32x128xf32>
    %c169 = arith.constant 169 : index
    %888 = memref.load %arg4[%c169] : memref<256xf32, #tpu.memory_space<smem>>
    %889 = vector.broadcast %888 : f32 to vector<32x128xf32>
    %890 = arith.mulf %883, %889 : vector<32x128xf32>
    %891 = arith.addf %851, %890 : vector<32x128xf32>
    %c170 = arith.constant 170 : index
    %892 = memref.load %arg4[%c170] : memref<256xf32, #tpu.memory_space<smem>>
    %893 = vector.broadcast %892 : f32 to vector<32x128xf32>
    %894 = arith.mulf %883, %893 : vector<32x128xf32>
    %895 = arith.addf %855, %894 : vector<32x128xf32>
    %c171 = arith.constant 171 : index
    %896 = memref.load %arg4[%c171] : memref<256xf32, #tpu.memory_space<smem>>
    %897 = vector.broadcast %896 : f32 to vector<32x128xf32>
    %898 = arith.mulf %883, %897 : vector<32x128xf32>
    %899 = arith.addf %859, %898 : vector<32x128xf32>
    %c172 = arith.constant 172 : index
    %900 = memref.load %arg4[%c172] : memref<256xf32, #tpu.memory_space<smem>>
    %901 = vector.broadcast %900 : f32 to vector<32x128xf32>
    %902 = arith.mulf %883, %901 : vector<32x128xf32>
    %903 = arith.addf %863, %902 : vector<32x128xf32>
    %c173 = arith.constant 173 : index
    %904 = memref.load %arg4[%c173] : memref<256xf32, #tpu.memory_space<smem>>
    %905 = vector.broadcast %904 : f32 to vector<32x128xf32>
    %906 = arith.mulf %883, %905 : vector<32x128xf32>
    %907 = arith.addf %867, %906 : vector<32x128xf32>
    %c174 = arith.constant 174 : index
    %908 = memref.load %arg4[%c174] : memref<256xf32, #tpu.memory_space<smem>>
    %909 = vector.broadcast %908 : f32 to vector<32x128xf32>
    %910 = arith.mulf %883, %909 : vector<32x128xf32>
    %911 = arith.addf %871, %910 : vector<32x128xf32>
    %c175 = arith.constant 175 : index
    %912 = memref.load %arg4[%c175] : memref<256xf32, #tpu.memory_space<smem>>
    %913 = vector.broadcast %912 : f32 to vector<32x128xf32>
    %914 = arith.mulf %883, %913 : vector<32x128xf32>
    %915 = arith.addf %875, %914 : vector<32x128xf32>
    %c22_82 = arith.constant 22 : index
    %916 = memref.load %arg2[%c22_82] : memref<32xf32, #tpu.memory_space<smem>>
    %917 = vector.broadcast %916 : f32 to vector<32x128xf32>
    %918 = arith.mulf %3, %917 : vector<32x128xf32>
    %c22_83 = arith.constant 22 : index
    %919 = memref.load %arg3[%c22_83] : memref<32xf32, #tpu.memory_space<smem>>
    %920 = vector.broadcast %919 : f32 to vector<32x128xf32>
    %921 = arith.addf %918, %920 : vector<32x128xf32>
    %cst_84 = arith.constant 0.000000e+00 : f32
    %922 = vector.broadcast %cst_84 : f32 to vector<32x128xf32>
    %923 = arith.maximumf %921, %922 : vector<32x128xf32>
    %c176 = arith.constant 176 : index
    %924 = memref.load %arg4[%c176] : memref<256xf32, #tpu.memory_space<smem>>
    %925 = vector.broadcast %924 : f32 to vector<32x128xf32>
    %926 = arith.mulf %923, %925 : vector<32x128xf32>
    %927 = arith.addf %887, %926 : vector<32x128xf32>
    %c177 = arith.constant 177 : index
    %928 = memref.load %arg4[%c177] : memref<256xf32, #tpu.memory_space<smem>>
    %929 = vector.broadcast %928 : f32 to vector<32x128xf32>
    %930 = arith.mulf %923, %929 : vector<32x128xf32>
    %931 = arith.addf %891, %930 : vector<32x128xf32>
    %c178 = arith.constant 178 : index
    %932 = memref.load %arg4[%c178] : memref<256xf32, #tpu.memory_space<smem>>
    %933 = vector.broadcast %932 : f32 to vector<32x128xf32>
    %934 = arith.mulf %923, %933 : vector<32x128xf32>
    %935 = arith.addf %895, %934 : vector<32x128xf32>
    %c179 = arith.constant 179 : index
    %936 = memref.load %arg4[%c179] : memref<256xf32, #tpu.memory_space<smem>>
    %937 = vector.broadcast %936 : f32 to vector<32x128xf32>
    %938 = arith.mulf %923, %937 : vector<32x128xf32>
    %939 = arith.addf %899, %938 : vector<32x128xf32>
    %c180 = arith.constant 180 : index
    %940 = memref.load %arg4[%c180] : memref<256xf32, #tpu.memory_space<smem>>
    %941 = vector.broadcast %940 : f32 to vector<32x128xf32>
    %942 = arith.mulf %923, %941 : vector<32x128xf32>
    %943 = arith.addf %903, %942 : vector<32x128xf32>
    %c181 = arith.constant 181 : index
    %944 = memref.load %arg4[%c181] : memref<256xf32, #tpu.memory_space<smem>>
    %945 = vector.broadcast %944 : f32 to vector<32x128xf32>
    %946 = arith.mulf %923, %945 : vector<32x128xf32>
    %947 = arith.addf %907, %946 : vector<32x128xf32>
    %c182 = arith.constant 182 : index
    %948 = memref.load %arg4[%c182] : memref<256xf32, #tpu.memory_space<smem>>
    %949 = vector.broadcast %948 : f32 to vector<32x128xf32>
    %950 = arith.mulf %923, %949 : vector<32x128xf32>
    %951 = arith.addf %911, %950 : vector<32x128xf32>
    %c183 = arith.constant 183 : index
    %952 = memref.load %arg4[%c183] : memref<256xf32, #tpu.memory_space<smem>>
    %953 = vector.broadcast %952 : f32 to vector<32x128xf32>
    %954 = arith.mulf %923, %953 : vector<32x128xf32>
    %955 = arith.addf %915, %954 : vector<32x128xf32>
    %c23_85 = arith.constant 23 : index
    %956 = memref.load %arg2[%c23_85] : memref<32xf32, #tpu.memory_space<smem>>
    %957 = vector.broadcast %956 : f32 to vector<32x128xf32>
    %958 = arith.mulf %3, %957 : vector<32x128xf32>
    %c23_86 = arith.constant 23 : index
    %959 = memref.load %arg3[%c23_86] : memref<32xf32, #tpu.memory_space<smem>>
    %960 = vector.broadcast %959 : f32 to vector<32x128xf32>
    %961 = arith.addf %958, %960 : vector<32x128xf32>
    %cst_87 = arith.constant 0.000000e+00 : f32
    %962 = vector.broadcast %cst_87 : f32 to vector<32x128xf32>
    %963 = arith.maximumf %961, %962 : vector<32x128xf32>
    %c184 = arith.constant 184 : index
    %964 = memref.load %arg4[%c184] : memref<256xf32, #tpu.memory_space<smem>>
    %965 = vector.broadcast %964 : f32 to vector<32x128xf32>
    %966 = arith.mulf %963, %965 : vector<32x128xf32>
    %967 = arith.addf %927, %966 : vector<32x128xf32>
    %c185 = arith.constant 185 : index
    %968 = memref.load %arg4[%c185] : memref<256xf32, #tpu.memory_space<smem>>
    %969 = vector.broadcast %968 : f32 to vector<32x128xf32>
    %970 = arith.mulf %963, %969 : vector<32x128xf32>
    %971 = arith.addf %931, %970 : vector<32x128xf32>
    %c186 = arith.constant 186 : index
    %972 = memref.load %arg4[%c186] : memref<256xf32, #tpu.memory_space<smem>>
    %973 = vector.broadcast %972 : f32 to vector<32x128xf32>
    %974 = arith.mulf %963, %973 : vector<32x128xf32>
    %975 = arith.addf %935, %974 : vector<32x128xf32>
    %c187 = arith.constant 187 : index
    %976 = memref.load %arg4[%c187] : memref<256xf32, #tpu.memory_space<smem>>
    %977 = vector.broadcast %976 : f32 to vector<32x128xf32>
    %978 = arith.mulf %963, %977 : vector<32x128xf32>
    %979 = arith.addf %939, %978 : vector<32x128xf32>
    %c188 = arith.constant 188 : index
    %980 = memref.load %arg4[%c188] : memref<256xf32, #tpu.memory_space<smem>>
    %981 = vector.broadcast %980 : f32 to vector<32x128xf32>
    %982 = arith.mulf %963, %981 : vector<32x128xf32>
    %983 = arith.addf %943, %982 : vector<32x128xf32>
    %c189 = arith.constant 189 : index
    %984 = memref.load %arg4[%c189] : memref<256xf32, #tpu.memory_space<smem>>
    %985 = vector.broadcast %984 : f32 to vector<32x128xf32>
    %986 = arith.mulf %963, %985 : vector<32x128xf32>
    %987 = arith.addf %947, %986 : vector<32x128xf32>
    %c190 = arith.constant 190 : index
    %988 = memref.load %arg4[%c190] : memref<256xf32, #tpu.memory_space<smem>>
    %989 = vector.broadcast %988 : f32 to vector<32x128xf32>
    %990 = arith.mulf %963, %989 : vector<32x128xf32>
    %991 = arith.addf %951, %990 : vector<32x128xf32>
    %c191 = arith.constant 191 : index
    %992 = memref.load %arg4[%c191] : memref<256xf32, #tpu.memory_space<smem>>
    %993 = vector.broadcast %992 : f32 to vector<32x128xf32>
    %994 = arith.mulf %963, %993 : vector<32x128xf32>
    %995 = arith.addf %955, %994 : vector<32x128xf32>
    %c24_88 = arith.constant 24 : index
    %996 = memref.load %arg2[%c24_88] : memref<32xf32, #tpu.memory_space<smem>>
    %997 = vector.broadcast %996 : f32 to vector<32x128xf32>
    %998 = arith.mulf %3, %997 : vector<32x128xf32>
    %c24_89 = arith.constant 24 : index
    %999 = memref.load %arg3[%c24_89] : memref<32xf32, #tpu.memory_space<smem>>
    %1000 = vector.broadcast %999 : f32 to vector<32x128xf32>
    %1001 = arith.addf %998, %1000 : vector<32x128xf32>
    %cst_90 = arith.constant 0.000000e+00 : f32
    %1002 = vector.broadcast %cst_90 : f32 to vector<32x128xf32>
    %1003 = arith.maximumf %1001, %1002 : vector<32x128xf32>
    %c192 = arith.constant 192 : index
    %1004 = memref.load %arg4[%c192] : memref<256xf32, #tpu.memory_space<smem>>
    %1005 = vector.broadcast %1004 : f32 to vector<32x128xf32>
    %1006 = arith.mulf %1003, %1005 : vector<32x128xf32>
    %1007 = arith.addf %967, %1006 : vector<32x128xf32>
    %c193 = arith.constant 193 : index
    %1008 = memref.load %arg4[%c193] : memref<256xf32, #tpu.memory_space<smem>>
    %1009 = vector.broadcast %1008 : f32 to vector<32x128xf32>
    %1010 = arith.mulf %1003, %1009 : vector<32x128xf32>
    %1011 = arith.addf %971, %1010 : vector<32x128xf32>
    %c194 = arith.constant 194 : index
    %1012 = memref.load %arg4[%c194] : memref<256xf32, #tpu.memory_space<smem>>
    %1013 = vector.broadcast %1012 : f32 to vector<32x128xf32>
    %1014 = arith.mulf %1003, %1013 : vector<32x128xf32>
    %1015 = arith.addf %975, %1014 : vector<32x128xf32>
    %c195 = arith.constant 195 : index
    %1016 = memref.load %arg4[%c195] : memref<256xf32, #tpu.memory_space<smem>>
    %1017 = vector.broadcast %1016 : f32 to vector<32x128xf32>
    %1018 = arith.mulf %1003, %1017 : vector<32x128xf32>
    %1019 = arith.addf %979, %1018 : vector<32x128xf32>
    %c196 = arith.constant 196 : index
    %1020 = memref.load %arg4[%c196] : memref<256xf32, #tpu.memory_space<smem>>
    %1021 = vector.broadcast %1020 : f32 to vector<32x128xf32>
    %1022 = arith.mulf %1003, %1021 : vector<32x128xf32>
    %1023 = arith.addf %983, %1022 : vector<32x128xf32>
    %c197 = arith.constant 197 : index
    %1024 = memref.load %arg4[%c197] : memref<256xf32, #tpu.memory_space<smem>>
    %1025 = vector.broadcast %1024 : f32 to vector<32x128xf32>
    %1026 = arith.mulf %1003, %1025 : vector<32x128xf32>
    %1027 = arith.addf %987, %1026 : vector<32x128xf32>
    %c198 = arith.constant 198 : index
    %1028 = memref.load %arg4[%c198] : memref<256xf32, #tpu.memory_space<smem>>
    %1029 = vector.broadcast %1028 : f32 to vector<32x128xf32>
    %1030 = arith.mulf %1003, %1029 : vector<32x128xf32>
    %1031 = arith.addf %991, %1030 : vector<32x128xf32>
    %c199 = arith.constant 199 : index
    %1032 = memref.load %arg4[%c199] : memref<256xf32, #tpu.memory_space<smem>>
    %1033 = vector.broadcast %1032 : f32 to vector<32x128xf32>
    %1034 = arith.mulf %1003, %1033 : vector<32x128xf32>
    %1035 = arith.addf %995, %1034 : vector<32x128xf32>
    %c25_91 = arith.constant 25 : index
    %1036 = memref.load %arg2[%c25_91] : memref<32xf32, #tpu.memory_space<smem>>
    %1037 = vector.broadcast %1036 : f32 to vector<32x128xf32>
    %1038 = arith.mulf %3, %1037 : vector<32x128xf32>
    %c25_92 = arith.constant 25 : index
    %1039 = memref.load %arg3[%c25_92] : memref<32xf32, #tpu.memory_space<smem>>
    %1040 = vector.broadcast %1039 : f32 to vector<32x128xf32>
    %1041 = arith.addf %1038, %1040 : vector<32x128xf32>
    %cst_93 = arith.constant 0.000000e+00 : f32
    %1042 = vector.broadcast %cst_93 : f32 to vector<32x128xf32>
    %1043 = arith.maximumf %1041, %1042 : vector<32x128xf32>
    %c200 = arith.constant 200 : index
    %1044 = memref.load %arg4[%c200] : memref<256xf32, #tpu.memory_space<smem>>
    %1045 = vector.broadcast %1044 : f32 to vector<32x128xf32>
    %1046 = arith.mulf %1043, %1045 : vector<32x128xf32>
    %1047 = arith.addf %1007, %1046 : vector<32x128xf32>
    %c201 = arith.constant 201 : index
    %1048 = memref.load %arg4[%c201] : memref<256xf32, #tpu.memory_space<smem>>
    %1049 = vector.broadcast %1048 : f32 to vector<32x128xf32>
    %1050 = arith.mulf %1043, %1049 : vector<32x128xf32>
    %1051 = arith.addf %1011, %1050 : vector<32x128xf32>
    %c202 = arith.constant 202 : index
    %1052 = memref.load %arg4[%c202] : memref<256xf32, #tpu.memory_space<smem>>
    %1053 = vector.broadcast %1052 : f32 to vector<32x128xf32>
    %1054 = arith.mulf %1043, %1053 : vector<32x128xf32>
    %1055 = arith.addf %1015, %1054 : vector<32x128xf32>
    %c203 = arith.constant 203 : index
    %1056 = memref.load %arg4[%c203] : memref<256xf32, #tpu.memory_space<smem>>
    %1057 = vector.broadcast %1056 : f32 to vector<32x128xf32>
    %1058 = arith.mulf %1043, %1057 : vector<32x128xf32>
    %1059 = arith.addf %1019, %1058 : vector<32x128xf32>
    %c204 = arith.constant 204 : index
    %1060 = memref.load %arg4[%c204] : memref<256xf32, #tpu.memory_space<smem>>
    %1061 = vector.broadcast %1060 : f32 to vector<32x128xf32>
    %1062 = arith.mulf %1043, %1061 : vector<32x128xf32>
    %1063 = arith.addf %1023, %1062 : vector<32x128xf32>
    %c205 = arith.constant 205 : index
    %1064 = memref.load %arg4[%c205] : memref<256xf32, #tpu.memory_space<smem>>
    %1065 = vector.broadcast %1064 : f32 to vector<32x128xf32>
    %1066 = arith.mulf %1043, %1065 : vector<32x128xf32>
    %1067 = arith.addf %1027, %1066 : vector<32x128xf32>
    %c206 = arith.constant 206 : index
    %1068 = memref.load %arg4[%c206] : memref<256xf32, #tpu.memory_space<smem>>
    %1069 = vector.broadcast %1068 : f32 to vector<32x128xf32>
    %1070 = arith.mulf %1043, %1069 : vector<32x128xf32>
    %1071 = arith.addf %1031, %1070 : vector<32x128xf32>
    %c207 = arith.constant 207 : index
    %1072 = memref.load %arg4[%c207] : memref<256xf32, #tpu.memory_space<smem>>
    %1073 = vector.broadcast %1072 : f32 to vector<32x128xf32>
    %1074 = arith.mulf %1043, %1073 : vector<32x128xf32>
    %1075 = arith.addf %1035, %1074 : vector<32x128xf32>
    %c26_94 = arith.constant 26 : index
    %1076 = memref.load %arg2[%c26_94] : memref<32xf32, #tpu.memory_space<smem>>
    %1077 = vector.broadcast %1076 : f32 to vector<32x128xf32>
    %1078 = arith.mulf %3, %1077 : vector<32x128xf32>
    %c26_95 = arith.constant 26 : index
    %1079 = memref.load %arg3[%c26_95] : memref<32xf32, #tpu.memory_space<smem>>
    %1080 = vector.broadcast %1079 : f32 to vector<32x128xf32>
    %1081 = arith.addf %1078, %1080 : vector<32x128xf32>
    %cst_96 = arith.constant 0.000000e+00 : f32
    %1082 = vector.broadcast %cst_96 : f32 to vector<32x128xf32>
    %1083 = arith.maximumf %1081, %1082 : vector<32x128xf32>
    %c208 = arith.constant 208 : index
    %1084 = memref.load %arg4[%c208] : memref<256xf32, #tpu.memory_space<smem>>
    %1085 = vector.broadcast %1084 : f32 to vector<32x128xf32>
    %1086 = arith.mulf %1083, %1085 : vector<32x128xf32>
    %1087 = arith.addf %1047, %1086 : vector<32x128xf32>
    %c209 = arith.constant 209 : index
    %1088 = memref.load %arg4[%c209] : memref<256xf32, #tpu.memory_space<smem>>
    %1089 = vector.broadcast %1088 : f32 to vector<32x128xf32>
    %1090 = arith.mulf %1083, %1089 : vector<32x128xf32>
    %1091 = arith.addf %1051, %1090 : vector<32x128xf32>
    %c210 = arith.constant 210 : index
    %1092 = memref.load %arg4[%c210] : memref<256xf32, #tpu.memory_space<smem>>
    %1093 = vector.broadcast %1092 : f32 to vector<32x128xf32>
    %1094 = arith.mulf %1083, %1093 : vector<32x128xf32>
    %1095 = arith.addf %1055, %1094 : vector<32x128xf32>
    %c211 = arith.constant 211 : index
    %1096 = memref.load %arg4[%c211] : memref<256xf32, #tpu.memory_space<smem>>
    %1097 = vector.broadcast %1096 : f32 to vector<32x128xf32>
    %1098 = arith.mulf %1083, %1097 : vector<32x128xf32>
    %1099 = arith.addf %1059, %1098 : vector<32x128xf32>
    %c212 = arith.constant 212 : index
    %1100 = memref.load %arg4[%c212] : memref<256xf32, #tpu.memory_space<smem>>
    %1101 = vector.broadcast %1100 : f32 to vector<32x128xf32>
    %1102 = arith.mulf %1083, %1101 : vector<32x128xf32>
    %1103 = arith.addf %1063, %1102 : vector<32x128xf32>
    %c213 = arith.constant 213 : index
    %1104 = memref.load %arg4[%c213] : memref<256xf32, #tpu.memory_space<smem>>
    %1105 = vector.broadcast %1104 : f32 to vector<32x128xf32>
    %1106 = arith.mulf %1083, %1105 : vector<32x128xf32>
    %1107 = arith.addf %1067, %1106 : vector<32x128xf32>
    %c214 = arith.constant 214 : index
    %1108 = memref.load %arg4[%c214] : memref<256xf32, #tpu.memory_space<smem>>
    %1109 = vector.broadcast %1108 : f32 to vector<32x128xf32>
    %1110 = arith.mulf %1083, %1109 : vector<32x128xf32>
    %1111 = arith.addf %1071, %1110 : vector<32x128xf32>
    %c215 = arith.constant 215 : index
    %1112 = memref.load %arg4[%c215] : memref<256xf32, #tpu.memory_space<smem>>
    %1113 = vector.broadcast %1112 : f32 to vector<32x128xf32>
    %1114 = arith.mulf %1083, %1113 : vector<32x128xf32>
    %1115 = arith.addf %1075, %1114 : vector<32x128xf32>
    %c27_97 = arith.constant 27 : index
    %1116 = memref.load %arg2[%c27_97] : memref<32xf32, #tpu.memory_space<smem>>
    %1117 = vector.broadcast %1116 : f32 to vector<32x128xf32>
    %1118 = arith.mulf %3, %1117 : vector<32x128xf32>
    %c27_98 = arith.constant 27 : index
    %1119 = memref.load %arg3[%c27_98] : memref<32xf32, #tpu.memory_space<smem>>
    %1120 = vector.broadcast %1119 : f32 to vector<32x128xf32>
    %1121 = arith.addf %1118, %1120 : vector<32x128xf32>
    %cst_99 = arith.constant 0.000000e+00 : f32
    %1122 = vector.broadcast %cst_99 : f32 to vector<32x128xf32>
    %1123 = arith.maximumf %1121, %1122 : vector<32x128xf32>
    %c216 = arith.constant 216 : index
    %1124 = memref.load %arg4[%c216] : memref<256xf32, #tpu.memory_space<smem>>
    %1125 = vector.broadcast %1124 : f32 to vector<32x128xf32>
    %1126 = arith.mulf %1123, %1125 : vector<32x128xf32>
    %1127 = arith.addf %1087, %1126 : vector<32x128xf32>
    %c217 = arith.constant 217 : index
    %1128 = memref.load %arg4[%c217] : memref<256xf32, #tpu.memory_space<smem>>
    %1129 = vector.broadcast %1128 : f32 to vector<32x128xf32>
    %1130 = arith.mulf %1123, %1129 : vector<32x128xf32>
    %1131 = arith.addf %1091, %1130 : vector<32x128xf32>
    %c218 = arith.constant 218 : index
    %1132 = memref.load %arg4[%c218] : memref<256xf32, #tpu.memory_space<smem>>
    %1133 = vector.broadcast %1132 : f32 to vector<32x128xf32>
    %1134 = arith.mulf %1123, %1133 : vector<32x128xf32>
    %1135 = arith.addf %1095, %1134 : vector<32x128xf32>
    %c219 = arith.constant 219 : index
    %1136 = memref.load %arg4[%c219] : memref<256xf32, #tpu.memory_space<smem>>
    %1137 = vector.broadcast %1136 : f32 to vector<32x128xf32>
    %1138 = arith.mulf %1123, %1137 : vector<32x128xf32>
    %1139 = arith.addf %1099, %1138 : vector<32x128xf32>
    %c220 = arith.constant 220 : index
    %1140 = memref.load %arg4[%c220] : memref<256xf32, #tpu.memory_space<smem>>
    %1141 = vector.broadcast %1140 : f32 to vector<32x128xf32>
    %1142 = arith.mulf %1123, %1141 : vector<32x128xf32>
    %1143 = arith.addf %1103, %1142 : vector<32x128xf32>
    %c221 = arith.constant 221 : index
    %1144 = memref.load %arg4[%c221] : memref<256xf32, #tpu.memory_space<smem>>
    %1145 = vector.broadcast %1144 : f32 to vector<32x128xf32>
    %1146 = arith.mulf %1123, %1145 : vector<32x128xf32>
    %1147 = arith.addf %1107, %1146 : vector<32x128xf32>
    %c222 = arith.constant 222 : index
    %1148 = memref.load %arg4[%c222] : memref<256xf32, #tpu.memory_space<smem>>
    %1149 = vector.broadcast %1148 : f32 to vector<32x128xf32>
    %1150 = arith.mulf %1123, %1149 : vector<32x128xf32>
    %1151 = arith.addf %1111, %1150 : vector<32x128xf32>
    %c223 = arith.constant 223 : index
    %1152 = memref.load %arg4[%c223] : memref<256xf32, #tpu.memory_space<smem>>
    %1153 = vector.broadcast %1152 : f32 to vector<32x128xf32>
    %1154 = arith.mulf %1123, %1153 : vector<32x128xf32>
    %1155 = arith.addf %1115, %1154 : vector<32x128xf32>
    %c28_100 = arith.constant 28 : index
    %1156 = memref.load %arg2[%c28_100] : memref<32xf32, #tpu.memory_space<smem>>
    %1157 = vector.broadcast %1156 : f32 to vector<32x128xf32>
    %1158 = arith.mulf %3, %1157 : vector<32x128xf32>
    %c28_101 = arith.constant 28 : index
    %1159 = memref.load %arg3[%c28_101] : memref<32xf32, #tpu.memory_space<smem>>
    %1160 = vector.broadcast %1159 : f32 to vector<32x128xf32>
    %1161 = arith.addf %1158, %1160 : vector<32x128xf32>
    %cst_102 = arith.constant 0.000000e+00 : f32
    %1162 = vector.broadcast %cst_102 : f32 to vector<32x128xf32>
    %1163 = arith.maximumf %1161, %1162 : vector<32x128xf32>
    %c224 = arith.constant 224 : index
    %1164 = memref.load %arg4[%c224] : memref<256xf32, #tpu.memory_space<smem>>
    %1165 = vector.broadcast %1164 : f32 to vector<32x128xf32>
    %1166 = arith.mulf %1163, %1165 : vector<32x128xf32>
    %1167 = arith.addf %1127, %1166 : vector<32x128xf32>
    %c225 = arith.constant 225 : index
    %1168 = memref.load %arg4[%c225] : memref<256xf32, #tpu.memory_space<smem>>
    %1169 = vector.broadcast %1168 : f32 to vector<32x128xf32>
    %1170 = arith.mulf %1163, %1169 : vector<32x128xf32>
    %1171 = arith.addf %1131, %1170 : vector<32x128xf32>
    %c226 = arith.constant 226 : index
    %1172 = memref.load %arg4[%c226] : memref<256xf32, #tpu.memory_space<smem>>
    %1173 = vector.broadcast %1172 : f32 to vector<32x128xf32>
    %1174 = arith.mulf %1163, %1173 : vector<32x128xf32>
    %1175 = arith.addf %1135, %1174 : vector<32x128xf32>
    %c227 = arith.constant 227 : index
    %1176 = memref.load %arg4[%c227] : memref<256xf32, #tpu.memory_space<smem>>
    %1177 = vector.broadcast %1176 : f32 to vector<32x128xf32>
    %1178 = arith.mulf %1163, %1177 : vector<32x128xf32>
    %1179 = arith.addf %1139, %1178 : vector<32x128xf32>
    %c228 = arith.constant 228 : index
    %1180 = memref.load %arg4[%c228] : memref<256xf32, #tpu.memory_space<smem>>
    %1181 = vector.broadcast %1180 : f32 to vector<32x128xf32>
    %1182 = arith.mulf %1163, %1181 : vector<32x128xf32>
    %1183 = arith.addf %1143, %1182 : vector<32x128xf32>
    %c229 = arith.constant 229 : index
    %1184 = memref.load %arg4[%c229] : memref<256xf32, #tpu.memory_space<smem>>
    %1185 = vector.broadcast %1184 : f32 to vector<32x128xf32>
    %1186 = arith.mulf %1163, %1185 : vector<32x128xf32>
    %1187 = arith.addf %1147, %1186 : vector<32x128xf32>
    %c230 = arith.constant 230 : index
    %1188 = memref.load %arg4[%c230] : memref<256xf32, #tpu.memory_space<smem>>
    %1189 = vector.broadcast %1188 : f32 to vector<32x128xf32>
    %1190 = arith.mulf %1163, %1189 : vector<32x128xf32>
    %1191 = arith.addf %1151, %1190 : vector<32x128xf32>
    %c231 = arith.constant 231 : index
    %1192 = memref.load %arg4[%c231] : memref<256xf32, #tpu.memory_space<smem>>
    %1193 = vector.broadcast %1192 : f32 to vector<32x128xf32>
    %1194 = arith.mulf %1163, %1193 : vector<32x128xf32>
    %1195 = arith.addf %1155, %1194 : vector<32x128xf32>
    %c29_103 = arith.constant 29 : index
    %1196 = memref.load %arg2[%c29_103] : memref<32xf32, #tpu.memory_space<smem>>
    %1197 = vector.broadcast %1196 : f32 to vector<32x128xf32>
    %1198 = arith.mulf %3, %1197 : vector<32x128xf32>
    %c29_104 = arith.constant 29 : index
    %1199 = memref.load %arg3[%c29_104] : memref<32xf32, #tpu.memory_space<smem>>
    %1200 = vector.broadcast %1199 : f32 to vector<32x128xf32>
    %1201 = arith.addf %1198, %1200 : vector<32x128xf32>
    %cst_105 = arith.constant 0.000000e+00 : f32
    %1202 = vector.broadcast %cst_105 : f32 to vector<32x128xf32>
    %1203 = arith.maximumf %1201, %1202 : vector<32x128xf32>
    %c232 = arith.constant 232 : index
    %1204 = memref.load %arg4[%c232] : memref<256xf32, #tpu.memory_space<smem>>
    %1205 = vector.broadcast %1204 : f32 to vector<32x128xf32>
    %1206 = arith.mulf %1203, %1205 : vector<32x128xf32>
    %1207 = arith.addf %1167, %1206 : vector<32x128xf32>
    %c233 = arith.constant 233 : index
    %1208 = memref.load %arg4[%c233] : memref<256xf32, #tpu.memory_space<smem>>
    %1209 = vector.broadcast %1208 : f32 to vector<32x128xf32>
    %1210 = arith.mulf %1203, %1209 : vector<32x128xf32>
    %1211 = arith.addf %1171, %1210 : vector<32x128xf32>
    %c234 = arith.constant 234 : index
    %1212 = memref.load %arg4[%c234] : memref<256xf32, #tpu.memory_space<smem>>
    %1213 = vector.broadcast %1212 : f32 to vector<32x128xf32>
    %1214 = arith.mulf %1203, %1213 : vector<32x128xf32>
    %1215 = arith.addf %1175, %1214 : vector<32x128xf32>
    %c235 = arith.constant 235 : index
    %1216 = memref.load %arg4[%c235] : memref<256xf32, #tpu.memory_space<smem>>
    %1217 = vector.broadcast %1216 : f32 to vector<32x128xf32>
    %1218 = arith.mulf %1203, %1217 : vector<32x128xf32>
    %1219 = arith.addf %1179, %1218 : vector<32x128xf32>
    %c236 = arith.constant 236 : index
    %1220 = memref.load %arg4[%c236] : memref<256xf32, #tpu.memory_space<smem>>
    %1221 = vector.broadcast %1220 : f32 to vector<32x128xf32>
    %1222 = arith.mulf %1203, %1221 : vector<32x128xf32>
    %1223 = arith.addf %1183, %1222 : vector<32x128xf32>
    %c237 = arith.constant 237 : index
    %1224 = memref.load %arg4[%c237] : memref<256xf32, #tpu.memory_space<smem>>
    %1225 = vector.broadcast %1224 : f32 to vector<32x128xf32>
    %1226 = arith.mulf %1203, %1225 : vector<32x128xf32>
    %1227 = arith.addf %1187, %1226 : vector<32x128xf32>
    %c238 = arith.constant 238 : index
    %1228 = memref.load %arg4[%c238] : memref<256xf32, #tpu.memory_space<smem>>
    %1229 = vector.broadcast %1228 : f32 to vector<32x128xf32>
    %1230 = arith.mulf %1203, %1229 : vector<32x128xf32>
    %1231 = arith.addf %1191, %1230 : vector<32x128xf32>
    %c239 = arith.constant 239 : index
    %1232 = memref.load %arg4[%c239] : memref<256xf32, #tpu.memory_space<smem>>
    %1233 = vector.broadcast %1232 : f32 to vector<32x128xf32>
    %1234 = arith.mulf %1203, %1233 : vector<32x128xf32>
    %1235 = arith.addf %1195, %1234 : vector<32x128xf32>
    %c30_106 = arith.constant 30 : index
    %1236 = memref.load %arg2[%c30_106] : memref<32xf32, #tpu.memory_space<smem>>
    %1237 = vector.broadcast %1236 : f32 to vector<32x128xf32>
    %1238 = arith.mulf %3, %1237 : vector<32x128xf32>
    %c30_107 = arith.constant 30 : index
    %1239 = memref.load %arg3[%c30_107] : memref<32xf32, #tpu.memory_space<smem>>
    %1240 = vector.broadcast %1239 : f32 to vector<32x128xf32>
    %1241 = arith.addf %1238, %1240 : vector<32x128xf32>
    %cst_108 = arith.constant 0.000000e+00 : f32
    %1242 = vector.broadcast %cst_108 : f32 to vector<32x128xf32>
    %1243 = arith.maximumf %1241, %1242 : vector<32x128xf32>
    %c240 = arith.constant 240 : index
    %1244 = memref.load %arg4[%c240] : memref<256xf32, #tpu.memory_space<smem>>
    %1245 = vector.broadcast %1244 : f32 to vector<32x128xf32>
    %1246 = arith.mulf %1243, %1245 : vector<32x128xf32>
    %1247 = arith.addf %1207, %1246 : vector<32x128xf32>
    %c241 = arith.constant 241 : index
    %1248 = memref.load %arg4[%c241] : memref<256xf32, #tpu.memory_space<smem>>
    %1249 = vector.broadcast %1248 : f32 to vector<32x128xf32>
    %1250 = arith.mulf %1243, %1249 : vector<32x128xf32>
    %1251 = arith.addf %1211, %1250 : vector<32x128xf32>
    %c242 = arith.constant 242 : index
    %1252 = memref.load %arg4[%c242] : memref<256xf32, #tpu.memory_space<smem>>
    %1253 = vector.broadcast %1252 : f32 to vector<32x128xf32>
    %1254 = arith.mulf %1243, %1253 : vector<32x128xf32>
    %1255 = arith.addf %1215, %1254 : vector<32x128xf32>
    %c243 = arith.constant 243 : index
    %1256 = memref.load %arg4[%c243] : memref<256xf32, #tpu.memory_space<smem>>
    %1257 = vector.broadcast %1256 : f32 to vector<32x128xf32>
    %1258 = arith.mulf %1243, %1257 : vector<32x128xf32>
    %1259 = arith.addf %1219, %1258 : vector<32x128xf32>
    %c244 = arith.constant 244 : index
    %1260 = memref.load %arg4[%c244] : memref<256xf32, #tpu.memory_space<smem>>
    %1261 = vector.broadcast %1260 : f32 to vector<32x128xf32>
    %1262 = arith.mulf %1243, %1261 : vector<32x128xf32>
    %1263 = arith.addf %1223, %1262 : vector<32x128xf32>
    %c245 = arith.constant 245 : index
    %1264 = memref.load %arg4[%c245] : memref<256xf32, #tpu.memory_space<smem>>
    %1265 = vector.broadcast %1264 : f32 to vector<32x128xf32>
    %1266 = arith.mulf %1243, %1265 : vector<32x128xf32>
    %1267 = arith.addf %1227, %1266 : vector<32x128xf32>
    %c246 = arith.constant 246 : index
    %1268 = memref.load %arg4[%c246] : memref<256xf32, #tpu.memory_space<smem>>
    %1269 = vector.broadcast %1268 : f32 to vector<32x128xf32>
    %1270 = arith.mulf %1243, %1269 : vector<32x128xf32>
    %1271 = arith.addf %1231, %1270 : vector<32x128xf32>
    %c247 = arith.constant 247 : index
    %1272 = memref.load %arg4[%c247] : memref<256xf32, #tpu.memory_space<smem>>
    %1273 = vector.broadcast %1272 : f32 to vector<32x128xf32>
    %1274 = arith.mulf %1243, %1273 : vector<32x128xf32>
    %1275 = arith.addf %1235, %1274 : vector<32x128xf32>
    %c31_109 = arith.constant 31 : index
    %1276 = memref.load %arg2[%c31_109] : memref<32xf32, #tpu.memory_space<smem>>
    %1277 = vector.broadcast %1276 : f32 to vector<32x128xf32>
    %1278 = arith.mulf %3, %1277 : vector<32x128xf32>
    %c31_110 = arith.constant 31 : index
    %1279 = memref.load %arg3[%c31_110] : memref<32xf32, #tpu.memory_space<smem>>
    %1280 = vector.broadcast %1279 : f32 to vector<32x128xf32>
    %1281 = arith.addf %1278, %1280 : vector<32x128xf32>
    %cst_111 = arith.constant 0.000000e+00 : f32
    %1282 = vector.broadcast %cst_111 : f32 to vector<32x128xf32>
    %1283 = arith.maximumf %1281, %1282 : vector<32x128xf32>
    %c248 = arith.constant 248 : index
    %1284 = memref.load %arg4[%c248] : memref<256xf32, #tpu.memory_space<smem>>
    %1285 = vector.broadcast %1284 : f32 to vector<32x128xf32>
    %1286 = arith.mulf %1283, %1285 : vector<32x128xf32>
    %1287 = arith.addf %1247, %1286 : vector<32x128xf32>
    %c249 = arith.constant 249 : index
    %1288 = memref.load %arg4[%c249] : memref<256xf32, #tpu.memory_space<smem>>
    %1289 = vector.broadcast %1288 : f32 to vector<32x128xf32>
    %1290 = arith.mulf %1283, %1289 : vector<32x128xf32>
    %1291 = arith.addf %1251, %1290 : vector<32x128xf32>
    %c250 = arith.constant 250 : index
    %1292 = memref.load %arg4[%c250] : memref<256xf32, #tpu.memory_space<smem>>
    %1293 = vector.broadcast %1292 : f32 to vector<32x128xf32>
    %1294 = arith.mulf %1283, %1293 : vector<32x128xf32>
    %1295 = arith.addf %1255, %1294 : vector<32x128xf32>
    %c251 = arith.constant 251 : index
    %1296 = memref.load %arg4[%c251] : memref<256xf32, #tpu.memory_space<smem>>
    %1297 = vector.broadcast %1296 : f32 to vector<32x128xf32>
    %1298 = arith.mulf %1283, %1297 : vector<32x128xf32>
    %1299 = arith.addf %1259, %1298 : vector<32x128xf32>
    %c252 = arith.constant 252 : index
    %1300 = memref.load %arg4[%c252] : memref<256xf32, #tpu.memory_space<smem>>
    %1301 = vector.broadcast %1300 : f32 to vector<32x128xf32>
    %1302 = arith.mulf %1283, %1301 : vector<32x128xf32>
    %1303 = arith.addf %1263, %1302 : vector<32x128xf32>
    %c253 = arith.constant 253 : index
    %1304 = memref.load %arg4[%c253] : memref<256xf32, #tpu.memory_space<smem>>
    %1305 = vector.broadcast %1304 : f32 to vector<32x128xf32>
    %1306 = arith.mulf %1283, %1305 : vector<32x128xf32>
    %1307 = arith.addf %1267, %1306 : vector<32x128xf32>
    %c254 = arith.constant 254 : index
    %1308 = memref.load %arg4[%c254] : memref<256xf32, #tpu.memory_space<smem>>
    %1309 = vector.broadcast %1308 : f32 to vector<32x128xf32>
    %1310 = arith.mulf %1283, %1309 : vector<32x128xf32>
    %1311 = arith.addf %1271, %1310 : vector<32x128xf32>
    %c255 = arith.constant 255 : index
    %1312 = memref.load %arg4[%c255] : memref<256xf32, #tpu.memory_space<smem>>
    %1313 = vector.broadcast %1312 : f32 to vector<32x128xf32>
    %1314 = arith.mulf %1283, %1313 : vector<32x128xf32>
    %1315 = arith.addf %1275, %1314 : vector<32x128xf32>
    %c0_i32_112 = arith.constant 0 : i32
    %1316 = vector.broadcast %c0_i32_112 : i32 to vector<32x128xi32>
    %1317 = arith.cmpf ogt, %1291, %1287 : vector<32x128xf32>
    %1318 = arith.select %1317, %1291, %1287 : vector<32x128xi1>, vector<32x128xf32>
    %c1_i32 = arith.constant 1 : i32
    %1319 = vector.broadcast %c1_i32 : i32 to vector<32x128xi32>
    %1320 = arith.select %1317, %1319, %1316 : vector<32x128xi1>, vector<32x128xi32>
    %1321 = arith.cmpf ogt, %1295, %1318 : vector<32x128xf32>
    %1322 = arith.select %1321, %1295, %1318 : vector<32x128xi1>, vector<32x128xf32>
    %c2_i32 = arith.constant 2 : i32
    %1323 = vector.broadcast %c2_i32 : i32 to vector<32x128xi32>
    %1324 = arith.select %1321, %1323, %1320 : vector<32x128xi1>, vector<32x128xi32>
    %1325 = arith.cmpf ogt, %1299, %1322 : vector<32x128xf32>
    %1326 = arith.select %1325, %1299, %1322 : vector<32x128xi1>, vector<32x128xf32>
    %c3_i32 = arith.constant 3 : i32
    %1327 = vector.broadcast %c3_i32 : i32 to vector<32x128xi32>
    %1328 = arith.select %1325, %1327, %1324 : vector<32x128xi1>, vector<32x128xi32>
    %1329 = arith.cmpf ogt, %1303, %1326 : vector<32x128xf32>
    %1330 = arith.select %1329, %1303, %1326 : vector<32x128xi1>, vector<32x128xf32>
    %c4_i32 = arith.constant 4 : i32
    %1331 = vector.broadcast %c4_i32 : i32 to vector<32x128xi32>
    %1332 = arith.select %1329, %1331, %1328 : vector<32x128xi1>, vector<32x128xi32>
    %1333 = arith.cmpf ogt, %1307, %1330 : vector<32x128xf32>
    %1334 = arith.select %1333, %1307, %1330 : vector<32x128xi1>, vector<32x128xf32>
    %c5_i32 = arith.constant 5 : i32
    %1335 = vector.broadcast %c5_i32 : i32 to vector<32x128xi32>
    %1336 = arith.select %1333, %1335, %1332 : vector<32x128xi1>, vector<32x128xi32>
    %1337 = arith.cmpf ogt, %1311, %1334 : vector<32x128xf32>
    %1338 = arith.select %1337, %1311, %1334 : vector<32x128xi1>, vector<32x128xf32>
    %c6_i32 = arith.constant 6 : i32
    %1339 = vector.broadcast %c6_i32 : i32 to vector<32x128xi32>
    %1340 = arith.select %1337, %1339, %1336 : vector<32x128xi1>, vector<32x128xi32>
    %1341 = arith.cmpf ogt, %1315, %1338 : vector<32x128xf32>
    %c7_i32 = arith.constant 7 : i32
    %1342 = vector.broadcast %c7_i32 : i32 to vector<32x128xi32>
    %1343 = arith.select %1341, %1342, %1340 : vector<32x128xi1>, vector<32x128xi32>
    %1344 = arith.trunci %1343 : vector<32x128xi32> to vector<32x128xi8>
    %1345 = arith.index_cast %1 : i32 to index
    %c0_113 = arith.constant 0 : index
    %1346 = vector.load %arg6[%1345, %c0_113] : memref<32x128xi8, #tpu.memory_space<vmem>>, vector<32x128xi8>
    tpu.vector_store %arg6[%1345, %c0_113], %1344 {strides = array<i32>} : memref<32x128xi8, #tpu.memory_space<vmem>>, vector<32x128xi8>,
    %c1_i32_114 = arith.constant 1 : i32
    return
  }
  func.func @transform_0(%arg0: i32) -> (i32, i32) {
    %c0_i32 = arith.constant 0 : i32
    %c0_i32_0 = arith.constant 0 : i32
    return %arg0, %c0_i32 : i32, i32
  }
  func.func @transform_1(%arg0: i32) -> i32 {
    %c0_i32 = arith.constant 0 : i32
    %c0_i32_0 = arith.constant 0 : i32
    return %c0_i32 : i32
  }
  func.func @transform_2(%arg0: i32) -> i32 {
    %c0_i32 = arith.constant 0 : i32
    %c0_i32_0 = arith.constant 0 : i32
    return %c0_i32 : i32
  }
  func.func @transform_3(%arg0: i32) -> i32 {
    %c0_i32 = arith.constant 0 : i32
    %c0_i32_0 = arith.constant 0 : i32
    return %c0_i32 : i32
  }
  func.func @transform_4(%arg0: i32) -> i32 {
    %c0_i32 = arith.constant 0 : i32
    %c0_i32_0 = arith.constant 0 : i32
    return %c0_i32 : i32
  }
  func.func @transform_5(%arg0: i32) -> (i32, i32) {
    %c0_i32 = arith.constant 0 : i32
    %c0_i32_0 = arith.constant 0 : i32
    return %arg0, %c0_i32 : i32, i32
  }
}

</mosaic_0001>

<bundles_post_ra>
// kernel: script_inference_forward.1
= control target key start
LH: loop header
LB: loop body
LE: loop exit
PB: predicated region body
PF: predicated region fallthrough
CT: control target
= control target key end

     0   :  { %10 = vsyncpa [#allocation3], 0  ;;  %s9836_s0 = inlined_call_operand.vmem [shape: f32[32,128], index: 0, kind: input, shape index: {}]   ;;  %s9837_s1 = inlined_call_operand.vmem [shape: f32[32], index: 1, kind: input, shape index: {}]   ;;  %s9838_s2 = inlined_call_operand.vmem [shape: f32[32], index: 2, kind: input, shape index: {}]   ;;  %s9839_s3 = inlined_call_operand.vmem [shape: f32[256], index: 3, kind: input, shape index: {}]   ;;  %s9840_s4 = inlined_call_operand.vmem [shape: f32[8], index: 4, kind: input, shape index: {}]   ;;  %s9841_s5 = inlined_call_operand.vmem [shape: s8[32,128], index: 5, kind: output, shape index: {}]  }
   0x1   :  { %11 = vsyncpa [#allocation5], 0  ;;  %s31_s20 = sshll.u32 %s9838_s2, 4  ;;  %s32_s20 = int_to_ptr.vmem [resolvable:$true] %s31_s20 }
   0x2   :  { %12 = vsyncpa [#allocation8], 0  ;;  %s21_s23 = sshll.u32 %s9837_s1, 4  ;;  %s3616_s24 = scalar_lea.vmem %s32_s20, 16  ;;  %s22_s23 = int_to_ptr.vmem [resolvable:$true] %s21_s23 }
   0x3   :  { %p3617_p0 = scmp.ne.s32.totalorder %s32_s20, %s3616_s24  ;;  %p3621_p1 = scmp.lt.s32.totalorder %s32_s20, %s32_s20 }
   0x4   :  { %p3622_p2 = scmp.lt.s32.totalorder %s3616_s24, %s3616_s24 }
   0x6   :  { %p3623_p3 = por %p3622_p2, %p3621_p1 }
   0x8   :  { %p3624_p4 = pnand %p3623_p3, %p3617_p0 }
   0xa   :  { %3627 = shalt.err (!%p3624_p4)
}
   0xb   :  { %s3670_s25 = smov [#allocation4]   ;;  %s3628_s26 = scalar_lea.vmem %s22_s23, 16 }
   0xc   :  { %34 = dma.vmem_to_smem %s32_s20, 16, %s3670_s25, [#allocation5]  }
   0xd   :  { %p3629_p5 = scmp.ne.s32.totalorder %s22_s23, %s3628_s26  ;;  %p3633_p6 = scmp.lt.s32.totalorder %s22_s23, %s22_s23 }
   0xe   :  { %p3634_p7 = scmp.lt.s32.totalorder %s3628_s26, %s3628_s26 }
  0x10   :  { %p3635_p8 = por %p3634_p7, %p3633_p6 }
  0x12   :  { %p3636_p9 = pnand %p3635_p8, %p3629_p5 }
  0x14   :  { %3639 = shalt.err (!%p3636_p9)
}
  0x15   :  { %s3671_s2 = smov [#allocation2]   ;;  %s41_s28 = sshll.u32 %s9839_s3, 4  ;;  %s42_s28 = int_to_ptr.vmem [resolvable:$true] %s41_s28 }
  0x16   :  { %24 = dma.vmem_to_smem %s22_s23, 16, %s3671_s2, [#allocation3]  }
  0x17   :  { %s51_s6 = sshll.u32 %s9840_s4, 4  ;;  %s3640_s7 = scalar_lea.vmem %s42_s28, 32  ;;  %s52_s6 = int_to_ptr.vmem [resolvable:$true] %s51_s6 }
  0x18   :  { %p3641_p10 = scmp.ne.s32.totalorder %s42_s28, %s3640_s7  ;;  %p3645_p11 = scmp.lt.s32.totalorder %s42_s28, %s42_s28 }
  0x19   :  { %p3646_p12 = scmp.lt.s32.totalorder %s3640_s7, %s3640_s7 }
  0x1b   :  { %p3647_p13 = por %p3646_p12, %p3645_p11 }
  0x1d   :  { %p3648_p0 = pnand %p3647_p13, %p3641_p10 }
  0x1f   :  { %3651 = shalt.err (!%p3648_p0)
}
  0x20   :  { %s3672_s8 = smov [#allocation6]   ;;  %s3652_s9 = scalar_lea.vmem %s52_s6, 16 }
  0x21   :  { %44 = dma.vmem_to_smem %s42_s28, 32, %s3672_s8, [#allocation5]  }
  0x22   :  { %p3653_p1 = scmp.ne.s32.totalorder %s52_s6, %s3652_s9  ;;  %p3657_p2 = scmp.lt.s32.totalorder %s52_s6, %s52_s6 }
  0x23   :  { %p3658_p3 = scmp.lt.s32.totalorder %s3652_s9, %s3652_s9 }
  0x25   :  { %p3659_p4 = por %p3658_p3, %p3657_p2 }
  0x27   :  { %p3660_p5 = pnand %p3659_p4, %p3653_p1 }
  0x29   :  { %3663 = shalt.err (!%p3660_p5)
}
  0x2a   :  { %s3673_s3 = smov [#allocation7]  }
  0x2b   :  { %54 = dma.vmem_to_smem %s52_s6, 16, %s3673_s3, [#allocation8]  }
  0x2c   :  { %3664 = dma.done.wait [#allocation3], 16  }
  0x2d   :  { %3665 = vsyncadd [#allocation3], 4294967280 }
  0x2e   :  { %3666 = dma.done.wait [#allocation5], 48  }
  0x2f   :  { %3667 = vsyncadd [#allocation5], 4294967248 }
  0x30   :  { %3668 = dma.done.wait [#allocation8], 16  }
  0x31   :  { %3669 = vsyncadd [#allocation8], 4294967280 }
  0x32   :  { %67 = sfence }
  0x33   :  { %s72_s4 = sld [smem:[#allocation7]]  ;;  %s3267_s10 = sld [smem:[#allocation7 + $0x1]]  ;;  %v3728_v0 = vld [vmem:[%s9836_s0] sm:$0xff]  ;;  %v3733_v1 = vld [vmem:[%s9836_s0 + $0x8] sm:$0xff]  ;;  %v3742_v2 = vld [vmem:[%s9836_s0 + $0x10] sm:$0xff] }
  0x34   :  { %s3268_s11 = sld [smem:[#allocation7 + $0x2]]  ;;  %s3269_s12 = sld [smem:[#allocation7 + $0x3]]  ;;  %9874 = vst [vmem:[#allocation12_spill] sm:$0xff] %v3733_v1  ;;  %9875 = vst [vmem:[#allocation13_spill] sm:$0xff] %v3742_v2  ;;  %v3747_v3 = vld [vmem:[%s9836_s0 + $0x18] sm:$0xff] }
  0x35   :  { %s3270_s13 = sld [smem:[#allocation7 + $0x4]]  ;;  %s3271_s14 = sld [smem:[#allocation7 + $0x5]] }
  0x36   :  { %s3272_s15 = sld [smem:[#allocation7 + $0x6]]  ;;  %s3717_s16 = sld [smem:[#allocation7 + $0x7]] }
  0x37   :  { %s96_s17 = sld [smem:[#allocation2]]  ;;  %s3721_s20 = sld [smem:[#allocation6 + $0x1]] }
  0x38   :  { %s102_s18 = sld [smem:[#allocation4]]  ;;  %s3723_s21 = sld [smem:[#allocation6 + $0x2]] }
  0x39   :  { %s3719_s19 = sld [smem:[#allocation6]]  ;;  %s3735_s26 = sld [smem:[#allocation6 + $0x3]]  ;;  %v73_v4 = vstv %s72_s4  ;;  %v76_v5 = vstv %s3267_s10 }
  0x3a   :  { %s3737_s2 = sld [smem:[#allocation6 + $0x4]]  ;;  %s3749_s30 = sld [smem:[#allocation6 + $0x5]]  ;;  %v79_v6 = vstv %s3268_s11  ;;  %v3757_v7 = vstv %s3269_s12 }
  0x3b   :  { %s3751_s6 = sld [smem:[#allocation6 + $0x6]]  ;;  %s3753_s7 = sld [smem:[#allocation6 + $0x7]]  ;;  %v3767_v13 = vstv %s3270_s13  ;;  %v3769_v14 = vstv %s3271_s14 }
  0x3c   :  { %s3755_s8 = sld [smem:[#allocation2 + $0x1]]  ;;  %s3761_s3 = sld [smem:[#allocation6 + $0x8]]  ;;  %v3771_v15 = vstv %s3272_s15  ;;  %v3774_v21 = vstv %s3717_s16 }
  0x3d   :  { %v97_v8 = vstv %s96_s17  ;;  %s3759_s9 = sld [smem:[#allocation4 + $0x1]]  ;;  %v123_v23 = vstv %s3721_s20  ;;  %s3863_s10 = sld [smem:[#allocation6 + $0xa]] }
  0x3e   :  { %v98_v9 = vmul.f32 %v97_v8, %v3728_v0  ;;  %v99_v10 = vmul.f32 %v97_v8, %v3733_v1  ;;  %v100_v11 = vmul.f32 %v97_v8, %v3742_v2  ;;  %v101_v12 = vmul.f32 %v97_v8, %v3747_v3  ;;  %s3861_s4 = sld [smem:[#allocation6 + $0x9]]  ;;  %s3877_s11 = sld [smem:[#allocation6 + $0xb]] }
  0x3f   :  { %v103_v16 = vstv %s102_s18  ;;  %v113_v22 = vstv %s3719_s19  ;;  %v133_v24 = vstv %s3723_s21  ;;  %v143_v29 = vstv %s3735_s26  ;;  %s3879_s12 = sld [smem:[#allocation2 + $0x2]]  ;;  %s3885_s13 = sld [smem:[#allocation6 + $0xc]] }
  0x40   :  { %v104_v17 = vadd.f32 %v103_v16, %v98_v9  ;;  %v105_v18 = vadd.f32 %v103_v16, %v99_v10  ;;  %v106_v19 = vadd.f32 %v103_v16, %v100_v11  ;;  %v107_v20 = vadd.f32 %v103_v16, %v101_v12  ;;  %s3887_s14 = sld [smem:[#allocation6 + $0xd]]  ;;  %s3893_s15 = sld [smem:[#allocation6 + $0xe]] }
  0x41   :  { %v153_v30 = vstv %s3737_s2  ;;  %v163_v31 = vstv %s3749_s30  ;;  %v173_v32 = vstv %s3751_s6  ;;  %v183_v37 = vstv %s3753_s7  ;;  %s3895_s16 = sld [smem:[#allocation6 + $0xf]]  ;;  %s4035_s17 = sld [smem:[#allocation4 + $0x2]] }
  0x42   :  { %v3779_v25 = vmax.f32 %v104_v17, 0.0  ;;  %v3781_v26 = vmax.f32 %v105_v18, 0.0  ;;  %v3783_v27 = vmax.f32 %v106_v19, 0.0  ;;  %v3785_v28 = vmax.f32 %v107_v20, 0.0  ;;  %s4047_s18 = sld [smem:[#allocation6 + $0x10]]  ;;  %s4055_s19 = sld [smem:[#allocation6 + $0x11]] }
  0x43   :  { %v3797_v38 = vstv %s3755_s8  ;;  %v3800_v39 = vstv %s3759_s9  ;;  %v3803_v40 = vstv %s3761_s3  ;;  %s4057_s20 = sld [smem:[#allocation6 + $0x12]]  ;;  %s4071_s21 = sld [smem:[#allocation6 + $0x13]] }
  0x44   :  { %v114_v33 = vmul.f32 %v113_v22, %v3779_v25  ;;  %v115_v34 = vmul.f32 %v113_v22, %v3781_v26  ;;  %v116_v35 = vmul.f32 %v113_v22, %v3783_v27  ;;  %v117_v36 = vmul.f32 %v113_v22, %v3785_v28  ;;  %s4073_s22 = sld [smem:[#allocation6 + $0x14]]  ;;  %s4079_s23 = sld [smem:[#allocation6 + $0x15]] }
  0x45   :  { %v124_v41 = vmul.f32 %v123_v23, %v3779_v25  ;;  %v125_v42 = vmul.f32 %v123_v23, %v3781_v26  ;;  %v126_v43 = vmul.f32 %v123_v23, %v3783_v27  ;;  %v127_v44 = vmul.f32 %v123_v23, %v3785_v28  ;;  %s4081_s24 = sld [smem:[#allocation6 + $0x16]]  ;;  %s4092_s25 = sld [smem:[#allocation6 + $0x17]] }
  0x46   :  { %v3809_v45 = vadd.f32 %v114_v33, %v73_v4  ;;  %v3811_v46 = vadd.f32 %v115_v34, %v73_v4  ;;  %v3813_v47 = vadd.f32 %v116_v35, %v73_v4  ;;  %v3815_v48 = vadd.f32 %v117_v36, %v73_v4  ;;  %s4094_s26 = sld [smem:[#allocation2 + $0x3]]  ;;  %s4109_s1 = sld [smem:[#allocation6 + $0x18]] }
  0x47   :  { %v134_v49 = vmul.f32 %v133_v24, %v3779_v25  ;;  %v135_v50 = vmul.f32 %v133_v24, %v3781_v26  ;;  %v136_v51 = vmul.f32 %v133_v24, %v3783_v27  ;;  %v137_v52 = vmul.f32 %v133_v24, %v3785_v28  ;;  %s4107_s2 = sld [smem:[#allocation4 + $0x3]]  ;;  %s4237_s27 = sld [smem:[#allocation6 + $0x19]] }
  0x48   :  { %v144_v53 = vmul.f32 %v143_v29, %v3779_v25  ;;  %v145_v54 = vmul.f32 %v143_v29, %v3781_v26  ;;  %v146_v55 = vmul.f32 %v143_v29, %v3783_v27  ;;  %v147_v56 = vmul.f32 %v143_v29, %v3785_v28  ;;  %s4239_s28 = sld [smem:[#allocation6 + $0x1a]]  ;;  %s4253_s29 = sld [smem:[#allocation6 + $0x1b]] }
  0x49   :  { %v3825_v57 = vadd.f32 %v124_v41, %v76_v5  ;;  %v3827_v58 = vadd.f32 %v125_v42, %v76_v5  ;;  %v3829_v59 = vadd.f32 %v126_v43, %v76_v5  ;;  %v3831_v60 = vadd.f32 %v127_v44, %v76_v5  ;;  %s4255_s30 = sld [smem:[#allocation2 + $0x4]]  ;;  %s4263_s7 = sld [smem:[#allocation6 + $0x1d]] }
  0x4a   :  { %v3833_v61 = vadd.f32 %v134_v49, %v79_v6  ;;  %v3835_v62 = vadd.f32 %v135_v50, %v79_v6  ;;  %v3837_v63 = vadd.f32 %v136_v51, %v79_v6  ;;  %v3839_v4 = vadd.f32 %v137_v52, %v79_v6  ;;  %s4261_s6 = sld [smem:[#allocation6 + $0x1c]]  ;;  %s4269_s8 = sld [smem:[#allocation6 + $0x1e]] }
  0x4b   :  { %v154_v8 = vmul.f32 %v153_v30, %v3779_v25  ;;  %v155_v9 = vmul.f32 %v153_v30, %v3781_v26  ;;  %v156_v10 = vmul.f32 %v153_v30, %v3783_v27  ;;  %v157_v11 = vmul.f32 %v153_v30, %v3785_v28  ;;  %s4271_s9 = sld [smem:[#allocation6 + $0x1f]]  ;;  %s4411_s3 = sld [smem:[#allocation4 + $0x4]] }
  0x4c   :  { %v3846_v12 = vadd.f32 %v144_v53, %v3757_v7  ;;  %v3849_v5 = vadd.f32 %v145_v54, %v3757_v7  ;;  %v3852_v16 = vadd.f32 %v146_v55, %v3757_v7  ;;  %v3855_v6 = vadd.f32 %v147_v56, %v3757_v7 }
  0x4d   :  { %v164_v17 = vmul.f32 %v163_v31, %v3779_v25  ;;  %v165_v18 = vmul.f32 %v163_v31, %v3781_v26  ;;  %v166_v19 = vmul.f32 %v163_v31, %v3783_v27  ;;  %v167_v20 = vmul.f32 %v163_v31, %v3785_v28 }
  0x4e   :  { %v3866_v22 = vadd.f32 %v154_v8, %v3767_v13  ;;  %v3869_v23 = vadd.f32 %v155_v9, %v3767_v13  ;;  %v3872_v7 = vadd.f32 %v156_v10, %v3767_v13  ;;  %v3875_v24 = vadd.f32 %v157_v11, %v3767_v13 }
  0x4f   :  { %v174_v29 = vmul.f32 %v173_v32, %v3779_v25  ;;  %v175_v30 = vmul.f32 %v173_v32, %v3781_v26  ;;  %v176_v31 = vmul.f32 %v173_v32, %v3783_v27  ;;  %v177_v33 = vmul.f32 %v173_v32, %v3785_v28 }
  0x50   :  { %v184_v34 = vmul.f32 %v183_v37, %v3779_v25  ;;  %v185_v13 = vmul.f32 %v183_v37, %v3781_v26  ;;  %v186_v35 = vmul.f32 %v183_v37, %v3783_v27  ;;  %v187_v36 = vmul.f32 %v183_v37, %v3785_v28 }
  0x51   :  { %v3898_v41 = vadd.f32 %v164_v17, %v3769_v14  ;;  %v3901_v32 = vadd.f32 %v165_v18, %v3769_v14  ;;  %v3904_v42 = vadd.f32 %v166_v19, %v3769_v14  ;;  %v3907_v25 = vadd.f32 %v167_v20, %v3769_v14 }
  0x52   :  { %v3910_v26 = vadd.f32 %v174_v29, %v3771_v15  ;;  %v3913_v27 = vadd.f32 %v175_v30, %v3771_v15  ;;  %v3916_v28 = vadd.f32 %v176_v31, %v3771_v15  ;;  %v3919_v37 = vadd.f32 %v177_v33, %v3771_v15 }
  0x53   :  { %v194_v14 = vmul.f32 %v3797_v38, %v3728_v0  ;;  %v195_v43 = vmul.f32 %v3797_v38, %v3733_v1  ;;  %v196_v44 = vmul.f32 %v3797_v38, %v3742_v2  ;;  %v197_v49 = vmul.f32 %v3797_v38, %v3747_v3 }
  0x54   :  { %v3930_v50 = vadd.f32 %v184_v34, %v3774_v21  ;;  %v3933_v15 = vadd.f32 %v185_v13, %v3774_v21  ;;  %v3936_v51 = vadd.f32 %v186_v35, %v3774_v21  ;;  %v3939_v52 = vadd.f32 %v187_v36, %v3774_v21 }
  0x55   :  { %v200_v53 = vadd.f32 %v3800_v39, %v194_v14  ;;  %v201_v38 = vadd.f32 %v3800_v39, %v195_v43  ;;  %v202_v54 = vadd.f32 %v3800_v39, %v196_v44  ;;  %v203_v55 = vadd.f32 %v3800_v39, %v197_v49 }
  0x56   :  { %v219_v56 = vstv %s3861_s4  ;;  %v229_v8 = vstv %s3863_s10  ;;  %v239_v9 = vstv %s3877_s11  ;;  %v289_v10 = vstv %s3879_s12  ;;  %s4423_s4 = sld [smem:[#allocation6 + $0x20]]  ;;  %s4431_s10 = sld [smem:[#allocation6 + $0x21]] }
  0x57   :  { %v3949_v11 = vmax.f32 %v200_v53, 0.0  ;;  %v3951_v17 = vmax.f32 %v201_v38, 0.0  ;;  %v3953_v18 = vmax.f32 %v202_v54, 0.0  ;;  %v3955_v21 = vmax.f32 %v203_v55, 0.0  ;;  %s4433_s11 = sld [smem:[#allocation6 + $0x22]]  ;;  %s4447_s12 = sld [smem:[#allocation6 + $0x23]] }
  0x58   :  { %v249_v19 = vstv %s3885_s13  ;;  %v259_v20 = vstv %s3887_s14  ;;  %v269_v29 = vstv %s3893_s15  ;;  %v3961_v30 = vstv %s3895_s16  ;;  %s4449_s13 = sld [smem:[#allocation6 + $0x24]]  ;;  %s4455_s14 = sld [smem:[#allocation6 + $0x25]] }
  0x59   :  { %v210_v39 = vmul.f32 %v3803_v40, %v3949_v11  ;;  %v211_v31 = vmul.f32 %v3803_v40, %v3951_v17  ;;  %v212_v33 = vmul.f32 %v3803_v40, %v3953_v18  ;;  %v213_v34 = vmul.f32 %v3803_v40, %v3955_v21  ;;  %s4457_s15 = sld [smem:[#allocation6 + $0x26]]  ;;  %s4468_s16 = sld [smem:[#allocation6 + $0x27]] }
  0x5a   :  { %v220_v13 = vmul.f32 %v219_v56, %v3949_v11  ;;  %v3973_v35 = vmul.f32 %v289_v10, %v3728_v0  ;;  %v3976_v36 = vmul.f32 %v289_v10, %v3733_v1  ;;  %v3979_v14 = vmul.f32 %v289_v10, %v3742_v2 }
  0x5b   :  { %v221_v43 = vmul.f32 %v219_v56, %v3951_v17  ;;  %v222_v44 = vmul.f32 %v219_v56, %v3953_v18  ;;  %v223_v49 = vmul.f32 %v219_v56, %v3955_v21  ;;  %v3985_v53 = vmul.f32 %v289_v10, %v3747_v3 }
  0x5c   :  { %v3988_v40 = vadd.f32 %v210_v39, %v3809_v45  ;;  %v3991_v38 = vadd.f32 %v211_v31, %v3811_v46  ;;  %v3994_v54 = vadd.f32 %v212_v33, %v3813_v47  ;;  %v3997_v55 = vadd.f32 %v213_v34, %v3815_v48 }
  0x5d   :  { %v230_v2 = vmul.f32 %v229_v8, %v3949_v11  ;;  %v231_v1 = vmul.f32 %v229_v8, %v3951_v17  ;;  %v232_v56 = vmul.f32 %v229_v8, %v3953_v18  ;;  %v233_v10 = vmul.f32 %v229_v8, %v3955_v21 }
  0x5e   :  { %v4004_v45 = vadd.f32 %v220_v13, %v3825_v57  ;;  %v240_v46 = vmul.f32 %v239_v9, %v3949_v11  ;;  %v241_v39 = vmul.f32 %v239_v9, %v3951_v17  ;;  %v242_v47 = vmul.f32 %v239_v9, %v3953_v18 }
  0x5f   :  { %v4010_v48 = vadd.f32 %v221_v43, %v3827_v58  ;;  %v4013_v31 = vadd.f32 %v222_v44, %v3829_v59  ;;  %v4016_v33 = vadd.f32 %v223_v49, %v3831_v60  ;;  %v243_v8 = vmul.f32 %v239_v9, %v3955_v21 }
  0x60   :  { %v4020_v57 = vadd.f32 %v230_v2, %v3833_v61  ;;  %v4023_v34 = vadd.f32 %v231_v1, %v3835_v62  ;;  %v4026_v13 = vadd.f32 %v232_v56, %v3837_v63  ;;  %v4029_v58 = vadd.f32 %v233_v10, %v3839_v4 }
  0x61   :  { %v250_v59 = vmul.f32 %v249_v19, %v3949_v11  ;;  %v251_v43 = vmul.f32 %v249_v19, %v3951_v17  ;;  %v252_v60 = vmul.f32 %v249_v19, %v3953_v18  ;;  %v253_v9 = vmul.f32 %v249_v19, %v3955_v21 }
  0x62   :  { %v4038_v2 = vadd.f32 %v240_v46, %v3846_v12  ;;  %v4041_v1 = vadd.f32 %v241_v39, %v3849_v5  ;;  %v4044_v61 = vadd.f32 %v242_v47, %v3852_v16  ;;  %v260_v62 = vmul.f32 %v259_v20, %v3949_v11 }
  0x63   :  { %v4050_v63 = vadd.f32 %v243_v8, %v3855_v6  ;;  %v261_v4 = vmul.f32 %v259_v20, %v3951_v17  ;;  %v262_v19 = vmul.f32 %v259_v20, %v3953_v18  ;;  %v263_v12 = vmul.f32 %v259_v20, %v3955_v21 }
  0x64   :  { %v4060_v5 = vadd.f32 %v250_v59, %v3866_v22  ;;  %v4063_v16 = vadd.f32 %v251_v43, %v3869_v23  ;;  %v4066_v44 = vadd.f32 %v252_v60, %v3872_v7  ;;  %v4069_v6 = vadd.f32 %v253_v9, %v3875_v24 }
  0x65   :  { %v270_v20 = vmul.f32 %v269_v29, %v3949_v11  ;;  %v271_v49 = vmul.f32 %v269_v29, %v3951_v17  ;;  %v272_v22 = vmul.f32 %v269_v29, %v3953_v18  ;;  %v273_v56 = vmul.f32 %v269_v29, %v3955_v21 }
  0x66   :  { %v4084_v23 = vadd.f32 %v260_v62, %v3898_v41  ;;  %v280_v7 = vmul.f32 %v3961_v30, %v3949_v11  ;;  %v281_v24 = vmul.f32 %v3961_v30, %v3951_v17  ;;  %v282_v10 = vmul.f32 %v3961_v30, %v3953_v18 }
  0x67   :  { %v4097_v29 = vadd.f32 %v261_v4, %v3901_v32  ;;  %v4100_v41 = vadd.f32 %v262_v19, %v3904_v42  ;;  %v4103_v46 = vadd.f32 %v263_v12, %v3907_v25  ;;  %v283_v11 = vmul.f32 %v3961_v30, %v3955_v21 }
  0x68   :  { %v4112_v17 = vadd.f32 %v270_v20, %v3910_v26  ;;  %v4115_v32 = vadd.f32 %v271_v49, %v3913_v27  ;;  %v4118_v42 = vadd.f32 %v272_v22, %v3916_v28  ;;  %v4121_v25 = vadd.f32 %v273_v56, %v3919_v37 }
  0x69   :  { %v4124_v18 = vadd.f32 %v280_v7, %v3930_v50  ;;  %v4127_v21 = vadd.f32 %v281_v24, %v3933_v15  ;;  %v4130_v26 = vadd.f32 %v282_v10, %v3936_v51  ;;  %v295_v27 = vstv %s4035_s17  ;;  %s4470_s17 = sld [smem:[#allocation2 + $0x5]] }
  0x6a   :  { %v296_v28 = vadd.f32 %v295_v27, %v3973_v35  ;;  %v297_v30 = vadd.f32 %v295_v27, %v3976_v36  ;;  %v298_v37 = vadd.f32 %v295_v27, %v3979_v14  ;;  %v299_v50 = vadd.f32 %v295_v27, %v3985_v53 }
  0x6b   :  { %v4138_v39 = vadd.f32 %v283_v11, %v3939_v52  ;;  %v305_v15 = vstv %s4047_s18  ;;  %v315_v47 = vstv %s4055_s19  ;;  %v325_v51 = vstv %s4057_s20  ;;  %s4483_s18 = sld [smem:[#allocation4 + $0x5]]  ;;  %s4485_s19 = sld [smem:[#allocation6 + $0x28]] }
  0x6c   :  { %v4143_v8 = vmax.f32 %v296_v28, 0.0  ;;  %v4145_v59 = vmax.f32 %v297_v30, 0.0  ;;  %v4147_v35 = vmax.f32 %v298_v37, 0.0  ;;  %v4149_v36 = vmax.f32 %v299_v50, 0.0  ;;  %s4613_s20 = sld [smem:[#allocation6 + $0x29]] }
  0x6d   :  { %v335_v14 = vstv %s4071_s21  ;;  %v345_v53 = vstv %s4073_s22  ;;  %v355_v43 = vstv %s4079_s23  ;;  %v365_v52 = vstv %s4081_s24  ;;  %s4615_s21 = sld [smem:[#allocation6 + $0x2a]]  ;;  %s4629_s22 = sld [smem:[#allocation6 + $0x2b]] }
  0x6e   :  { %v306_v60 = vmul.f32 %v305_v15, %v4143_v8  ;;  %v307_v9 = vmul.f32 %v305_v15, %v4145_v59  ;;  %v308_v62 = vmul.f32 %v305_v15, %v4147_v35  ;;  %v309_v4 = vmul.f32 %v305_v15, %v4149_v36  ;;  %s4631_s23 = sld [smem:[#allocation2 + $0x6]]  ;;  %s4637_s24 = sld [smem:[#allocation6 + $0x2c]] }
  0x6f   :  { %v375_v19 = vstv %s4092_s25  ;;  %v4161_v12 = vstv %s4094_s26  ;;  %v4164_v20 = vstv %s4107_s2  ;;  %v4167_v49 = vstv %s4109_s1  ;;  %s4639_s25 = sld [smem:[#allocation6 + $0x2d]]  ;;  %s4645_s26 = sld [smem:[#allocation6 + $0x2e]] }
  0x70   :  { %v316_v22 = vmul.f32 %v315_v47, %v4143_v8  ;;  %v317_v56 = vmul.f32 %v315_v47, %v4145_v59  ;;  %v318_v7 = vmul.f32 %v315_v47, %v4147_v35  ;;  %v319_v24 = vmul.f32 %v315_v47, %v4149_v36  ;;  %s4647_s2 = sld [smem:[#allocation6 + $0x2f]]  ;;  %s5201_s1 = sld [smem:[#allocation6 + $0x40]] }
  0x71   :  { %v4174_v10 = vadd.f32 %v306_v60, %v3988_v40  ;;  %v4177_v11 = vadd.f32 %v307_v9, %v3991_v38  ;;  %v4180_v27 = vadd.f32 %v308_v62, %v3994_v54  ;;  %v4183_v28 = vadd.f32 %v309_v4, %v3997_v55 }
  0x72   :  { %v326_v30 = vmul.f32 %v325_v51, %v4143_v8  ;;  %v327_v37 = vmul.f32 %v325_v51, %v4145_v59  ;;  %v328_v50 = vmul.f32 %v325_v51, %v4147_v35  ;;  %v329_v15 = vmul.f32 %v325_v51, %v4149_v36 }
  0x73   :  { %v336_v40 = vmul.f32 %v335_v14, %v4143_v8  ;;  %v337_v47 = vmul.f32 %v335_v14, %v4145_v59  ;;  %v338_v38 = vmul.f32 %v335_v14, %v4147_v35  ;;  %v339_v54 = vmul.f32 %v335_v14, %v4149_v36 }
  0x74   :  { %v4194_v60 = vadd.f32 %v316_v22, %v4004_v45  ;;  %v4197_v55 = vadd.f32 %v317_v56, %v4010_v48  ;;  %v4200_v9 = vadd.f32 %v318_v7, %v4013_v31  ;;  %v4203_v62 = vadd.f32 %v319_v24, %v4016_v33 }
  0x75   :  { %v4206_v51 = vadd.f32 %v326_v30, %v4020_v57  ;;  %v4209_v4 = vadd.f32 %v327_v37, %v4023_v34  ;;  %v4212_v14 = vadd.f32 %v328_v50, %v4026_v13  ;;  %v4215_v45 = vadd.f32 %v329_v15, %v4029_v58 }
  0x76   :  { %v346_v48 = vmul.f32 %v345_v53, %v4143_v8  ;;  %v347_v31 = vmul.f32 %v345_v53, %v4145_v59  ;;  %v348_v22 = vmul.f32 %v345_v53, %v4147_v35  ;;  %v349_v33 = vmul.f32 %v345_v53, %v4149_v36 }
  0x77   :  { %v4222_v57 = vadd.f32 %v336_v40, %v4038_v2  ;;  %v4225_v34 = vadd.f32 %v337_v47, %v4041_v1  ;;  %v4228_v13 = vadd.f32 %v338_v38, %v4044_v61  ;;  %v4231_v58 = vadd.f32 %v339_v54, %v4050_v63 }
  0x78   :  { %v356_v56 = vmul.f32 %v355_v43, %v4143_v8  ;;  %v357_v7 = vmul.f32 %v355_v43, %v4145_v59  ;;  %v358_v24 = vmul.f32 %v355_v43, %v4147_v35  ;;  %v359_v53 = vmul.f32 %v355_v43, %v4149_v36 }
  0x79   :  { %v4242_v2 = vadd.f32 %v346_v48, %v4060_v5  ;;  %v4245_v1 = vadd.f32 %v347_v31, %v4063_v16  ;;  %v4248_v61 = vadd.f32 %v348_v22, %v4066_v44  ;;  %v4251_v63 = vadd.f32 %v349_v33, %v4069_v6 }
  0x7a   :  { %v366_v43 = vmul.f32 %v365_v52, %v4143_v8  ;;  %v367_v30 = vmul.f32 %v365_v52, %v4145_v59  ;;  %v368_v5 = vmul.f32 %v365_v52, %v4147_v35  ;;  %v369_v37 = vmul.f32 %v365_v52, %v4149_v36 }
  0x7b   :  { %v376_v16 = vmul.f32 %v375_v19, %v4143_v8  ;;  %v377_v44 = vmul.f32 %v375_v19, %v4145_v59  ;;  %v378_v6 = vmul.f32 %v375_v19, %v4147_v35  ;;  %v379_v50 = vmul.f32 %v375_v19, %v4149_v36  ;;  %v9877_v36 = vld [vmem:[#allocation13_spill] sm:$0xff] }
  0x7c   :  { %v4274_v15 = vadd.f32 %v356_v56, %v4084_v23  ;;  %v4277_v52 = vadd.f32 %v357_v7, %v4097_v29  ;;  %v4280_v40 = vadd.f32 %v358_v24, %v4100_v41  ;;  %v4283_v8 = vadd.f32 %v359_v53, %v4103_v46  ;;  %v9876_v46 = vld [vmem:[#allocation12_spill] sm:$0xff] }
  0x7d   :  { %v4286_v59 = vadd.f32 %v366_v43, %v4112_v17  ;;  %v4289_v35 = vadd.f32 %v367_v30, %v4115_v32  ;;  %v4292_v23 = vadd.f32 %v368_v5, %v4118_v42  ;;  %v4295_v29 = vadd.f32 %v369_v37, %v4121_v25 }
  0x7e   :  { %v386_v41 = vmul.f32 %v4161_v12, %v3728_v0  ;;  %v387_v17 = vmul.f32 %v4161_v12, %v9876_v46  ;;  %v388_v19 = vmul.f32 %v4161_v12, %v9877_v36  ;;  %v389_v32 = vmul.f32 %v4161_v12, %v3747_v3 }
  0x7f   :  { %v4306_v42 = vadd.f32 %v376_v16, %v4124_v18  ;;  %v4309_v25 = vadd.f32 %v377_v44, %v4127_v21  ;;  %v4312_v47 = vadd.f32 %v378_v6, %v4130_v26  ;;  %v4315_v38 = vadd.f32 %v379_v50, %v4138_v39 }
  0x80   :  { %v392_v54 = vadd.f32 %v4164_v20, %v386_v41  ;;  %v393_v12 = vadd.f32 %v4164_v20, %v387_v17  ;;  %v394_v18 = vadd.f32 %v4164_v20, %v388_v19  ;;  %v395_v48 = vadd.f32 %v4164_v20, %v389_v32 }
  0x81   :  { %v411_v31 = vstv %s4237_s27  ;;  %v421_v21 = vstv %s4239_s28  ;;  %v431_v22 = vstv %s4253_s29  ;;  %v481_v33 = vstv %s4255_s30  ;;  %s5209_s27 = sld [smem:[#allocation6 + $0x41]]  ;;  %s5211_s28 = sld [smem:[#allocation6 + $0x42]] }
  0x82   :  { %v4325_v56 = vmax.f32 %v392_v54, 0.0  ;;  %v4327_v26 = vmax.f32 %v393_v12, 0.0  ;;  %v4329_v7 = vmax.f32 %v394_v18, 0.0  ;;  %v4331_v39 = vmax.f32 %v395_v48, 0.0  ;;  %s5225_s29 = sld [smem:[#allocation6 + $0x43]]  ;;  %s5227_s30 = sld [smem:[#allocation6 + $0x44]] }
  0x83   :  { %v441_v24 = vstv %s4261_s6  ;;  %v451_v53 = vstv %s4263_s7  ;;  %v461_v43 = vstv %s4269_s8  ;;  %v4337_v30 = vstv %s4271_s9  ;;  %s4809_s9 = sld [smem:[#allocation4 + $0x6]]  ;;  %s5233_s6 = sld [smem:[#allocation6 + $0x45]] }
  0x84   :  { %v402_v20 = vmul.f32 %v4167_v49, %v4325_v56  ;;  %v403_v5 = vmul.f32 %v4167_v49, %v4327_v26  ;;  %v404_v37 = vmul.f32 %v4167_v49, %v4329_v7  ;;  %v405_v16 = vmul.f32 %v4167_v49, %v4331_v39  ;;  %s5235_s7 = sld [smem:[#allocation6 + $0x46]]  ;;  %s5246_s8 = sld [smem:[#allocation6 + $0x47]] }
  0x85   :  { %v412_v44 = vmul.f32 %v411_v31, %v4325_v56  ;;  %v4349_v6 = vmul.f32 %v481_v33, %v3728_v0  ;;  %v4352_v50 = vmul.f32 %v481_v33, %v9876_v46  ;;  %v4355_v41 = vmul.f32 %v481_v33, %v9877_v36 }
  0x86   :  { %v413_v17 = vmul.f32 %v411_v31, %v4327_v26  ;;  %v414_v19 = vmul.f32 %v411_v31, %v4329_v7  ;;  %v415_v32 = vmul.f32 %v411_v31, %v4331_v39  ;;  %v4361_v54 = vmul.f32 %v481_v33, %v3747_v3 }
  0x87   :  { %v4364_v49 = vadd.f32 %v402_v20, %v4174_v10  ;;  %v4367_v12 = vadd.f32 %v403_v5, %v4177_v11  ;;  %v4370_v18 = vadd.f32 %v404_v37, %v4180_v27  ;;  %v4373_v48 = vadd.f32 %v405_v16, %v4183_v28 }
  0x88   :  { %v422_v36 = vmul.f32 %v421_v21, %v4325_v56  ;;  %v423_v46 = vmul.f32 %v421_v21, %v4327_v26  ;;  %v424_v31 = vmul.f32 %v421_v21, %v4329_v7  ;;  %v425_v33 = vmul.f32 %v421_v21, %v4331_v39 }
  0x89   :  { %v4380_v10 = vadd.f32 %v412_v44, %v4194_v60  ;;  %v432_v11 = vmul.f32 %v431_v22, %v4325_v56  ;;  %v433_v20 = vmul.f32 %v431_v22, %v4327_v26  ;;  %v434_v27 = vmul.f32 %v431_v22, %v4329_v7 }
  0x8a   :  { %v4386_v28 = vadd.f32 %v413_v17, %v4197_v55  ;;  %v4389_v5 = vadd.f32 %v414_v19, %v4200_v9  ;;  %v4392_v37 = vadd.f32 %v415_v32, %v4203_v62  ;;  %v435_v21 = vmul.f32 %v431_v22, %v4331_v39 }
  0x8b   :  { %v4396_v60 = vadd.f32 %v422_v36, %v4206_v51  ;;  %v4399_v16 = vadd.f32 %v423_v46, %v4209_v4  ;;  %v4402_v44 = vadd.f32 %v424_v31, %v4212_v14  ;;  %v4405_v55 = vadd.f32 %v425_v33, %v4215_v45 }
  0x8c   :  { %v442_v9 = vmul.f32 %v441_v24, %v4325_v56  ;;  %v443_v17 = vmul.f32 %v441_v24, %v4327_v26  ;;  %v444_v62 = vmul.f32 %v441_v24, %v4329_v7  ;;  %v445_v22 = vmul.f32 %v441_v24, %v4331_v39 }
  0x8d   :  { %v4414_v51 = vadd.f32 %v432_v11, %v4222_v57  ;;  %v4417_v4 = vadd.f32 %v433_v20, %v4225_v34  ;;  %v4420_v14 = vadd.f32 %v434_v27, %v4228_v13  ;;  %v452_v45 = vmul.f32 %v451_v53, %v4325_v56 }
  0x8e   :  { %v4426_v46 = vadd.f32 %v435_v21, %v4231_v58  ;;  %v453_v36 = vmul.f32 %v451_v53, %v4327_v26  ;;  %v454_v24 = vmul.f32 %v451_v53, %v4329_v7  ;;  %v455_v57 = vmul.f32 %v451_v53, %v4331_v39 }
  0x8f   :  { %v4436_v34 = vadd.f32 %v442_v9, %v4242_v2  ;;  %v4439_v13 = vadd.f32 %v443_v17, %v4245_v1  ;;  %v4442_v19 = vadd.f32 %v444_v62, %v4248_v61  ;;  %v4445_v58 = vadd.f32 %v445_v22, %v4251_v63 }
  0x90   :  { %v462_v53 = vmul.f32 %v461_v43, %v4325_v56  ;;  %v463_v32 = vmul.f32 %v461_v43, %v4327_v26  ;;  %v464_v2 = vmul.f32 %v461_v43, %v4329_v7  ;;  %v465_v31 = vmul.f32 %v461_v43, %v4331_v39 }
  0x91   :  { %v4460_v1 = vadd.f32 %v452_v45, %v4274_v15  ;;  %v472_v61 = vmul.f32 %v4337_v30, %v4325_v56  ;;  %v473_v63 = vmul.f32 %v4337_v30, %v4327_v26  ;;  %v474_v33 = vmul.f32 %v4337_v30, %v4329_v7 }
  0x92   :  { %v4473_v43 = vadd.f32 %v453_v36, %v4277_v52  ;;  %v4476_v15 = vadd.f32 %v454_v24, %v4280_v40  ;;  %v4479_v11 = vadd.f32 %v455_v57, %v4283_v8  ;;  %v475_v56 = vmul.f32 %v4337_v30, %v4331_v39 }
  0x93   :  { %v4488_v26 = vadd.f32 %v462_v53, %v4286_v59  ;;  %v4491_v52 = vadd.f32 %v463_v32, %v4289_v35  ;;  %v4494_v40 = vadd.f32 %v464_v2, %v4292_v23  ;;  %v4497_v8 = vadd.f32 %v465_v31, %v4295_v29 }
  0x94   :  { %v4500_v7 = vadd.f32 %v472_v61, %v4306_v42  ;;  %v4503_v39 = vadd.f32 %v473_v63, %v4309_v25  ;;  %v4506_v59 = vadd.f32 %v474_v33, %v4312_v47  ;;  %v487_v35 = vstv %s4411_s3  ;;  %s4821_s3 = sld [smem:[#allocation6 + $0x30]] }
  0x95   :  { %v488_v23 = vadd.f32 %v487_v35, %v4349_v6  ;;  %v489_v30 = vadd.f32 %v487_v35, %v4352_v50  ;;  %v490_v29 = vadd.f32 %v487_v35, %v4355_v41  ;;  %v491_v42 = vadd.f32 %v487_v35, %v4361_v54 }
  0x96   :  { %v4514_v20 = vadd.f32 %v475_v56, %v4315_v38  ;;  %v497_v25 = vstv %s4423_s4  ;;  %v507_v27 = vstv %s4431_s10  ;;  %v517_v47 = vstv %s4433_s11  ;;  %s4829_s4 = sld [smem:[#allocation6 + $0x31]]  ;;  %s4831_s10 = sld [smem:[#allocation6 + $0x32]] }
  0x97   :  { %v4519_v21 = vmax.f32 %v488_v23, 0.0  ;;  %v4521_v9 = vmax.f32 %v489_v30, 0.0  ;;  %v4523_v6 = vmax.f32 %v490_v29, 0.0  ;;  %v4525_v50 = vmax.f32 %v491_v42, 0.0  ;;  %s4845_s11 = sld [smem:[#allocation6 + $0x33]] }
  0x98   :  { %v527_v41 = vstv %s4447_s12  ;;  %v537_v54 = vstv %s4449_s13  ;;  %v547_v17 = vstv %s4455_s14  ;;  %v557_v38 = vstv %s4457_s15  ;;  %s4847_s12 = sld [smem:[#allocation6 + $0x34]]  ;;  %s4857_s13 = sld [smem:[#allocation6 + $0x35]] }
  0x99   :  { %v498_v62 = vmul.f32 %v497_v25, %v4519_v21  ;;  %v499_v22 = vmul.f32 %v497_v25, %v4521_v9  ;;  %v500_v45 = vmul.f32 %v497_v25, %v4523_v6  ;;  %v501_v36 = vmul.f32 %v497_v25, %v4525_v50  ;;  %s4859_s14 = sld [smem:[#allocation6 + $0x36]]  ;;  %s4870_s15 = sld [smem:[#allocation6 + $0x37]] }
  0x9a   :  { %v567_v24 = vstv %s4468_s16  ;;  %v4537_v57 = vstv %s4470_s17  ;;  %v4540_v53 = vstv %s4483_s18  ;;  %v4543_v32 = vstv %s4485_s19  ;;  %s4872_s16 = sld [smem:[#allocation2 + $0x7]]  ;;  %s4887_s18 = sld [smem:[#allocation6 + $0x38]] }
  0x9b   :  { %v508_v2 = vmul.f32 %v507_v27, %v4519_v21  ;;  %v509_v31 = vmul.f32 %v507_v27, %v4521_v9  ;;  %v510_v61 = vmul.f32 %v507_v27, %v4523_v6  ;;  %v511_v63 = vmul.f32 %v507_v27, %v4525_v50  ;;  %s4885_s17 = sld [smem:[#allocation4 + $0x7]]  ;;  %s5015_s19 = sld [smem:[#allocation6 + $0x39]] }
  0x9c   :  { %v4550_v33 = vadd.f32 %v498_v62, %v4364_v49  ;;  %v4553_v56 = vadd.f32 %v499_v22, %v4367_v12  ;;  %v4556_v35 = vadd.f32 %v500_v45, %v4370_v18  ;;  %v4559_v23 = vadd.f32 %v501_v36, %v4373_v48 }
  0x9d   :  { %v518_v30 = vmul.f32 %v517_v47, %v4519_v21  ;;  %v519_v29 = vmul.f32 %v517_v47, %v4521_v9  ;;  %v520_v42 = vmul.f32 %v517_v47, %v4523_v6  ;;  %v521_v25 = vmul.f32 %v517_v47, %v4525_v50 }
  0x9e   :  { %v528_v49 = vmul.f32 %v527_v41, %v4519_v21  ;;  %v529_v27 = vmul.f32 %v527_v41, %v4521_v9  ;;  %v530_v12 = vmul.f32 %v527_v41, %v4523_v6  ;;  %v531_v18 = vmul.f32 %v527_v41, %v4525_v50 }
  0x9f   :  { %v4570_v62 = vadd.f32 %v508_v2, %v4380_v10  ;;  %v4573_v48 = vadd.f32 %v509_v31, %v4386_v28  ;;  %v4576_v22 = vadd.f32 %v510_v61, %v4389_v5  ;;  %v4579_v45 = vadd.f32 %v511_v63, %v4392_v37 }
  0xa0   :  { %v4582_v47 = vadd.f32 %v518_v30, %v4396_v60  ;;  %v4585_v36 = vadd.f32 %v519_v29, %v4399_v16  ;;  %v4588_v41 = vadd.f32 %v520_v42, %v4402_v44  ;;  %v4591_v10 = vadd.f32 %v521_v25, %v4405_v55 }
  0xa1   :  { %v538_v28 = vmul.f32 %v537_v54, %v4519_v21  ;;  %v539_v5 = vmul.f32 %v537_v54, %v4521_v9  ;;  %v540_v2 = vmul.f32 %v537_v54, %v4523_v6  ;;  %v541_v37 = vmul.f32 %v537_v54, %v4525_v50 }
  0xa2   :  { %v4598_v60 = vadd.f32 %v528_v49, %v4414_v51  ;;  %v4601_v16 = vadd.f32 %v529_v27, %v4417_v4  ;;  %v4604_v44 = vadd.f32 %v530_v12, %v4420_v14  ;;  %v4607_v55 = vadd.f32 %v531_v18, %v4426_v46 }
  0xa3   :  { %v548_v31 = vmul.f32 %v547_v17, %v4519_v21  ;;  %v549_v61 = vmul.f32 %v547_v17, %v4521_v9  ;;  %v550_v63 = vmul.f32 %v547_v17, %v4523_v6  ;;  %v551_v54 = vmul.f32 %v547_v17, %v4525_v50 }
  0xa4   :  { %v4618_v51 = vadd.f32 %v538_v28, %v4436_v34  ;;  %v4621_v4 = vadd.f32 %v539_v5, %v4439_v13  ;;  %v4624_v14 = vadd.f32 %v540_v2, %v4442_v19  ;;  %v4627_v46 = vadd.f32 %v541_v37, %v4445_v58 }
  0xa5   :  { %v558_v17 = vmul.f32 %v557_v38, %v4519_v21  ;;  %v559_v30 = vmul.f32 %v557_v38, %v4521_v9  ;;  %v560_v34 = vmul.f32 %v557_v38, %v4523_v6  ;;  %v561_v29 = vmul.f32 %v557_v38, %v4525_v50 }
  0xa6   :  { %v568_v13 = vmul.f32 %v567_v24, %v4519_v21  ;;  %v569_v19 = vmul.f32 %v567_v24, %v4521_v9  ;;  %v570_v58 = vmul.f32 %v567_v24, %v4523_v6  ;;  %v571_v42 = vmul.f32 %v567_v24, %v4525_v50  ;;  %v9879_v50 = vld [vmem:[#allocation13_spill] sm:$0xff] }
  0xa7   :  { %v4650_v25 = vadd.f32 %v548_v31, %v4460_v1  ;;  %v4653_v38 = vadd.f32 %v549_v61, %v4473_v43  ;;  %v4656_v49 = vadd.f32 %v550_v63, %v4476_v15  ;;  %v4659_v21 = vadd.f32 %v551_v54, %v4479_v11  ;;  %v9878_v11 = vld [vmem:[#allocation12_spill] sm:$0xff] }
  0xa8   :  { %v4662_v9 = vadd.f32 %v558_v17, %v4488_v26  ;;  %v4665_v6 = vadd.f32 %v559_v30, %v4491_v52  ;;  %v4668_v1 = vadd.f32 %v560_v34, %v4494_v40  ;;  %v4671_v43 = vadd.f32 %v561_v29, %v4497_v8 }
  0xa9   :  { %v578_v15 = vmul.f32 %v4537_v57, %v3728_v0  ;;  %v579_v26 = vmul.f32 %v4537_v57, %v9878_v11  ;;  %v580_v24 = vmul.f32 %v4537_v57, %v9879_v50  ;;  %v581_v52 = vmul.f32 %v4537_v57, %v3747_v3 }
  0xaa   :  { %v4682_v40 = vadd.f32 %v568_v13, %v4500_v7  ;;  %v4685_v8 = vadd.f32 %v569_v19, %v4503_v39  ;;  %v4688_v27 = vadd.f32 %v570_v58, %v4506_v59  ;;  %v4691_v0 = vadd.f32 %v571_v42, %v4514_v20  ;;  %v4729_v13 = vld [vmem:[%s9836_s0] sm:$0xff]  ;;  %v4737_v58 = vld [vmem:[%s9836_s0 + $0x8] sm:$0xff] }
  0xab   :  { %v584_v12 = vadd.f32 %v4540_v53, %v578_v15  ;;  %v585_v3 = vadd.f32 %v4540_v53, %v579_v26  ;;  %v586_v7 = vadd.f32 %v4540_v53, %v580_v24  ;;  %v587_v57 = vadd.f32 %v4540_v53, %v581_v52  ;;  %9880 = vst [vmem:[#allocation12_spill] sm:$0xff] %v4737_v58  ;;  %v4756_v24 = vld [vmem:[%s9836_s0 + $0x18] sm:$0xff] }
  0xac   :  { %v603_v18 = vstv %s4613_s20  ;;  %v613_v39 = vstv %s4615_s21  ;;  %v623_v28 = vstv %s4629_s22  ;;  %v673_v5 = vstv %s4631_s23  ;;  %s5017_s20 = sld [smem:[#allocation6 + $0x3a]]  ;;  %s5031_s21 = sld [smem:[#allocation6 + $0x3b]] }
  0xad   :  { %v4701_v2 = vmax.f32 %v584_v12, 0.0  ;;  %v4703_v59 = vmax.f32 %v585_v3, 0.0  ;;  %v4705_v37 = vmax.f32 %v586_v7, 0.0  ;;  %v4707_v20 = vmax.f32 %v587_v57, 0.0  ;;  %s5033_s22 = sld [smem:[#allocation2 + $0x8]]  ;;  %s5039_s23 = sld [smem:[#allocation6 + $0x3c]] }
  0xae   :  { %v633_v31 = vstv %s4637_s24  ;;  %v643_v61 = vstv %s4639_s25  ;;  %v4712_v63 = vstv %s4645_s26  ;;  %v4715_v54 = vstv %s4647_s2  ;;  %s5041_s24 = sld [smem:[#allocation6 + $0x3d]]  ;;  %s5047_s25 = sld [smem:[#allocation6 + $0x3e]] }
  0xaf   :  { %v594_v53 = vmul.f32 %v4543_v32, %v4701_v2  ;;  %v595_v17 = vmul.f32 %v4543_v32, %v4703_v59  ;;  %v596_v30 = vmul.f32 %v4543_v32, %v4705_v37  ;;  %v597_v34 = vmul.f32 %v4543_v32, %v4707_v20  ;;  %v4745_v32 = vld [vmem:[%s9836_s0 + $0x10] sm:$0xff]  ;;  %s5049_s26 = sld [smem:[#allocation6 + $0x3f]]  ;;  %s5189_s2 = sld [smem:[#allocation4 + $0x8]] }
  0xb0   :  { %v604_v29 = vmul.f32 %v603_v18, %v4701_v2  ;;  %v4732_v19 = vmul.f32 %v4729_v13, %v673_v5  ;;  %v4740_v42 = vmul.f32 %v4737_v58, %v673_v5  ;;  %9881 = vst [vmem:[#allocation13_spill] sm:$0xff] %v4745_v32  ;;  %v4748_v15 = vmul.f32 %v4745_v32, %v673_v5 }
  0xb1   :  { %v605_v11 = vmul.f32 %v603_v18, %v4703_v59  ;;  %v606_v26 = vmul.f32 %v603_v18, %v4705_v37  ;;  %v607_v50 = vmul.f32 %v603_v18, %v4707_v20  ;;  %v4759_v52 = vmul.f32 %v4756_v24, %v673_v5 }
  0xb2   :  { %v4762_v12 = vadd.f32 %v594_v53, %v4550_v33  ;;  %v4765_v3 = vadd.f32 %v595_v17, %v4553_v56  ;;  %v4768_v7 = vadd.f32 %v596_v30, %v4556_v35  ;;  %v4771_v57 = vadd.f32 %v597_v34, %v4559_v23 }
  0xb3   :  { %v614_v18 = vmul.f32 %v613_v39, %v4701_v2  ;;  %v615_v32 = vmul.f32 %v613_v39, %v4703_v59  ;;  %v616_v58 = vmul.f32 %v613_v39, %v4705_v37  ;;  %v617_v5 = vmul.f32 %v613_v39, %v4707_v20 }
  0xb4   :  { %v4778_v33 = vadd.f32 %v604_v29, %v4570_v62  ;;  %v624_v56 = vmul.f32 %v623_v28, %v4701_v2  ;;  %v625_v53 = vmul.f32 %v623_v28, %v4703_v59  ;;  %v626_v35 = vmul.f32 %v623_v28, %v4705_v37 }
  0xb5   :  { %v4784_v23 = vadd.f32 %v605_v11, %v4573_v48  ;;  %v4787_v17 = vadd.f32 %v606_v26, %v4576_v22  ;;  %v4790_v30 = vadd.f32 %v607_v50, %v4579_v45  ;;  %v627_v39 = vmul.f32 %v623_v28, %v4707_v20 }
  0xb6   :  { %v4794_v62 = vadd.f32 %v614_v18, %v4582_v47  ;;  %v4797_v34 = vadd.f32 %v615_v32, %v4585_v36  ;;  %v4800_v29 = vadd.f32 %v616_v58, %v4588_v41  ;;  %v4803_v48 = vadd.f32 %v617_v5, %v4591_v10 }
  0xb7   :  { %v634_v22 = vmul.f32 %v633_v31, %v4701_v2  ;;  %v635_v11 = vmul.f32 %v633_v31, %v4703_v59  ;;  %v636_v45 = vmul.f32 %v633_v31, %v4705_v37  ;;  %v637_v28 = vmul.f32 %v633_v31, %v4707_v20 }
  0xb8   :  { %v4812_v47 = vadd.f32 %v624_v56, %v4598_v60  ;;  %v4815_v36 = vadd.f32 %v625_v53, %v4601_v16  ;;  %v4818_v41 = vadd.f32 %v626_v35, %v4604_v44  ;;  %v644_v10 = vmul.f32 %v643_v61, %v4701_v2 }
  0xb9   :  { %v4824_v58 = vadd.f32 %v627_v39, %v4607_v55  ;;  %v645_v31 = vmul.f32 %v643_v61, %v4703_v59  ;;  %v646_v32 = vmul.f32 %v643_v61, %v4705_v37  ;;  %v647_v60 = vmul.f32 %v643_v61, %v4707_v20 }
  0xba   :  { %v4834_v16 = vadd.f32 %v634_v22, %v4618_v51  ;;  %v4837_v44 = vadd.f32 %v635_v11, %v4621_v4  ;;  %v4840_v26 = vadd.f32 %v636_v45, %v4624_v14  ;;  %v4843_v55 = vadd.f32 %v637_v28, %v4627_v46 }
  0xbb   :  { %v654_v61 = vmul.f32 %v4712_v63, %v4701_v2  ;;  %v655_v51 = vmul.f32 %v4712_v63, %v4703_v59  ;;  %v656_v4 = vmul.f32 %v4712_v63, %v4705_v37  ;;  %v657_v14 = vmul.f32 %v4712_v63, %v4707_v20 }
  0xbc   :  { %v4862_v46 = vadd.f32 %v644_v10, %v4650_v25  ;;  %v664_v50 = vmul.f32 %v4715_v54, %v4701_v2  ;;  %v665_v18 = vmul.f32 %v4715_v54, %v4703_v59  ;;  %v666_v5 = vmul.f32 %v4715_v54, %v4705_v37 }
  0xbd   :  { %v4875_v63 = vadd.f32 %v645_v31, %v4653_v38  ;;  %v4878_v25 = vadd.f32 %v646_v32, %v4656_v49  ;;  %v4881_v56 = vadd.f32 %v647_v60, %v4659_v21  ;;  %v667_v2 = vmul.f32 %v4715_v54, %v4707_v20 }
  0xbe   :  { %v4890_v59 = vadd.f32 %v654_v61, %v4662_v9  ;;  %v4893_v38 = vadd.f32 %v655_v51, %v4665_v6  ;;  %v4896_v49 = vadd.f32 %v656_v4, %v4668_v1  ;;  %v4899_v21 = vadd.f32 %v657_v14, %v4671_v43 }
  0xbf   :  { %v4902_v37 = vadd.f32 %v664_v50, %v4682_v40  ;;  %v4905_v20 = vadd.f32 %v665_v18, %v4685_v8  ;;  %v4908_v9 = vadd.f32 %v666_v5, %v4688_v27  ;;  %v679_v6 = vstv %s4809_s9  ;;  %s5248_s9 = sld [smem:[#allocation2 + $0x9]] }
  0xc0   :  { %v680_v1 = vadd.f32 %v679_v6, %v4732_v19  ;;  %v681_v54 = vadd.f32 %v679_v6, %v4740_v42  ;;  %v682_v43 = vadd.f32 %v679_v6, %v4748_v15  ;;  %v683_v40 = vadd.f32 %v679_v6, %v4759_v52 }
  0xc1   :  { %v4916_v53 = vadd.f32 %v667_v2, %v4691_v0  ;;  %v689_v8 = vstv %s4821_s3  ;;  %v699_v35 = vstv %s4829_s4  ;;  %v709_v27 = vstv %s4831_s10  ;;  %s5261_s3 = sld [smem:[#allocation4 + $0x9]]  ;;  %s5263_s4 = sld [smem:[#allocation6 + $0x48]] }
  0xc2   :  { %v4921_v39 = vmax.f32 %v680_v1, 0.0  ;;  %v4923_v22 = vmax.f32 %v681_v54, 0.0  ;;  %v4925_v19 = vmax.f32 %v682_v43, 0.0  ;;  %v4927_v42 = vmax.f32 %v683_v40, 0.0  ;;  %s5391_s10 = sld [smem:[#allocation6 + $0x49]] }
  0xc3   :  { %v719_v15 = vstv %s4845_s11  ;;  %v729_v52 = vstv %s4847_s12  ;;  %v739_v11 = vstv %s4857_s13  ;;  %v749_v0 = vstv %s4859_s14  ;;  %s5393_s11 = sld [smem:[#allocation2 + $0xa]]  ;;  %s5409_s13 = sld [smem:[#allocation6 + $0x4b]] }
  0xc4   :  { %v690_v45 = vmul.f32 %v689_v8, %v4921_v39  ;;  %v691_v28 = vmul.f32 %v689_v8, %v4923_v22  ;;  %v692_v10 = vmul.f32 %v689_v8, %v4925_v19  ;;  %v693_v31 = vmul.f32 %v689_v8, %v4927_v42  ;;  %s5407_s12 = sld [smem:[#allocation6 + $0x4a]]  ;;  %s5415_s14 = sld [smem:[#allocation6 + $0x4c]] }
  0xc5   :  { %v759_v32 = vstv %s4870_s15  ;;  %v4939_v60 = vstv %s4872_s16  ;;  %v4942_v61 = vstv %s4885_s17  ;;  %v4945_v51 = vstv %s4887_s18  ;;  %s5417_s15 = sld [smem:[#allocation6 + $0x4d]]  ;;  %s5423_s16 = sld [smem:[#allocation6 + $0x4e]] }
  0xc6   :  { %v700_v4 = vmul.f32 %v699_v35, %v4921_v39  ;;  %v701_v14 = vmul.f32 %v699_v35, %v4923_v22  ;;  %v702_v50 = vmul.f32 %v699_v35, %v4925_v19  ;;  %v703_v18 = vmul.f32 %v699_v35, %v4927_v42  ;;  %s5425_s17 = sld [smem:[#allocation6 + $0x4f]]  ;;  %s5565_s18 = sld [smem:[#allocation4 + $0xa]] }
  0xc7   :  { %v4952_v5 = vadd.f32 %v690_v45, %v4762_v12  ;;  %v4955_v2 = vadd.f32 %v691_v28, %v4765_v3  ;;  %v4958_v6 = vadd.f32 %v692_v10, %v4768_v7  ;;  %v4961_v1 = vadd.f32 %v693_v31, %v4771_v57 }
  0xc8   :  { %v710_v54 = vmul.f32 %v709_v27, %v4921_v39  ;;  %v711_v43 = vmul.f32 %v709_v27, %v4923_v22  ;;  %v712_v40 = vmul.f32 %v709_v27, %v4925_v19  ;;  %v713_v8 = vmul.f32 %v709_v27, %v4927_v42 }
  0xc9   :  { %v720_v12 = vmul.f32 %v719_v15, %v4921_v39  ;;  %v721_v35 = vmul.f32 %v719_v15, %v4923_v22  ;;  %v722_v3 = vmul.f32 %v719_v15, %v4925_v19  ;;  %v723_v7 = vmul.f32 %v719_v15, %v4927_v42 }
  0xca   :  { %v4972_v45 = vadd.f32 %v700_v4, %v4778_v33  ;;  %v4975_v57 = vadd.f32 %v701_v14, %v4784_v23  ;;  %v4978_v28 = vadd.f32 %v702_v50, %v4787_v17  ;;  %v4981_v10 = vadd.f32 %v703_v18, %v4790_v30 }
  0xcb   :  { %v4984_v27 = vadd.f32 %v710_v54, %v4794_v62  ;;  %v4987_v31 = vadd.f32 %v711_v43, %v4797_v34  ;;  %v4990_v15 = vadd.f32 %v712_v40, %v4800_v29  ;;  %v4993_v33 = vadd.f32 %v713_v8, %v4803_v48 }
  0xcc   :  { %v730_v23 = vmul.f32 %v729_v52, %v4921_v39  ;;  %v731_v17 = vmul.f32 %v729_v52, %v4923_v22  ;;  %v732_v4 = vmul.f32 %v729_v52, %v4925_v19  ;;  %v733_v30 = vmul.f32 %v729_v52, %v4927_v42 }
  0xcd   :  { %v5000_v62 = vadd.f32 %v720_v12, %v4812_v47  ;;  %v5003_v34 = vadd.f32 %v721_v35, %v4815_v36  ;;  %v5006_v29 = vadd.f32 %v722_v3, %v4818_v41  ;;  %v5009_v48 = vadd.f32 %v723_v7, %v4824_v58 }
  0xce   :  { %v740_v14 = vmul.f32 %v739_v11, %v4921_v39  ;;  %v741_v50 = vmul.f32 %v739_v11, %v4923_v22  ;;  %v742_v18 = vmul.f32 %v739_v11, %v4925_v19  ;;  %v743_v52 = vmul.f32 %v739_v11, %v4927_v42 }
  0xcf   :  { %v5020_v47 = vadd.f32 %v730_v23, %v4834_v16  ;;  %v5023_v36 = vadd.f32 %v731_v17, %v4837_v44  ;;  %v5026_v41 = vadd.f32 %v732_v4, %v4840_v26  ;;  %v5029_v58 = vadd.f32 %v733_v30, %v4843_v55 }
  0xd0   :  { %v750_v11 = vmul.f32 %v749_v0, %v4921_v39  ;;  %v751_v54 = vmul.f32 %v749_v0, %v4923_v22  ;;  %v752_v16 = vmul.f32 %v749_v0, %v4925_v19  ;;  %v753_v43 = vmul.f32 %v749_v0, %v4927_v42 }
  0xd1   :  { %v760_v44 = vmul.f32 %v759_v32, %v4921_v39  ;;  %v761_v26 = vmul.f32 %v759_v32, %v4923_v22  ;;  %v762_v55 = vmul.f32 %v759_v32, %v4925_v19  ;;  %v763_v40 = vmul.f32 %v759_v32, %v4927_v42  ;;  %v9883_v42 = vld [vmem:[#allocation13_spill] sm:$0xff] }
  0xd2   :  { %v5052_v8 = vadd.f32 %v740_v14, %v4862_v46  ;;  %v5055_v0 = vadd.f32 %v741_v50, %v4875_v63  ;;  %v5058_v12 = vadd.f32 %v742_v18, %v4878_v25  ;;  %v5061_v39 = vadd.f32 %v743_v52, %v4881_v56  ;;  %v9882_v56 = vld [vmem:[#allocation12_spill] sm:$0xff] }
  0xd3   :  { %v5064_v22 = vadd.f32 %v750_v11, %v4890_v59  ;;  %v5067_v19 = vadd.f32 %v751_v54, %v4893_v38  ;;  %v5070_v46 = vadd.f32 %v752_v16, %v4896_v49  ;;  %v5073_v63 = vadd.f32 %v753_v43, %v4899_v21 }
  0xd4   :  { %v770_v25 = vmul.f32 %v4729_v13, %v4939_v60  ;;  %v771_v59 = vmul.f32 %v9882_v56, %v4939_v60  ;;  %v772_v32 = vmul.f32 %v9883_v42, %v4939_v60  ;;  %v773_v38 = vmul.f32 %v4756_v24, %v4939_v60 }
  0xd5   :  { %v5084_v49 = vadd.f32 %v760_v44, %v4902_v37  ;;  %v5087_v21 = vadd.f32 %v761_v26, %v4905_v20  ;;  %v5090_v35 = vadd.f32 %v762_v55, %v4908_v9  ;;  %v5093_v3 = vadd.f32 %v763_v40, %v4916_v53 }
  0xd6   :  { %v776_v7 = vadd.f32 %v4942_v61, %v770_v25  ;;  %v777_v60 = vadd.f32 %v4942_v61, %v771_v59  ;;  %v778_v37 = vadd.f32 %v4942_v61, %v772_v32  ;;  %v779_v23 = vadd.f32 %v4942_v61, %v773_v38 }
  0xd7   :  { %v795_v17 = vstv %s5015_s19  ;;  %v805_v20 = vstv %s5017_s20  ;;  %v815_v4 = vstv %s5031_s21  ;;  %v865_v30 = vstv %s5033_s22  ;;  %s5577_s19 = sld [smem:[#allocation6 + $0x50]]  ;;  %s5585_s20 = sld [smem:[#allocation6 + $0x51]] }
  0xd8   :  { %v5103_v14 = vmax.f32 %v776_v7, 0.0  ;;  %v5105_v9 = vmax.f32 %v777_v60, 0.0  ;;  %v5107_v50 = vmax.f32 %v778_v37, 0.0  ;;  %v5109_v53 = vmax.f32 %v779_v23, 0.0  ;;  %s5587_s21 = sld [smem:[#allocation6 + $0x52]]  ;;  %s5601_s22 = sld [smem:[#allocation6 + $0x53]] }
  0xd9   :  { %v825_v18 = vstv %s5039_s23  ;;  %v835_v52 = vstv %s5041_s24  ;;  %v845_v11 = vstv %s5047_s25  ;;  %v5115_v54 = vstv %s5049_s26  ;;  %s5603_s23 = sld [smem:[#allocation6 + $0x54]]  ;;  %s5609_s24 = sld [smem:[#allocation6 + $0x55]] }
  0xda   :  { %v786_v61 = vmul.f32 %v4945_v51, %v5103_v14  ;;  %v787_v16 = vmul.f32 %v4945_v51, %v5105_v9  ;;  %v788_v43 = vmul.f32 %v4945_v51, %v5107_v50  ;;  %v789_v44 = vmul.f32 %v4945_v51, %v5109_v53  ;;  %s5611_s25 = sld [smem:[#allocation6 + $0x56]]  ;;  %s5622_s26 = sld [smem:[#allocation6 + $0x57]] }
  0xdb   :  { %v796_v26 = vmul.f32 %v795_v17, %v5103_v14  ;;  %v5127_v55 = vmul.f32 %v4729_v13, %v865_v30  ;;  %v5130_v40 = vmul.f32 %v9882_v56, %v865_v30  ;;  %v5133_v25 = vmul.f32 %v9883_v42, %v865_v30 }
  0xdc   :  { %v797_v59 = vmul.f32 %v795_v17, %v5105_v9  ;;  %v798_v32 = vmul.f32 %v795_v17, %v5107_v50  ;;  %v799_v38 = vmul.f32 %v795_v17, %v5109_v53  ;;  %v5139_v7 = vmul.f32 %v4756_v24, %v865_v30 }
  0xdd   :  { %v5142_v51 = vadd.f32 %v786_v61, %v4952_v5  ;;  %v5145_v60 = vadd.f32 %v787_v16, %v4955_v2  ;;  %v5148_v37 = vadd.f32 %v788_v43, %v4958_v6  ;;  %v5151_v23 = vadd.f32 %v789_v44, %v4961_v1 }
  0xde   :  { %v806_v42 = vmul.f32 %v805_v20, %v5103_v14  ;;  %v807_v56 = vmul.f32 %v805_v20, %v5105_v9  ;;  %v808_v17 = vmul.f32 %v805_v20, %v5107_v50  ;;  %v809_v30 = vmul.f32 %v805_v20, %v5109_v53 }
  0xdf   :  { %v5158_v5 = vadd.f32 %v796_v26, %v4972_v45  ;;  %v816_v2 = vmul.f32 %v815_v4, %v5103_v14  ;;  %v817_v61 = vmul.f32 %v815_v4, %v5105_v9  ;;  %v818_v6 = vmul.f32 %v815_v4, %v5107_v50 }
  0xe0   :  { %v5164_v1 = vadd.f32 %v797_v59, %v4975_v57  ;;  %v5167_v16 = vadd.f32 %v798_v32, %v4978_v28  ;;  %v5170_v43 = vadd.f32 %v799_v38, %v4981_v10  ;;  %v819_v20 = vmul.f32 %v815_v4, %v5109_v53 }
  0xe1   :  { %v5174_v45 = vadd.f32 %v806_v42, %v4984_v27  ;;  %v5177_v44 = vadd.f32 %v807_v56, %v4987_v31  ;;  %v5180_v26 = vadd.f32 %v808_v17, %v4990_v15  ;;  %v5183_v57 = vadd.f32 %v809_v30, %v4993_v33 }
  0xe2   :  { %v826_v28 = vmul.f32 %v825_v18, %v5103_v14  ;;  %v827_v59 = vmul.f32 %v825_v18, %v5105_v9  ;;  %v828_v10 = vmul.f32 %v825_v18, %v5107_v50  ;;  %v829_v4 = vmul.f32 %v825_v18, %v5109_v53 }
  0xe3   :  { %v5192_v27 = vadd.f32 %v816_v2, %v5000_v62  ;;  %v5195_v31 = vadd.f32 %v817_v61, %v5003_v34  ;;  %v5198_v15 = vadd.f32 %v818_v6, %v5006_v29  ;;  %v836_v33 = vmul.f32 %v835_v52, %v5103_v14 }
  0xe4   :  { %v5204_v56 = vadd.f32 %v819_v20, %v5009_v48  ;;  %v837_v42 = vmul.f32 %v835_v52, %v5105_v9  ;;  %v838_v18 = vmul.f32 %v835_v52, %v5107_v50  ;;  %v839_v62 = vmul.f32 %v835_v52, %v5109_v53 }
  0xe5   :  { %v5214_v34 = vadd.f32 %v826_v28, %v5020_v47  ;;  %v5217_v29 = vadd.f32 %v827_v59, %v5023_v36  ;;  %v5220_v32 = vadd.f32 %v828_v10, %v5026_v41  ;;  %v5223_v48 = vadd.f32 %v829_v4, %v5029_v58 }
  0xe6   :  { %v846_v52 = vmul.f32 %v845_v11, %v5103_v14  ;;  %v847_v38 = vmul.f32 %v845_v11, %v5105_v9  ;;  %v848_v47 = vmul.f32 %v845_v11, %v5107_v50  ;;  %v849_v17 = vmul.f32 %v845_v11, %v5109_v53 }
  0xe7   :  { %v5238_v36 = vadd.f32 %v836_v33, %v5052_v8  ;;  %v856_v41 = vmul.f32 %v5115_v54, %v5103_v14  ;;  %v857_v58 = vmul.f32 %v5115_v54, %v5105_v9  ;;  %v858_v30 = vmul.f32 %v5115_v54, %v5107_v50 }
  0xe8   :  { %v5251_v11 = vadd.f32 %v837_v42, %v5055_v0  ;;  %v5254_v8 = vadd.f32 %v838_v18, %v5058_v12  ;;  %v5257_v2 = vadd.f32 %v839_v62, %v5061_v39  ;;  %v859_v14 = vmul.f32 %v5115_v54, %v5109_v53 }
  0xe9   :  { %v5266_v9 = vadd.f32 %v846_v52, %v5064_v22  ;;  %v5269_v0 = vadd.f32 %v847_v38, %v5067_v19  ;;  %v5272_v12 = vadd.f32 %v848_v47, %v5070_v46  ;;  %v5275_v39 = vadd.f32 %v849_v17, %v5073_v63 }
  0xea   :  { %v5278_v50 = vadd.f32 %v856_v41, %v5084_v49  ;;  %v5281_v53 = vadd.f32 %v857_v58, %v5087_v21  ;;  %v5284_v22 = vadd.f32 %v858_v30, %v5090_v35  ;;  %v871_v19 = vstv %s5189_s2  ;;  %s5624_s2 = sld [smem:[#allocation2 + $0xb]] }
  0xeb   :  { %v872_v46 = vadd.f32 %v871_v19, %v5127_v55  ;;  %v873_v54 = vadd.f32 %v871_v19, %v5130_v40  ;;  %v874_v63 = vadd.f32 %v871_v19, %v5133_v25  ;;  %v875_v49 = vadd.f32 %v871_v19, %v5139_v7 }
  0xec   :  { %v5292_v61 = vadd.f32 %v859_v14, %v5093_v3  ;;  %v881_v21 = vstv %s5201_s1  ;;  %v891_v6 = vstv %s5209_s27  ;;  %v901_v35 = vstv %s5211_s28  ;;  %s5637_s1 = sld [smem:[#allocation4 + $0xb]]  ;;  %s5639_s27 = sld [smem:[#allocation6 + $0x58]] }
  0xed   :  { %v5297_v20 = vmax.f32 %v872_v46, 0.0  ;;  %v5299_v28 = vmax.f32 %v873_v54, 0.0  ;;  %v5301_v55 = vmax.f32 %v874_v63, 0.0  ;;  %v5303_v40 = vmax.f32 %v875_v49, 0.0  ;;  %s5767_s28 = sld [smem:[#allocation6 + $0x59]] }
  0xee   :  { %v911_v25 = vstv %s5225_s29  ;;  %v921_v7 = vstv %s5227_s30  ;;  %v931_v59 = vstv %s5233_s6  ;;  %v941_v3 = vstv %s5235_s7  ;;  %s5769_s29 = sld [smem:[#allocation2 + $0xc]]  ;;  %s5783_s30 = sld [smem:[#allocation6 + $0x5a]] }
  0xef   :  { %v882_v10 = vmul.f32 %v881_v21, %v5297_v20  ;;  %v883_v4 = vmul.f32 %v881_v21, %v5299_v28  ;;  %v884_v33 = vmul.f32 %v881_v21, %v5301_v55  ;;  %v885_v42 = vmul.f32 %v881_v21, %v5303_v40  ;;  %s5785_s6 = sld [smem:[#allocation6 + $0x5b]]  ;;  %s5791_s7 = sld [smem:[#allocation6 + $0x5c]] }
  0xf0   :  { %v951_v18 = vstv %s5246_s8  ;;  %v5315_v62 = vstv %s5248_s9  ;;  %v5318_v52 = vstv %s5261_s3  ;;  %v5321_v38 = vstv %s5263_s4  ;;  %s5793_s8 = sld [smem:[#allocation6 + $0x5d]]  ;;  %s5799_s9 = sld [smem:[#allocation6 + $0x5e]] }
  0xf1   :  { %v892_v47 = vmul.f32 %v891_v6, %v5297_v20  ;;  %v893_v17 = vmul.f32 %v891_v6, %v5299_v28  ;;  %v894_v41 = vmul.f32 %v891_v6, %v5301_v55  ;;  %v895_v58 = vmul.f32 %v891_v6, %v5303_v40  ;;  %s5801_s3 = sld [smem:[#allocation6 + $0x5f]]  ;;  %s6349_s4 = sld [smem:[#allocation6 + $0x70]] }
  0xf2   :  { %v5328_v30 = vadd.f32 %v882_v10, %v5142_v51  ;;  %v5331_v14 = vadd.f32 %v883_v4, %v5145_v60  ;;  %v5334_v19 = vadd.f32 %v884_v33, %v5148_v37  ;;  %v5337_v46 = vadd.f32 %v885_v42, %v5151_v23 }
  0xf3   :  { %v902_v54 = vmul.f32 %v901_v35, %v5297_v20  ;;  %v903_v63 = vmul.f32 %v901_v35, %v5299_v28  ;;  %v904_v49 = vmul.f32 %v901_v35, %v5301_v55  ;;  %v905_v21 = vmul.f32 %v901_v35, %v5303_v40 }
  0xf4   :  { %v912_v51 = vmul.f32 %v911_v25, %v5297_v20  ;;  %v913_v6 = vmul.f32 %v911_v25, %v5299_v28  ;;  %v914_v60 = vmul.f32 %v911_v25, %v5301_v55  ;;  %v915_v37 = vmul.f32 %v911_v25, %v5303_v40 }
  0xf5   :  { %v5348_v10 = vadd.f32 %v892_v47, %v5158_v5  ;;  %v5351_v23 = vadd.f32 %v893_v17, %v5164_v1  ;;  %v5354_v4 = vadd.f32 %v894_v41, %v5167_v16  ;;  %v5357_v33 = vadd.f32 %v895_v58, %v5170_v43 }
  0xf6   :  { %v5360_v35 = vadd.f32 %v902_v54, %v5174_v45  ;;  %v5363_v42 = vadd.f32 %v903_v63, %v5177_v44  ;;  %v5366_v25 = vadd.f32 %v904_v49, %v5180_v26  ;;  %v5369_v5 = vadd.f32 %v905_v21, %v5183_v57 }
  0xf7   :  { %v922_v1 = vmul.f32 %v921_v7, %v5297_v20  ;;  %v923_v16 = vmul.f32 %v921_v7, %v5299_v28  ;;  %v924_v47 = vmul.f32 %v921_v7, %v5301_v55  ;;  %v925_v43 = vmul.f32 %v921_v7, %v5303_v40 }
  0xf8   :  { %v5376_v45 = vadd.f32 %v912_v51, %v5192_v27  ;;  %v5379_v44 = vadd.f32 %v913_v6, %v5195_v31  ;;  %v5382_v26 = vadd.f32 %v914_v60, %v5198_v15  ;;  %v5385_v57 = vadd.f32 %v915_v37, %v5204_v56 }
  0xf9   :  { %v932_v17 = vmul.f32 %v931_v59, %v5297_v20  ;;  %v933_v41 = vmul.f32 %v931_v59, %v5299_v28  ;;  %v934_v58 = vmul.f32 %v931_v59, %v5301_v55  ;;  %v935_v7 = vmul.f32 %v931_v59, %v5303_v40 }
  0xfa   :  { %v5396_v27 = vadd.f32 %v922_v1, %v5214_v34  ;;  %v5399_v31 = vadd.f32 %v923_v16, %v5217_v29  ;;  %v5402_v15 = vadd.f32 %v924_v47, %v5220_v32  ;;  %v5405_v56 = vadd.f32 %v925_v43, %v5223_v48 }
  0xfb   :  { %v942_v59 = vmul.f32 %v941_v3, %v5297_v20  ;;  %v943_v54 = vmul.f32 %v941_v3, %v5299_v28  ;;  %v944_v34 = vmul.f32 %v941_v3, %v5301_v55  ;;  %v945_v63 = vmul.f32 %v941_v3, %v5303_v40 }
  0xfc   :  { %v952_v29 = vmul.f32 %v951_v18, %v5297_v20  ;;  %v953_v32 = vmul.f32 %v951_v18, %v5299_v28  ;;  %v954_v48 = vmul.f32 %v951_v18, %v5301_v55  ;;  %v955_v49 = vmul.f32 %v951_v18, %v5303_v40  ;;  %v9885_v40 = vld [vmem:[#allocation13_spill] sm:$0xff] }
  0xfd   :  { %v5428_v21 = vadd.f32 %v932_v17, %v5238_v36  ;;  %v5431_v3 = vadd.f32 %v933_v41, %v5251_v11  ;;  %v5434_v51 = vadd.f32 %v934_v58, %v5254_v8  ;;  %v5437_v20 = vadd.f32 %v935_v7, %v5257_v2  ;;  %v9884_v2 = vld [vmem:[#allocation12_spill] sm:$0xff] }
  0xfe   :  { %v5440_v28 = vadd.f32 %v942_v59, %v5266_v9  ;;  %v5443_v55 = vadd.f32 %v943_v54, %v5269_v0  ;;  %v5446_v36 = vadd.f32 %v944_v34, %v5272_v12  ;;  %v5449_v11 = vadd.f32 %v945_v63, %v5275_v39 }
  0xff   :  { %v962_v8 = vmul.f32 %v4729_v13, %v5315_v62  ;;  %v963_v9 = vmul.f32 %v9884_v2, %v5315_v62  ;;  %v964_v18 = vmul.f32 %v9885_v40, %v5315_v62  ;;  %v965_v0 = vmul.f32 %v4756_v24, %v5315_v62 }
 0x100   :  { %v5460_v12 = vadd.f32 %v952_v29, %v5278_v50  ;;  %v5463_v39 = vadd.f32 %v953_v32, %v5281_v53  ;;  %v5466_v6 = vadd.f32 %v954_v48, %v5284_v22  ;;  %v5469_v60 = vadd.f32 %v955_v49, %v5292_v61 }
 0x101   :  { %v968_v37 = vadd.f32 %v5318_v52, %v962_v8  ;;  %v969_v62 = vadd.f32 %v5318_v52, %v963_v9  ;;  %v970_v50 = vadd.f32 %v5318_v52, %v964_v18  ;;  %v971_v1 = vadd.f32 %v5318_v52, %v965_v0 }
 0x102   :  { %v987_v16 = vstv %s5391_s10  ;;  %v997_v53 = vstv %s5407_s12  ;;  %v1007_v47 = vstv %s5409_s13  ;;  %v1057_v43 = vstv %s5393_s11  ;;  %s6357_s10 = sld [smem:[#allocation6 + $0x71]]  ;;  %s6359_s11 = sld [smem:[#allocation6 + $0x72]] }
 0x103   :  { %v5479_v17 = vmax.f32 %v968_v37, 0.0  ;;  %v5481_v22 = vmax.f32 %v969_v62, 0.0  ;;  %v5483_v41 = vmax.f32 %v970_v50, 0.0  ;;  %v5485_v61 = vmax.f32 %v971_v1, 0.0  ;;  %s6373_s12 = sld [smem:[#allocation6 + $0x73]]  ;;  %s6375_s13 = sld [smem:[#allocation6 + $0x74]] }
 0x104   :  { %v1017_v58 = vstv %s5415_s14  ;;  %v1027_v7 = vstv %s5417_s15  ;;  %v1037_v59 = vstv %s5423_s16  ;;  %v5491_v54 = vstv %s5425_s17  ;;  %s5961_s17 = sld [smem:[#allocation4 + $0xc]]  ;;  %s6381_s14 = sld [smem:[#allocation6 + $0x75]] }
 0x105   :  { %v978_v52 = vmul.f32 %v5321_v38, %v5479_v17  ;;  %v979_v34 = vmul.f32 %v5321_v38, %v5481_v22  ;;  %v980_v63 = vmul.f32 %v5321_v38, %v5483_v41  ;;  %v981_v29 = vmul.f32 %v5321_v38, %v5485_v61  ;;  %s6383_s15 = sld [smem:[#allocation6 + $0x76]]  ;;  %s6394_s16 = sld [smem:[#allocation6 + $0x77]] }
 0x106   :  { %v988_v32 = vmul.f32 %v987_v16, %v5479_v17  ;;  %v5503_v48 = vmul.f32 %v4729_v13, %v1057_v43  ;;  %v5506_v49 = vmul.f32 %v9884_v2, %v1057_v43  ;;  %v5509_v8 = vmul.f32 %v9885_v40, %v1057_v43 }
 0x107   :  { %v989_v9 = vmul.f32 %v987_v16, %v5481_v22  ;;  %v990_v18 = vmul.f32 %v987_v16, %v5483_v41  ;;  %v991_v0 = vmul.f32 %v987_v16, %v5485_v61  ;;  %v5515_v37 = vmul.f32 %v4756_v24, %v1057_v43 }
 0x108   :  { %v5518_v38 = vadd.f32 %v978_v52, %v5328_v30  ;;  %v5521_v13 = vadd.f32 %v979_v34, %v5331_v14  ;;  %v5524_v2 = vadd.f32 %v980_v63, %v5334_v19  ;;  %v5527_v40 = vadd.f32 %v981_v29, %v5337_v46 }
 0x109   :  { %v998_v62 = vmul.f32 %v997_v53, %v5479_v17  ;;  %v999_v50 = vmul.f32 %v997_v53, %v5481_v22  ;;  %v1000_v1 = vmul.f32 %v997_v53, %v5483_v41  ;;  %v1001_v24 = vmul.f32 %v997_v53, %v5485_v61 }
 0x10a   :  { %v5534_v30 = vadd.f32 %v988_v32, %v5348_v10  ;;  %v1008_v14 = vmul.f32 %v1007_v47, %v5479_v17  ;;  %v1009_v16 = vmul.f32 %v1007_v47, %v5481_v22  ;;  %v1010_v19 = vmul.f32 %v1007_v47, %v5483_v41 }
 0x10b   :  { %v5540_v46 = vadd.f32 %v989_v9, %v5351_v23  ;;  %v5543_v43 = vadd.f32 %v990_v18, %v5354_v4  ;;  %v5546_v52 = vadd.f32 %v991_v0, %v5357_v33  ;;  %v1011_v53 = vmul.f32 %v1007_v47, %v5485_v61 }
 0x10c   :  { %v5550_v10 = vadd.f32 %v998_v62, %v5360_v35  ;;  %v5553_v34 = vadd.f32 %v999_v50, %v5363_v42  ;;  %v5556_v63 = vadd.f32 %v1000_v1, %v5366_v25  ;;  %v5559_v23 = vadd.f32 %v1001_v24, %v5369_v5 }
 0x10d   :  { %v1018_v4 = vmul.f32 %v1017_v58, %v5479_v17  ;;  %v1019_v29 = vmul.f32 %v1017_v58, %v5481_v22  ;;  %v1020_v33 = vmul.f32 %v1017_v58, %v5483_v41  ;;  %v1021_v47 = vmul.f32 %v1017_v58, %v5485_v61 }
 0x10e   :  { %v5568_v35 = vadd.f32 %v1008_v14, %v5376_v45  ;;  %v5571_v42 = vadd.f32 %v1009_v16, %v5379_v44  ;;  %v5574_v25 = vadd.f32 %v1010_v19, %v5382_v26  ;;  %v1028_v5 = vmul.f32 %v1027_v7, %v5479_v17 }
 0x10f   :  { %v5580_v32 = vadd.f32 %v1011_v53, %v5385_v57  ;;  %v1029_v58 = vmul.f32 %v1027_v7, %v5481_v22  ;;  %v1030_v9 = vmul.f32 %v1027_v7, %v5483_v41  ;;  %v1031_v45 = vmul.f32 %v1027_v7, %v5485_v61 }
 0x110   :  { %v5590_v44 = vadd.f32 %v1018_v4, %v5396_v27  ;;  %v5593_v26 = vadd.f32 %v1019_v29, %v5399_v31  ;;  %v5596_v18 = vadd.f32 %v1020_v33, %v5402_v15  ;;  %v5599_v57 = vadd.f32 %v1021_v47, %v5405_v56 }
 0x111   :  { %v1038_v7 = vmul.f32 %v1037_v59, %v5479_v17  ;;  %v1039_v0 = vmul.f32 %v1037_v59, %v5481_v22  ;;  %v1040_v27 = vmul.f32 %v1037_v59, %v5483_v41  ;;  %v1041_v62 = vmul.f32 %v1037_v59, %v5485_v61 }
 0x112   :  { %v5614_v31 = vadd.f32 %v1028_v5, %v5428_v21  ;;  %v1048_v15 = vmul.f32 %v5491_v54, %v5479_v17  ;;  %v1049_v56 = vmul.f32 %v5491_v54, %v5481_v22  ;;  %v1050_v50 = vmul.f32 %v5491_v54, %v5483_v41 }
 0x113   :  { %v5627_v59 = vadd.f32 %v1029_v58, %v5431_v3  ;;  %v5630_v21 = vadd.f32 %v1030_v9, %v5434_v51  ;;  %v5633_v1 = vadd.f32 %v1031_v45, %v5437_v20  ;;  %v1051_v17 = vmul.f32 %v5491_v54, %v5485_v61 }
 0x114   :  { %v5642_v22 = vadd.f32 %v1038_v7, %v5440_v28  ;;  %v5645_v3 = vadd.f32 %v1039_v0, %v5443_v55  ;;  %v5648_v51 = vadd.f32 %v1040_v27, %v5446_v36  ;;  %v5651_v20 = vadd.f32 %v1041_v62, %v5449_v11 }
 0x115   :  { %v5654_v41 = vadd.f32 %v1048_v15, %v5460_v12  ;;  %v5657_v61 = vadd.f32 %v1049_v56, %v5463_v39  ;;  %v5660_v28 = vadd.f32 %v1050_v50, %v5466_v6  ;;  %v1063_v55 = vstv %s5565_s18  ;;  %s5973_s18 = sld [smem:[#allocation6 + $0x60]] }
 0x116   :  { %v1064_v36 = vadd.f32 %v1063_v55, %v5503_v48  ;;  %v1065_v54 = vadd.f32 %v1063_v55, %v5506_v49  ;;  %v1066_v11 = vadd.f32 %v1063_v55, %v5509_v8  ;;  %v1067_v12 = vadd.f32 %v1063_v55, %v5515_v37 }
 0x117   :  { %v5668_v24 = vadd.f32 %v1051_v17, %v5469_v60  ;;  %v1073_v39 = vstv %s5577_s19  ;;  %v1083_v14 = vstv %s5585_s20  ;;  %v1093_v6 = vstv %s5587_s21  ;;  %s5981_s19 = sld [smem:[#allocation6 + $0x61]]  ;;  %s5983_s20 = sld [smem:[#allocation6 + $0x62]] }
 0x118   :  { %v5673_v16 = vmax.f32 %v1064_v36, 0.0  ;;  %v5675_v19 = vmax.f32 %v1065_v54, 0.0  ;;  %v5677_v48 = vmax.f32 %v1066_v11, 0.0  ;;  %v5679_v49 = vmax.f32 %v1067_v12, 0.0  ;;  %s5997_s21 = sld [smem:[#allocation6 + $0x63]] }
 0x119   :  { %v1103_v8 = vstv %s5601_s22  ;;  %v1113_v37 = vstv %s5603_s23  ;;  %v1123_v53 = vstv %s5609_s24  ;;  %v1133_v60 = vstv %s5611_s25  ;;  %s5999_s22 = sld [smem:[#allocation6 + $0x64]]  ;;  %s6005_s23 = sld [smem:[#allocation6 + $0x65]] }
 0x11a   :  { %v1074_v4 = vmul.f32 %v1073_v39, %v5673_v16  ;;  %v1075_v29 = vmul.f32 %v1073_v39, %v5675_v19  ;;  %v1076_v33 = vmul.f32 %v1073_v39, %v5677_v48  ;;  %v1077_v47 = vmul.f32 %v1073_v39, %v5679_v49  ;;  %s6007_s24 = sld [smem:[#allocation6 + $0x66]]  ;;  %s6018_s25 = sld [smem:[#allocation6 + $0x67]] }
 0x11b   :  { %v1143_v5 = vstv %s5622_s26  ;;  %v5691_v58 = vstv %s5624_s2  ;;  %v5694_v9 = vstv %s5637_s1  ;;  %v5697_v45 = vstv %s5639_s27  ;;  %s6020_s26 = sld [smem:[#allocation2 + $0xd]]  ;;  %s6035_s1 = sld [smem:[#allocation6 + $0x68]] }
 0x11c   :  { %v1084_v7 = vmul.f32 %v1083_v14, %v5673_v16  ;;  %v1085_v0 = vmul.f32 %v1083_v14, %v5675_v19  ;;  %v1086_v27 = vmul.f32 %v1083_v14, %v5677_v48  ;;  %v1087_v62 = vmul.f32 %v1083_v14, %v5679_v49  ;;  %s6033_s2 = sld [smem:[#allocation4 + $0xd]]  ;;  %s6163_s27 = sld [smem:[#allocation6 + $0x69]] }
 0x11d   :  { %v5704_v15 = vadd.f32 %v1074_v4, %v5518_v38  ;;  %v5707_v56 = vadd.f32 %v1075_v29, %v5521_v13  ;;  %v5710_v50 = vadd.f32 %v1076_v33, %v5524_v2  ;;  %v5713_v17 = vadd.f32 %v1077_v47, %v5527_v40 }
 0x11e   :  { %v1094_v55 = vmul.f32 %v1093_v6, %v5673_v16  ;;  %v1095_v36 = vmul.f32 %v1093_v6, %v5675_v19  ;;  %v1096_v54 = vmul.f32 %v1093_v6, %v5677_v48  ;;  %v1097_v11 = vmul.f32 %v1093_v6, %v5679_v49 }
 0x11f   :  { %v1104_v38 = vmul.f32 %v1103_v8, %v5673_v16  ;;  %v1105_v12 = vmul.f32 %v1103_v8, %v5675_v19  ;;  %v1106_v13 = vmul.f32 %v1103_v8, %v5677_v48  ;;  %v1107_v2 = vmul.f32 %v1103_v8, %v5679_v49 }
 0x120   :  { %v5724_v39 = vadd.f32 %v1084_v7, %v5534_v30  ;;  %v5727_v40 = vadd.f32 %v1085_v0, %v5540_v46  ;;  %v5730_v14 = vadd.f32 %v1086_v27, %v5543_v43  ;;  %v5733_v4 = vadd.f32 %v1087_v62, %v5546_v52 }
 0x121   :  { %v5736_v6 = vadd.f32 %v1094_v55, %v5550_v10  ;;  %v5739_v29 = vadd.f32 %v1095_v36, %v5553_v34  ;;  %v5742_v8 = vadd.f32 %v1096_v54, %v5556_v63  ;;  %v5745_v30 = vadd.f32 %v1097_v11, %v5559_v23 }
 0x122   :  { %v1114_v46 = vmul.f32 %v1113_v37, %v5673_v16  ;;  %v1115_v43 = vmul.f32 %v1113_v37, %v5675_v19  ;;  %v1116_v33 = vmul.f32 %v1113_v37, %v5677_v48  ;;  %v1117_v52 = vmul.f32 %v1113_v37, %v5679_v49 }
 0x123   :  { %v5752_v10 = vadd.f32 %v1104_v38, %v5568_v35  ;;  %v5755_v34 = vadd.f32 %v1105_v12, %v5571_v42  ;;  %v5758_v63 = vadd.f32 %v1106_v13, %v5574_v25  ;;  %v5761_v23 = vadd.f32 %v1107_v2, %v5580_v32 }
 0x124   :  { %v1124_v47 = vmul.f32 %v1123_v53, %v5673_v16  ;;  %v1125_v7 = vmul.f32 %v1123_v53, %v5675_v19  ;;  %v1126_v0 = vmul.f32 %v1123_v53, %v5677_v48  ;;  %v1127_v37 = vmul.f32 %v1123_v53, %v5679_v49 }
 0x125   :  { %v5772_v35 = vadd.f32 %v1114_v46, %v5590_v44  ;;  %v5775_v42 = vadd.f32 %v1115_v43, %v5593_v26  ;;  %v5778_v25 = vadd.f32 %v1116_v33, %v5596_v18  ;;  %v5781_v32 = vadd.f32 %v1117_v52, %v5599_v57 }
 0x126   :  { %v1134_v53 = vmul.f32 %v1133_v60, %v5673_v16  ;;  %v1135_v27 = vmul.f32 %v1133_v60, %v5675_v19  ;;  %v1136_v44 = vmul.f32 %v1133_v60, %v5677_v48  ;;  %v1137_v62 = vmul.f32 %v1133_v60, %v5679_v49 }
 0x127   :  { %v1144_v26 = vmul.f32 %v1143_v5, %v5673_v16  ;;  %v1145_v18 = vmul.f32 %v1143_v5, %v5675_v19  ;;  %v1146_v57 = vmul.f32 %v1143_v5, %v5677_v48  ;;  %v1147_v55 = vmul.f32 %v1143_v5, %v5679_v49 }
 0x128   :  { %v5804_v36 = vadd.f32 %v1124_v47, %v5614_v31  ;;  %v5807_v60 = vadd.f32 %v1125_v7, %v5627_v59  ;;  %v5810_v54 = vadd.f32 %v1126_v0, %v5630_v21  ;;  %v5813_v16 = vadd.f32 %v1127_v37, %v5633_v1  ;;  %v5830_v59 = vld [vmem:[%s9836_s0] sm:$0xff]  ;;  %v5837_v1 = vld [vmem:[%s9836_s0 + $0x8] sm:$0xff] }
 0x129   :  { %v5816_v19 = vadd.f32 %v1134_v53, %v5642_v22  ;;  %v5819_v48 = vadd.f32 %v1135_v27, %v5645_v3  ;;  %v5822_v49 = vadd.f32 %v1136_v44, %v5648_v51  ;;  %v5825_v31 = vadd.f32 %v1137_v62, %v5651_v20  ;;  %9886 = vst [vmem:[#allocation12_spill] sm:$0xff] %v5837_v1  ;;  %v5844_v3 = vld [vmem:[%s9836_s0 + $0x10] sm:$0xff]  ;;  %v5851_v20 = vld [vmem:[%s9836_s0 + $0x18] sm:$0xff] }
 0x12a   :  { %v1154_v21 = vmul.f32 %v5830_v59, %v5691_v58  ;;  %v1155_v22 = vmul.f32 %v5837_v1, %v5691_v58  ;;  %9887 = vst [vmem:[#allocation13_spill] sm:$0xff] %v5844_v3  ;;  %v1156_v51 = vmul.f32 %v5844_v3, %v5691_v58  ;;  %v1157_v5 = vmul.f32 %v5851_v20, %v5691_v58 }
 0x12b   :  { %v5856_v11 = vadd.f32 %v1144_v26, %v5654_v41  ;;  %v5859_v38 = vadd.f32 %v1145_v18, %v5657_v61  ;;  %v5862_v12 = vadd.f32 %v1146_v57, %v5660_v28  ;;  %v5865_v13 = vadd.f32 %v1147_v55, %v5668_v24 }
 0x12c   :  { %v1160_v2 = vadd.f32 %v5694_v9, %v1154_v21  ;;  %v1161_v58 = vadd.f32 %v5694_v9, %v1155_v22  ;;  %v1162_v41 = vadd.f32 %v5694_v9, %v1156_v51  ;;  %v1163_v46 = vadd.f32 %v5694_v9, %v1157_v5 }
 0x12d   :  { %v1179_v43 = vstv %s5767_s28  ;;  %v1189_v61 = vstv %s5783_s30  ;;  %v1199_v33 = vstv %s5785_s6  ;;  %v1249_v52 = vstv %s5769_s29  ;;  %s6165_s28 = sld [smem:[#allocation2 + $0xe]]  ;;  %s6179_s29 = sld [smem:[#allocation6 + $0x6a]] }
 0x12e   :  { %v5875_v47 = vmax.f32 %v1160_v2, 0.0  ;;  %v5877_v28 = vmax.f32 %v1161_v58, 0.0  ;;  %v5879_v7 = vmax.f32 %v1162_v41, 0.0  ;;  %v5881_v24 = vmax.f32 %v1163_v46, 0.0  ;;  %s6181_s30 = sld [smem:[#allocation6 + $0x6b]]  ;;  %s6187_s6 = sld [smem:[#allocation6 + $0x6c]] }
 0x12f   :  { %v1209_v0 = vstv %s5791_s7  ;;  %v1219_v37 = vstv %s5793_s8  ;;  %v1229_v53 = vstv %s5799_s9  ;;  %v5887_v27 = vstv %s5801_s3  ;;  %s6189_s7 = sld [smem:[#allocation6 + $0x6d]]  ;;  %s6195_s8 = sld [smem:[#allocation6 + $0x6e]] }
 0x130   :  { %v1170_v9 = vmul.f32 %v5697_v45, %v5875_v47  ;;  %v1171_v44 = vmul.f32 %v5697_v45, %v5877_v28  ;;  %v1172_v62 = vmul.f32 %v5697_v45, %v5879_v7  ;;  %v1173_v26 = vmul.f32 %v5697_v45, %v5881_v24  ;;  %s6197_s9 = sld [smem:[#allocation6 + $0x6f]]  ;;  %s6337_s3 = sld [smem:[#allocation4 + $0xe]] }
 0x131   :  { %v1180_v18 = vmul.f32 %v1179_v43, %v5875_v47  ;;  %v5899_v57 = vmul.f32 %v5830_v59, %v1249_v52  ;;  %v5902_v55 = vmul.f32 %v5837_v1, %v1249_v52  ;;  %v5905_v21 = vmul.f32 %v5844_v3, %v1249_v52 }
 0x132   :  { %v1181_v22 = vmul.f32 %v1179_v43, %v5877_v28  ;;  %v1182_v51 = vmul.f32 %v1179_v43, %v5879_v7  ;;  %v1183_v5 = vmul.f32 %v1179_v43, %v5881_v24  ;;  %v5911_v2 = vmul.f32 %v5851_v20, %v1249_v52 }
 0x133   :  { %v5914_v45 = vadd.f32 %v1170_v9, %v5704_v15  ;;  %v5917_v58 = vadd.f32 %v1171_v44, %v5707_v56  ;;  %v5920_v41 = vadd.f32 %v1172_v62, %v5710_v50  ;;  %v5923_v46 = vadd.f32 %v1173_v26, %v5713_v17 }
 0x134   :  { %v1190_v3 = vmul.f32 %v1189_v61, %v5875_v47  ;;  %v1191_v1 = vmul.f32 %v1189_v61, %v5877_v28  ;;  %v1192_v43 = vmul.f32 %v1189_v61, %v5879_v7  ;;  %v1193_v52 = vmul.f32 %v1189_v61, %v5881_v24 }
 0x135   :  { %v5930_v15 = vadd.f32 %v1180_v18, %v5724_v39  ;;  %v1200_v56 = vmul.f32 %v1199_v33, %v5875_v47  ;;  %v1201_v9 = vmul.f32 %v1199_v33, %v5877_v28  ;;  %v1202_v50 = vmul.f32 %v1199_v33, %v5879_v7 }
 0x136   :  { %v5936_v17 = vadd.f32 %v1181_v22, %v5727_v40  ;;  %v5939_v44 = vadd.f32 %v1182_v51, %v5730_v14  ;;  %v5942_v62 = vadd.f32 %v1183_v5, %v5733_v4  ;;  %v1203_v61 = vmul.f32 %v1199_v33, %v5881_v24 }
 0x137   :  { %v5946_v39 = vadd.f32 %v1190_v3, %v5736_v6  ;;  %v5949_v26 = vadd.f32 %v1191_v1, %v5739_v29  ;;  %v5952_v18 = vadd.f32 %v1192_v43, %v5742_v8  ;;  %v5955_v40 = vadd.f32 %v1193_v52, %v5745_v30 }
 0x138   :  { %v1210_v14 = vmul.f32 %v1209_v0, %v5875_v47  ;;  %v1211_v22 = vmul.f32 %v1209_v0, %v5877_v28  ;;  %v1212_v4 = vmul.f32 %v1209_v0, %v5879_v7  ;;  %v1213_v33 = vmul.f32 %v1209_v0, %v5881_v24 }
 0x139   :  { %v5964_v6 = vadd.f32 %v1200_v56, %v5752_v10  ;;  %v5967_v29 = vadd.f32 %v1201_v9, %v5755_v34  ;;  %v5970_v8 = vadd.f32 %v1202_v50, %v5758_v63  ;;  %v1220_v30 = vmul.f32 %v1219_v37, %v5875_v47 }
 0x13a   :  { %v5976_v1 = vadd.f32 %v1203_v61, %v5761_v23  ;;  %v1221_v3 = vmul.f32 %v1219_v37, %v5877_v28  ;;  %v1222_v0 = vmul.f32 %v1219_v37, %v5879_v7  ;;  %v1223_v10 = vmul.f32 %v1219_v37, %v5881_v24 }
 0x13b   :  { %v5986_v34 = vadd.f32 %v1210_v14, %v5772_v35  ;;  %v5989_v63 = vadd.f32 %v1211_v22, %v5775_v42  ;;  %v5992_v51 = vadd.f32 %v1212_v4, %v5778_v25  ;;  %v5995_v23 = vadd.f32 %v1213_v33, %v5781_v32 }
 0x13c   :  { %v1230_v37 = vmul.f32 %v1229_v53, %v5875_v47  ;;  %v1231_v5 = vmul.f32 %v1229_v53, %v5877_v28  ;;  %v1232_v35 = vmul.f32 %v1229_v53, %v5879_v7  ;;  %v1233_v43 = vmul.f32 %v1229_v53, %v5881_v24 }
 0x13d   :  { %v6010_v42 = vadd.f32 %v1220_v30, %v5804_v36  ;;  %v1240_v25 = vmul.f32 %v5887_v27, %v5875_v47  ;;  %v1241_v32 = vmul.f32 %v5887_v27, %v5877_v28  ;;  %v1242_v52 = vmul.f32 %v5887_v27, %v5879_v7 }
 0x13e   :  { %v6023_v53 = vadd.f32 %v1221_v3, %v5807_v60  ;;  %v6026_v36 = vadd.f32 %v1222_v0, %v5810_v54  ;;  %v6029_v56 = vadd.f32 %v1223_v10, %v5813_v16  ;;  %v1243_v47 = vmul.f32 %v5887_v27, %v5881_v24 }
 0x13f   :  { %v6038_v28 = vadd.f32 %v1230_v37, %v5816_v19  ;;  %v6041_v60 = vadd.f32 %v1231_v5, %v5819_v48  ;;  %v6044_v54 = vadd.f32 %v1232_v35, %v5822_v49  ;;  %v6047_v16 = vadd.f32 %v1233_v43, %v5825_v31 }
 0x140   :  { %v6050_v7 = vadd.f32 %v1240_v25, %v5856_v11  ;;  %v6053_v24 = vadd.f32 %v1241_v32, %v5859_v38  ;;  %v6056_v19 = vadd.f32 %v1242_v52, %v5862_v12  ;;  %v1255_v48 = vstv %s5961_s17  ;;  %s6396_s17 = sld [smem:[#allocation2 + $0xf]] }
 0x141   :  { %v1256_v49 = vadd.f32 %v1255_v48, %v5899_v57  ;;  %v1257_v27 = vadd.f32 %v1255_v48, %v5902_v55  ;;  %v1258_v31 = vadd.f32 %v1255_v48, %v5905_v21  ;;  %v1259_v11 = vadd.f32 %v1255_v48, %v5911_v2 }
 0x142   :  { %v6064_v9 = vadd.f32 %v1243_v47, %v5865_v13  ;;  %v1265_v38 = vstv %s5973_s18  ;;  %v1275_v50 = vstv %s5981_s19  ;;  %v1285_v12 = vstv %s5983_s20  ;;  %s6409_s18 = sld [smem:[#allocation4 + $0xf]]  ;;  %s6411_s19 = sld [smem:[#allocation6 + $0x78]] }
 0x143   :  { %v6069_v61 = vmax.f32 %v1256_v49, 0.0  ;;  %v6071_v14 = vmax.f32 %v1257_v27, 0.0  ;;  %v6073_v57 = vmax.f32 %v1258_v31, 0.0  ;;  %v6075_v55 = vmax.f32 %v1259_v11, 0.0  ;;  %s6539_s20 = sld [smem:[#allocation6 + $0x79]] }
 0x144   :  { %v1295_v21 = vstv %s5997_s21  ;;  %v1305_v2 = vstv %s5999_s22  ;;  %v1315_v22 = vstv %s6005_s23  ;;  %v1325_v13 = vstv %s6007_s24  ;;  %s6541_s21 = sld [smem:[#allocation2 + $0x10]]  ;;  %s6555_s22 = sld [smem:[#allocation6 + $0x7a]] }
 0x145   :  { %v1266_v4 = vmul.f32 %v1265_v38, %v6069_v61  ;;  %v1267_v33 = vmul.f32 %v1265_v38, %v6071_v14  ;;  %v1268_v30 = vmul.f32 %v1265_v38, %v6073_v57  ;;  %v1269_v3 = vmul.f32 %v1265_v38, %v6075_v55  ;;  %s6557_s23 = sld [smem:[#allocation6 + $0x7b]]  ;;  %s6563_s24 = sld [smem:[#allocation6 + $0x7c]] }
 0x146   :  { %v1335_v0 = vstv %s6018_s25  ;;  %v6087_v10 = vstv %s6020_s26  ;;  %v6090_v37 = vstv %s6033_s2  ;;  %v6093_v5 = vstv %s6035_s1  ;;  %s6565_s25 = sld [smem:[#allocation6 + $0x7d]]  ;;  %s6571_s26 = sld [smem:[#allocation6 + $0x7e]] }
 0x147   :  { %v1276_v35 = vmul.f32 %v1275_v50, %v6069_v61  ;;  %v1277_v43 = vmul.f32 %v1275_v50, %v6071_v14  ;;  %v1278_v25 = vmul.f32 %v1275_v50, %v6073_v57  ;;  %v1279_v32 = vmul.f32 %v1275_v50, %v6075_v55  ;;  %s6573_s2 = sld [smem:[#allocation6 + $0x7f]]  ;;  %s6713_s1 = sld [smem:[#allocation4 + $0x10]] }
 0x148   :  { %v6100_v52 = vadd.f32 %v1266_v4, %v5914_v45  ;;  %v6103_v47 = vadd.f32 %v1267_v33, %v5917_v58  ;;  %v6106_v48 = vadd.f32 %v1268_v30, %v5920_v41  ;;  %v6109_v49 = vadd.f32 %v1269_v3, %v5923_v46 }
 0x149   :  { %v1286_v27 = vmul.f32 %v1285_v12, %v6069_v61  ;;  %v1287_v31 = vmul.f32 %v1285_v12, %v6071_v14  ;;  %v1288_v11 = vmul.f32 %v1285_v12, %v6073_v57  ;;  %v1289_v38 = vmul.f32 %v1285_v12, %v6075_v55 }
 0x14a   :  { %v1296_v45 = vmul.f32 %v1295_v21, %v6069_v61  ;;  %v1297_v50 = vmul.f32 %v1295_v21, %v6071_v14  ;;  %v1298_v58 = vmul.f32 %v1295_v21, %v6073_v57  ;;  %v1299_v41 = vmul.f32 %v1295_v21, %v6075_v55 }
 0x14b   :  { %v6120_v4 = vadd.f32 %v1276_v35, %v5930_v15  ;;  %v6123_v46 = vadd.f32 %v1277_v43, %v5936_v17  ;;  %v6126_v33 = vadd.f32 %v1278_v25, %v5939_v44  ;;  %v6129_v30 = vadd.f32 %v1279_v32, %v5942_v62 }
 0x14c   :  { %v6132_v12 = vadd.f32 %v1286_v27, %v5946_v39  ;;  %v6135_v3 = vadd.f32 %v1287_v31, %v5949_v26  ;;  %v6138_v21 = vadd.f32 %v1288_v11, %v5952_v18  ;;  %v6141_v15 = vadd.f32 %v1289_v38, %v5955_v40 }
 0x14d   :  { %v1306_v17 = vmul.f32 %v1305_v2, %v6069_v61  ;;  %v1307_v44 = vmul.f32 %v1305_v2, %v6071_v14  ;;  %v1308_v35 = vmul.f32 %v1305_v2, %v6073_v57  ;;  %v1309_v62 = vmul.f32 %v1305_v2, %v6075_v55 }
 0x14e   :  { %v6148_v39 = vadd.f32 %v1296_v45, %v5964_v6  ;;  %v6151_v26 = vadd.f32 %v1297_v50, %v5967_v29  ;;  %v6154_v18 = vadd.f32 %v1298_v58, %v5970_v8  ;;  %v6157_v40 = vadd.f32 %v1299_v41, %v5976_v1 }
 0x14f   :  { %v1316_v43 = vmul.f32 %v1315_v22, %v6069_v61  ;;  %v1317_v25 = vmul.f32 %v1315_v22, %v6071_v14  ;;  %v1318_v32 = vmul.f32 %v1315_v22, %v6073_v57  ;;  %v1319_v2 = vmul.f32 %v1315_v22, %v6075_v55 }
 0x150   :  { %v6168_v6 = vadd.f32 %v1306_v17, %v5986_v34  ;;  %v6171_v29 = vadd.f32 %v1307_v44, %v5989_v63  ;;  %v6174_v8 = vadd.f32 %v1308_v35, %v5992_v51  ;;  %v6177_v1 = vadd.f32 %v1309_v62, %v5995_v23 }
 0x151   :  { %v1326_v22 = vmul.f32 %v1325_v13, %v6069_v61  ;;  %v1327_v27 = vmul.f32 %v1325_v13, %v6071_v14  ;;  %v1328_v34 = vmul.f32 %v1325_v13, %v6073_v57  ;;  %v1329_v31 = vmul.f32 %v1325_v13, %v6075_v55 }
 0x152   :  { %v1336_v63 = vmul.f32 %v1335_v0, %v6069_v61  ;;  %v1337_v51 = vmul.f32 %v1335_v0, %v6071_v14  ;;  %v1338_v23 = vmul.f32 %v1335_v0, %v6073_v57  ;;  %v1339_v11 = vmul.f32 %v1335_v0, %v6075_v55  ;;  %v9889_v55 = vld [vmem:[#allocation13_spill] sm:$0xff] }
 0x153   :  { %v6200_v38 = vadd.f32 %v1316_v43, %v6010_v42  ;;  %v6203_v13 = vadd.f32 %v1317_v25, %v6023_v53  ;;  %v6206_v45 = vadd.f32 %v1318_v32, %v6026_v36  ;;  %v6209_v61 = vadd.f32 %v1319_v2, %v6029_v56  ;;  %v9888_v56 = vld [vmem:[#allocation12_spill] sm:$0xff] }
 0x154   :  { %v6212_v14 = vadd.f32 %v1326_v22, %v6038_v28  ;;  %v6215_v57 = vadd.f32 %v1327_v27, %v6041_v60  ;;  %v6218_v42 = vadd.f32 %v1328_v34, %v6044_v54  ;;  %v6221_v53 = vadd.f32 %v1329_v31, %v6047_v16 }
 0x155   :  { %v1346_v36 = vmul.f32 %v5830_v59, %v6087_v10  ;;  %v1347_v28 = vmul.f32 %v9888_v56, %v6087_v10  ;;  %v1348_v0 = vmul.f32 %v9889_v55, %v6087_v10  ;;  %v1349_v60 = vmul.f32 %v5851_v20, %v6087_v10 }
 0x156   :  { %v6232_v54 = vadd.f32 %v1336_v63, %v6050_v7  ;;  %v6235_v16 = vadd.f32 %v1337_v51, %v6053_v24  ;;  %v6238_v50 = vadd.f32 %v1338_v23, %v6056_v19  ;;  %v6241_v58 = vadd.f32 %v1339_v11, %v6064_v9 }
 0x157   :  { %v1352_v41 = vadd.f32 %v6090_v37, %v1346_v36  ;;  %v1353_v10 = vadd.f32 %v6090_v37, %v1347_v28  ;;  %v1354_v7 = vadd.f32 %v6090_v37, %v1348_v0  ;;  %v1355_v17 = vadd.f32 %v6090_v37, %v1349_v60 }
 0x158   :  { %v1371_v44 = vstv %s6163_s27  ;;  %v1381_v24 = vstv %s6179_s29  ;;  %v1391_v35 = vstv %s6181_s30  ;;  %v1441_v62 = vstv %s6165_s28  ;;  %s6725_s27 = sld [smem:[#allocation6 + $0x80]]  ;;  %s6733_s28 = sld [smem:[#allocation6 + $0x81]] }
 0x159   :  { %v6251_v43 = vmax.f32 %v1352_v41, 0.0  ;;  %v6253_v19 = vmax.f32 %v1353_v10, 0.0  ;;  %v6255_v25 = vmax.f32 %v1354_v7, 0.0  ;;  %v6257_v9 = vmax.f32 %v1355_v17, 0.0  ;;  %s6735_s29 = sld [smem:[#allocation6 + $0x82]]  ;;  %s6749_s30 = sld [smem:[#allocation6 + $0x83]] }
 0x15a   :  { %v1401_v32 = vstv %s6187_s6  ;;  %v1411_v2 = vstv %s6189_s7  ;;  %v1421_v22 = vstv %s6195_s8  ;;  %v6263_v27 = vstv %s6197_s9  ;;  %s6751_s6 = sld [smem:[#allocation6 + $0x84]]  ;;  %s6757_s7 = sld [smem:[#allocation6 + $0x85]] }
 0x15b   :  { %v1362_v37 = vmul.f32 %v6093_v5, %v6251_v43  ;;  %v1363_v34 = vmul.f32 %v6093_v5, %v6253_v19  ;;  %v1364_v31 = vmul.f32 %v6093_v5, %v6255_v25  ;;  %v1365_v63 = vmul.f32 %v6093_v5, %v6257_v9  ;;  %s6759_s8 = sld [smem:[#allocation6 + $0x86]]  ;;  %s6770_s9 = sld [smem:[#allocation6 + $0x87]] }
 0x15c   :  { %v1372_v51 = vmul.f32 %v1371_v44, %v6251_v43  ;;  %v6275_v23 = vmul.f32 %v5830_v59, %v1441_v62  ;;  %v6278_v11 = vmul.f32 %v9888_v56, %v1441_v62  ;;  %v6281_v36 = vmul.f32 %v9889_v55, %v1441_v62 }
 0x15d   :  { %v1373_v28 = vmul.f32 %v1371_v44, %v6253_v19  ;;  %v1374_v0 = vmul.f32 %v1371_v44, %v6255_v25  ;;  %v1375_v60 = vmul.f32 %v1371_v44, %v6257_v9  ;;  %v6287_v41 = vmul.f32 %v5851_v20, %v1441_v62 }
 0x15e   :  { %v6290_v5 = vadd.f32 %v1362_v37, %v6100_v52  ;;  %v6293_v10 = vadd.f32 %v1363_v34, %v6103_v47  ;;  %v6296_v7 = vadd.f32 %v1364_v31, %v6106_v48  ;;  %v6299_v17 = vadd.f32 %v1365_v63, %v6109_v49 }
 0x15f   :  { %v1382_v55 = vmul.f32 %v1381_v24, %v6251_v43  ;;  %v1383_v56 = vmul.f32 %v1381_v24, %v6253_v19  ;;  %v1384_v44 = vmul.f32 %v1381_v24, %v6255_v25  ;;  %v1385_v62 = vmul.f32 %v1381_v24, %v6257_v9 }
 0x160   :  { %v6306_v52 = vadd.f32 %v1372_v51, %v6120_v4  ;;  %v1392_v47 = vmul.f32 %v1391_v35, %v6251_v43  ;;  %v1393_v37 = vmul.f32 %v1391_v35, %v6253_v19  ;;  %v1394_v48 = vmul.f32 %v1391_v35, %v6255_v25 }
 0x161   :  { %v6312_v49 = vadd.f32 %v1373_v28, %v6123_v46  ;;  %v6315_v34 = vadd.f32 %v1374_v0, %v6126_v33  ;;  %v6318_v31 = vadd.f32 %v1375_v60, %v6129_v30  ;;  %v1395_v24 = vmul.f32 %v1391_v35, %v6257_v9 }
 0x162   :  { %v6322_v4 = vadd.f32 %v1382_v55, %v6132_v12  ;;  %v6325_v63 = vadd.f32 %v1383_v56, %v6135_v3  ;;  %v6328_v51 = vadd.f32 %v1384_v44, %v6138_v21  ;;  %v6331_v46 = vadd.f32 %v1385_v62, %v6141_v15 }
 0x163   :  { %v1402_v33 = vmul.f32 %v1401_v32, %v6251_v43  ;;  %v1403_v28 = vmul.f32 %v1401_v32, %v6253_v19  ;;  %v1404_v30 = vmul.f32 %v1401_v32, %v6255_v25  ;;  %v1405_v35 = vmul.f32 %v1401_v32, %v6257_v9 }
 0x164   :  { %v6340_v12 = vadd.f32 %v1392_v47, %v6148_v39  ;;  %v6343_v3 = vadd.f32 %v1393_v37, %v6151_v26  ;;  %v6346_v21 = vadd.f32 %v1394_v48, %v6154_v18  ;;  %v1412_v15 = vmul.f32 %v1411_v2, %v6251_v43 }
 0x165   :  { %v6352_v56 = vadd.f32 %v1395_v24, %v6157_v40  ;;  %v1413_v55 = vmul.f32 %v1411_v2, %v6253_v19  ;;  %v1414_v32 = vmul.f32 %v1411_v2, %v6255_v25  ;;  %v1415_v39 = vmul.f32 %v1411_v2, %v6257_v9 }
 0x166   :  { %v6362_v26 = vadd.f32 %v1402_v33, %v6168_v6  ;;  %v6365_v18 = vadd.f32 %v1403_v28, %v6171_v29  ;;  %v6368_v0 = vadd.f32 %v1404_v30, %v6174_v8  ;;  %v6371_v40 = vadd.f32 %v1405_v35, %v6177_v1 }
 0x167   :  { %v1422_v2 = vmul.f32 %v1421_v22, %v6251_v43  ;;  %v1423_v60 = vmul.f32 %v1421_v22, %v6253_v19  ;;  %v1424_v6 = vmul.f32 %v1421_v22, %v6255_v25  ;;  %v1425_v44 = vmul.f32 %v1421_v22, %v6257_v9 }
 0x168   :  { %v6386_v29 = vadd.f32 %v1412_v15, %v6200_v38  ;;  %v1432_v8 = vmul.f32 %v6263_v27, %v6251_v43  ;;  %v1433_v1 = vmul.f32 %v6263_v27, %v6253_v19  ;;  %v1434_v62 = vmul.f32 %v6263_v27, %v6255_v25 }
 0x169   :  { %v6399_v22 = vadd.f32 %v1413_v55, %v6203_v13  ;;  %v6402_v38 = vadd.f32 %v1414_v32, %v6206_v45  ;;  %v6405_v47 = vadd.f32 %v1415_v39, %v6209_v61  ;;  %v1435_v43 = vmul.f32 %v6263_v27, %v6257_v9 }
 0x16a   :  { %v6414_v19 = vadd.f32 %v1422_v2, %v6212_v14  ;;  %v6417_v13 = vadd.f32 %v1423_v60, %v6215_v57  ;;  %v6420_v45 = vadd.f32 %v1424_v6, %v6218_v42  ;;  %v6423_v61 = vadd.f32 %v1425_v44, %v6221_v53 }
 0x16b   :  { %v6426_v25 = vadd.f32 %v1432_v8, %v6232_v54  ;;  %v6429_v9 = vadd.f32 %v1433_v1, %v6235_v16  ;;  %v6432_v14 = vadd.f32 %v1434_v62, %v6238_v50  ;;  %v1447_v57 = vstv %s6337_s3  ;;  %s6772_s3 = sld [smem:[#allocation2 + $0x11]] }
 0x16c   :  { %v1448_v42 = vadd.f32 %v1447_v57, %v6275_v23  ;;  %v1449_v27 = vadd.f32 %v1447_v57, %v6278_v11  ;;  %v1450_v53 = vadd.f32 %v1447_v57, %v6281_v36  ;;  %v1451_v54 = vadd.f32 %v1447_v57, %v6287_v41 }
 0x16d   :  { %v6440_v37 = vadd.f32 %v1435_v43, %v6241_v58  ;;  %v1457_v16 = vstv %s6349_s4  ;;  %v1467_v48 = vstv %s6357_s10  ;;  %v1477_v50 = vstv %s6359_s11  ;;  %s6785_s4 = sld [smem:[#allocation4 + $0x11]]  ;;  %s6787_s10 = sld [smem:[#allocation6 + $0x88]] }
 0x16e   :  { %v6445_v24 = vmax.f32 %v1448_v42, 0.0  ;;  %v6447_v33 = vmax.f32 %v1449_v27, 0.0  ;;  %v6449_v23 = vmax.f32 %v1450_v53, 0.0  ;;  %v6451_v11 = vmax.f32 %v1451_v54, 0.0  ;;  %s6915_s11 = sld [smem:[#allocation6 + $0x89]] }
 0x16f   :  { %v1487_v36 = vstv %s6373_s12  ;;  %v1497_v41 = vstv %s6375_s13  ;;  %v1507_v28 = vstv %s6381_s14  ;;  %v1517_v58 = vstv %s6383_s15  ;;  %s6917_s12 = sld [smem:[#allocation2 + $0x12]]  ;;  %s6933_s14 = sld [smem:[#allocation6 + $0x8b]] }
 0x170   :  { %v1458_v30 = vmul.f32 %v1457_v16, %v6445_v24  ;;  %v1459_v35 = vmul.f32 %v1457_v16, %v6447_v33  ;;  %v1460_v15 = vmul.f32 %v1457_v16, %v6449_v23  ;;  %v1461_v55 = vmul.f32 %v1457_v16, %v6451_v11  ;;  %s6931_s13 = sld [smem:[#allocation6 + $0x8a]]  ;;  %s6939_s15 = sld [smem:[#allocation6 + $0x8c]] }
 0x171   :  { %v1527_v32 = vstv %s6394_s16  ;;  %v6463_v39 = vstv %s6396_s17  ;;  %v6466_v2 = vstv %s6409_s18  ;;  %v6469_v60 = vstv %s6411_s19  ;;  %s6941_s16 = sld [smem:[#allocation6 + $0x8d]]  ;;  %s6947_s17 = sld [smem:[#allocation6 + $0x8e]] }
 0x172   :  { %v1468_v6 = vmul.f32 %v1467_v48, %v6445_v24  ;;  %v1469_v44 = vmul.f32 %v1467_v48, %v6447_v33  ;;  %v1470_v8 = vmul.f32 %v1467_v48, %v6449_v23  ;;  %v1471_v1 = vmul.f32 %v1467_v48, %v6451_v11  ;;  %s6949_s18 = sld [smem:[#allocation6 + $0x8f]]  ;;  %s7497_s19 = sld [smem:[#allocation6 + $0xa0]] }
 0x173   :  { %v6476_v62 = vadd.f32 %v1458_v30, %v6290_v5  ;;  %v6479_v43 = vadd.f32 %v1459_v35, %v6293_v10  ;;  %v6482_v57 = vadd.f32 %v1460_v15, %v6296_v7  ;;  %v6485_v42 = vadd.f32 %v1461_v55, %v6299_v17 }
 0x174   :  { %v1478_v27 = vmul.f32 %v1477_v50, %v6445_v24  ;;  %v1479_v53 = vmul.f32 %v1477_v50, %v6447_v33  ;;  %v1480_v54 = vmul.f32 %v1477_v50, %v6449_v23  ;;  %v1481_v16 = vmul.f32 %v1477_v50, %v6451_v11 }
 0x175   :  { %v1488_v5 = vmul.f32 %v1487_v36, %v6445_v24  ;;  %v1489_v48 = vmul.f32 %v1487_v36, %v6447_v33  ;;  %v1490_v10 = vmul.f32 %v1487_v36, %v6449_v23  ;;  %v1491_v7 = vmul.f32 %v1487_v36, %v6451_v11 }
 0x176   :  { %v6496_v30 = vadd.f32 %v1468_v6, %v6306_v52  ;;  %v6499_v17 = vadd.f32 %v1469_v44, %v6312_v49  ;;  %v6502_v35 = vadd.f32 %v1470_v8, %v6315_v34  ;;  %v6505_v15 = vadd.f32 %v1471_v1, %v6318_v31 }
 0x177   :  { %v6508_v50 = vadd.f32 %v1478_v27, %v6322_v4  ;;  %v6511_v55 = vadd.f32 %v1479_v53, %v6325_v63  ;;  %v6514_v36 = vadd.f32 %v1480_v54, %v6328_v51  ;;  %v6517_v52 = vadd.f32 %v1481_v16, %v6331_v46 }
 0x178   :  { %v1498_v49 = vmul.f32 %v1497_v41, %v6445_v24  ;;  %v1499_v34 = vmul.f32 %v1497_v41, %v6447_v33  ;;  %v1500_v6 = vmul.f32 %v1497_v41, %v6449_v23  ;;  %v1501_v31 = vmul.f32 %v1497_v41, %v6451_v11 }
 0x179   :  { %v6524_v4 = vadd.f32 %v1488_v5, %v6340_v12  ;;  %v6527_v63 = vadd.f32 %v1489_v48, %v6343_v3  ;;  %v6530_v51 = vadd.f32 %v1490_v10, %v6346_v21  ;;  %v6533_v46 = vadd.f32 %v1491_v7, %v6352_v56 }
 0x17a   :  { %v1508_v44 = vmul.f32 %v1507_v28, %v6445_v24  ;;  %v1509_v8 = vmul.f32 %v1507_v28, %v6447_v33  ;;  %v1510_v1 = vmul.f32 %v1507_v28, %v6449_v23  ;;  %v1511_v41 = vmul.f32 %v1507_v28, %v6451_v11 }
 0x17b   :  { %v6544_v12 = vadd.f32 %v1498_v49, %v6362_v26  ;;  %v6547_v3 = vadd.f32 %v1499_v34, %v6365_v18  ;;  %v6550_v21 = vadd.f32 %v1500_v6, %v6368_v0  ;;  %v6553_v56 = vadd.f32 %v1501_v31, %v6371_v40 }
 0x17c   :  { %v1518_v28 = vmul.f32 %v1517_v58, %v6445_v24  ;;  %v1519_v27 = vmul.f32 %v1517_v58, %v6447_v33  ;;  %v1520_v26 = vmul.f32 %v1517_v58, %v6449_v23  ;;  %v1521_v53 = vmul.f32 %v1517_v58, %v6451_v11 }
 0x17d   :  { %v1528_v18 = vmul.f32 %v1527_v32, %v6445_v24  ;;  %v1529_v0 = vmul.f32 %v1527_v32, %v6447_v33  ;;  %v1530_v40 = vmul.f32 %v1527_v32, %v6449_v23  ;;  %v1531_v54 = vmul.f32 %v1527_v32, %v6451_v11  ;;  %v9891_v11 = vld [vmem:[#allocation13_spill] sm:$0xff] }
 0x17e   :  { %v6576_v16 = vadd.f32 %v1508_v44, %v6386_v29  ;;  %v6579_v58 = vadd.f32 %v1509_v8, %v6399_v22  ;;  %v6582_v5 = vadd.f32 %v1510_v1, %v6402_v38  ;;  %v6585_v24 = vadd.f32 %v1511_v41, %v6405_v47  ;;  %v9890_v47 = vld [vmem:[#allocation12_spill] sm:$0xff] }
 0x17f   :  { %v6588_v33 = vadd.f32 %v1518_v28, %v6414_v19  ;;  %v6591_v23 = vadd.f32 %v1519_v27, %v6417_v13  ;;  %v6594_v29 = vadd.f32 %v1520_v26, %v6420_v45  ;;  %v6597_v22 = vadd.f32 %v1521_v53, %v6423_v61 }
 0x180   :  { %v1538_v38 = vmul.f32 %v5830_v59, %v6463_v39  ;;  %v1539_v19 = vmul.f32 %v9890_v47, %v6463_v39  ;;  %v1540_v32 = vmul.f32 %v9891_v11, %v6463_v39  ;;  %v1541_v13 = vmul.f32 %v5851_v20, %v6463_v39 }
 0x181   :  { %v6608_v45 = vadd.f32 %v1528_v18, %v6426_v25  ;;  %v6611_v61 = vadd.f32 %v1529_v0, %v6429_v9  ;;  %v6614_v48 = vadd.f32 %v1530_v40, %v6432_v14  ;;  %v6617_v10 = vadd.f32 %v1531_v54, %v6440_v37 }
 0x182   :  { %v1544_v7 = vadd.f32 %v6466_v2, %v1538_v38  ;;  %v1545_v39 = vadd.f32 %v6466_v2, %v1539_v19  ;;  %v1546_v25 = vadd.f32 %v6466_v2, %v1540_v32  ;;  %v1547_v49 = vadd.f32 %v6466_v2, %v1541_v13 }
 0x183   :  { %v1563_v34 = vstv %s6539_s20  ;;  %v1573_v9 = vstv %s6555_s22  ;;  %v1583_v6 = vstv %s6557_s23  ;;  %v1633_v31 = vstv %s6541_s21  ;;  %s7505_s20 = sld [smem:[#allocation6 + $0xa1]]  ;;  %s7507_s21 = sld [smem:[#allocation6 + $0xa2]] }
 0x184   :  { %v6627_v44 = vmax.f32 %v1544_v7, 0.0  ;;  %v6629_v14 = vmax.f32 %v1545_v39, 0.0  ;;  %v6631_v8 = vmax.f32 %v1546_v25, 0.0  ;;  %v6633_v37 = vmax.f32 %v1547_v49, 0.0  ;;  %s7521_s22 = sld [smem:[#allocation6 + $0xa3]]  ;;  %s7523_s23 = sld [smem:[#allocation6 + $0xa4]] }
 0x185   :  { %v1593_v1 = vstv %s6563_s24  ;;  %v1603_v41 = vstv %s6565_s25  ;;  %v1613_v28 = vstv %s6571_s26  ;;  %v6639_v27 = vstv %s6573_s2  ;;  %s7109_s2 = sld [smem:[#allocation4 + $0x12]]  ;;  %s7529_s24 = sld [smem:[#allocation6 + $0xa5]] }
 0x186   :  { %v1554_v2 = vmul.f32 %v6469_v60, %v6627_v44  ;;  %v1555_v26 = vmul.f32 %v6469_v60, %v6629_v14  ;;  %v1556_v53 = vmul.f32 %v6469_v60, %v6631_v8  ;;  %v1557_v18 = vmul.f32 %v6469_v60, %v6633_v37  ;;  %s7531_s25 = sld [smem:[#allocation6 + $0xa6]]  ;;  %s7542_s26 = sld [smem:[#allocation6 + $0xa7]] }
 0x187   :  { %v1564_v0 = vmul.f32 %v1563_v34, %v6627_v44  ;;  %v6651_v40 = vmul.f32 %v5830_v59, %v1633_v31  ;;  %v6654_v54 = vmul.f32 %v9890_v47, %v1633_v31  ;;  %v6657_v38 = vmul.f32 %v9891_v11, %v1633_v31 }
 0x188   :  { %v1565_v19 = vmul.f32 %v1563_v34, %v6629_v14  ;;  %v1566_v32 = vmul.f32 %v1563_v34, %v6631_v8  ;;  %v1567_v13 = vmul.f32 %v1563_v34, %v6633_v37  ;;  %v6663_v7 = vmul.f32 %v5851_v20, %v1633_v31 }
 0x189   :  { %v6666_v60 = vadd.f32 %v1554_v2, %v6476_v62  ;;  %v6669_v59 = vadd.f32 %v1555_v26, %v6479_v43  ;;  %v6672_v47 = vadd.f32 %v1556_v53, %v6482_v57  ;;  %v6675_v11 = vadd.f32 %v1557_v18, %v6485_v42 }
 0x18a   :  { %v1574_v39 = vmul.f32 %v1573_v9, %v6627_v44  ;;  %v1575_v25 = vmul.f32 %v1573_v9, %v6629_v14  ;;  %v1576_v49 = vmul.f32 %v1573_v9, %v6631_v8  ;;  %v1577_v20 = vmul.f32 %v1573_v9, %v6633_v37 }
 0x18b   :  { %v6682_v62 = vadd.f32 %v1564_v0, %v6496_v30  ;;  %v1584_v43 = vmul.f32 %v1583_v6, %v6627_v44  ;;  %v1585_v34 = vmul.f32 %v1583_v6, %v6629_v14  ;;  %v1586_v57 = vmul.f32 %v1583_v6, %v6631_v8 }
 0x18c   :  { %v6688_v42 = vadd.f32 %v1565_v19, %v6499_v17  ;;  %v6691_v31 = vadd.f32 %v1566_v32, %v6502_v35  ;;  %v6694_v2 = vadd.f32 %v1567_v13, %v6505_v15  ;;  %v1587_v9 = vmul.f32 %v1583_v6, %v6633_v37 }
 0x18d   :  { %v6698_v30 = vadd.f32 %v1574_v39, %v6508_v50  ;;  %v6701_v26 = vadd.f32 %v1575_v25, %v6511_v55  ;;  %v6704_v53 = vadd.f32 %v1576_v49, %v6514_v36  ;;  %v6707_v17 = vadd.f32 %v1577_v20, %v6517_v52 }
 0x18e   :  { %v1594_v35 = vmul.f32 %v1593_v1, %v6627_v44  ;;  %v1595_v18 = vmul.f32 %v1593_v1, %v6629_v14  ;;  %v1596_v15 = vmul.f32 %v1593_v1, %v6631_v8  ;;  %v1597_v6 = vmul.f32 %v1593_v1, %v6633_v37 }
 0x18f   :  { %v6716_v50 = vadd.f32 %v1584_v43, %v6524_v4  ;;  %v6719_v55 = vadd.f32 %v1585_v34, %v6527_v63  ;;  %v6722_v36 = vadd.f32 %v1586_v57, %v6530_v51  ;;  %v1604_v52 = vmul.f32 %v1603_v41, %v6627_v44 }
 0x190   :  { %v6728_v0 = vadd.f32 %v1587_v9, %v6533_v46  ;;  %v1605_v1 = vmul.f32 %v1603_v41, %v6629_v14  ;;  %v1606_v19 = vmul.f32 %v1603_v41, %v6631_v8  ;;  %v1607_v4 = vmul.f32 %v1603_v41, %v6633_v37 }
 0x191   :  { %v6738_v63 = vadd.f32 %v1594_v35, %v6544_v12  ;;  %v6741_v51 = vadd.f32 %v1595_v18, %v6547_v3  ;;  %v6744_v32 = vadd.f32 %v1596_v15, %v6550_v21  ;;  %v6747_v46 = vadd.f32 %v1597_v6, %v6553_v56 }
 0x192   :  { %v1614_v41 = vmul.f32 %v1613_v28, %v6627_v44  ;;  %v1615_v13 = vmul.f32 %v1613_v28, %v6629_v14  ;;  %v1616_v12 = vmul.f32 %v1613_v28, %v6631_v8  ;;  %v1617_v39 = vmul.f32 %v1613_v28, %v6633_v37 }
 0x193   :  { %v6762_v3 = vadd.f32 %v1604_v52, %v6576_v16  ;;  %v1624_v21 = vmul.f32 %v6639_v27, %v6627_v44  ;;  %v1625_v56 = vmul.f32 %v6639_v27, %v6629_v14  ;;  %v1626_v25 = vmul.f32 %v6639_v27, %v6631_v8 }
 0x194   :  { %v6775_v28 = vadd.f32 %v1605_v1, %v6579_v58  ;;  %v6778_v16 = vadd.f32 %v1606_v19, %v6582_v5  ;;  %v6781_v49 = vadd.f32 %v1607_v4, %v6585_v24  ;;  %v1627_v44 = vmul.f32 %v6639_v27, %v6633_v37 }
 0x195   :  { %v6790_v14 = vadd.f32 %v1614_v41, %v6588_v33  ;;  %v6793_v58 = vadd.f32 %v1615_v13, %v6591_v23  ;;  %v6796_v5 = vadd.f32 %v1616_v12, %v6594_v29  ;;  %v6799_v24 = vadd.f32 %v1617_v39, %v6597_v22 }
 0x196   :  { %v6802_v8 = vadd.f32 %v1624_v21, %v6608_v45  ;;  %v6805_v37 = vadd.f32 %v1625_v56, %v6611_v61  ;;  %v6808_v33 = vadd.f32 %v1626_v25, %v6614_v48  ;;  %v1639_v23 = vstv %s6713_s1  ;;  %s7121_s1 = sld [smem:[#allocation6 + $0x90]] }
 0x197   :  { %v1640_v29 = vadd.f32 %v1639_v23, %v6651_v40  ;;  %v1641_v27 = vadd.f32 %v1639_v23, %v6654_v54  ;;  %v1642_v22 = vadd.f32 %v1639_v23, %v6657_v38  ;;  %v1643_v45 = vadd.f32 %v1639_v23, %v6663_v7 }
 0x198   :  { %v6816_v20 = vadd.f32 %v1627_v44, %v6617_v10  ;;  %v1649_v61 = vstv %s6725_s27  ;;  %v1659_v43 = vstv %s6733_s28  ;;  %v1669_v48 = vstv %s6735_s29  ;;  %s7129_s27 = sld [smem:[#allocation6 + $0x91]]  ;;  %s7131_s28 = sld [smem:[#allocation6 + $0x92]] }
 0x199   :  { %v6821_v34 = vmax.f32 %v1640_v29, 0.0  ;;  %v6823_v57 = vmax.f32 %v1641_v27, 0.0  ;;  %v6825_v40 = vmax.f32 %v1642_v22, 0.0  ;;  %v6827_v54 = vmax.f32 %v1643_v45, 0.0  ;;  %s7145_s29 = sld [smem:[#allocation6 + $0x93]] }
 0x19a   :  { %v1679_v38 = vstv %s6749_s30  ;;  %v1689_v7 = vstv %s6751_s6  ;;  %v1699_v9 = vstv %s6757_s7  ;;  %v1709_v10 = vstv %s6759_s8  ;;  %s7147_s30 = sld [smem:[#allocation6 + $0x94]]  ;;  %s7153_s6 = sld [smem:[#allocation6 + $0x95]] }
 0x19b   :  { %v1650_v35 = vmul.f32 %v1649_v61, %v6821_v34  ;;  %v1651_v18 = vmul.f32 %v1649_v61, %v6823_v57  ;;  %v1652_v15 = vmul.f32 %v1649_v61, %v6825_v40  ;;  %v1653_v6 = vmul.f32 %v1649_v61, %v6827_v54  ;;  %s7155_s7 = sld [smem:[#allocation6 + $0x96]]  ;;  %s7166_s8 = sld [smem:[#allocation6 + $0x97]] }
 0x19c   :  { %v1719_v52 = vstv %s6770_s9  ;;  %v6839_v1 = vstv %s6772_s3  ;;  %v6842_v19 = vstv %s6785_s4  ;;  %v6845_v4 = vstv %s6787_s10  ;;  %s7168_s9 = sld [smem:[#allocation2 + $0x13]]  ;;  %s7183_s4 = sld [smem:[#allocation6 + $0x98]] }
 0x19d   :  { %v1660_v41 = vmul.f32 %v1659_v43, %v6821_v34  ;;  %v1661_v13 = vmul.f32 %v1659_v43, %v6823_v57  ;;  %v1662_v12 = vmul.f32 %v1659_v43, %v6825_v40  ;;  %v1663_v39 = vmul.f32 %v1659_v43, %v6827_v54  ;;  %s7181_s3 = sld [smem:[#allocation4 + $0x13]]  ;;  %s7311_s10 = sld [smem:[#allocation6 + $0x99]] }
 0x19e   :  { %v6852_v21 = vadd.f32 %v1650_v35, %v6666_v60  ;;  %v6855_v56 = vadd.f32 %v1651_v18, %v6669_v59  ;;  %v6858_v25 = vadd.f32 %v1652_v15, %v6672_v47  ;;  %v6861_v44 = vadd.f32 %v1653_v6, %v6675_v11 }
 0x19f   :  { %v1670_v23 = vmul.f32 %v1669_v48, %v6821_v34  ;;  %v1671_v29 = vmul.f32 %v1669_v48, %v6823_v57  ;;  %v1672_v27 = vmul.f32 %v1669_v48, %v6825_v40  ;;  %v1673_v22 = vmul.f32 %v1669_v48, %v6827_v54 }
 0x1a0   :  { %v1680_v60 = vmul.f32 %v1679_v38, %v6821_v34  ;;  %v1681_v45 = vmul.f32 %v1679_v38, %v6823_v57  ;;  %v1682_v59 = vmul.f32 %v1679_v38, %v6825_v40  ;;  %v1683_v47 = vmul.f32 %v1679_v38, %v6827_v54 }
 0x1a1   :  { %v6872_v61 = vadd.f32 %v1660_v41, %v6682_v62  ;;  %v6875_v11 = vadd.f32 %v1661_v13, %v6688_v42  ;;  %v6878_v43 = vadd.f32 %v1662_v12, %v6691_v31  ;;  %v6881_v35 = vadd.f32 %v1663_v39, %v6694_v2 }
 0x1a2   :  { %v6884_v48 = vadd.f32 %v1670_v23, %v6698_v30  ;;  %v6887_v18 = vadd.f32 %v1671_v29, %v6701_v26  ;;  %v6890_v38 = vadd.f32 %v1672_v27, %v6704_v53  ;;  %v6893_v62 = vadd.f32 %v1673_v22, %v6707_v17 }
 0x1a3   :  { %v1690_v42 = vmul.f32 %v1689_v7, %v6821_v34  ;;  %v1691_v31 = vmul.f32 %v1689_v7, %v6823_v57  ;;  %v1692_v15 = vmul.f32 %v1689_v7, %v6825_v40  ;;  %v1693_v2 = vmul.f32 %v1689_v7, %v6827_v54 }
 0x1a4   :  { %v6900_v30 = vadd.f32 %v1680_v60, %v6716_v50  ;;  %v6903_v26 = vadd.f32 %v1681_v45, %v6719_v55  ;;  %v6906_v53 = vadd.f32 %v1682_v59, %v6722_v36  ;;  %v6909_v17 = vadd.f32 %v1683_v47, %v6728_v0 }
 0x1a5   :  { %v1700_v6 = vmul.f32 %v1699_v9, %v6821_v34  ;;  %v1701_v41 = vmul.f32 %v1699_v9, %v6823_v57  ;;  %v1702_v13 = vmul.f32 %v1699_v9, %v6825_v40  ;;  %v1703_v7 = vmul.f32 %v1699_v9, %v6827_v54 }
 0x1a6   :  { %v6920_v50 = vadd.f32 %v1690_v42, %v6738_v63  ;;  %v6923_v55 = vadd.f32 %v1691_v31, %v6741_v51  ;;  %v6926_v36 = vadd.f32 %v1692_v15, %v6744_v32  ;;  %v6929_v0 = vadd.f32 %v1693_v2, %v6747_v46 }
 0x1a7   :  { %v1710_v9 = vmul.f32 %v1709_v10, %v6821_v34  ;;  %v1711_v12 = vmul.f32 %v1709_v10, %v6823_v57  ;;  %v1712_v63 = vmul.f32 %v1709_v10, %v6825_v40  ;;  %v1713_v39 = vmul.f32 %v1709_v10, %v6827_v54 }
 0x1a8   :  { %v1720_v51 = vmul.f32 %v1719_v52, %v6821_v34  ;;  %v1721_v32 = vmul.f32 %v1719_v52, %v6823_v57  ;;  %v1722_v46 = vmul.f32 %v1719_v52, %v6825_v40  ;;  %v1723_v23 = vmul.f32 %v1719_v52, %v6827_v54 }
 0x1a9   :  { %v6952_v29 = vadd.f32 %v1700_v6, %v6762_v3  ;;  %v6955_v10 = vadd.f32 %v1701_v41, %v6775_v28  ;;  %v6958_v27 = vadd.f32 %v1702_v13, %v6778_v16  ;;  %v6961_v34 = vadd.f32 %v1703_v7, %v6781_v49  ;;  %v6978_v28 = vld [vmem:[%s9836_s0] sm:$0xff]  ;;  %v6985_v49 = vld [vmem:[%s9836_s0 + $0x8] sm:$0xff] }
 0x1aa   :  { %v6964_v57 = vadd.f32 %v1710_v9, %v6790_v14  ;;  %v6967_v40 = vadd.f32 %v1711_v12, %v6793_v58  ;;  %v6970_v54 = vadd.f32 %v1712_v63, %v6796_v5  ;;  %v6973_v3 = vadd.f32 %v1713_v39, %v6799_v24  ;;  %9892 = vst [vmem:[#allocation12_spill] sm:$0xff] %v6985_v49  ;;  %v6992_v58 = vld [vmem:[%s9836_s0 + $0x10] sm:$0xff]  ;;  %v6999_v24 = vld [vmem:[%s9836_s0 + $0x18] sm:$0xff] }
 0x1ab   :  { %v1730_v16 = vmul.f32 %v6978_v28, %v6839_v1  ;;  %v1731_v14 = vmul.f32 %v6985_v49, %v6839_v1  ;;  %9893 = vst [vmem:[#allocation13_spill] sm:$0xff] %v6992_v58  ;;  %v1732_v5 = vmul.f32 %v6992_v58, %v6839_v1  ;;  %v1733_v52 = vmul.f32 %v6999_v24, %v6839_v1 }
 0x1ac   :  { %v7004_v22 = vadd.f32 %v1720_v51, %v6802_v8  ;;  %v7007_v60 = vadd.f32 %v1721_v32, %v6805_v37  ;;  %v7010_v45 = vadd.f32 %v1722_v46, %v6808_v33  ;;  %v7013_v59 = vadd.f32 %v1723_v23, %v6816_v20 }
 0x1ad   :  { %v1736_v47 = vadd.f32 %v6842_v19, %v1730_v16  ;;  %v1737_v1 = vadd.f32 %v6842_v19, %v1731_v14  ;;  %v1738_v8 = vadd.f32 %v6842_v19, %v1732_v5  ;;  %v1739_v42 = vadd.f32 %v6842_v19, %v1733_v52 }
 0x1ae   :  { %v1755_v31 = vstv %s6915_s11  ;;  %v1765_v37 = vstv %s6931_s13  ;;  %v1775_v15 = vstv %s6933_s14  ;;  %v1825_v2 = vstv %s6917_s12  ;;  %s7313_s11 = sld [smem:[#allocation2 + $0x14]]  ;;  %s7327_s12 = sld [smem:[#allocation6 + $0x9a]] }
 0x1af   :  { %v7023_v6 = vmax.f32 %v1736_v47, 0.0  ;;  %v7025_v33 = vmax.f32 %v1737_v1, 0.0  ;;  %v7027_v41 = vmax.f32 %v1738_v8, 0.0  ;;  %v7029_v20 = vmax.f32 %v1739_v42, 0.0  ;;  %s7329_s13 = sld [smem:[#allocation6 + $0x9b]]  ;;  %s7335_s14 = sld [smem:[#allocation6 + $0x9c]] }
 0x1b0   :  { %v1785_v13 = vstv %s6939_s15  ;;  %v1795_v7 = vstv %s6941_s16  ;;  %v1805_v9 = vstv %s6947_s17  ;;  %v7035_v12 = vstv %s6949_s18  ;;  %s7337_s15 = sld [smem:[#allocation6 + $0x9d]]  ;;  %s7343_s16 = sld [smem:[#allocation6 + $0x9e]] }
 0x1b1   :  { %v1746_v19 = vmul.f32 %v6845_v4, %v7023_v6  ;;  %v1747_v63 = vmul.f32 %v6845_v4, %v7025_v33  ;;  %v1748_v39 = vmul.f32 %v6845_v4, %v7027_v41  ;;  %v1749_v51 = vmul.f32 %v6845_v4, %v7029_v20  ;;  %s7345_s17 = sld [smem:[#allocation6 + $0x9f]]  ;;  %s7485_s18 = sld [smem:[#allocation4 + $0x14]] }
 0x1b2   :  { %v1756_v32 = vmul.f32 %v1755_v31, %v7023_v6  ;;  %v7047_v46 = vmul.f32 %v6978_v28, %v1825_v2  ;;  %v7050_v23 = vmul.f32 %v6985_v49, %v1825_v2  ;;  %v7053_v16 = vmul.f32 %v6992_v58, %v1825_v2 }
 0x1b3   :  { %v1757_v14 = vmul.f32 %v1755_v31, %v7025_v33  ;;  %v1758_v5 = vmul.f32 %v1755_v31, %v7027_v41  ;;  %v1759_v52 = vmul.f32 %v1755_v31, %v7029_v20  ;;  %v7059_v47 = vmul.f32 %v6999_v24, %v1825_v2 }
 0x1b4   :  { %v7062_v4 = vadd.f32 %v1746_v19, %v6852_v21  ;;  %v7065_v1 = vadd.f32 %v1747_v63, %v6855_v56  ;;  %v7068_v8 = vadd.f32 %v1748_v39, %v6858_v25  ;;  %v7071_v42 = vadd.f32 %v1749_v51, %v6861_v44 }
 0x1b5   :  { %v1766_v58 = vmul.f32 %v1765_v37, %v7023_v6  ;;  %v1767_v49 = vmul.f32 %v1765_v37, %v7025_v33  ;;  %v1768_v31 = vmul.f32 %v1765_v37, %v7027_v41  ;;  %v1769_v2 = vmul.f32 %v1765_v37, %v7029_v20 }
 0x1b6   :  { %v7078_v21 = vadd.f32 %v1756_v32, %v6872_v61  ;;  %v1776_v56 = vmul.f32 %v1775_v15, %v7023_v6  ;;  %v1777_v19 = vmul.f32 %v1775_v15, %v7025_v33  ;;  %v1778_v25 = vmul.f32 %v1775_v15, %v7027_v41 }
 0x1b7   :  { %v7084_v44 = vadd.f32 %v1757_v14, %v6875_v11  ;;  %v7087_v63 = vadd.f32 %v1758_v5, %v6878_v43  ;;  %v7090_v39 = vadd.f32 %v1759_v52, %v6881_v35  ;;  %v1779_v37 = vmul.f32 %v1775_v15, %v7029_v20 }
 0x1b8   :  { %v7094_v61 = vadd.f32 %v1766_v58, %v6884_v48  ;;  %v7097_v51 = vadd.f32 %v1767_v49, %v6887_v18  ;;  %v7100_v32 = vadd.f32 %v1768_v31, %v6890_v38  ;;  %v7103_v11 = vadd.f32 %v1769_v2, %v6893_v62 }
 0x1b9   :  { %v1786_v43 = vmul.f32 %v1785_v13, %v7023_v6  ;;  %v1787_v14 = vmul.f32 %v1785_v13, %v7025_v33  ;;  %v1788_v35 = vmul.f32 %v1785_v13, %v7027_v41  ;;  %v1789_v15 = vmul.f32 %v1785_v13, %v7029_v20 }
 0x1ba   :  { %v7112_v48 = vadd.f32 %v1776_v56, %v6900_v30  ;;  %v7115_v18 = vadd.f32 %v1777_v19, %v6903_v26  ;;  %v7118_v38 = vadd.f32 %v1778_v25, %v6906_v53  ;;  %v1796_v62 = vmul.f32 %v1795_v7, %v7023_v6 }
 0x1bb   :  { %v7124_v49 = vadd.f32 %v1779_v37, %v6909_v17  ;;  %v1797_v58 = vmul.f32 %v1795_v7, %v7025_v33  ;;  %v1798_v13 = vmul.f32 %v1795_v7, %v7027_v41  ;;  %v1799_v30 = vmul.f32 %v1795_v7, %v7029_v20 }
 0x1bc   :  { %v7134_v26 = vadd.f32 %v1786_v43, %v6920_v50  ;;  %v7137_v53 = vadd.f32 %v1787_v14, %v6923_v55  ;;  %v7140_v5 = vadd.f32 %v1788_v35, %v6926_v36  ;;  %v7143_v17 = vadd.f32 %v1789_v15, %v6929_v0 }
 0x1bd   :  { %v1806_v7 = vmul.f32 %v1805_v9, %v7023_v6  ;;  %v1807_v52 = vmul.f32 %v1805_v9, %v7025_v33  ;;  %v1808_v50 = vmul.f32 %v1805_v9, %v7027_v41  ;;  %v1809_v31 = vmul.f32 %v1805_v9, %v7029_v20 }
 0x1be   :  { %v7158_v55 = vadd.f32 %v1796_v62, %v6952_v29  ;;  %v1816_v36 = vmul.f32 %v7035_v12, %v7023_v6  ;;  %v1817_v0 = vmul.f32 %v7035_v12, %v7025_v33  ;;  %v1818_v2 = vmul.f32 %v7035_v12, %v7027_v41 }
 0x1bf   :  { %v7171_v9 = vadd.f32 %v1797_v58, %v6955_v10  ;;  %v7174_v29 = vadd.f32 %v1798_v13, %v6958_v27  ;;  %v7177_v56 = vadd.f32 %v1799_v30, %v6961_v34  ;;  %v1819_v6 = vmul.f32 %v7035_v12, %v7029_v20 }
 0x1c0   :  { %v7186_v33 = vadd.f32 %v1806_v7, %v6964_v57  ;;  %v7189_v10 = vadd.f32 %v1807_v52, %v6967_v40  ;;  %v7192_v27 = vadd.f32 %v1808_v50, %v6970_v54  ;;  %v7195_v34 = vadd.f32 %v1809_v31, %v6973_v3 }
 0x1c1   :  { %v7198_v41 = vadd.f32 %v1816_v36, %v7004_v22  ;;  %v7201_v20 = vadd.f32 %v1817_v0, %v7007_v60  ;;  %v7204_v57 = vadd.f32 %v1818_v2, %v7010_v45  ;;  %v1831_v40 = vstv %s7109_s2  ;;  %s7544_s2 = sld [smem:[#allocation2 + $0x15]] }
 0x1c2   :  { %v1832_v54 = vadd.f32 %v1831_v40, %v7047_v46  ;;  %v1833_v12 = vadd.f32 %v1831_v40, %v7050_v23  ;;  %v1834_v3 = vadd.f32 %v1831_v40, %v7053_v16  ;;  %v1835_v22 = vadd.f32 %v1831_v40, %v7059_v47 }
 0x1c3   :  { %v7212_v19 = vadd.f32 %v1819_v6, %v7013_v59  ;;  %v1841_v60 = vstv %s7121_s1  ;;  %v1851_v25 = vstv %s7129_s27  ;;  %v1861_v45 = vstv %s7131_s28  ;;  %s7557_s1 = sld [smem:[#allocation4 + $0x15]]  ;;  %s7559_s27 = sld [smem:[#allocation6 + $0xa8]] }
 0x1c4   :  { %v7217_v37 = vmax.f32 %v1832_v54, 0.0  ;;  %v7219_v43 = vmax.f32 %v1833_v12, 0.0  ;;  %v7221_v46 = vmax.f32 %v1834_v3, 0.0  ;;  %v7223_v23 = vmax.f32 %v1835_v22, 0.0  ;;  %s7687_s28 = sld [smem:[#allocation6 + $0xa9]] }
 0x1c5   :  { %v1871_v16 = vstv %s7145_s29  ;;  %v1881_v47 = vstv %s7147_s30  ;;  %v1891_v14 = vstv %s7153_s6  ;;  %v1901_v59 = vstv %s7155_s7  ;;  %s7689_s29 = sld [smem:[#allocation2 + $0x16]]  ;;  %s7703_s30 = sld [smem:[#allocation6 + $0xaa]] }
 0x1c6   :  { %v1842_v35 = vmul.f32 %v1841_v60, %v7217_v37  ;;  %v1843_v15 = vmul.f32 %v1841_v60, %v7219_v43  ;;  %v1844_v62 = vmul.f32 %v1841_v60, %v7221_v46  ;;  %v1845_v58 = vmul.f32 %v1841_v60, %v7223_v23  ;;  %s7705_s6 = sld [smem:[#allocation6 + $0xab]]  ;;  %s7711_s7 = sld [smem:[#allocation6 + $0xac]] }
 0x1c7   :  { %v1911_v13 = vstv %s7166_s8  ;;  %v7235_v30 = vstv %s7168_s9  ;;  %v7238_v7 = vstv %s7181_s3  ;;  %v7241_v52 = vstv %s7183_s4  ;;  %s7713_s8 = sld [smem:[#allocation6 + $0xad]]  ;;  %s7719_s9 = sld [smem:[#allocation6 + $0xae]] }
 0x1c8   :  { %v1852_v50 = vmul.f32 %v1851_v25, %v7217_v37  ;;  %v1853_v31 = vmul.f32 %v1851_v25, %v7219_v43  ;;  %v1854_v36 = vmul.f32 %v1851_v25, %v7221_v46  ;;  %v1855_v0 = vmul.f32 %v1851_v25, %v7223_v23  ;;  %s7721_s3 = sld [smem:[#allocation6 + $0xaf]]  ;;  %s7861_s4 = sld [smem:[#allocation4 + $0x16]] }
 0x1c9   :  { %v7248_v2 = vadd.f32 %v1842_v35, %v7062_v4  ;;  %v7251_v6 = vadd.f32 %v1843_v15, %v7065_v1  ;;  %v7254_v40 = vadd.f32 %v1844_v62, %v7068_v8  ;;  %v7257_v54 = vadd.f32 %v1845_v58, %v7071_v42 }
 0x1ca   :  { %v1862_v12 = vmul.f32 %v1861_v45, %v7217_v37  ;;  %v1863_v3 = vmul.f32 %v1861_v45, %v7219_v43  ;;  %v1864_v22 = vmul.f32 %v1861_v45, %v7221_v46  ;;  %v1865_v60 = vmul.f32 %v1861_v45, %v7223_v23 }
 0x1cb   :  { %v1872_v4 = vmul.f32 %v1871_v16, %v7217_v37  ;;  %v1873_v25 = vmul.f32 %v1871_v16, %v7219_v43  ;;  %v1874_v1 = vmul.f32 %v1871_v16, %v7221_v46  ;;  %v1875_v8 = vmul.f32 %v1871_v16, %v7223_v23 }
 0x1cc   :  { %v7268_v35 = vadd.f32 %v1852_v50, %v7078_v21  ;;  %v7271_v42 = vadd.f32 %v1853_v31, %v7084_v44  ;;  %v7274_v15 = vadd.f32 %v1854_v36, %v7087_v63  ;;  %v7277_v62 = vadd.f32 %v1855_v0, %v7090_v39 }
 0x1cd   :  { %v7280_v45 = vadd.f32 %v1862_v12, %v7094_v61  ;;  %v7283_v58 = vadd.f32 %v1863_v3, %v7097_v51  ;;  %v7286_v16 = vadd.f32 %v1864_v22, %v7100_v32  ;;  %v7289_v21 = vadd.f32 %v1865_v60, %v7103_v11 }
 0x1ce   :  { %v1882_v44 = vmul.f32 %v1881_v47, %v7217_v37  ;;  %v1883_v63 = vmul.f32 %v1881_v47, %v7219_v43  ;;  %v1884_v50 = vmul.f32 %v1881_v47, %v7221_v46  ;;  %v1885_v39 = vmul.f32 %v1881_v47, %v7223_v23 }
 0x1cf   :  { %v7296_v61 = vadd.f32 %v1872_v4, %v7112_v48  ;;  %v7299_v51 = vadd.f32 %v1873_v25, %v7115_v18  ;;  %v7302_v32 = vadd.f32 %v1874_v1, %v7118_v38  ;;  %v7305_v11 = vadd.f32 %v1875_v8, %v7124_v49 }
 0x1d0   :  { %v1892_v31 = vmul.f32 %v1891_v14, %v7217_v37  ;;  %v1893_v36 = vmul.f32 %v1891_v14, %v7219_v43  ;;  %v1894_v0 = vmul.f32 %v1891_v14, %v7221_v46  ;;  %v1895_v47 = vmul.f32 %v1891_v14, %v7223_v23 }
 0x1d1   :  { %v7316_v48 = vadd.f32 %v1882_v44, %v7134_v26  ;;  %v7319_v18 = vadd.f32 %v1883_v63, %v7137_v53  ;;  %v7322_v38 = vadd.f32 %v1884_v50, %v7140_v5  ;;  %v7325_v49 = vadd.f32 %v1885_v39, %v7143_v17 }
 0x1d2   :  { %v1902_v14 = vmul.f32 %v1901_v59, %v7217_v37  ;;  %v1903_v12 = vmul.f32 %v1901_v59, %v7219_v43  ;;  %v1904_v26 = vmul.f32 %v1901_v59, %v7221_v46  ;;  %v1905_v3 = vmul.f32 %v1901_v59, %v7223_v23 }
 0x1d3   :  { %v1912_v53 = vmul.f32 %v1911_v13, %v7217_v37  ;;  %v1913_v5 = vmul.f32 %v1911_v13, %v7219_v43  ;;  %v1914_v17 = vmul.f32 %v1911_v13, %v7221_v46  ;;  %v1915_v22 = vmul.f32 %v1911_v13, %v7223_v23  ;;  %v9895_v23 = vld [vmem:[#allocation13_spill] sm:$0xff] }
 0x1d4   :  { %v7348_v60 = vadd.f32 %v1892_v31, %v7158_v55  ;;  %v7351_v59 = vadd.f32 %v1893_v36, %v7171_v9  ;;  %v7354_v4 = vadd.f32 %v1894_v0, %v7174_v29  ;;  %v7357_v37 = vadd.f32 %v1895_v47, %v7177_v56  ;;  %v9894_v56 = vld [vmem:[#allocation12_spill] sm:$0xff] }
 0x1d5   :  { %v7360_v43 = vadd.f32 %v1902_v14, %v7186_v33  ;;  %v7363_v46 = vadd.f32 %v1903_v12, %v7189_v10  ;;  %v7366_v55 = vadd.f32 %v1904_v26, %v7192_v27  ;;  %v7369_v9 = vadd.f32 %v1905_v3, %v7195_v34 }
 0x1d6   :  { %v1922_v29 = vmul.f32 %v6978_v28, %v7235_v30  ;;  %v1923_v33 = vmul.f32 %v9894_v56, %v7235_v30  ;;  %v1924_v13 = vmul.f32 %v9895_v23, %v7235_v30  ;;  %v1925_v10 = vmul.f32 %v6999_v24, %v7235_v30 }
 0x1d7   :  { %v7380_v27 = vadd.f32 %v1912_v53, %v7198_v41  ;;  %v7383_v34 = vadd.f32 %v1913_v5, %v7201_v20  ;;  %v7386_v25 = vadd.f32 %v1914_v17, %v7204_v57  ;;  %v7389_v1 = vadd.f32 %v1915_v22, %v7212_v19 }
 0x1d8   :  { %v1928_v8 = vadd.f32 %v7238_v7, %v1922_v29  ;;  %v1929_v30 = vadd.f32 %v7238_v7, %v1923_v33  ;;  %v1930_v41 = vadd.f32 %v7238_v7, %v1924_v13  ;;  %v1931_v44 = vadd.f32 %v7238_v7, %v1925_v10 }
 0x1d9   :  { %v1947_v63 = vstv %s7311_s10  ;;  %v1957_v20 = vstv %s7327_s12  ;;  %v1967_v50 = vstv %s7329_s13  ;;  %v2017_v39 = vstv %s7313_s11  ;;  %s7873_s10 = sld [smem:[#allocation6 + $0xb0]]  ;;  %s7881_s11 = sld [smem:[#allocation6 + $0xb1]] }
 0x1da   :  { %v7399_v31 = vmax.f32 %v1928_v8, 0.0  ;;  %v7401_v57 = vmax.f32 %v1929_v30, 0.0  ;;  %v7403_v36 = vmax.f32 %v1930_v41, 0.0  ;;  %v7405_v19 = vmax.f32 %v1931_v44, 0.0  ;;  %s7883_s12 = sld [smem:[#allocation6 + $0xb2]]  ;;  %s7897_s13 = sld [smem:[#allocation6 + $0xb3]] }
 0x1db   :  { %v1977_v0 = vstv %s7335_s14  ;;  %v1987_v47 = vstv %s7337_s15  ;;  %v1997_v14 = vstv %s7343_s16  ;;  %v7411_v12 = vstv %s7345_s17  ;;  %s7899_s14 = sld [smem:[#allocation6 + $0xb4]]  ;;  %s7905_s15 = sld [smem:[#allocation6 + $0xb5]] }
 0x1dc   :  { %v1938_v7 = vmul.f32 %v7241_v52, %v7399_v31  ;;  %v1939_v26 = vmul.f32 %v7241_v52, %v7401_v57  ;;  %v1940_v3 = vmul.f32 %v7241_v52, %v7403_v36  ;;  %v1941_v53 = vmul.f32 %v7241_v52, %v7405_v19  ;;  %s7907_s16 = sld [smem:[#allocation6 + $0xb6]]  ;;  %s7918_s17 = sld [smem:[#allocation6 + $0xb7]] }
 0x1dd   :  { %v1948_v5 = vmul.f32 %v1947_v63, %v7399_v31  ;;  %v7423_v17 = vmul.f32 %v6978_v28, %v2017_v39  ;;  %v7426_v22 = vmul.f32 %v9894_v56, %v2017_v39  ;;  %v7429_v29 = vmul.f32 %v9895_v23, %v2017_v39 }
 0x1de   :  { %v1949_v33 = vmul.f32 %v1947_v63, %v7401_v57  ;;  %v1950_v13 = vmul.f32 %v1947_v63, %v7403_v36  ;;  %v1951_v10 = vmul.f32 %v1947_v63, %v7405_v19  ;;  %v7435_v8 = vmul.f32 %v6999_v24, %v2017_v39 }
 0x1df   :  { %v7438_v52 = vadd.f32 %v1938_v7, %v7248_v2  ;;  %v7441_v30 = vadd.f32 %v1939_v26, %v7251_v6  ;;  %v7444_v41 = vadd.f32 %v1940_v3, %v7254_v40  ;;  %v7447_v44 = vadd.f32 %v1941_v53, %v7257_v54 }
 0x1e0   :  { %v1958_v23 = vmul.f32 %v1957_v20, %v7399_v31  ;;  %v1959_v56 = vmul.f32 %v1957_v20, %v7401_v57  ;;  %v1960_v63 = vmul.f32 %v1957_v20, %v7403_v36  ;;  %v1961_v39 = vmul.f32 %v1957_v20, %v7405_v19 }
 0x1e1   :  { %v7454_v2 = vadd.f32 %v1948_v5, %v7268_v35  ;;  %v1968_v6 = vmul.f32 %v1967_v50, %v7399_v31  ;;  %v1969_v7 = vmul.f32 %v1967_v50, %v7401_v57  ;;  %v1970_v40 = vmul.f32 %v1967_v50, %v7403_v36 }
 0x1e2   :  { %v7460_v54 = vadd.f32 %v1949_v33, %v7271_v42  ;;  %v7463_v26 = vadd.f32 %v1950_v13, %v7274_v15  ;;  %v7466_v3 = vadd.f32 %v1951_v10, %v7277_v62  ;;  %v1971_v20 = vmul.f32 %v1967_v50, %v7405_v19 }
 0x1e3   :  { %v7470_v35 = vadd.f32 %v1958_v23, %v7280_v45  ;;  %v7473_v53 = vadd.f32 %v1959_v56, %v7283_v58  ;;  %v7476_v5 = vadd.f32 %v1960_v63, %v7286_v16  ;;  %v7479_v42 = vadd.f32 %v1961_v39, %v7289_v21 }
 0x1e4   :  { %v1978_v15 = vmul.f32 %v1977_v0, %v7399_v31  ;;  %v1979_v33 = vmul.f32 %v1977_v0, %v7401_v57  ;;  %v1980_v62 = vmul.f32 %v1977_v0, %v7403_v36  ;;  %v1981_v50 = vmul.f32 %v1977_v0, %v7405_v19 }
 0x1e5   :  { %v7488_v45 = vadd.f32 %v1968_v6, %v7296_v61  ;;  %v7491_v58 = vadd.f32 %v1969_v7, %v7299_v51  ;;  %v7494_v16 = vadd.f32 %v1970_v40, %v7302_v32  ;;  %v1988_v21 = vmul.f32 %v1987_v47, %v7399_v31 }
 0x1e6   :  { %v7500_v56 = vadd.f32 %v1971_v20, %v7305_v11  ;;  %v1989_v23 = vmul.f32 %v1987_v47, %v7401_v57  ;;  %v1990_v0 = vmul.f32 %v1987_v47, %v7403_v36  ;;  %v1991_v61 = vmul.f32 %v1987_v47, %v7405_v19 }
 0x1e7   :  { %v7510_v51 = vadd.f32 %v1978_v15, %v7316_v48  ;;  %v7513_v32 = vadd.f32 %v1979_v33, %v7319_v18  ;;  %v7516_v13 = vadd.f32 %v1980_v62, %v7322_v38  ;;  %v7519_v11 = vadd.f32 %v1981_v50, %v7325_v49 }
 0x1e8   :  { %v1998_v47 = vmul.f32 %v1997_v14, %v7399_v31  ;;  %v1999_v10 = vmul.f32 %v1997_v14, %v7401_v57  ;;  %v2000_v48 = vmul.f32 %v1997_v14, %v7403_v36  ;;  %v2001_v63 = vmul.f32 %v1997_v14, %v7405_v19 }
 0x1e9   :  { %v7534_v18 = vadd.f32 %v1988_v21, %v7348_v60  ;;  %v2008_v38 = vmul.f32 %v7411_v12, %v7399_v31  ;;  %v2009_v49 = vmul.f32 %v7411_v12, %v7401_v57  ;;  %v2010_v39 = vmul.f32 %v7411_v12, %v7403_v36 }
 0x1ea   :  { %v7547_v14 = vadd.f32 %v1989_v23, %v7351_v59  ;;  %v7550_v60 = vadd.f32 %v1990_v0, %v7354_v4  ;;  %v7553_v6 = vadd.f32 %v1991_v61, %v7357_v37  ;;  %v2011_v31 = vmul.f32 %v7411_v12, %v7405_v19 }
 0x1eb   :  { %v7562_v57 = vadd.f32 %v1998_v47, %v7360_v43  ;;  %v7565_v59 = vadd.f32 %v1999_v10, %v7363_v46  ;;  %v7568_v4 = vadd.f32 %v2000_v48, %v7366_v55  ;;  %v7571_v37 = vadd.f32 %v2001_v63, %v7369_v9 }
 0x1ec   :  { %v7574_v36 = vadd.f32 %v2008_v38, %v7380_v27  ;;  %v7577_v19 = vadd.f32 %v2009_v49, %v7383_v34  ;;  %v7580_v43 = vadd.f32 %v2010_v39, %v7386_v25  ;;  %v2023_v46 = vstv %s7485_s18  ;;  %s7920_s18 = sld [smem:[#allocation2 + $0x17]] }
 0x1ed   :  { %v2024_v55 = vadd.f32 %v2023_v46, %v7423_v17  ;;  %v2025_v12 = vadd.f32 %v2023_v46, %v7426_v22  ;;  %v2026_v9 = vadd.f32 %v2023_v46, %v7429_v29  ;;  %v2027_v27 = vadd.f32 %v2023_v46, %v7435_v8 }
 0x1ee   :  { %v7588_v7 = vadd.f32 %v2011_v31, %v7389_v1  ;;  %v2033_v34 = vstv %s7497_s19  ;;  %v2043_v40 = vstv %s7505_s20  ;;  %v2053_v25 = vstv %s7507_s21  ;;  %s7933_s19 = sld [smem:[#allocation4 + $0x17]]  ;;  %s7935_s20 = sld [smem:[#allocation6 + $0xb8]] }
 0x1ef   :  { %v7593_v20 = vmax.f32 %v2024_v55, 0.0  ;;  %v7595_v15 = vmax.f32 %v2025_v12, 0.0  ;;  %v7597_v17 = vmax.f32 %v2026_v9, 0.0  ;;  %v7599_v22 = vmax.f32 %v2027_v27, 0.0  ;;  %s8063_s21 = sld [smem:[#allocation6 + $0xb9]] }
 0x1f0   :  { %v2063_v29 = vstv %s7521_s22  ;;  %v2073_v8 = vstv %s7523_s23  ;;  %v2083_v33 = vstv %s7529_s24  ;;  %v2093_v1 = vstv %s7531_s25  ;;  %s8065_s22 = sld [smem:[#allocation2 + $0x18]]  ;;  %s8079_s23 = sld [smem:[#allocation6 + $0xba]] }
 0x1f1   :  { %v2034_v62 = vmul.f32 %v2033_v34, %v7593_v20  ;;  %v2035_v50 = vmul.f32 %v2033_v34, %v7595_v15  ;;  %v2036_v21 = vmul.f32 %v2033_v34, %v7597_v17  ;;  %v2037_v23 = vmul.f32 %v2033_v34, %v7599_v22  ;;  %s8081_s24 = sld [smem:[#allocation6 + $0xbb]]  ;;  %s8087_s25 = sld [smem:[#allocation6 + $0xbc]] }
 0x1f2   :  { %v2103_v0 = vstv %s7542_s26  ;;  %v7611_v61 = vstv %s7544_s2  ;;  %v7614_v47 = vstv %s7557_s1  ;;  %v7617_v10 = vstv %s7559_s27  ;;  %s8089_s26 = sld [smem:[#allocation6 + $0xbd]]  ;;  %s8095_s2 = sld [smem:[#allocation6 + $0xbe]] }
 0x1f3   :  { %v2044_v48 = vmul.f32 %v2043_v40, %v7593_v20  ;;  %v2045_v63 = vmul.f32 %v2043_v40, %v7595_v15  ;;  %v2046_v38 = vmul.f32 %v2043_v40, %v7597_v17  ;;  %v2047_v49 = vmul.f32 %v2043_v40, %v7599_v22  ;;  %s8097_s1 = sld [smem:[#allocation6 + $0xbf]]  ;;  %s8645_s27 = sld [smem:[#allocation6 + $0xd0]] }
 0x1f4   :  { %v7624_v39 = vadd.f32 %v2034_v62, %v7438_v52  ;;  %v7627_v31 = vadd.f32 %v2035_v50, %v7441_v30  ;;  %v7630_v46 = vadd.f32 %v2036_v21, %v7444_v41  ;;  %v7633_v55 = vadd.f32 %v2037_v23, %v7447_v44 }
 0x1f5   :  { %v2054_v12 = vmul.f32 %v2053_v25, %v7593_v20  ;;  %v2055_v9 = vmul.f32 %v2053_v25, %v7595_v15  ;;  %v2056_v27 = vmul.f32 %v2053_v25, %v7597_v17  ;;  %v2057_v34 = vmul.f32 %v2053_v25, %v7599_v22 }
 0x1f6   :  { %v2064_v52 = vmul.f32 %v2063_v29, %v7593_v20  ;;  %v2065_v40 = vmul.f32 %v2063_v29, %v7595_v15  ;;  %v2066_v30 = vmul.f32 %v2063_v29, %v7597_v17  ;;  %v2067_v41 = vmul.f32 %v2063_v29, %v7599_v22 }
 0x1f7   :  { %v7644_v62 = vadd.f32 %v2044_v48, %v7454_v2  ;;  %v7647_v44 = vadd.f32 %v2045_v63, %v7460_v54  ;;  %v7650_v50 = vadd.f32 %v2046_v38, %v7463_v26  ;;  %v7653_v21 = vadd.f32 %v2047_v49, %v7466_v3 }
 0x1f8   :  { %v7656_v25 = vadd.f32 %v2054_v12, %v7470_v35  ;;  %v7659_v23 = vadd.f32 %v2055_v9, %v7473_v53  ;;  %v7662_v29 = vadd.f32 %v2056_v27, %v7476_v5  ;;  %v7665_v2 = vadd.f32 %v2057_v34, %v7479_v42 }
 0x1f9   :  { %v2074_v54 = vmul.f32 %v2073_v8, %v7593_v20  ;;  %v2075_v26 = vmul.f32 %v2073_v8, %v7595_v15  ;;  %v2076_v48 = vmul.f32 %v2073_v8, %v7597_v17  ;;  %v2077_v3 = vmul.f32 %v2073_v8, %v7599_v22 }
 0x1fa   :  { %v7672_v35 = vadd.f32 %v2064_v52, %v7488_v45  ;;  %v7675_v53 = vadd.f32 %v2065_v40, %v7491_v58  ;;  %v7678_v5 = vadd.f32 %v2066_v30, %v7494_v16  ;;  %v7681_v42 = vadd.f32 %v2067_v41, %v7500_v56 }
 0x1fb   :  { %v2084_v63 = vmul.f32 %v2083_v33, %v7593_v20  ;;  %v2085_v38 = vmul.f32 %v2083_v33, %v7595_v15  ;;  %v2086_v49 = vmul.f32 %v2083_v33, %v7597_v17  ;;  %v2087_v8 = vmul.f32 %v2083_v33, %v7599_v22 }
 0x1fc   :  { %v7692_v45 = vadd.f32 %v2074_v54, %v7510_v51  ;;  %v7695_v58 = vadd.f32 %v2075_v26, %v7513_v32  ;;  %v7698_v16 = vadd.f32 %v2076_v48, %v7516_v13  ;;  %v7701_v56 = vadd.f32 %v2077_v3, %v7519_v11 }
 0x1fd   :  { %v2094_v33 = vmul.f32 %v2093_v1, %v7593_v20  ;;  %v2095_v12 = vmul.f32 %v2093_v1, %v7595_v15  ;;  %v2096_v51 = vmul.f32 %v2093_v1, %v7597_v17  ;;  %v2097_v9 = vmul.f32 %v2093_v1, %v7599_v22 }
 0x1fe   :  { %v2104_v32 = vmul.f32 %v2103_v0, %v7593_v20  ;;  %v2105_v13 = vmul.f32 %v2103_v0, %v7595_v15  ;;  %v2106_v11 = vmul.f32 %v2103_v0, %v7597_v17  ;;  %v2107_v27 = vmul.f32 %v2103_v0, %v7599_v22  ;;  %v9897_v22 = vld [vmem:[#allocation13_spill] sm:$0xff] }
 0x1ff   :  { %v7724_v34 = vadd.f32 %v2084_v63, %v7534_v18  ;;  %v7727_v1 = vadd.f32 %v2085_v38, %v7547_v14  ;;  %v7730_v52 = vadd.f32 %v2086_v49, %v7550_v60  ;;  %v7733_v20 = vadd.f32 %v2087_v8, %v7553_v6  ;;  %v9896_v6 = vld [vmem:[#allocation12_spill] sm:$0xff] }
 0x200   :  { %v7736_v15 = vadd.f32 %v2094_v33, %v7562_v57  ;;  %v7739_v17 = vadd.f32 %v2095_v12, %v7565_v59  ;;  %v7742_v18 = vadd.f32 %v2096_v51, %v7568_v4  ;;  %v7745_v14 = vadd.f32 %v2097_v9, %v7571_v37 }
 0x201   :  { %v2114_v60 = vmul.f32 %v6978_v28, %v7611_v61  ;;  %v2115_v57 = vmul.f32 %v9896_v6, %v7611_v61  ;;  %v2116_v0 = vmul.f32 %v9897_v22, %v7611_v61  ;;  %v2117_v59 = vmul.f32 %v6999_v24, %v7611_v61 }
 0x202   :  { %v7756_v4 = vadd.f32 %v2104_v32, %v7574_v36  ;;  %v7759_v37 = vadd.f32 %v2105_v13, %v7577_v19  ;;  %v7762_v40 = vadd.f32 %v2106_v11, %v7580_v43  ;;  %v7765_v30 = vadd.f32 %v2107_v27, %v7588_v7 }
 0x203   :  { %v2120_v41 = vadd.f32 %v7614_v47, %v2114_v60  ;;  %v2121_v61 = vadd.f32 %v7614_v47, %v2115_v57  ;;  %v2122_v36 = vadd.f32 %v7614_v47, %v2116_v0  ;;  %v2123_v54 = vadd.f32 %v7614_v47, %v2117_v59 }
 0x204   :  { %v2139_v26 = vstv %s7687_s28  ;;  %v2149_v19 = vstv %s7703_s30  ;;  %v2159_v48 = vstv %s7705_s6  ;;  %v2209_v3 = vstv %s7689_s29  ;;  %s8653_s28 = sld [smem:[#allocation6 + $0xd1]]  ;;  %s8655_s29 = sld [smem:[#allocation6 + $0xd2]] }
 0x205   :  { %v7775_v63 = vmax.f32 %v2120_v41, 0.0  ;;  %v7777_v43 = vmax.f32 %v2121_v61, 0.0  ;;  %v7779_v38 = vmax.f32 %v2122_v36, 0.0  ;;  %v7781_v7 = vmax.f32 %v2123_v54, 0.0  ;;  %s8669_s30 = sld [smem:[#allocation6 + $0xd3]]  ;;  %s8671_s6 = sld [smem:[#allocation6 + $0xd4]] }
 0x206   :  { %v2169_v49 = vstv %s7711_s7  ;;  %v2179_v8 = vstv %s7713_s8  ;;  %v2189_v33 = vstv %s7719_s9  ;;  %v7787_v12 = vstv %s7721_s3  ;;  %s8257_s3 = sld [smem:[#allocation4 + $0x18]]  ;;  %s8677_s7 = sld [smem:[#allocation6 + $0xd5]] }
 0x207   :  { %v2130_v47 = vmul.f32 %v7617_v10, %v7775_v63  ;;  %v2131_v51 = vmul.f32 %v7617_v10, %v7777_v43  ;;  %v2132_v9 = vmul.f32 %v7617_v10, %v7779_v38  ;;  %v2133_v32 = vmul.f32 %v7617_v10, %v7781_v7  ;;  %s8679_s8 = sld [smem:[#allocation6 + $0xd6]]  ;;  %s8690_s9 = sld [smem:[#allocation6 + $0xd7]] }
 0x208   :  { %v2140_v13 = vmul.f32 %v2139_v26, %v7775_v63  ;;  %v7799_v11 = vmul.f32 %v6978_v28, %v2209_v3  ;;  %v7802_v27 = vmul.f32 %v9896_v6, %v2209_v3  ;;  %v7805_v60 = vmul.f32 %v9897_v22, %v2209_v3 }
 0x209   :  { %v2141_v57 = vmul.f32 %v2139_v26, %v7777_v43  ;;  %v2142_v0 = vmul.f32 %v2139_v26, %v7779_v38  ;;  %v2143_v59 = vmul.f32 %v2139_v26, %v7781_v7  ;;  %v7811_v41 = vmul.f32 %v6999_v24, %v2209_v3 }
 0x20a   :  { %v7814_v10 = vadd.f32 %v2130_v47, %v7624_v39  ;;  %v7817_v28 = vadd.f32 %v2131_v51, %v7627_v31  ;;  %v7820_v6 = vadd.f32 %v2132_v9, %v7630_v46  ;;  %v7823_v22 = vadd.f32 %v2133_v32, %v7633_v55 }
 0x20b   :  { %v2150_v61 = vmul.f32 %v2149_v19, %v7775_v63  ;;  %v2151_v36 = vmul.f32 %v2149_v19, %v7777_v43  ;;  %v2152_v54 = vmul.f32 %v2149_v19, %v7779_v38  ;;  %v2153_v24 = vmul.f32 %v2149_v19, %v7781_v7 }
 0x20c   :  { %v7830_v39 = vadd.f32 %v2140_v13, %v7644_v62  ;;  %v2160_v31 = vmul.f32 %v2159_v48, %v7775_v63  ;;  %v2161_v26 = vmul.f32 %v2159_v48, %v7777_v43  ;;  %v2162_v46 = vmul.f32 %v2159_v48, %v7779_v38 }
 0x20d   :  { %v7836_v55 = vadd.f32 %v2141_v57, %v7647_v44  ;;  %v7839_v3 = vadd.f32 %v2142_v0, %v7650_v50  ;;  %v7842_v47 = vadd.f32 %v2143_v59, %v7653_v21  ;;  %v2163_v19 = vmul.f32 %v2159_v48, %v7781_v7 }
 0x20e   :  { %v7846_v62 = vadd.f32 %v2150_v61, %v7656_v25  ;;  %v7849_v51 = vadd.f32 %v2151_v36, %v7659_v23  ;;  %v7852_v9 = vadd.f32 %v2152_v54, %v7662_v29  ;;  %v7855_v44 = vadd.f32 %v2153_v24, %v7665_v2 }
 0x20f   :  { %v2170_v50 = vmul.f32 %v2169_v49, %v7775_v63  ;;  %v2171_v32 = vmul.f32 %v2169_v49, %v7777_v43  ;;  %v2172_v21 = vmul.f32 %v2169_v49, %v7779_v38  ;;  %v2173_v48 = vmul.f32 %v2169_v49, %v7781_v7 }
 0x210   :  { %v7864_v25 = vadd.f32 %v2160_v31, %v7672_v35  ;;  %v7867_v23 = vadd.f32 %v2161_v26, %v7675_v53  ;;  %v7870_v29 = vadd.f32 %v2162_v46, %v7678_v5  ;;  %v2180_v2 = vmul.f32 %v2179_v8, %v7775_v63 }
 0x211   :  { %v7876_v13 = vadd.f32 %v2163_v19, %v7681_v42  ;;  %v2181_v49 = vmul.f32 %v2179_v8, %v7777_v43  ;;  %v2182_v57 = vmul.f32 %v2179_v8, %v7779_v38  ;;  %v2183_v35 = vmul.f32 %v2179_v8, %v7781_v7 }
 0x212   :  { %v7886_v53 = vadd.f32 %v2170_v50, %v7692_v45  ;;  %v7889_v5 = vadd.f32 %v2171_v32, %v7695_v58  ;;  %v7892_v0 = vadd.f32 %v2172_v21, %v7698_v16  ;;  %v7895_v42 = vadd.f32 %v2173_v48, %v7701_v56 }
 0x213   :  { %v2190_v8 = vmul.f32 %v2189_v33, %v7775_v63  ;;  %v2191_v59 = vmul.f32 %v2189_v33, %v7777_v43  ;;  %v2192_v45 = vmul.f32 %v2189_v33, %v7779_v38  ;;  %v2193_v61 = vmul.f32 %v2189_v33, %v7781_v7 }
 0x214   :  { %v7910_v58 = vadd.f32 %v2180_v2, %v7724_v34  ;;  %v2200_v16 = vmul.f32 %v7787_v12, %v7775_v63  ;;  %v2201_v56 = vmul.f32 %v7787_v12, %v7777_v43  ;;  %v2202_v36 = vmul.f32 %v7787_v12, %v7779_v38 }
 0x215   :  { %v7923_v33 = vadd.f32 %v2181_v49, %v7727_v1  ;;  %v7926_v34 = vadd.f32 %v2182_v57, %v7730_v52  ;;  %v7929_v54 = vadd.f32 %v2183_v35, %v7733_v20  ;;  %v2203_v63 = vmul.f32 %v7787_v12, %v7781_v7 }
 0x216   :  { %v7938_v43 = vadd.f32 %v2190_v8, %v7736_v15  ;;  %v7941_v1 = vadd.f32 %v2191_v59, %v7739_v17  ;;  %v7944_v52 = vadd.f32 %v2192_v45, %v7742_v18  ;;  %v7947_v20 = vadd.f32 %v2193_v61, %v7745_v14 }
 0x217   :  { %v7950_v38 = vadd.f32 %v2200_v16, %v7756_v4  ;;  %v7953_v7 = vadd.f32 %v2201_v56, %v7759_v37  ;;  %v7956_v15 = vadd.f32 %v2202_v36, %v7762_v40  ;;  %v2215_v17 = vstv %s7861_s4  ;;  %s8269_s4 = sld [smem:[#allocation6 + $0xc0]] }
 0x218   :  { %v2216_v18 = vadd.f32 %v2215_v17, %v7799_v11  ;;  %v2217_v12 = vadd.f32 %v2215_v17, %v7802_v27  ;;  %v2218_v14 = vadd.f32 %v2215_v17, %v7805_v60  ;;  %v2219_v4 = vadd.f32 %v2215_v17, %v7811_v41 }
 0x219   :  { %v7964_v24 = vadd.f32 %v2203_v63, %v7765_v30  ;;  %v2225_v37 = vstv %s7873_s10  ;;  %v2235_v31 = vstv %s7881_s11  ;;  %v2245_v40 = vstv %s7883_s12  ;;  %s8277_s10 = sld [smem:[#allocation6 + $0xc1]]  ;;  %s8279_s11 = sld [smem:[#allocation6 + $0xc2]] }
 0x21a   :  { %v7969_v26 = vmax.f32 %v2216_v18, 0.0  ;;  %v7971_v46 = vmax.f32 %v2217_v12, 0.0  ;;  %v7973_v11 = vmax.f32 %v2218_v14, 0.0  ;;  %v7975_v27 = vmax.f32 %v2219_v4, 0.0  ;;  %s8293_s12 = sld [smem:[#allocation6 + $0xc3]] }
 0x21b   :  { %v2255_v60 = vstv %s7897_s13  ;;  %v2265_v41 = vstv %s7899_s14  ;;  %v2275_v19 = vstv %s7905_s15  ;;  %v2285_v30 = vstv %s7907_s16  ;;  %s8295_s13 = sld [smem:[#allocation6 + $0xc4]]  ;;  %s8301_s14 = sld [smem:[#allocation6 + $0xc5]] }
 0x21c   :  { %v2226_v50 = vmul.f32 %v2225_v37, %v7969_v26  ;;  %v2227_v32 = vmul.f32 %v2225_v37, %v7971_v46  ;;  %v2228_v21 = vmul.f32 %v2225_v37, %v7973_v11  ;;  %v2229_v48 = vmul.f32 %v2225_v37, %v7975_v27  ;;  %s8303_s15 = sld [smem:[#allocation6 + $0xc6]]  ;;  %s8314_s16 = sld [smem:[#allocation6 + $0xc7]] }
 0x21d   :  { %v2295_v2 = vstv %s7918_s17  ;;  %v7987_v49 = vstv %s7920_s18  ;;  %v7990_v57 = vstv %s7933_s19  ;;  %v7993_v35 = vstv %s7935_s20  ;;  %s8316_s17 = sld [smem:[#allocation2 + $0x19]]  ;;  %s8331_s19 = sld [smem:[#allocation6 + $0xc8]] }
 0x21e   :  { %v2236_v8 = vmul.f32 %v2235_v31, %v7969_v26  ;;  %v2237_v59 = vmul.f32 %v2235_v31, %v7971_v46  ;;  %v2238_v45 = vmul.f32 %v2235_v31, %v7973_v11  ;;  %v2239_v61 = vmul.f32 %v2235_v31, %v7975_v27  ;;  %s8329_s18 = sld [smem:[#allocation4 + $0x19]] }
 0x21f   :  { %v8000_v16 = vadd.f32 %v2226_v50, %v7814_v10  ;;  %v8003_v56 = vadd.f32 %v2227_v32, %v7817_v28  ;;  %v8006_v36 = vadd.f32 %v2228_v21, %v7820_v6  ;;  %v8009_v63 = vadd.f32 %v2229_v48, %v7823_v22  ;;  %s8459_s20 = sld [smem:[#allocation6 + $0xc9]] }
 0x220   :  { %v2246_v17 = vmul.f32 %v2245_v40, %v7969_v26  ;;  %v2247_v18 = vmul.f32 %v2245_v40, %v7971_v46  ;;  %v2248_v12 = vmul.f32 %v2245_v40, %v7973_v11  ;;  %v2249_v14 = vmul.f32 %v2245_v40, %v7975_v27 }
 0x221   :  { %v2256_v10 = vmul.f32 %v2255_v60, %v7969_v26  ;;  %v2257_v4 = vmul.f32 %v2255_v60, %v7971_v46  ;;  %v2258_v28 = vmul.f32 %v2255_v60, %v7973_v11  ;;  %v2259_v6 = vmul.f32 %v2255_v60, %v7975_v27 }
 0x222   :  { %v8020_v37 = vadd.f32 %v2236_v8, %v7830_v39  ;;  %v8023_v22 = vadd.f32 %v2237_v59, %v7836_v55  ;;  %v8026_v31 = vadd.f32 %v2238_v45, %v7839_v3  ;;  %v8029_v50 = vadd.f32 %v2239_v61, %v7842_v47 }
 0x223   :  { %v8032_v40 = vadd.f32 %v2246_v17, %v7846_v62  ;;  %v8035_v32 = vadd.f32 %v2247_v18, %v7849_v51  ;;  %v8038_v60 = vadd.f32 %v2248_v12, %v7852_v9  ;;  %v8041_v39 = vadd.f32 %v2249_v14, %v7855_v44 }
 0x224   :  { %v2266_v55 = vmul.f32 %v2265_v41, %v7969_v26  ;;  %v2267_v3 = vmul.f32 %v2265_v41, %v7971_v46  ;;  %v2268_v21 = vmul.f32 %v2265_v41, %v7973_v11  ;;  %v2269_v47 = vmul.f32 %v2265_v41, %v7975_v27 }
 0x225   :  { %v8048_v62 = vadd.f32 %v2256_v10, %v7864_v25  ;;  %v8051_v51 = vadd.f32 %v2257_v4, %v7867_v23  ;;  %v8054_v9 = vadd.f32 %v2258_v28, %v7870_v29  ;;  %v8057_v44 = vadd.f32 %v2259_v6, %v7876_v13 }
 0x226   :  { %v2276_v48 = vmul.f32 %v2275_v19, %v7969_v26  ;;  %v2277_v8 = vmul.f32 %v2275_v19, %v7971_v46  ;;  %v2278_v59 = vmul.f32 %v2275_v19, %v7973_v11  ;;  %v2279_v41 = vmul.f32 %v2275_v19, %v7975_v27 }
 0x227   :  { %v8068_v25 = vadd.f32 %v2266_v55, %v7886_v53  ;;  %v8071_v23 = vadd.f32 %v2267_v3, %v7889_v5  ;;  %v8074_v29 = vadd.f32 %v2268_v21, %v7892_v0  ;;  %v8077_v13 = vadd.f32 %v2269_v47, %v7895_v42 }
 0x228   :  { %v2286_v19 = vmul.f32 %v2285_v30, %v7969_v26  ;;  %v2287_v45 = vmul.f32 %v2285_v30, %v7971_v46  ;;  %v2288_v53 = vmul.f32 %v2285_v30, %v7973_v11  ;;  %v2289_v61 = vmul.f32 %v2285_v30, %v7975_v27 }
 0x229   :  { %v2296_v5 = vmul.f32 %v2295_v2, %v7969_v26  ;;  %v2297_v0 = vmul.f32 %v2295_v2, %v7971_v46  ;;  %v2298_v42 = vmul.f32 %v2295_v2, %v7973_v11  ;;  %v2299_v17 = vmul.f32 %v2295_v2, %v7975_v27 }
 0x22a   :  { %v8100_v18 = vadd.f32 %v2276_v48, %v7910_v58  ;;  %v8103_v30 = vadd.f32 %v2277_v8, %v7923_v33  ;;  %v8106_v12 = vadd.f32 %v2278_v59, %v7926_v34  ;;  %v8109_v26 = vadd.f32 %v2279_v41, %v7929_v54  ;;  %v8126_v33 = vld [vmem:[%s9836_s0] sm:$0xff]  ;;  %v8133_v54 = vld [vmem:[%s9836_s0 + $0x8] sm:$0xff] }
 0x22b   :  { %v8112_v46 = vadd.f32 %v2286_v19, %v7938_v43  ;;  %v8115_v11 = vadd.f32 %v2287_v45, %v7941_v1  ;;  %v8118_v27 = vadd.f32 %v2288_v53, %v7944_v52  ;;  %v8121_v58 = vadd.f32 %v2289_v61, %v7947_v20  ;;  %9898 = vst [vmem:[#allocation12_spill] sm:$0xff] %v8133_v54  ;;  %v8140_v1 = vld [vmem:[%s9836_s0 + $0x10] sm:$0xff]  ;;  %v8147_v20 = vld [vmem:[%s9836_s0 + $0x18] sm:$0xff] }
 0x22c   :  { %v2306_v34 = vmul.f32 %v8126_v33, %v7987_v49  ;;  %v2307_v43 = vmul.f32 %v8133_v54, %v7987_v49  ;;  %9899 = vst [vmem:[#allocation13_spill] sm:$0xff] %v8140_v1  ;;  %v2308_v52 = vmul.f32 %v8140_v1, %v7987_v49  ;;  %v2309_v2 = vmul.f32 %v8147_v20, %v7987_v49 }
 0x22d   :  { %v8152_v14 = vadd.f32 %v2296_v5, %v7950_v38  ;;  %v8155_v10 = vadd.f32 %v2297_v0, %v7953_v7  ;;  %v8158_v4 = vadd.f32 %v2298_v42, %v7956_v15  ;;  %v8161_v28 = vadd.f32 %v2299_v17, %v7964_v24 }
 0x22e   :  { %v2312_v6 = vadd.f32 %v7990_v57, %v2306_v34  ;;  %v2313_v49 = vadd.f32 %v7990_v57, %v2307_v43  ;;  %v2314_v38 = vadd.f32 %v7990_v57, %v2308_v52  ;;  %v2315_v55 = vadd.f32 %v7990_v57, %v2309_v2 }
 0x22f   :  { %v2331_v3 = vstv %s8063_s21  ;;  %v2341_v7 = vstv %s8079_s23  ;;  %v2351_v21 = vstv %s8081_s24  ;;  %v2401_v47 = vstv %s8065_s22  ;;  %s8461_s21 = sld [smem:[#allocation2 + $0x1a]]  ;;  %s8477_s23 = sld [smem:[#allocation6 + $0xcb]] }
 0x230   :  { %v8171_v48 = vmax.f32 %v2312_v6, 0.0  ;;  %v8173_v15 = vmax.f32 %v2313_v49, 0.0  ;;  %v8175_v8 = vmax.f32 %v2314_v38, 0.0  ;;  %v8177_v24 = vmax.f32 %v2315_v55, 0.0  ;;  %s8475_s22 = sld [smem:[#allocation6 + $0xca]]  ;;  %s8483_s24 = sld [smem:[#allocation6 + $0xcc]] }
 0x231   :  { %v2361_v59 = vstv %s8087_s25  ;;  %v2371_v41 = vstv %s8089_s26  ;;  %v2381_v19 = vstv %s8095_s2  ;;  %v8183_v45 = vstv %s8097_s1  ;;  %s8485_s25 = sld [smem:[#allocation6 + $0xcd]]  ;;  %s8491_s26 = sld [smem:[#allocation6 + $0xce]] }
 0x232   :  { %v2322_v57 = vmul.f32 %v7993_v35, %v8171_v48  ;;  %v2323_v53 = vmul.f32 %v7993_v35, %v8173_v15  ;;  %v2324_v61 = vmul.f32 %v7993_v35, %v8175_v8  ;;  %v2325_v5 = vmul.f32 %v7993_v35, %v8177_v24  ;;  %s8493_s2 = sld [smem:[#allocation6 + $0xcf]]  ;;  %s8633_s1 = sld [smem:[#allocation4 + $0x1a]] }
 0x233   :  { %v2332_v0 = vmul.f32 %v2331_v3, %v8171_v48  ;;  %v8195_v42 = vmul.f32 %v8126_v33, %v2401_v47  ;;  %v8198_v17 = vmul.f32 %v8133_v54, %v2401_v47  ;;  %v8201_v34 = vmul.f32 %v8140_v1, %v2401_v47 }
 0x234   :  { %v2333_v43 = vmul.f32 %v2331_v3, %v8173_v15  ;;  %v2334_v52 = vmul.f32 %v2331_v3, %v8175_v8  ;;  %v2335_v2 = vmul.f32 %v2331_v3, %v8177_v24  ;;  %v8207_v6 = vmul.f32 %v8147_v20, %v2401_v47 }
 0x235   :  { %v8210_v35 = vadd.f32 %v2322_v57, %v8000_v16  ;;  %v8213_v49 = vadd.f32 %v2323_v53, %v8003_v56  ;;  %v8216_v38 = vadd.f32 %v2324_v61, %v8006_v36  ;;  %v8219_v55 = vadd.f32 %v2325_v5, %v8009_v63 }
 0x236   :  { %v2342_v1 = vmul.f32 %v2341_v7, %v8171_v48  ;;  %v2343_v54 = vmul.f32 %v2341_v7, %v8173_v15  ;;  %v2344_v3 = vmul.f32 %v2341_v7, %v8175_v8  ;;  %v2345_v47 = vmul.f32 %v2341_v7, %v8177_v24 }
 0x237   :  { %v8226_v16 = vadd.f32 %v2332_v0, %v8020_v37  ;;  %v2352_v56 = vmul.f32 %v2351_v21, %v8171_v48  ;;  %v2353_v57 = vmul.f32 %v2351_v21, %v8173_v15  ;;  %v2354_v36 = vmul.f32 %v2351_v21, %v8175_v8 }
 0x238   :  { %v8232_v63 = vadd.f32 %v2333_v43, %v8023_v22  ;;  %v8235_v53 = vadd.f32 %v2334_v52, %v8026_v31  ;;  %v8238_v61 = vadd.f32 %v2335_v2, %v8029_v50  ;;  %v2355_v7 = vmul.f32 %v2351_v21, %v8177_v24 }
 0x239   :  { %v8242_v37 = vadd.f32 %v2342_v1, %v8032_v40  ;;  %v8245_v5 = vadd.f32 %v2343_v54, %v8035_v32  ;;  %v8248_v0 = vadd.f32 %v2344_v3, %v8038_v60  ;;  %v8251_v22 = vadd.f32 %v2345_v47, %v8041_v39 }
 0x23a   :  { %v2362_v31 = vmul.f32 %v2361_v59, %v8171_v48  ;;  %v2363_v43 = vmul.f32 %v2361_v59, %v8173_v15  ;;  %v2364_v50 = vmul.f32 %v2361_v59, %v8175_v8  ;;  %v2365_v21 = vmul.f32 %v2361_v59, %v8177_v24 }
 0x23b   :  { %v8260_v40 = vadd.f32 %v2352_v56, %v8048_v62  ;;  %v8263_v32 = vadd.f32 %v2353_v57, %v8051_v51  ;;  %v8266_v60 = vadd.f32 %v2354_v36, %v8054_v9  ;;  %v2372_v39 = vmul.f32 %v2371_v41, %v8171_v48 }
 0x23c   :  { %v8272_v54 = vadd.f32 %v2355_v7, %v8057_v44  ;;  %v2373_v1 = vmul.f32 %v2371_v41, %v8173_v15  ;;  %v2374_v59 = vmul.f32 %v2371_v41, %v8175_v8  ;;  %v2375_v62 = vmul.f32 %v2371_v41, %v8177_v24 }
 0x23d   :  { %v8282_v51 = vadd.f32 %v2362_v31, %v8068_v25  ;;  %v8285_v9 = vadd.f32 %v2363_v43, %v8071_v23  ;;  %v8288_v52 = vadd.f32 %v2364_v50, %v8074_v29  ;;  %v8291_v44 = vadd.f32 %v2365_v21, %v8077_v13 }
 0x23e   :  { %v2382_v41 = vmul.f32 %v2381_v19, %v8171_v48  ;;  %v2383_v2 = vmul.f32 %v2381_v19, %v8173_v15  ;;  %v2384_v25 = vmul.f32 %v2381_v19, %v8175_v8  ;;  %v2385_v3 = vmul.f32 %v2381_v19, %v8177_v24 }
 0x23f   :  { %v8306_v23 = vadd.f32 %v2372_v39, %v8100_v18  ;;  %v2392_v29 = vmul.f32 %v8183_v45, %v8171_v48  ;;  %v2393_v13 = vmul.f32 %v8183_v45, %v8173_v15  ;;  %v2394_v47 = vmul.f32 %v8183_v45, %v8175_v8 }
 0x240   :  { %v8319_v19 = vadd.f32 %v2373_v1, %v8103_v30  ;;  %v8322_v18 = vadd.f32 %v2374_v59, %v8106_v12  ;;  %v8325_v56 = vadd.f32 %v2375_v62, %v8109_v26  ;;  %v2395_v48 = vmul.f32 %v8183_v45, %v8177_v24 }
 0x241   :  { %v8334_v15 = vadd.f32 %v2382_v41, %v8112_v46  ;;  %v8337_v30 = vadd.f32 %v2383_v2, %v8115_v11  ;;  %v8340_v12 = vadd.f32 %v2384_v25, %v8118_v27  ;;  %v8343_v26 = vadd.f32 %v2385_v3, %v8121_v58 }
 0x242   :  { %v8346_v8 = vadd.f32 %v2392_v29, %v8152_v14  ;;  %v8349_v24 = vadd.f32 %v2393_v13, %v8155_v10  ;;  %v8352_v46 = vadd.f32 %v2394_v47, %v8158_v4  ;;  %v2407_v11 = vstv %s8257_s3  ;;  %s8692_s3 = sld [smem:[#allocation2 + $0x1b]] }
 0x243   :  { %v2408_v27 = vadd.f32 %v2407_v11, %v8195_v42  ;;  %v2409_v45 = vadd.f32 %v2407_v11, %v8198_v17  ;;  %v2410_v58 = vadd.f32 %v2407_v11, %v8201_v34  ;;  %v2411_v14 = vadd.f32 %v2407_v11, %v8207_v6 }
 0x244   :  { %v8360_v57 = vadd.f32 %v2395_v48, %v8161_v28  ;;  %v2417_v10 = vstv %s8269_s4  ;;  %v2427_v36 = vstv %s8277_s10  ;;  %v2437_v4 = vstv %s8279_s11  ;;  %s8705_s4 = sld [smem:[#allocation4 + $0x1b]]  ;;  %s8707_s10 = sld [smem:[#allocation6 + $0xd8]] }
 0x245   :  { %v8365_v7 = vmax.f32 %v2408_v27, 0.0  ;;  %v8367_v31 = vmax.f32 %v2409_v45, 0.0  ;;  %v8369_v42 = vmax.f32 %v2410_v58, 0.0  ;;  %v8371_v17 = vmax.f32 %v2411_v14, 0.0  ;;  %s8835_s11 = sld [smem:[#allocation6 + $0xd9]] }
 0x246   :  { %v2447_v34 = vstv %s8293_s12  ;;  %v2457_v6 = vstv %s8295_s13  ;;  %v2467_v43 = vstv %s8301_s14  ;;  %v2477_v28 = vstv %s8303_s15  ;;  %s8837_s12 = sld [smem:[#allocation2 + $0x1c]]  ;;  %s8851_s13 = sld [smem:[#allocation6 + $0xda]] }
 0x247   :  { %v2418_v50 = vmul.f32 %v2417_v10, %v8365_v7  ;;  %v2419_v21 = vmul.f32 %v2417_v10, %v8367_v31  ;;  %v2420_v39 = vmul.f32 %v2417_v10, %v8369_v42  ;;  %v2421_v1 = vmul.f32 %v2417_v10, %v8371_v17  ;;  %s8853_s14 = sld [smem:[#allocation6 + $0xdb]]  ;;  %s8859_s15 = sld [smem:[#allocation6 + $0xdc]] }
 0x248   :  { %v2487_v59 = vstv %s8314_s16  ;;  %v8383_v62 = vstv %s8316_s17  ;;  %v8386_v41 = vstv %s8329_s18  ;;  %v8389_v2 = vstv %s8331_s19  ;;  %s8861_s16 = sld [smem:[#allocation6 + $0xdd]]  ;;  %s8867_s17 = sld [smem:[#allocation6 + $0xde]] }
 0x249   :  { %v2428_v25 = vmul.f32 %v2427_v36, %v8365_v7  ;;  %v2429_v3 = vmul.f32 %v2427_v36, %v8367_v31  ;;  %v2430_v29 = vmul.f32 %v2427_v36, %v8369_v42  ;;  %v2431_v13 = vmul.f32 %v2427_v36, %v8371_v17  ;;  %s8869_s18 = sld [smem:[#allocation6 + $0xdf]]  ;;  %s9009_s19 = sld [smem:[#allocation4 + $0x1c]] }
 0x24a   :  { %v8396_v47 = vadd.f32 %v2418_v50, %v8210_v35  ;;  %v8399_v48 = vadd.f32 %v2419_v21, %v8213_v49  ;;  %v8402_v11 = vadd.f32 %v2420_v39, %v8216_v38  ;;  %v8405_v27 = vadd.f32 %v2421_v1, %v8219_v55 }
 0x24b   :  { %v2438_v45 = vmul.f32 %v2437_v4, %v8365_v7  ;;  %v2439_v58 = vmul.f32 %v2437_v4, %v8367_v31  ;;  %v2440_v14 = vmul.f32 %v2437_v4, %v8369_v42  ;;  %v2441_v10 = vmul.f32 %v2437_v4, %v8371_v17 }
 0x24c   :  { %v2448_v35 = vmul.f32 %v2447_v34, %v8365_v7  ;;  %v2449_v36 = vmul.f32 %v2447_v34, %v8367_v31  ;;  %v2450_v49 = vmul.f32 %v2447_v34, %v8369_v42  ;;  %v2451_v38 = vmul.f32 %v2447_v34, %v8371_v17 }
 0x24d   :  { %v8416_v50 = vadd.f32 %v2428_v25, %v8226_v16  ;;  %v8419_v55 = vadd.f32 %v2429_v3, %v8232_v63  ;;  %v8422_v21 = vadd.f32 %v2430_v29, %v8235_v53  ;;  %v8425_v39 = vadd.f32 %v2431_v13, %v8238_v61 }
 0x24e   :  { %v8428_v4 = vadd.f32 %v2438_v45, %v8242_v37  ;;  %v8431_v1 = vadd.f32 %v2439_v58, %v8245_v5  ;;  %v8434_v34 = vadd.f32 %v2440_v14, %v8248_v0  ;;  %v8437_v16 = vadd.f32 %v2441_v10, %v8251_v22 }
 0x24f   :  { %v2458_v63 = vmul.f32 %v2457_v6, %v8365_v7  ;;  %v2459_v53 = vmul.f32 %v2457_v6, %v8367_v31  ;;  %v2460_v25 = vmul.f32 %v2457_v6, %v8369_v42  ;;  %v2461_v61 = vmul.f32 %v2457_v6, %v8371_v17 }
 0x250   :  { %v8444_v37 = vadd.f32 %v2448_v35, %v8260_v40  ;;  %v8447_v5 = vadd.f32 %v2449_v36, %v8263_v32  ;;  %v8450_v0 = vadd.f32 %v2450_v49, %v8266_v60  ;;  %v8453_v22 = vadd.f32 %v2451_v38, %v8272_v54 }
 0x251   :  { %v2468_v3 = vmul.f32 %v2467_v43, %v8365_v7  ;;  %v2469_v29 = vmul.f32 %v2467_v43, %v8367_v31  ;;  %v2470_v13 = vmul.f32 %v2467_v43, %v8369_v42  ;;  %v2471_v6 = vmul.f32 %v2467_v43, %v8371_v17 }
 0x252   :  { %v8464_v40 = vadd.f32 %v2458_v63, %v8282_v51  ;;  %v8467_v32 = vadd.f32 %v2459_v53, %v8285_v9  ;;  %v8470_v60 = vadd.f32 %v2460_v25, %v8288_v52  ;;  %v8473_v54 = vadd.f32 %v2461_v61, %v8291_v44 }
 0x253   :  { %v2478_v43 = vmul.f32 %v2477_v28, %v8365_v7  ;;  %v2479_v45 = vmul.f32 %v2477_v28, %v8367_v31  ;;  %v2480_v51 = vmul.f32 %v2477_v28, %v8369_v42  ;;  %v2481_v58 = vmul.f32 %v2477_v28, %v8371_v17 }
 0x254   :  { %v2488_v9 = vmul.f32 %v2487_v59, %v8365_v7  ;;  %v2489_v52 = vmul.f32 %v2487_v59, %v8367_v31  ;;  %v2490_v44 = vmul.f32 %v2487_v59, %v8369_v42  ;;  %v2491_v14 = vmul.f32 %v2487_v59, %v8371_v17  ;;  %v9901_v17 = vld [vmem:[#allocation13_spill] sm:$0xff] }
 0x255   :  { %v8496_v10 = vadd.f32 %v2468_v3, %v8306_v23  ;;  %v8499_v28 = vadd.f32 %v2469_v29, %v8319_v19  ;;  %v8502_v35 = vadd.f32 %v2470_v13, %v8322_v18  ;;  %v8505_v7 = vadd.f32 %v2471_v6, %v8325_v56  ;;  %v9900_v56 = vld [vmem:[#allocation12_spill] sm:$0xff] }
 0x256   :  { %v8508_v31 = vadd.f32 %v2478_v43, %v8334_v15  ;;  %v8511_v42 = vadd.f32 %v2479_v45, %v8337_v30  ;;  %v8514_v23 = vadd.f32 %v2480_v51, %v8340_v12  ;;  %v8517_v19 = vadd.f32 %v2481_v58, %v8343_v26 }
 0x257   :  { %v2498_v18 = vmul.f32 %v8126_v33, %v8383_v62  ;;  %v2499_v15 = vmul.f32 %v9900_v56, %v8383_v62  ;;  %v2500_v59 = vmul.f32 %v9901_v17, %v8383_v62  ;;  %v2501_v30 = vmul.f32 %v8147_v20, %v8383_v62 }
 0x258   :  { %v8528_v12 = vadd.f32 %v2488_v9, %v8346_v8  ;;  %v8531_v26 = vadd.f32 %v2489_v52, %v8349_v24  ;;  %v8534_v36 = vadd.f32 %v2490_v44, %v8352_v46  ;;  %v8537_v49 = vadd.f32 %v2491_v14, %v8360_v57 }
 0x259   :  { %v2504_v38 = vadd.f32 %v8386_v41, %v2498_v18  ;;  %v2505_v62 = vadd.f32 %v8386_v41, %v2499_v15  ;;  %v2506_v8 = vadd.f32 %v8386_v41, %v2500_v59  ;;  %v2507_v63 = vadd.f32 %v8386_v41, %v2501_v30 }
 0x25a   :  { %v2523_v53 = vstv %s8459_s20  ;;  %v2533_v24 = vstv %s8475_s22  ;;  %v2543_v25 = vstv %s8477_s23  ;;  %v2593_v61 = vstv %s8461_s21  ;;  %s9021_s20 = sld [smem:[#allocation6 + $0xe0]]  ;;  %s9029_s21 = sld [smem:[#allocation6 + $0xe1]] }
 0x25b   :  { %v8547_v3 = vmax.f32 %v2504_v38, 0.0  ;;  %v8549_v46 = vmax.f32 %v2505_v62, 0.0  ;;  %v8551_v29 = vmax.f32 %v2506_v8, 0.0  ;;  %v8553_v57 = vmax.f32 %v2507_v63, 0.0  ;;  %s9031_s22 = sld [smem:[#allocation6 + $0xe2]]  ;;  %s9045_s23 = sld [smem:[#allocation6 + $0xe3]] }
 0x25c   :  { %v2553_v13 = vstv %s8483_s24  ;;  %v2563_v6 = vstv %s8485_s25  ;;  %v2573_v43 = vstv %s8491_s26  ;;  %v8559_v45 = vstv %s8493_s2  ;;  %s9047_s24 = sld [smem:[#allocation6 + $0xe4]]  ;;  %s9053_s25 = sld [smem:[#allocation6 + $0xe5]] }
 0x25d   :  { %v2514_v41 = vmul.f32 %v8389_v2, %v8547_v3  ;;  %v2515_v51 = vmul.f32 %v8389_v2, %v8549_v46  ;;  %v2516_v58 = vmul.f32 %v8389_v2, %v8551_v29  ;;  %v2517_v9 = vmul.f32 %v8389_v2, %v8553_v57  ;;  %s9055_s26 = sld [smem:[#allocation6 + $0xe6]]  ;;  %s9066_s2 = sld [smem:[#allocation6 + $0xe7]] }
 0x25e   :  { %v2524_v52 = vmul.f32 %v2523_v53, %v8547_v3  ;;  %v8571_v44 = vmul.f32 %v8126_v33, %v2593_v61  ;;  %v8574_v14 = vmul.f32 %v9900_v56, %v2593_v61  ;;  %v8577_v18 = vmul.f32 %v9901_v17, %v2593_v61 }
 0x25f   :  { %v2525_v15 = vmul.f32 %v2523_v53, %v8549_v46  ;;  %v2526_v59 = vmul.f32 %v2523_v53, %v8551_v29  ;;  %v2527_v30 = vmul.f32 %v2523_v53, %v8553_v57  ;;  %v8583_v38 = vmul.f32 %v8147_v20, %v2593_v61 }
 0x260   :  { %v8586_v2 = vadd.f32 %v2514_v41, %v8396_v47  ;;  %v8589_v62 = vadd.f32 %v2515_v51, %v8399_v48  ;;  %v8592_v8 = vadd.f32 %v2516_v58, %v8402_v11  ;;  %v8595_v63 = vadd.f32 %v2517_v9, %v8405_v27 }
 0x261   :  { %v2534_v17 = vmul.f32 %v2533_v24, %v8547_v3  ;;  %v2535_v56 = vmul.f32 %v2533_v24, %v8549_v46  ;;  %v2536_v53 = vmul.f32 %v2533_v24, %v8551_v29  ;;  %v2537_v61 = vmul.f32 %v2533_v24, %v8553_v57 }
 0x262   :  { %v8602_v47 = vadd.f32 %v2524_v52, %v8416_v50  ;;  %v2544_v48 = vmul.f32 %v2543_v25, %v8547_v3  ;;  %v2545_v41 = vmul.f32 %v2543_v25, %v8549_v46  ;;  %v2546_v11 = vmul.f32 %v2543_v25, %v8551_v29 }
 0x263   :  { %v8608_v27 = vadd.f32 %v2525_v15, %v8419_v55  ;;  %v8611_v51 = vadd.f32 %v2526_v59, %v8422_v21  ;;  %v8614_v58 = vadd.f32 %v2527_v30, %v8425_v39  ;;  %v2547_v24 = vmul.f32 %v2543_v25, %v8553_v57 }
 0x264   :  { %v8618_v50 = vadd.f32 %v2534_v17, %v8428_v4  ;;  %v8621_v9 = vadd.f32 %v2535_v56, %v8431_v1  ;;  %v8624_v52 = vadd.f32 %v2536_v53, %v8434_v34  ;;  %v8627_v55 = vadd.f32 %v2537_v61, %v8437_v16 }
 0x265   :  { %v2554_v21 = vmul.f32 %v2553_v13, %v8547_v3  ;;  %v2555_v15 = vmul.f32 %v2553_v13, %v8549_v46  ;;  %v2556_v39 = vmul.f32 %v2553_v13, %v8551_v29  ;;  %v2557_v25 = vmul.f32 %v2553_v13, %v8553_v57 }
 0x266   :  { %v8636_v4 = vadd.f32 %v2544_v48, %v8444_v37  ;;  %v8639_v1 = vadd.f32 %v2545_v41, %v8447_v5  ;;  %v8642_v34 = vadd.f32 %v2546_v11, %v8450_v0  ;;  %v2564_v16 = vmul.f32 %v2563_v6, %v8547_v3 }
 0x267   :  { %v8648_v56 = vadd.f32 %v2547_v24, %v8453_v22  ;;  %v2565_v17 = vmul.f32 %v2563_v6, %v8549_v46  ;;  %v2566_v13 = vmul.f32 %v2563_v6, %v8551_v29  ;;  %v2567_v37 = vmul.f32 %v2563_v6, %v8553_v57 }
 0x268   :  { %v8658_v5 = vadd.f32 %v2554_v21, %v8464_v40  ;;  %v8661_v0 = vadd.f32 %v2555_v15, %v8467_v32  ;;  %v8664_v59 = vadd.f32 %v2556_v39, %v8470_v60  ;;  %v8667_v22 = vadd.f32 %v2557_v25, %v8473_v54 }
 0x269   :  { %v2574_v6 = vmul.f32 %v2573_v43, %v8547_v3  ;;  %v2575_v30 = vmul.f32 %v2573_v43, %v8549_v46  ;;  %v2576_v40 = vmul.f32 %v2573_v43, %v8551_v29  ;;  %v2577_v53 = vmul.f32 %v2573_v43, %v8553_v57 }
 0x26a   :  { %v8682_v32 = vadd.f32 %v2564_v16, %v8496_v10  ;;  %v2584_v60 = vmul.f32 %v8559_v45, %v8547_v3  ;;  %v2585_v54 = vmul.f32 %v8559_v45, %v8549_v46  ;;  %v2586_v61 = vmul.f32 %v8559_v45, %v8551_v29 }
 0x26b   :  { %v8695_v43 = vadd.f32 %v2565_v17, %v8499_v28  ;;  %v8698_v10 = vadd.f32 %v2566_v13, %v8502_v35  ;;  %v8701_v48 = vadd.f32 %v2567_v37, %v8505_v7  ;;  %v2587_v3 = vmul.f32 %v8559_v45, %v8553_v57 }
 0x26c   :  { %v8710_v46 = vadd.f32 %v2574_v6, %v8508_v31  ;;  %v8713_v28 = vadd.f32 %v2575_v30, %v8511_v42  ;;  %v8716_v35 = vadd.f32 %v2576_v40, %v8514_v23  ;;  %v8719_v7 = vadd.f32 %v2577_v53, %v8517_v19 }
 0x26d   :  { %v8722_v29 = vadd.f32 %v2584_v60, %v8528_v12  ;;  %v8725_v57 = vadd.f32 %v2585_v54, %v8531_v26  ;;  %v8728_v31 = vadd.f32 %v2586_v61, %v8534_v36  ;;  %v2599_v42 = vstv %s8633_s1  ;;  %s9068_s1 = sld [smem:[#allocation2 + $0x1d]] }
 0x26e   :  { %v2600_v23 = vadd.f32 %v2599_v42, %v8571_v44  ;;  %v2601_v45 = vadd.f32 %v2599_v42, %v8574_v14  ;;  %v2602_v19 = vadd.f32 %v2599_v42, %v8577_v18  ;;  %v2603_v12 = vadd.f32 %v2599_v42, %v8583_v38 }
 0x26f   :  { %v8736_v41 = vadd.f32 %v2587_v3, %v8537_v49  ;;  %v2609_v26 = vstv %s8645_s27  ;;  %v2619_v11 = vstv %s8653_s28  ;;  %v2629_v36 = vstv %s8655_s29  ;;  %s9081_s27 = sld [smem:[#allocation4 + $0x1d]]  ;;  %s9083_s28 = sld [smem:[#allocation6 + $0xe8]] }
 0x270   :  { %v8741_v24 = vmax.f32 %v2600_v23, 0.0  ;;  %v8743_v21 = vmax.f32 %v2601_v45, 0.0  ;;  %v8745_v44 = vmax.f32 %v2602_v19, 0.0  ;;  %v8747_v14 = vmax.f32 %v2603_v12, 0.0  ;;  %s9211_s29 = sld [smem:[#allocation6 + $0xe9]] }
 0x271   :  { %v2639_v18 = vstv %s8669_s30  ;;  %v2649_v38 = vstv %s8671_s6  ;;  %v2659_v15 = vstv %s8677_s7  ;;  %v2669_v49 = vstv %s8679_s8  ;;  %s9213_s30 = sld [smem:[#allocation2 + $0x1e]]  ;;  %s9227_s6 = sld [smem:[#allocation6 + $0xea]] }
 0x272   :  { %v2610_v39 = vmul.f32 %v2609_v26, %v8741_v24  ;;  %v2611_v25 = vmul.f32 %v2609_v26, %v8743_v21  ;;  %v2612_v16 = vmul.f32 %v2609_v26, %v8745_v44  ;;  %v2613_v17 = vmul.f32 %v2609_v26, %v8747_v14  ;;  %s9229_s7 = sld [smem:[#allocation6 + $0xeb]]  ;;  %s9235_s8 = sld [smem:[#allocation6 + $0xec]] }
 0x273   :  { %v2679_v13 = vstv %s8690_s9  ;;  %v8759_v37 = vstv %s8692_s3  ;;  %v8762_v6 = vstv %s8705_s4  ;;  %v8765_v30 = vstv %s8707_s10  ;;  %s9237_s9 = sld [smem:[#allocation6 + $0xed]]  ;;  %s9243_s3 = sld [smem:[#allocation6 + $0xee]] }
 0x274   :  { %v2620_v40 = vmul.f32 %v2619_v11, %v8741_v24  ;;  %v2621_v53 = vmul.f32 %v2619_v11, %v8743_v21  ;;  %v2622_v60 = vmul.f32 %v2619_v11, %v8745_v44  ;;  %v2623_v54 = vmul.f32 %v2619_v11, %v8747_v14  ;;  %s9245_s4 = sld [smem:[#allocation6 + $0xef]] }
 0x275   :  { %v8772_v61 = vadd.f32 %v2610_v39, %v8586_v2  ;;  %v8775_v3 = vadd.f32 %v2611_v25, %v8589_v62  ;;  %v8778_v42 = vadd.f32 %v2612_v16, %v8592_v8  ;;  %v8781_v23 = vadd.f32 %v2613_v17, %v8595_v63 }
 0x276   :  { %v2630_v45 = vmul.f32 %v2629_v36, %v8741_v24  ;;  %v2631_v19 = vmul.f32 %v2629_v36, %v8743_v21  ;;  %v2632_v12 = vmul.f32 %v2629_v36, %v8745_v44  ;;  %v2633_v26 = vmul.f32 %v2629_v36, %v8747_v14 }
 0x277   :  { %v2640_v2 = vmul.f32 %v2639_v18, %v8741_v24  ;;  %v2641_v11 = vmul.f32 %v2639_v18, %v8743_v21  ;;  %v2642_v62 = vmul.f32 %v2639_v18, %v8745_v44  ;;  %v2643_v8 = vmul.f32 %v2639_v18, %v8747_v14 }
 0x278   :  { %v8792_v39 = vadd.f32 %v2620_v40, %v8602_v47  ;;  %v8795_v63 = vadd.f32 %v2621_v53, %v8608_v27  ;;  %v8798_v25 = vadd.f32 %v2622_v60, %v8611_v51  ;;  %v8801_v16 = vadd.f32 %v2623_v54, %v8614_v58 }
 0x279   :  { %v8804_v36 = vadd.f32 %v2630_v45, %v8618_v50  ;;  %v8807_v17 = vadd.f32 %v2631_v19, %v8621_v9  ;;  %v8810_v18 = vadd.f32 %v2632_v12, %v8624_v52  ;;  %v8813_v47 = vadd.f32 %v2633_v26, %v8627_v55 }
 0x27a   :  { %v2650_v27 = vmul.f32 %v2649_v38, %v8741_v24  ;;  %v2651_v51 = vmul.f32 %v2649_v38, %v8743_v21  ;;  %v2652_v40 = vmul.f32 %v2649_v38, %v8745_v44  ;;  %v2653_v58 = vmul.f32 %v2649_v38, %v8747_v14 }
 0x27b   :  { %v8820_v50 = vadd.f32 %v2640_v2, %v8636_v4  ;;  %v8823_v9 = vadd.f32 %v2641_v11, %v8639_v1  ;;  %v8826_v52 = vadd.f32 %v2642_v62, %v8642_v34  ;;  %v8829_v55 = vadd.f32 %v2643_v8, %v8648_v56 }
 0x27c   :  { %v2660_v53 = vmul.f32 %v2659_v15, %v8741_v24  ;;  %v2661_v60 = vmul.f32 %v2659_v15, %v8743_v21  ;;  %v2662_v54 = vmul.f32 %v2659_v15, %v8745_v44  ;;  %v2663_v38 = vmul.f32 %v2659_v15, %v8747_v14 }
 0x27d   :  { %v8840_v4 = vadd.f32 %v2650_v27, %v8658_v5  ;;  %v8843_v1 = vadd.f32 %v2651_v51, %v8661_v0  ;;  %v8846_v34 = vadd.f32 %v2652_v40, %v8664_v59  ;;  %v8849_v56 = vadd.f32 %v2653_v58, %v8667_v22 }
 0x27e   :  { %v2670_v15 = vmul.f32 %v2669_v49, %v8741_v24  ;;  %v2671_v45 = vmul.f32 %v2669_v49, %v8743_v21  ;;  %v2672_v5 = vmul.f32 %v2669_v49, %v8745_v44  ;;  %v2673_v19 = vmul.f32 %v2669_v49, %v8747_v14 }
 0x27f   :  { %v2680_v0 = vmul.f32 %v2679_v13, %v8741_v24  ;;  %v2681_v59 = vmul.f32 %v2679_v13, %v8743_v21  ;;  %v2682_v22 = vmul.f32 %v2679_v13, %v8745_v44  ;;  %v2683_v12 = vmul.f32 %v2679_v13, %v8747_v14  ;;  %v9903_v14 = vld [vmem:[#allocation13_spill] sm:$0xff] }
 0x280   :  { %v8872_v26 = vadd.f32 %v2660_v53, %v8682_v32  ;;  %v8875_v49 = vadd.f32 %v2661_v60, %v8695_v43  ;;  %v8878_v2 = vadd.f32 %v2662_v54, %v8698_v10  ;;  %v8881_v24 = vadd.f32 %v2663_v38, %v8701_v48  ;;  %v9902_v48 = vld [vmem:[#allocation12_spill] sm:$0xff] }
 0x281   :  { %v8884_v21 = vadd.f32 %v2670_v15, %v8710_v46  ;;  %v8887_v44 = vadd.f32 %v2671_v45, %v8713_v28  ;;  %v8890_v32 = vadd.f32 %v2672_v5, %v8716_v35  ;;  %v8893_v43 = vadd.f32 %v2673_v19, %v8719_v7 }
 0x282   :  { %v2690_v10 = vmul.f32 %v8126_v33, %v8759_v37  ;;  %v2691_v46 = vmul.f32 %v9902_v48, %v8759_v37  ;;  %v2692_v13 = vmul.f32 %v9903_v14, %v8759_v37  ;;  %v2693_v28 = vmul.f32 %v8147_v20, %v8759_v37 }
 0x283   :  { %v8904_v35 = vadd.f32 %v2680_v0, %v8722_v29  ;;  %v8907_v7 = vadd.f32 %v2681_v59, %v8725_v57  ;;  %v8910_v11 = vadd.f32 %v2682_v22, %v8728_v31  ;;  %v8913_v62 = vadd.f32 %v2683_v12, %v8736_v41 }
 0x284   :  { %v2696_v8 = vadd.f32 %v8762_v6, %v2690_v10  ;;  %v2697_v37 = vadd.f32 %v8762_v6, %v2691_v46  ;;  %v2698_v29 = vadd.f32 %v8762_v6, %v2692_v13  ;;  %v2699_v27 = vadd.f32 %v8762_v6, %v2693_v28 }
 0x285   :  { %v2715_v51 = vstv %s8835_s11  ;;  %v2725_v57 = vstv %s8851_s13  ;;  %v2735_v40 = vstv %s8853_s14  ;;  %v2785_v58 = vstv %s8837_s12 }
 0x286   :  { %v8923_v53 = vmax.f32 %v2696_v8, 0.0  ;;  %v8925_v31 = vmax.f32 %v2697_v37, 0.0  ;;  %v8927_v60 = vmax.f32 %v2698_v29, 0.0  ;;  %v8929_v41 = vmax.f32 %v2699_v27, 0.0 }
 0x287   :  { %v2745_v54 = vstv %s8859_s15  ;;  %v2755_v38 = vstv %s8861_s16  ;;  %v2765_v15 = vstv %s8867_s17  ;;  %v8935_v45 = vstv %s8869_s18  ;;  %s9417_s18 = sld [smem:[#allocation6 + $0xf0]] }
 0x288   :  { %v2706_v6 = vmul.f32 %v8765_v30, %v8923_v53  ;;  %v2707_v5 = vmul.f32 %v8765_v30, %v8925_v31  ;;  %v2708_v19 = vmul.f32 %v8765_v30, %v8927_v60  ;;  %v2709_v0 = vmul.f32 %v8765_v30, %v8929_v41 }
 0x289   :  { %v2716_v59 = vmul.f32 %v2715_v51, %v8923_v53  ;;  %v8947_v22 = vmul.f32 %v8126_v33, %v2785_v58  ;;  %v8950_v12 = vmul.f32 %v9902_v48, %v2785_v58  ;;  %v8953_v10 = vmul.f32 %v9903_v14, %v2785_v58 }
 0x28a   :  { %v2717_v46 = vmul.f32 %v2715_v51, %v8925_v31  ;;  %v2718_v13 = vmul.f32 %v2715_v51, %v8927_v60  ;;  %v2719_v28 = vmul.f32 %v2715_v51, %v8929_v41  ;;  %v8959_v8 = vmul.f32 %v8147_v20, %v2785_v58 }
 0x28b   :  { %v8962_v30 = vadd.f32 %v2706_v6, %v8772_v61  ;;  %v8965_v33 = vadd.f32 %v2707_v5, %v8775_v3  ;;  %v8968_v48 = vadd.f32 %v2708_v19, %v8778_v42  ;;  %v8971_v14 = vadd.f32 %v2709_v0, %v8781_v23 }
 0x28c   :  { %v2726_v37 = vmul.f32 %v2725_v57, %v8923_v53  ;;  %v2727_v29 = vmul.f32 %v2725_v57, %v8925_v31  ;;  %v2728_v27 = vmul.f32 %v2725_v57, %v8927_v60  ;;  %v2729_v20 = vmul.f32 %v2725_v57, %v8929_v41 }
 0x28d   :  { %v8978_v61 = vadd.f32 %v2716_v59, %v8792_v39  ;;  %v2736_v3 = vmul.f32 %v2735_v40, %v8923_v53  ;;  %v2737_v51 = vmul.f32 %v2735_v40, %v8925_v31  ;;  %v2738_v42 = vmul.f32 %v2735_v40, %v8927_v60 }
 0x28e   :  { %v8984_v23 = vadd.f32 %v2717_v46, %v8795_v63  ;;  %v8987_v58 = vadd.f32 %v2718_v13, %v8798_v25  ;;  %v8990_v6 = vadd.f32 %v2719_v28, %v8801_v16  ;;  %v2739_v57 = vmul.f32 %v2735_v40, %v8929_v41 }
 0x28f   :  { %v8994_v39 = vadd.f32 %v2726_v37, %v8804_v36  ;;  %v8997_v5 = vadd.f32 %v2727_v29, %v8807_v17  ;;  %v9000_v19 = vadd.f32 %v2728_v27, %v8810_v18  ;;  %v9003_v63 = vadd.f32 %v2729_v20, %v8813_v47 }
 0x290   :  { %v2746_v25 = vmul.f32 %v2745_v54, %v8923_v53  ;;  %v2747_v0 = vmul.f32 %v2745_v54, %v8925_v31  ;;  %v2748_v16 = vmul.f32 %v2745_v54, %v8927_v60  ;;  %v2749_v40 = vmul.f32 %v2745_v54, %v8929_v41 }
 0x291   :  { %v9012_v36 = vadd.f32 %v2736_v3, %v8820_v50  ;;  %v9015_v17 = vadd.f32 %v2737_v51, %v8823_v9  ;;  %v9018_v18 = vadd.f32 %v2738_v42, %v8826_v52  ;;  %v2756_v47 = vmul.f32 %v2755_v38, %v8923_v53 }
 0x292   :  { %v9024_v59 = vadd.f32 %v2739_v57, %v8829_v55  ;;  %v2757_v54 = vmul.f32 %v2755_v38, %v8925_v31  ;;  %v2758_v46 = vmul.f32 %v2755_v38, %v8927_v60  ;;  %v2759_v50 = vmul.f32 %v2755_v38, %v8929_v41 }
 0x293   :  { %v9034_v9 = vadd.f32 %v2746_v25, %v8840_v4  ;;  %v9037_v52 = vadd.f32 %v2747_v0, %v8843_v1  ;;  %v9040_v13 = vadd.f32 %v2748_v16, %v8846_v34  ;;  %v9043_v55 = vadd.f32 %v2749_v40, %v8849_v56 }
 0x294   :  { %v2766_v38 = vmul.f32 %v2765_v15, %v8923_v53  ;;  %v2767_v28 = vmul.f32 %v2765_v15, %v8925_v31  ;;  %v2768_v4 = vmul.f32 %v2765_v15, %v8927_v60  ;;  %v2769_v37 = vmul.f32 %v2765_v15, %v8929_v41 }
 0x295   :  { %v9058_v1 = vadd.f32 %v2756_v47, %v8872_v26  ;;  %v2776_v34 = vmul.f32 %v8935_v45, %v8923_v53  ;;  %v2777_v56 = vmul.f32 %v8935_v45, %v8925_v31  ;;  %v2778_v29 = vmul.f32 %v8935_v45, %v8927_v60 }
 0x296   :  { %v9071_v15 = vadd.f32 %v2757_v54, %v8875_v49  ;;  %v9074_v26 = vadd.f32 %v2758_v46, %v8878_v2  ;;  %v9077_v27 = vadd.f32 %v2759_v50, %v8881_v24  ;;  %v2779_v53 = vmul.f32 %v8935_v45, %v8929_v41 }
 0x297   :  { %v9086_v31 = vadd.f32 %v2766_v38, %v8884_v21  ;;  %v9089_v49 = vadd.f32 %v2767_v28, %v8887_v44  ;;  %v9092_v2 = vadd.f32 %v2768_v4, %v8890_v32  ;;  %v9095_v24 = vadd.f32 %v2769_v37, %v8893_v43 }
 0x298   :  { %v9098_v60 = vadd.f32 %v2776_v34, %v8904_v35  ;;  %v9101_v41 = vadd.f32 %v2777_v56, %v8907_v7  ;;  %v9104_v21 = vadd.f32 %v2778_v29, %v8910_v11  ;;  %v2791_v44 = vstv %s9009_s19  ;;  %s9425_s19 = sld [smem:[#allocation6 + $0xf1]] }
 0x299   :  { %v2792_v32 = vadd.f32 %v2791_v44, %v8947_v22  ;;  %v2793_v45 = vadd.f32 %v2791_v44, %v8950_v12  ;;  %v2794_v43 = vadd.f32 %v2791_v44, %v8953_v10  ;;  %v2795_v35 = vadd.f32 %v2791_v44, %v8959_v8 }
 0x29a   :  { %v9112_v20 = vadd.f32 %v2779_v53, %v8913_v62  ;;  %v2801_v7 = vstv %s9021_s20  ;;  %v2811_v3 = vstv %s9029_s21  ;;  %v2821_v11 = vstv %s9031_s22  ;;  %s9427_s20 = sld [smem:[#allocation6 + $0xf2]]  ;;  %s9441_s21 = sld [smem:[#allocation6 + $0xf3]] }
 0x29b   :  { %v9117_v51 = vmax.f32 %v2792_v32, 0.0  ;;  %v9119_v42 = vmax.f32 %v2793_v45, 0.0  ;;  %v9121_v22 = vmax.f32 %v2794_v43, 0.0  ;;  %v9123_v12 = vmax.f32 %v2795_v35, 0.0  ;;  %s9443_s22 = sld [smem:[#allocation6 + $0xf4]] }
 0x29c   :  { %v2831_v10 = vstv %s9045_s23  ;;  %v2841_v8 = vstv %s9047_s24  ;;  %v2851_v57 = vstv %s9053_s25  ;;  %v2861_v62 = vstv %s9055_s26  ;;  %s9449_s23 = sld [smem:[#allocation6 + $0xf5]]  ;;  %s9451_s24 = sld [smem:[#allocation6 + $0xf6]] }
 0x29d   :  { %v2802_v25 = vmul.f32 %v2801_v7, %v9117_v51  ;;  %v2803_v0 = vmul.f32 %v2801_v7, %v9119_v42  ;;  %v2804_v16 = vmul.f32 %v2801_v7, %v9121_v22  ;;  %v2805_v40 = vmul.f32 %v2801_v7, %v9123_v12  ;;  %s9462_s25 = sld [smem:[#allocation6 + $0xf7]] }
 0x29e   :  { %v2871_v47 = vstv %s9066_s2  ;;  %v9135_v54 = vstv %s9068_s1  ;;  %v9138_v46 = vstv %s9081_s27  ;;  %v9141_v50 = vstv %s9083_s28  ;;  %s9464_s26 = sld [smem:[#allocation2 + $0x1f]]  ;;  %s9479_s1 = sld [smem:[#allocation6 + $0xf8]] }
 0x29f   :  { %v2812_v38 = vmul.f32 %v2811_v3, %v9117_v51  ;;  %v2813_v28 = vmul.f32 %v2811_v3, %v9119_v42  ;;  %v2814_v4 = vmul.f32 %v2811_v3, %v9121_v22  ;;  %v2815_v37 = vmul.f32 %v2811_v3, %v9123_v12  ;;  %s9477_s2 = sld [smem:[#allocation4 + $0x1f]]  ;;  %s9607_s27 = sld [smem:[#allocation6 + $0xf9]] }
 0x2a0   :  { %v9148_v34 = vadd.f32 %v2802_v25, %v8962_v30  ;;  %v9151_v56 = vadd.f32 %v2803_v0, %v8965_v33  ;;  %v9154_v29 = vadd.f32 %v2804_v16, %v8968_v48  ;;  %v9157_v53 = vadd.f32 %v2805_v40, %v8971_v14  ;;  %s9609_s28 = sld [smem:[#allocation6 + $0xfa]] }
 0x2a1   :  { %v2822_v44 = vmul.f32 %v2821_v11, %v9117_v51  ;;  %v2823_v32 = vmul.f32 %v2821_v11, %v9119_v42  ;;  %v2824_v45 = vmul.f32 %v2821_v11, %v9121_v22  ;;  %v2825_v43 = vmul.f32 %v2821_v11, %v9123_v12 }
 0x2a2   :  { %v2832_v30 = vmul.f32 %v2831_v10, %v9117_v51  ;;  %v2833_v35 = vmul.f32 %v2831_v10, %v9119_v42  ;;  %v2834_v33 = vmul.f32 %v2831_v10, %v9121_v22  ;;  %v2835_v48 = vmul.f32 %v2831_v10, %v9123_v12 }
 0x2a3   :  { %v9168_v7 = vadd.f32 %v2812_v38, %v8978_v61  ;;  %v9171_v14 = vadd.f32 %v2813_v28, %v8984_v23  ;;  %v9174_v3 = vadd.f32 %v2814_v4, %v8987_v58  ;;  %v9177_v25 = vadd.f32 %v2815_v37, %v8990_v6 }
 0x2a4   :  { %v9180_v11 = vadd.f32 %v2822_v44, %v8994_v39  ;;  %v9183_v0 = vadd.f32 %v2823_v32, %v8997_v5  ;;  %v9186_v10 = vadd.f32 %v2824_v45, %v9000_v19  ;;  %v9189_v61 = vadd.f32 %v2825_v43, %v9003_v63 }
 0x2a5   :  { %v2842_v23 = vmul.f32 %v2841_v8, %v9117_v51  ;;  %v2843_v58 = vmul.f32 %v2841_v8, %v9119_v42  ;;  %v2844_v16 = vmul.f32 %v2841_v8, %v9121_v22  ;;  %v2845_v6 = vmul.f32 %v2841_v8, %v9123_v12 }
 0x2a6   :  { %v9196_v39 = vadd.f32 %v2832_v30, %v9012_v36  ;;  %v9199_v5 = vadd.f32 %v2833_v35, %v9015_v17  ;;  %v9202_v19 = vadd.f32 %v2834_v33, %v9018_v18  ;;  %v9205_v63 = vadd.f32 %v2835_v48, %v9024_v59 }
 0x2a7   :  { %v2852_v40 = vmul.f32 %v2851_v57, %v9117_v51  ;;  %v2853_v38 = vmul.f32 %v2851_v57, %v9119_v42  ;;  %v2854_v28 = vmul.f32 %v2851_v57, %v9121_v22  ;;  %v2855_v8 = vmul.f32 %v2851_v57, %v9123_v12 }
 0x2a8   :  { %v9216_v36 = vadd.f32 %v2842_v23, %v9034_v9  ;;  %v9219_v17 = vadd.f32 %v2843_v58, %v9037_v52  ;;  %v9222_v18 = vadd.f32 %v2844_v16, %v9040_v13  ;;  %v9225_v59 = vadd.f32 %v2845_v6, %v9043_v55 }
 0x2a9   :  { %v2862_v57 = vmul.f32 %v2861_v62, %v9117_v51  ;;  %v2863_v4 = vmul.f32 %v2861_v62, %v9119_v42  ;;  %v2864_v9 = vmul.f32 %v2861_v62, %v9121_v22  ;;  %v2865_v37 = vmul.f32 %v2861_v62, %v9123_v12 }
 0x2aa   :  { %v2872_v52 = vmul.f32 %v2871_v47, %v9117_v51  ;;  %v2873_v13 = vmul.f32 %v2871_v47, %v9119_v42  ;;  %v2874_v55 = vmul.f32 %v2871_v47, %v9121_v22  ;;  %v2875_v44 = vmul.f32 %v2871_v47, %v9123_v12 }
 0x2ab   :  { %v9248_v32 = vadd.f32 %v2852_v40, %v9058_v1  ;;  %v9251_v62 = vadd.f32 %v2853_v38, %v9071_v15  ;;  %v9254_v45 = vadd.f32 %v2854_v28, %v9074_v26  ;;  %v9257_v51 = vadd.f32 %v2855_v8, %v9077_v27  ;;  %v9274_v15 = vld [vmem:[%s9836_s0] sm:$0xff]  ;;  %v9281_v27 = vld [vmem:[%s9836_s0 + $0x8] sm:$0xff] }
 0x2ac   :  { %v9260_v42 = vadd.f32 %v2862_v57, %v9086_v31  ;;  %v9263_v22 = vadd.f32 %v2863_v4, %v9089_v49  ;;  %v9266_v12 = vadd.f32 %v2864_v9, %v9092_v2  ;;  %v9269_v1 = vadd.f32 %v2865_v37, %v9095_v24  ;;  %9904 = vst [vmem:[#allocation12_spill] sm:$0xff] %v9281_v27  ;;  %v9288_v49 = vld [vmem:[%s9836_s0 + $0x10] sm:$0xff]  ;;  %v9295_v24 = vld [vmem:[%s9836_s0 + $0x18] sm:$0xff]  ;;  %s9405_s0 = sld [smem:[#allocation4 + $0x1e]] }
 0x2ad   :  { %v2882_v26 = vmul.f32 %v9274_v15, %v9135_v54  ;;  %v2883_v31 = vmul.f32 %v9281_v27, %v9135_v54  ;;  %9905 = vst [vmem:[#allocation13_spill] sm:$0xff] %v9288_v49  ;;  %v2884_v2 = vmul.f32 %v9288_v49, %v9135_v54  ;;  %v2885_v47 = vmul.f32 %v9295_v24, %v9135_v54 }
 0x2ae   :  { %v9300_v43 = vadd.f32 %v2872_v52, %v9098_v60  ;;  %v9303_v30 = vadd.f32 %v2873_v13, %v9101_v41  ;;  %v9306_v35 = vadd.f32 %v2874_v55, %v9104_v21  ;;  %v9309_v33 = vadd.f32 %v2875_v44, %v9112_v20 }
 0x2af   :  { %v2888_v48 = vadd.f32 %v9138_v46, %v2882_v26  ;;  %v2889_v54 = vadd.f32 %v9138_v46, %v2883_v31  ;;  %v2890_v60 = vadd.f32 %v9138_v46, %v2884_v2  ;;  %v2891_v23 = vadd.f32 %v9138_v46, %v2885_v47 }
 0x2b0   :  { %v2907_v58 = vstv %s9211_s29  ;;  %v2917_v41 = vstv %s9227_s6  ;;  %v2927_v16 = vstv %s9229_s7  ;;  %v2977_v6 = vstv %s9213_s30  ;;  %s9623_s29 = sld [smem:[#allocation6 + $0xfb]]  ;;  %s9625_s30 = sld [smem:[#allocation6 + $0xfc]] }
 0x2b1   :  { %v9319_v40 = vmax.f32 %v2888_v48, 0.0  ;;  %v9321_v21 = vmax.f32 %v2889_v54, 0.0  ;;  %v9323_v38 = vmax.f32 %v2890_v60, 0.0  ;;  %v9325_v20 = vmax.f32 %v2891_v23, 0.0  ;;  %s9631_s6 = sld [smem:[#allocation6 + $0xfd]]  ;;  %s9637_s7 = sld [smem:[#allocation6 + $0xfe]] }
 0x2b2   :  { %v2937_v28 = vstv %s9235_s8  ;;  %v2947_v8 = vstv %s9237_s9  ;;  %v2957_v57 = vstv %s9243_s3  ;;  %v9331_v4 = vstv %s9245_s4  ;;  %s9639_s8 = sld [smem:[#allocation6 + $0xff]] }
 0x2b3   :  { %v2898_v46 = vmul.f32 %v9141_v50, %v9319_v40  ;;  %v2899_v9 = vmul.f32 %v9141_v50, %v9321_v21  ;;  %v2900_v37 = vmul.f32 %v9141_v50, %v9323_v38  ;;  %v2901_v52 = vmul.f32 %v9141_v50, %v9325_v20 }
 0x2b4   :  { %v2908_v13 = vmul.f32 %v2907_v58, %v9319_v40  ;;  %v9343_v55 = vmul.f32 %v9274_v15, %v2977_v6  ;;  %v9346_v44 = vmul.f32 %v9281_v27, %v2977_v6  ;;  %v9349_v26 = vmul.f32 %v9288_v49, %v2977_v6 }
 0x2b5   :  { %v2909_v31 = vmul.f32 %v2907_v58, %v9321_v21  ;;  %v2910_v2 = vmul.f32 %v2907_v58, %v9323_v38  ;;  %v2911_v47 = vmul.f32 %v2907_v58, %v9325_v20  ;;  %v9355_v48 = vmul.f32 %v9295_v24, %v2977_v6 }
 0x2b6   :  { %v9358_v50 = vadd.f32 %v2898_v46, %v9148_v34  ;;  %v9361_v54 = vadd.f32 %v2899_v9, %v9151_v56  ;;  %v9364_v60 = vadd.f32 %v2900_v37, %v9154_v29  ;;  %v9367_v23 = vadd.f32 %v2901_v52, %v9157_v53 }
 0x2b7   :  { %v2918_v49 = vmul.f32 %v2917_v41, %v9319_v40  ;;  %v2919_v27 = vmul.f32 %v2917_v41, %v9321_v21  ;;  %v2920_v58 = vmul.f32 %v2917_v41, %v9323_v38  ;;  %v2921_v6 = vmul.f32 %v2917_v41, %v9325_v20 }
 0x2b8   :  { %v9374_v34 = vadd.f32 %v2908_v13, %v9168_v7  ;;  %v2928_v56 = vmul.f32 %v2927_v16, %v9319_v40  ;;  %v2929_v46 = vmul.f32 %v2927_v16, %v9321_v21  ;;  %v2930_v29 = vmul.f32 %v2927_v16, %v9323_v38 }
 0x2b9   :  { %v9380_v53 = vadd.f32 %v2909_v31, %v9171_v14  ;;  %v9383_v9 = vadd.f32 %v2910_v2, %v9174_v3  ;;  %v9386_v37 = vadd.f32 %v2911_v47, %v9177_v25  ;;  %v2931_v41 = vmul.f32 %v2927_v16, %v9325_v20 }
 0x2ba   :  { %v9390_v7 = vadd.f32 %v2918_v49, %v9180_v11  ;;  %v9393_v52 = vadd.f32 %v2919_v27, %v9183_v0  ;;  %v9396_v13 = vadd.f32 %v2920_v58, %v9186_v10  ;;  %v9399_v14 = vadd.f32 %v2921_v6, %v9189_v61 }
 0x2bb   :  { %v2938_v3 = vmul.f32 %v2937_v28, %v9319_v40  ;;  %v2939_v31 = vmul.f32 %v2937_v28, %v9321_v21  ;;  %v2940_v25 = vmul.f32 %v2937_v28, %v9323_v38  ;;  %v2941_v16 = vmul.f32 %v2937_v28, %v9325_v20 }
 0x2bc   :  { %v9408_v11 = vadd.f32 %v2928_v56, %v9196_v39  ;;  %v9411_v0 = vadd.f32 %v2929_v46, %v9199_v5  ;;  %v9414_v10 = vadd.f32 %v2930_v29, %v9202_v19  ;;  %v2948_v61 = vmul.f32 %v2947_v8, %v9319_v40 }
 0x2bd   :  { %v9420_v27 = vadd.f32 %v2931_v41, %v9205_v63  ;;  %v2949_v49 = vmul.f32 %v2947_v8, %v9321_v21  ;;  %v2950_v28 = vmul.f32 %v2947_v8, %v9323_v38  ;;  %v2951_v39 = vmul.f32 %v2947_v8, %v9325_v20 }
 0x2be   :  { %v9430_v5 = vadd.f32 %v2938_v3, %v9216_v36  ;;  %v9433_v19 = vadd.f32 %v2939_v31, %v9219_v17  ;;  %v9436_v2 = vadd.f32 %v2940_v25, %v9222_v18  ;;  %v9439_v63 = vadd.f32 %v2941_v16, %v9225_v59 }
 0x2bf   :  { %v2958_v8 = vmul.f32 %v2957_v57, %v9319_v40  ;;  %v2959_v47 = vmul.f32 %v2957_v57, %v9321_v21  ;;  %v2960_v36 = vmul.f32 %v2957_v57, %v9323_v38  ;;  %v2961_v58 = vmul.f32 %v2957_v57, %v9325_v20 }
 0x2c0   :  { %v9454_v17 = vadd.f32 %v2948_v61, %v9248_v32  ;;  %v2968_v18 = vmul.f32 %v9331_v4, %v9319_v40  ;;  %v2969_v59 = vmul.f32 %v9331_v4, %v9321_v21  ;;  %v2970_v6 = vmul.f32 %v9331_v4, %v9323_v38 }
 0x2c1   :  { %v9467_v57 = vadd.f32 %v2949_v49, %v9251_v62  ;;  %v9470_v32 = vadd.f32 %v2950_v28, %v9254_v45  ;;  %v9473_v56 = vadd.f32 %v2951_v39, %v9257_v51  ;;  %v2971_v40 = vmul.f32 %v9331_v4, %v9325_v20 }
 0x2c2   :  { %v9482_v21 = vadd.f32 %v2958_v8, %v9260_v42  ;;  %v9485_v62 = vadd.f32 %v2959_v47, %v9263_v22  ;;  %v9488_v45 = vadd.f32 %v2960_v36, %v9266_v12  ;;  %v9491_v51 = vadd.f32 %v2961_v58, %v9269_v1 }
 0x2c3   :  { %v9494_v38 = vadd.f32 %v2968_v18, %v9300_v43  ;;  %v9497_v20 = vadd.f32 %v2969_v59, %v9303_v30  ;;  %v9500_v42 = vadd.f32 %v2970_v6, %v9306_v35  ;;  %v2983_v22 = vstv %s9405_s0 }
 0x2c4   :  { %v2984_v12 = vadd.f32 %v2983_v22, %v9343_v55  ;;  %v2985_v4 = vadd.f32 %v2983_v22, %v9346_v44  ;;  %v2986_v1 = vadd.f32 %v2983_v22, %v9349_v26  ;;  %v2987_v43 = vadd.f32 %v2983_v22, %v9355_v48 }
 0x2c5   :  { %v9508_v46 = vadd.f32 %v2971_v40, %v9309_v33  ;;  %v2993_v30 = vstv %s9417_s18  ;;  %v3003_v29 = vstv %s9425_s19  ;;  %v3013_v35 = vstv %s9427_s20 }
 0x2c6   :  { %v9513_v41 = vmax.f32 %v2984_v12, 0.0  ;;  %v9515_v3 = vmax.f32 %v2985_v4, 0.0  ;;  %v9517_v55 = vmax.f32 %v2986_v1, 0.0  ;;  %v9519_v44 = vmax.f32 %v2987_v43, 0.0 }
 0x2c7   :  { %v3023_v26 = vstv %s9441_s21  ;;  %v3033_v48 = vstv %s9443_s22  ;;  %v3043_v31 = vstv %s9449_s23  ;;  %v3053_v33 = vstv %s9451_s24 }
 0x2c8   :  { %v2994_v25 = vmul.f32 %v2993_v30, %v9513_v41  ;;  %v2995_v16 = vmul.f32 %v2993_v30, %v9515_v3  ;;  %v2996_v61 = vmul.f32 %v2993_v30, %v9517_v55  ;;  %v2997_v49 = vmul.f32 %v2993_v30, %v9519_v44 }
 0x2c9   :  { %v3063_v28 = vstv %s9462_s25  ;;  %v9531_v39 = vstv %s9464_s26  ;;  %v9534_v8 = vstv %s9477_s2  ;;  %v9537_v47 = vstv %s9479_s1 }
 0x2ca   :  { %v3004_v36 = vmul.f32 %v3003_v29, %v9513_v41  ;;  %v3005_v58 = vmul.f32 %v3003_v29, %v9515_v3  ;;  %v3006_v18 = vmul.f32 %v3003_v29, %v9517_v55  ;;  %v3007_v59 = vmul.f32 %v3003_v29, %v9519_v44 }
 0x2cb   :  { %v9544_v6 = vadd.f32 %v2994_v25, %v9358_v50  ;;  %v9547_v40 = vadd.f32 %v2995_v16, %v9361_v54  ;;  %v9550_v22 = vadd.f32 %v2996_v61, %v9364_v60  ;;  %v9553_v12 = vadd.f32 %v2997_v49, %v9367_v23 }
 0x2cc   :  { %v3014_v4 = vmul.f32 %v3013_v35, %v9513_v41  ;;  %v3015_v1 = vmul.f32 %v3013_v35, %v9515_v3  ;;  %v3016_v43 = vmul.f32 %v3013_v35, %v9517_v55  ;;  %v3017_v30 = vmul.f32 %v3013_v35, %v9519_v44 }
 0x2cd   :  { %v3024_v50 = vmul.f32 %v3023_v26, %v9513_v41  ;;  %v3025_v29 = vmul.f32 %v3023_v26, %v9515_v3  ;;  %v3026_v54 = vmul.f32 %v3023_v26, %v9517_v55  ;;  %v3027_v60 = vmul.f32 %v3023_v26, %v9519_v44 }
 0x2ce   :  { %v9564_v25 = vadd.f32 %v3004_v36, %v9374_v34  ;;  %v9567_v23 = vadd.f32 %v3005_v58, %v9380_v53  ;;  %v9570_v16 = vadd.f32 %v3006_v18, %v9383_v9  ;;  %v9573_v61 = vadd.f32 %v3007_v59, %v9386_v37 }
 0x2cf   :  { %v9576_v35 = vadd.f32 %v3014_v4, %v9390_v7  ;;  %v9579_v49 = vadd.f32 %v3015_v1, %v9393_v52  ;;  %v9582_v26 = vadd.f32 %v3016_v43, %v9396_v13  ;;  %v9585_v34 = vadd.f32 %v3017_v30, %v9399_v14 }
 0x2d0   :  { %v3034_v53 = vmul.f32 %v3033_v48, %v9513_v41  ;;  %v3035_v9 = vmul.f32 %v3033_v48, %v9515_v3  ;;  %v3036_v36 = vmul.f32 %v3033_v48, %v9517_v55  ;;  %v3037_v37 = vmul.f32 %v3033_v48, %v9519_v44 }
 0x2d1   :  { %v9592_v7 = vadd.f32 %v3024_v50, %v9408_v11  ;;  %v9595_v52 = vadd.f32 %v3025_v29, %v9411_v0  ;;  %v9598_v13 = vadd.f32 %v3026_v54, %v9414_v10  ;;  %v9601_v14 = vadd.f32 %v3027_v60, %v9420_v27 }
 0x2d2   :  { %v3044_v58 = vmul.f32 %v3043_v31, %v9513_v41  ;;  %v3045_v18 = vmul.f32 %v3043_v31, %v9515_v3  ;;  %v3046_v59 = vmul.f32 %v3043_v31, %v9517_v55  ;;  %v3047_v48 = vmul.f32 %v3043_v31, %v9519_v44 }
 0x2d3   :  { %v9612_v11 = vadd.f32 %v3034_v53, %v9430_v5  ;;  %v9615_v0 = vadd.f32 %v3035_v9, %v9433_v19  ;;  %v9618_v10 = vadd.f32 %v3036_v36, %v9436_v2  ;;  %v9621_v27 = vadd.f32 %v3037_v37, %v9439_v63 }
 0x2d4   :  { %v3054_v31 = vmul.f32 %v3053_v33, %v9513_v41  ;;  %v3055_v4 = vmul.f32 %v3053_v33, %v9515_v3  ;;  %v3056_v5 = vmul.f32 %v3053_v33, %v9517_v55  ;;  %v3057_v1 = vmul.f32 %v3053_v33, %v9519_v44 }
 0x2d5   :  { %v3064_v19 = vmul.f32 %v3063_v28, %v9513_v41  ;;  %v3065_v2 = vmul.f32 %v3063_v28, %v9515_v3  ;;  %v3066_v63 = vmul.f32 %v3063_v28, %v9517_v55  ;;  %v3067_v43 = vmul.f32 %v3063_v28, %v9519_v44  ;;  %v9907_v44 = vld [vmem:[#allocation13_spill] sm:$0xff] }
 0x2d6   :  { %v9642_v30 = vadd.f32 %v3044_v58, %v9454_v17  ;;  %v9645_v50 = vadd.f32 %v3045_v18, %v9467_v57  ;;  %v9648_v33 = vadd.f32 %v3046_v59, %v9470_v32  ;;  %v9651_v41 = vadd.f32 %v3047_v48, %v9473_v56  ;;  %v9906_v56 = vld [vmem:[#allocation12_spill] sm:$0xff] }
 0x2d7   :  { %v9654_v3 = vadd.f32 %v3054_v31, %v9482_v21  ;;  %v9657_v55 = vadd.f32 %v3055_v4, %v9485_v62  ;;  %v9660_v17 = vadd.f32 %v3056_v5, %v9488_v45  ;;  %v9663_v57 = vadd.f32 %v3057_v1, %v9491_v51 }
 0x2d8   :  { %v3074_v32 = vmul.f32 %v9274_v15, %v9531_v39  ;;  %v3075_v21 = vmul.f32 %v9906_v56, %v9531_v39  ;;  %v3076_v28 = vmul.f32 %v9907_v44, %v9531_v39  ;;  %v3077_v62 = vmul.f32 %v9295_v24, %v9531_v39 }
 0x2d9   :  { %v9674_v45 = vadd.f32 %v3064_v19, %v9494_v38  ;;  %v9677_v51 = vadd.f32 %v3065_v2, %v9497_v20  ;;  %v9680_v29 = vadd.f32 %v3066_v63, %v9500_v42  ;;  %v9683_v15 = vadd.f32 %v3067_v43, %v9508_v46 }
 0x2da   :  { %v3080_v54 = vadd.f32 %v9534_v8, %v3074_v32  ;;  %v3081_v60 = vadd.f32 %v9534_v8, %v3075_v21  ;;  %v3082_v24 = vadd.f32 %v9534_v8, %v3076_v28  ;;  %v3083_v38 = vadd.f32 %v9534_v8, %v3077_v62 }
 0x2db   :  { %v3099_v39 = vstv %s9607_s27  ;;  %v3109_v53 = vstv %s9609_s28  ;;  %v3119_v20 = vstv %s9623_s29  ;;  %v3129_v9 = vstv %s9625_s30 }
 0x2dc   :  { %v3084_v36 = vmax.f32 %v3080_v54, 0.0  ;;  %v3085_v37 = vmax.f32 %v3081_v60, 0.0  ;;  %v3086_v42 = vmax.f32 %v3082_v24, 0.0  ;;  %v3087_v58 = vmax.f32 %v3083_v38, 0.0 }
 0x2dd   :  { %v3139_v18 = vstv %s9631_s6  ;;  %v3149_v59 = vstv %s9637_s7  ;;  %v3159_v46 = vstv %s9639_s8 }
 0x2de   :  { %v3090_v48 = vmul.f32 %v9537_v47, %v3084_v36  ;;  %v3091_v31 = vmul.f32 %v9537_v47, %v3085_v37  ;;  %v3092_v4 = vmul.f32 %v9537_v47, %v3086_v42  ;;  %v3093_v5 = vmul.f32 %v9537_v47, %v3087_v58 }
 0x2df   :  { %v3100_v8 = vmul.f32 %v3099_v39, %v3084_v36  ;;  %v3101_v1 = vmul.f32 %v3099_v39, %v3085_v37  ;;  %v3102_v19 = vmul.f32 %v3099_v39, %v3086_v42  ;;  %v3103_v2 = vmul.f32 %v3099_v39, %v3087_v58 }
 0x2e0   :  { %v9701_v63 = vadd.f32 %v3090_v48, %v9544_v6  ;;  %v9704_v43 = vadd.f32 %v3091_v31, %v9547_v40  ;;  %v9707_v32 = vadd.f32 %v3092_v4, %v9550_v22  ;;  %v9710_v56 = vadd.f32 %v3093_v5, %v9553_v12 }
 0x2e1   :  { %v3104_v21 = vadd.f32 %v3100_v8, %v9564_v25  ;;  %v3105_v47 = vadd.f32 %v3101_v1, %v9567_v23  ;;  %v3106_v44 = vadd.f32 %v3102_v19, %v9570_v16  ;;  %v3107_v28 = vadd.f32 %v3103_v2, %v9573_v61 }
 0x2e2   :  { %v3110_v62 = vmul.f32 %v3109_v53, %v3084_v36  ;;  %v3111_v6 = vmul.f32 %v3109_v53, %v3085_v37  ;;  %v3112_v54 = vmul.f32 %v3109_v53, %v3086_v42  ;;  %v3113_v60 = vmul.f32 %v3109_v53, %v3087_v58 }
 0x2e3   :  { %v3120_v40 = vmul.f32 %v3119_v20, %v3084_v36  ;;  %v3121_v24 = vmul.f32 %v3119_v20, %v3085_v37  ;;  %v3122_v38 = vmul.f32 %v3119_v20, %v3086_v42  ;;  %v3123_v22 = vmul.f32 %v3119_v20, %v3087_v58 }
 0x2e4   :  { %v3114_v39 = vadd.f32 %v3110_v62, %v9576_v35  ;;  %v3115_v12 = vadd.f32 %v3111_v6, %v9579_v49  ;;  %v3116_v25 = vadd.f32 %v3112_v54, %v9582_v26  ;;  %v3117_v23 = vadd.f32 %v3113_v60, %v9585_v34 }
 0x2e5   :  { %v9721_v16 = vadd.f32 %v3120_v40, %v9592_v7  ;;  %v9724_v61 = vadd.f32 %v3121_v24, %v9595_v52  ;;  %v9727_v53 = vadd.f32 %v3122_v38, %v9598_v13  ;;  %v9730_v48 = vadd.f32 %v3123_v22, %v9601_v14 }
 0x2e6   :  { %v3130_v20 = vmul.f32 %v3129_v9, %v3084_v36  ;;  %v3131_v35 = vmul.f32 %v3129_v9, %v3085_v37  ;;  %v3132_v31 = vmul.f32 %v3129_v9, %v3086_v42  ;;  %v3133_v49 = vmul.f32 %v3129_v9, %v3087_v58 }
 0x2e7   :  { %v3140_v4 = vmul.f32 %v3139_v18, %v3084_v36  ;;  %v3141_v26 = vmul.f32 %v3139_v18, %v3085_v37  ;;  %v3142_v5 = vmul.f32 %v3139_v18, %v3086_v42  ;;  %v3143_v34 = vmul.f32 %v3139_v18, %v3087_v58 }
 0x2e8   :  { %v9733_v7 = vadd.f32 %v3130_v20, %v9612_v11  ;;  %v9736_v52 = vadd.f32 %v3131_v35, %v9615_v0  ;;  %v9739_v13 = vadd.f32 %v3132_v31, %v9618_v10  ;;  %v9742_v14 = vadd.f32 %v3133_v49, %v9621_v27 }
 0x2e9   :  { %v9745_v8 = vadd.f32 %v3140_v4, %v9642_v30  ;;  %v9748_v9 = vadd.f32 %v3141_v26, %v9645_v50  ;;  %v9751_v18 = vadd.f32 %v3142_v5, %v9648_v33  ;;  %v9754_v11 = vadd.f32 %v3143_v34, %v9651_v41 }
 0x2ea   :  { %v3150_v0 = vmul.f32 %v3149_v59, %v3084_v36  ;;  %v3151_v1 = vmul.f32 %v3149_v59, %v3085_v37  ;;  %v3152_v19 = vmul.f32 %v3149_v59, %v3086_v42  ;;  %v3153_v10 = vmul.f32 %v3149_v59, %v3087_v58 }
 0x2eb   :  { %v3160_v2 = vmul.f32 %v3159_v46, %v3084_v36  ;;  %v3161_v62 = vmul.f32 %v3159_v46, %v3085_v37  ;;  %v3162_v27 = vmul.f32 %v3159_v46, %v3086_v42  ;;  %v3163_v6 = vmul.f32 %v3159_v46, %v3087_v58 }
 0x2ec   :  { %v9757_v30 = vadd.f32 %v3150_v0, %v9654_v3  ;;  %v9760_v50 = vadd.f32 %v3151_v1, %v9657_v55  ;;  %v9763_v33 = vadd.f32 %v3152_v19, %v9660_v17  ;;  %v9766_v41 = vadd.f32 %v3153_v10, %v9663_v57 }
 0x2ed   :  { %v9769_v54 = vadd.f32 %v3160_v2, %v9674_v45  ;;  %v9772_v36 = vadd.f32 %v3161_v62, %v9677_v51  ;;  %v9775_v37 = vadd.f32 %v3162_v27, %v9680_v29  ;;  %v9778_v3 = vadd.f32 %v3163_v6, %v9683_v15 }
 0x2ee   :  { %vm3168_vm0 = vcmp.gt.f32.partialorder %v3104_v21, %v9701_v63  ;;  %vm3169_vm1 = vcmp.gt.f32.partialorder %v3105_v47, %v9704_v43  ;;  %vm3170_vm2 = vcmp.gt.f32.partialorder %v3106_v44, %v9707_v32  ;;  %vm3171_vm3 = vcmp.gt.f32.partialorder %v3107_v28, %v9710_v56 }
 0x2ef   :  { %v3172_v55 = vsel %vm3168_vm0, %v3104_v21, %v9701_v63  ;;  %v3173_v17 = vsel %vm3169_vm1, %v3105_v47, %v9704_v43  ;;  %v3174_v57 = vsel %vm3170_vm2, %v3106_v44, %v9707_v32  ;;  %v3175_v45 = vsel %vm3171_vm3, %v3107_v28, %v9710_v56 }
 0x2f0   :  { %v3674_v51 = vmov 0   ;;  %vm3180_vm4 = vcmp.gt.f32.partialorder %v3114_v39, %v3172_v55  ;;  %vm3181_vm5 = vcmp.gt.f32.partialorder %v3115_v12, %v3173_v17  ;;  %vm3182_vm6 = vcmp.gt.f32.partialorder %v3116_v25, %v3174_v57 }
 0x2f1   :  { %v3176_v29 = vsel %vm3168_vm0, 1, %v3674_v51  ;;  %v3177_v15 = vsel %vm3169_vm1, 1, %v3674_v51  ;;  %v3178_v42 = vsel %vm3170_vm2, 1, %v3674_v51  ;;  %v3179_v58 = vsel %vm3171_vm3, 1, %v3674_v51 }
 0x2f2   :  { %vm3183_vm7 = vcmp.gt.f32.partialorder %v3117_v23, %v3175_v45  ;;  %v3184_v59 = vsel %vm3180_vm4, %v3114_v39, %v3172_v55  ;;  %v3185_v46 = vsel %vm3181_vm5, %v3115_v12, %v3173_v17  ;;  %v3186_v60 = vsel %vm3182_vm6, %v3116_v25, %v3174_v57 }
 0x2f3   :  { %v3187_v40 = vsel %vm3183_vm7, %v3117_v23, %v3175_v45  ;;  %v3188_v63 = vsel %vm3180_vm4, 2, %v3176_v29  ;;  %v3189_v21 = vsel %vm3181_vm5, 2, %v3177_v15  ;;  %v3190_v43 = vsel %vm3182_vm6, 2, %v3178_v42 }
 0x2f4   :  { %v3191_v47 = vsel %vm3183_vm7, 2, %v3179_v58  ;;  %vm3192_vm8 = vcmp.gt.f32.partialorder %v9721_v16, %v3184_v59  ;;  %vm3193_vm9 = vcmp.gt.f32.partialorder %v9724_v61, %v3185_v46  ;;  %vm3194_vm10 = vcmp.gt.f32.partialorder %v9727_v53, %v3186_v60 }
 0x2f5   :  { %vm3195_vm11 = vcmp.gt.f32.partialorder %v9730_v48, %v3187_v40  ;;  %v3196_v32 = vsel %vm3192_vm8, %v9721_v16, %v3184_v59  ;;  %v3197_v56 = vsel %vm3193_vm9, %v9724_v61, %v3185_v46  ;;  %v3198_v44 = vsel %vm3194_vm10, %v9727_v53, %v3186_v60 }
 0x2f6   :  { %v3199_v28 = vsel %vm3195_vm11, %v9730_v48, %v3187_v40  ;;  %v3200_v24 = vsel %vm3192_vm8, 3, %v3188_v63  ;;  %v3201_v38 = vsel %vm3193_vm9, 3, %v3189_v21  ;;  %v3202_v22 = vsel %vm3194_vm10, 3, %v3190_v43 }
 0x2f7   :  { %v3203_v39 = vsel %vm3195_vm11, 3, %v3191_v47  ;;  %vm3204_vm12 = vcmp.gt.f32.partialorder %v9733_v7, %v3196_v32  ;;  %vm3205_vm13 = vcmp.gt.f32.partialorder %v9736_v52, %v3197_v56  ;;  %vm3206_vm14 = vcmp.gt.f32.partialorder %v9739_v13, %v3198_v44 }
 0x2f8   :  { %vm3207_vm15 = vcmp.gt.f32.partialorder %v9742_v14, %v3199_v28  ;;  %v3208_v12 = vsel %vm3204_vm12, %v9733_v7, %v3196_v32  ;;  %v3209_v25 = vsel %vm3205_vm13, %v9736_v52, %v3197_v56  ;;  %v3210_v23 = vsel %vm3206_vm14, %v9739_v13, %v3198_v44 }
 0x2f9   :  { %v3211_v16 = vsel %vm3207_vm15, %v9742_v14, %v3199_v28  ;;  %v3212_v61 = vsel %vm3204_vm12, 4, %v3200_v24  ;;  %v3213_v53 = vsel %vm3205_vm13, 4, %v3201_v38  ;;  %v3214_v48 = vsel %vm3206_vm14, 4, %v3202_v22 }
 0x2fa   :  { %v3215_v20 = vsel %vm3207_vm15, 4, %v3203_v39  ;;  %vm3216_vm0 = vcmp.gt.f32.partialorder %v9745_v8, %v3208_v12  ;;  %vm3217_vm1 = vcmp.gt.f32.partialorder %v9748_v9, %v3209_v25  ;;  %vm3218_vm2 = vcmp.gt.f32.partialorder %v9751_v18, %v3210_v23 }
 0x2fb   :  { %vm3219_vm3 = vcmp.gt.f32.partialorder %v9754_v11, %v3211_v16  ;;  %v3220_v35 = vsel %vm3216_vm0, %v9745_v8, %v3208_v12  ;;  %v3221_v31 = vsel %vm3217_vm1, %v9748_v9, %v3209_v25  ;;  %v3222_v49 = vsel %vm3218_vm2, %v9751_v18, %v3210_v23 }
 0x2fc   :  { %v3223_v4 = vsel %vm3219_vm3, %v9754_v11, %v3211_v16  ;;  %v3224_v26 = vsel %vm3216_vm0, 5, %v3212_v61  ;;  %v3225_v5 = vsel %vm3217_vm1, 5, %v3213_v53  ;;  %v3226_v34 = vsel %vm3218_vm2, 5, %v3214_v48 }
 0x2fd   :  { %v3227_v7 = vsel %vm3219_vm3, 5, %v3215_v20  ;;  %vm3228_vm4 = vcmp.gt.f32.partialorder %v9757_v30, %v3220_v35  ;;  %vm3229_vm5 = vcmp.gt.f32.partialorder %v9760_v50, %v3221_v31  ;;  %vm3230_vm6 = vcmp.gt.f32.partialorder %v9763_v33, %v3222_v49 }
 0x2fe   :  { %vm3231_vm7 = vcmp.gt.f32.partialorder %v9766_v41, %v3223_v4  ;;  %v3232_v52 = vsel %vm3228_vm4, %v9757_v30, %v3220_v35  ;;  %v3233_v13 = vsel %vm3229_vm5, %v9760_v50, %v3221_v31  ;;  %v3234_v14 = vsel %vm3230_vm6, %v9763_v33, %v3222_v49 }
 0x2ff   :  { %v3235_v8 = vsel %vm3231_vm7, %v9766_v41, %v3223_v4  ;;  %v3236_v9 = vsel %vm3228_vm4, 6, %v3224_v26  ;;  %v3237_v18 = vsel %vm3229_vm5, 6, %v3225_v5  ;;  %v3238_v11 = vsel %vm3230_vm6, 6, %v3226_v34 }
 0x300   :  { %v3239_v0 = vsel %vm3231_vm7, 6, %v3227_v7  ;;  %vm3240_vm8 = vcmp.gt.f32.partialorder %v9769_v54, %v3232_v52  ;;  %vm3241_vm9 = vcmp.gt.f32.partialorder %v9772_v36, %v3233_v13  ;;  %vm3242_vm10 = vcmp.gt.f32.partialorder %v9775_v37, %v3234_v14 }
 0x301   :  { %vm3243_vm11 = vcmp.gt.f32.partialorder %v9778_v3, %v3235_v8  ;;  %v3244_v1 = vsel %vm3240_vm8, 7, %v3236_v9  ;;  %v3245_v19 = vsel %vm3241_vm9, 7, %v3237_v18  ;;  %v3246_v10 = vsel %vm3242_vm10, 7, %v3238_v11 }
 0x302   :  { %v3247_v2 = vsel %vm3243_vm11, 7, %v3239_v0  ;;  %v3248_v62 = vpack.c.b16 %v3244_v1, %v3244_v1  ;;  %v3250_v27 = vpack.c.b16 %v3245_v19, %v3245_v19  ;;  %v3252_v6 = vpack.c.b16 %v3246_v10, %v3246_v10 }
 0x303   :  { %v3254_v30 = vpack.c.b16 %v3247_v2, %v3247_v2 }
 0x304   :  { %v3249_v50 = vpack.c.b8 %v3248_v62, %v3248_v62  ;;  %v3251_v33 = vpack.c.b8 %v3250_v27, %v3250_v27  ;;  %v3253_v41 = vpack.c.b8 %v3252_v6, %v3252_v6 }
 0x305   :  { %v3255_v55 = vpack.c.b8 %v3254_v30, %v3254_v30 }
 0x306   :  { %3256 = vst [vmem:[%s9841_s5] sm:$0x3] %v3249_v50  ;;  %3257 = vst [vmem:[%s9841_s5 + $0x2] sm:$0x3] %v3251_v33 }
 0x307   :  { %3258 = vst [vmem:[%s9841_s5 + $0x4] sm:$0x3] %v3253_v41  ;;  %3259 = vst [vmem:[%s9841_s5 + $0x6] sm:$0x3] %v3255_v55 }
 0x308   :  { %3264 = vsyncpa [#allocation3], 1 }
 0x309   :  { %3265 = vsyncpa [#allocation5], 1 }
 0x30a   :  { %3266 = vsyncpa [#allocation8], 1 }

</bundles_post_ra>
